<compile_context>
chip_gen: v7x
topology: tpu7x:2x2x1
jax: 0.10.0
libtpu: 0.0.40
codegen_flags: <defaults>
</compile_context>

<pallas_src>
import functools

import jax
import jax.numpy as jnp
from jax import lax
from jax.experimental import pallas as pl
from jax.experimental.pallas import tpu as pltpu

EPS = 1e-8
EPS2 = EPS * EPS


@functools.lru_cache(maxsize=None)
def _num_tc_splits():
    """2 on dual-TensorCore chips (v7x) so both cores stay busy, else 1."""
    try:
        kind = jax.devices()[0].device_kind.lower()
        if "v7" in kind or "7x" in kind:
            return 2
    except Exception:
        pass
    return 1


# --------------------------------------------------------------------------
# Fused bidirectional LSTM recurrence (shared by both LSTM kernels).
# Packed 8H column layout: [ I_f I_b | F_f F_b | O_f O_b | G_f G_b ]
# so every gate is a contiguous 2H block [fwd | bwd]; h/c carried as (Bt, 2H).
# --------------------------------------------------------------------------
def _bilstm_recurrence(x2d_ref, wih_ref, whh_ref, b_ref, seq_len, collect_seq):
    S = seq_len
    rows = x2d_ref.shape[0]
    Bt = rows // S
    H8 = wih_ref.shape[1]
    H = H8 // 8

    # Bulk input projection: ONE matmul over all rows and both directions.
    x2d = x2d_ref[...].astype(jnp.bfloat16)
    proj = (jnp.dot(x2d, wih_ref[...], preferred_element_type=jnp.float32)
            + b_ref[...]).reshape(Bt, S, H8)
    whh = whh_ref[...]

    # Hoisted lane masks (broadcasts are not CSE'd by JAX -> build once).
    lane = lax.broadcasted_iota(jnp.int32, (Bt, H8), 1)
    fwd_mask = (lane % (2 * H)) < H          # fwd lanes within every 2H gate block
    sig_mask = lane < 6 * H                  # i/f/o lanes -> sigmoid, g -> tanh

    h_cat = jnp.zeros((Bt, 2 * H), jnp.float32)
    c_cat = jnp.zeros((Bt, 2 * H), jnp.float32)
    hf_seq = [None] * S if collect_seq else None
    hb_seq = [None] * S if collect_seq else None

    # Fully unrolled static time loop; one recurrent MXU push per step drives
    # BOTH directions through the block-diagonal whh.
    for t in range(S):
        tb = S - 1 - t
        # fwd half reads time t, bwd half reads time S-1-t: one full-width select
        proj_t = jnp.where(fwd_mask, proj[:, t, :], proj[:, tb, :])
        pre = proj_t + jnp.dot(h_cat.astype(jnp.bfloat16), whh,
                               preferred_element_type=jnp.float32)
        # Two full-width EUP ops + one select instead of 8 quarter-width ones.
        act = jnp.where(sig_mask, jax.nn.sigmoid(pre), jnp.tanh(pre))
        i_g = act[:, 0 * 2 * H:1 * 2 * H]
        f_g = act[:, 1 * 2 * H:2 * 2 * H]
        o_g = act[:, 2 * 2 * H:3 * 2 * H]
        g_g = act[:, 3 * 2 * H:4 * 2 * H]
        c_cat = f_g * c_cat + i_g * g_g
        h_cat = o_g * jnp.tanh(c_cat)
        if collect_seq:
            hf_seq[t] = h_cat[:, :H]
            hb_seq[tb] = h_cat[:, H:]
    return h_cat, hf_seq, hb_seq


def bilstm_seq_kernel(x2d_ref, wih_ref, whh_ref, b_ref, of_ref, ob_ref, *, seq_len):
    _, hf_seq, hb_seq = _bilstm_recurrence(
        x2d_ref, wih_ref, whh_ref, b_ref, seq_len, collect_seq=True)
    # Single bulk store per direction (no per-step masked stores).
    of_ref[...] = jnp.stack(hf_seq, axis=1)
    ob_ref[...] = jnp.stack(hb_seq, axis=1)


def agg_ff_kernel(x2d_ref, wih_ref, whh_ref, b_ref,
                  w1a_ref, w1b_ref, b1_ref, w2_ref, b2_ref, out_ref,
                  *, seq_len, batch):
    """Aggregation BiLSTM (final states only) fused with the tanh-FF head."""
    h_cat, _, _ = _bilstm_recurrence(
        x2d_ref, wih_ref, whh_ref, b_ref, seq_len, collect_seq=False)
    # After the last step h_cat == [h_fwd(S-1) | h_bwd(0)] == the BiLSTM finals.
    # Rows: [p1_0..p1_{B-1}, p2_0..p2_{B-1}]; columns: [fwd H | bwd H].
    f_p1 = h_cat[:batch].astype(jnp.bfloat16)      # (B, 2H) == [p1_fwd | p1_bwd]
    f_p2 = h_cat[batch:].astype(jnp.bfloat16)      # (B, 2H) == [p2_fwd | p2_bwd]
    hidden = jnp.tanh(
        jnp.dot(f_p1, w1a_ref[...], preferred_element_type=jnp.float32)
        + jnp.dot(f_p2, w1b_ref[...], preferred_element_type=jnp.float32)
        + b1_ref[...])
    out_ref[...] = (jnp.dot(hidden.astype(jnp.bfloat16), w2_ref[...],
                            preferred_element_type=jnp.float32) + b2_ref[...])


def run_context_bilstm(x2d, lstm_params, Bc, S):
    """Context BiLSTM over pre-flattened x2d (Bc*S, D) -> (Bc,S,H), (Bc,S,H)."""
    wih, whh, b = lstm_params
    D = x2d.shape[1]
    H = whh.shape[0] // 2
    nblk = _num_tc_splits()
    if Bc % nblk:
        nblk = 1
    Bt = Bc // nblk
    kernel = functools.partial(bilstm_seq_kernel, seq_len=S)
    # TODO(synk): at realistic BiMPM sizes (B~64, S~50, d=300, H=100) this
    # whole-block-in-VMEM kernel needs per-generation batch tiling and
    # vmem_limit_bytes (v7x has 64 MiB physical VMEM vs 128 MiB on v5e/v6e).
    return pl.pallas_call(
        kernel,
        out_shape=(jax.ShapeDtypeStruct((Bc, S, H), jnp.float32),
                   jax.ShapeDtypeStruct((Bc, S, H), jnp.float32)),
        grid=(nblk,),
        in_specs=[
            pl.BlockSpec((Bt * S, D), lambda i: (i, 0)),
            pl.BlockSpec(wih.shape, lambda i: (0, 0)),
            pl.BlockSpec(whh.shape, lambda i: (0, 0)),
            pl.BlockSpec(b.shape, lambda i: (0, 0)),
        ],
        out_specs=(pl.BlockSpec((Bt, S, H), lambda i: (i, 0, 0)),
                   pl.BlockSpec((Bt, S, H), lambda i: (i, 0, 0))),
        compiler_params=pltpu.CompilerParams(dimension_semantics=("parallel",)),
    )(x2d, wih, whh, b)


def run_agg_ff(aggr2d, agg_params, ff_params, B, S):
    """Aggregation BiLSTM + FF head, single fused grid-less invocation."""
    wih, whh, b = agg_params
    w1a, w1b, b1, w2, b2 = ff_params
    kernel = functools.partial(agg_ff_kernel, seq_len=S, batch=B)
    return pl.pallas_call(
        kernel,
        out_shape=jax.ShapeDtypeStruct((B, w2.shape[1]), jnp.float32),
    )(aggr2d, wih, whh, b, w1a, w1b, b1, w2, b2)


# --------------------------------------------------------------------------
# Matching kernel: full / maxpool / attentive / max-attentive matching.
# Output (2, B, S, 8L): index 0 -> premise aggregates, 1 -> hypothesis.
# --------------------------------------------------------------------------
def _dot_t(a, b):
    # contract last dim of a with last dim of b -> (a.shape[0], b.shape[0])
    return lax.dot_general(a, b, (((1,), (1,)), ((), ())),
                           preferred_element_type=jnp.float32)


def _full_match(p1, p2_last, wsq):
    # p1: (S,H), p2_last: (1,H), wsq = w*w: (L,H) -> (S,L)
    num = _dot_t(p1, wsq * p2_last)
    n1sq = _dot_t(p1 * p1, wsq)
    n2sq = _dot_t(p2_last * p2_last, wsq)
    # per-factor clamp; rsqrt on the EUP instead of sqrt+divide on the VPU
    return (num * lax.rsqrt(jnp.maximum(n1sq, EPS2))
                * lax.rsqrt(jnp.maximum(n2sq, EPS2)))


def _maxpool_match(p1, p2, wsq):
    # p1: (S1,H), p2: (S2,H), wsq: (L,H) -> maxm_p1 (S1,L), maxm_p2 (S2,L)
    L = wsq.shape[0]
    S1 = p1.shape[0]
    S2 = p2.shape[0]
    # All-perspective numerators in ONE matmul; rows are l-major so the reshape
    # back to (L,S1,S2) stays on (8,128) tile boundaries (S1 == 8).
    p1w = (wsq[:, None, :] * p1[None, :, :]).reshape(L * S1, -1)
    num = _dot_t(p1w, p2).reshape(L, S1, S2)
    n1sq = _dot_t(wsq, p1 * p1)                        # (L, S1)
    n2sq = _dot_t(wsq, p2 * p2)                        # (L, S2)
    denosq = n1sq[:, :, None] * n2sq[:, None, :]       # VPU broadcast, no MXU
    cos = num * lax.rsqrt(jnp.maximum(denosq, EPS2))   # == num / max(deno, EPS)
    maxm_p1 = jnp.transpose(jnp.max(cos, axis=2))      # (S1, L)
    maxm_p2 = jnp.transpose(jnp.max(cos, axis=1))      # (S2, L)
    return maxm_p1, maxm_p2


def _cos_weighted(a, b, wsq):
    # per-perspective cosine between (w*a) and (w*b) over the hidden dim
    num = _dot_t(a * b, wsq)
    nasq = _dot_t(a * a, wsq)
    nbsq = _dot_t(b * b, wsq)
    return (num * lax.rsqrt(jnp.maximum(nasq, EPS2))
                * lax.rsqrt(jnp.maximum(nbsq, EPS2)))


def _attentive_match(p1, p2, wsq_att, wsq_max):
    # p1: (S1,H), p2: (S2,H) -> (S1,L), (S1,L)
    s2 = p2.shape[0]
    prod = _dot_t(p1, p2)                                    # (S1,S2)
    n1sq = jnp.sum(p1 * p1, axis=1, keepdims=True)           # (S1,1)
    n2sq = jnp.sum(p2 * p2, axis=1, keepdims=True)           # (S2,1)
    denosq = n1sq * jnp.transpose(n2sq)                      # broadcast, no MXU
    alpha = prod * lax.rsqrt(jnp.maximum(denosq, EPS2))      # == prod / max(deno,EPS)
    h_mat = jnp.dot(alpha, p2, preferred_element_type=jnp.float32)
    alpha_sum = jnp.sum(alpha, axis=1, keepdims=True)
    resultant = h_mat / alpha_sum                            # no eps, as in source
    result_match = _cos_weighted(resultant, p1, wsq_att)

    # max-attentive: gather the p2 row with the highest alpha (first max index)
    max_val = jnp.max(alpha, axis=1, keepdims=True)
    iota = lax.broadcasted_iota(jnp.int32, alpha.shape, 1)
    masked = jnp.where(alpha == max_val, iota, s2)
    idx = jnp.min(masked, axis=1, keepdims=True)
    onehot = (iota == idx).astype(jnp.float32)
    out_mat = jnp.dot(onehot, p2, preferred_element_type=jnp.float32)
    result_max = _cos_weighted(out_mat, p1, wsq_max)
    return result_match, result_max


def matching_kernel(p1f_ref, p1b_ref, p2f_ref, p2b_ref,
                    w1_ref, w2_ref, w3_ref, w4_ref,
                    w5_ref, w6_ref, w7_ref, w8_ref, out_ref):
    L = w1_ref.shape[0]
    Bblk = p1f_ref.shape[0]
    S = p1f_ref.shape[1]
    w1s, w2s, w3s, w4s, w5s, w6s, w7s, w8s = [
        r[...] * r[...] for r in
        (w1_ref, w2_ref, w3_ref, w4_ref, w5_ref, w6_ref, w7_ref, w8_ref)]

    def put(a, i, k, val):
        # direct lane-slice store; no vreg-side 8-way concatenation
        out_ref[a, i, :, k * L:(k + 1) * L] = val

    for i in range(Bblk):
        p1f = p1f_ref[i]
        p1b = p1b_ref[i]
        p2f = p2f_ref[i]
        p2b = p2b_ref[i]
        p1f_last = p1f[S - 1:S, :]
        p1b_last = p1b[S - 1:S, :]
        p2f_last = p2f[S - 1:S, :]
        p2b_last = p2b[S - 1:S, :]

        # full matching
        put(0, i, 0, _full_match(p1f, p2f_last, w1s))
        put(0, i, 1, _full_match(p1b, p2b_last, w2s))
        put(1, i, 0, _full_match(p2f, p1f_last, w1s))
        put(1, i, 1, _full_match(p2b, p1b_last, w2s))

        # maxpool matching
        m1f, m2f = _maxpool_match(p1f, p2f, w3s)
        m1b, m2b = _maxpool_match(p1b, p2b, w4s)
        put(0, i, 2, m1f)
        put(0, i, 3, m1b)
        put(1, i, 2, m2f)
        put(1, i, 3, m2b)

        # attentive + max-attentive matching
        a1f, am1f = _attentive_match(p1f, p2f, w5s, w7s)
        a1b, am1b = _attentive_match(p1b, p2b, w6s, w8s)
        a2f, am2f = _attentive_match(p2f, p1f, w5s, w7s)
        a2b, am2b = _attentive_match(p2b, p1b, w6s, w8s)
        put(0, i, 4, a1f)
        put(0, i, 5, a1b)
        put(0, i, 6, am1f)
        put(0, i, 7, am1b)
        put(1, i, 4, a2f)
        put(1, i, 5, a2b)
        put(1, i, 6, am2f)
        put(1, i, 7, am2b)


def run_matching(ctx_f, ctx_b, ws):
    Bc, S, H = ctx_f.shape
    B = Bc // 2
    L = ws[0].shape[0]
    # single-TC chips (v5e/v6e): one invocation processes the whole batch;
    # dual-TC v7x: grid=(B,) "parallel" so each TensorCore takes a batch element.
    bblk = 1 if _num_tc_splits() > 1 else B
    nblk = B // bblk
    p1_spec = pl.BlockSpec((bblk, S, H), lambda i: (i, 0, 0))
    p2_spec = pl.BlockSpec((bblk, S, H), lambda i: (i + nblk, 0, 0))
    w_spec = pl.BlockSpec((L, H), lambda i: (0, 0))
    out_spec = pl.BlockSpec((2, bblk, S, 8 * L), lambda i: (0, i, 0, 0))
    return pl.pallas_call(
        matching_kernel,
        out_shape=jax.ShapeDtypeStruct((2, B, S, 8 * L), jnp.float32),
        grid=(nblk,),
        in_specs=[p1_spec, p1_spec, p2_spec, p2_spec] + [w_spec] * 8,
        out_specs=out_spec,
        compiler_params=pltpu.CompilerParams(dimension_semantics=("parallel",)),
    )(ctx_f, ctx_b, ctx_f, ctx_b, *ws)


# --------------------------------------------------------------------------
# Parameter construction (deterministic, uniform(-0.01, 0.01) like init_weights)
# --------------------------------------------------------------------------
def _uni(key, shape):
    return jax.random.uniform(key, shape, jnp.float32, -0.01, 0.01)


def make_bilstm_packed(key, in_dim, hidden):
    """Packed bidirectional LSTM params.

    Output-column layout (8H): [I_f I_b | F_f F_b | O_f O_b | G_f G_b].
    wih: (in_dim, 8H) bf16; whh: (2H, 8H) bf16, block-diagonal per direction;
    b: (1, 8H) f32 (= b_ih + b_hh)."""
    H = hidden
    k = jax.random.split(key, 8)

    def pack_cols(wf, wb):
        cols = []
        for g in range(4):
            cols.append(wf[:, g * H:(g + 1) * H])
            cols.append(wb[:, g * H:(g + 1) * H])
        return jnp.concatenate(cols, axis=1)

    wih_f = _uni(k[0], (in_dim, 4 * H))
    wih_b = _uni(k[1], (in_dim, 4 * H))
    whh_f = _uni(k[2], (H, 4 * H))
    whh_b = _uni(k[3], (H, 4 * H))
    b_f = _uni(k[4], (1, 4 * H)) + _uni(k[5], (1, 4 * H))
    b_b = _uni(k[6], (1, 4 * H)) + _uni(k[7], (1, 4 * H))

    wih = pack_cols(wih_f, wih_b).astype(jnp.bfloat16)
    whh_top = pack_cols(whh_f, jnp.zeros_like(whh_f))       # rows for h_fwd
    whh_bot = pack_cols(jnp.zeros_like(whh_b), whh_b)       # rows for h_bwd
    whh = jnp.concatenate([whh_top, whh_bot], axis=0).astype(jnp.bfloat16)
    b = pack_cols(b_f, b_b)
    return (wih, whh, b)


def make_params(key, vocab, word_dim, hidden, n_persp, n_class):
    keys = jax.random.split(key, 17)
    ws = [_uni(keys[5 + i], (n_persp, hidden)) for i in range(8)]
    ff1_w = _uni(keys[13], (4 * hidden, 2 * hidden))
    return {
        "wemb": _uni(keys[0], (vocab, word_dim)),
        "ctx": make_bilstm_packed(keys[1], word_dim, hidden),
        "agg": make_bilstm_packed(keys[2], 8 * n_persp, hidden),
        "ws": ws,
        # ff1 row-split: rows 0:2H act on [p1_fwd|p1_bwd], rows 2H:4H on [p2_fwd|p2_bwd]
        "ff1_wa": ff1_w[:2 * hidden].astype(jnp.bfloat16),
        "ff1_wb": ff1_w[2 * hidden:].astype(jnp.bfloat16),
        "ff1_b": _uni(keys[14], (1, 2 * hidden)),
        "ff2_w": _uni(keys[15], (2 * hidden, n_class)).astype(jnp.bfloat16),
        "ff2_b": _uni(keys[16], (1, n_class)),
    }


# --------------------------------------------------------------------------
# Full forward pass.  Only XLA glue left: embedding gather, one batch concat,
# and free leading-dim reshapes -- no transposes, reverses or feature concats.
# --------------------------------------------------------------------------
@jax.jit
def bimpm_forward(params, p_ids, h_ids):
    B, S = p_ids.shape
    L = params["ws"][0].shape[0]

    # word embedding lookup (glue, stays in plain JAX)
    e1 = params["wemb"][p_ids]                       # (B, S, word_dim)
    e2 = params["wemb"][h_ids]
    x = jnp.concatenate([e1, e2], axis=0)            # (2B, S, d): premise rows then hyp rows
    x2d = x.reshape(2 * B * S, x.shape[-1])          # free wrapper reshape (not in-kernel)

    # context BiLSTM for both sentences in one fused pass
    ctx_f, ctx_b = run_context_bilstm(x2d, params["ctx"], 2 * B, S)   # (2B,S,H) each

    # matching: (2, B, S, 8L); index 0 -> premise, 1 -> hypothesis
    match_out = run_matching(ctx_f, ctx_b, params["ws"])
    # dropout -> identity (eval mode); free leading-dim reshape to 2D rows
    aggr2d = match_out.reshape(2 * B * S, 8 * L)     # rows: [p1_0..p1_{B-1}, p2_0..p2_{B-1}]

    # aggregation BiLSTM (final states) fused with the tanh-FF head
    ff_params = (params["ff1_wa"], params["ff1_wb"], params["ff1_b"],
                 params["ff2_w"], params["ff2_b"])
    logits = run_agg_ff(aggr2d, params["agg"], ff_params, B, S)
    return logits


if __name__ == "__main__":
    B, S = 2, 8
    VOCAB = 100
    WORD_DIM = 32     # d = word_dim (use_char_emb = False)
    HIDDEN = 32
    NUM_PERSPECTIVE = 4
    NUM_CLASS = 2

    key = jax.random.PRNGKey(0)
    k_param, k_p, k_h = jax.random.split(key, 3)
    params = make_params(k_param, VOCAB, WORD_DIM, HIDDEN, NUM_PERSPECTIVE, NUM_CLASS)

    p_ids = jax.random.randint(k_p, (B, S), 0, VOCAB)
    h_ids = jax.random.randint(k_h, (B, S), 0, VOCAB)

    logits = bimpm_forward(params, p_ids, h_ids)
    jax.block_until_ready(logits)
    assert logits.shape == (B, NUM_CLASS), logits.shape
    assert bool(jnp.all(jnp.isfinite(logits)))
    print("KERNEL_OK")
</pallas_src>

<mosaic_0001>
module attributes {stable_mosaic.version = 11 : i64} {
  func.func @bilstm_seq_kernel(%arg0: i32, %arg1: memref<32x32xf32, #tpu.memory_space<vmem>>, %arg2: memref<32x256xbf16, #tpu.memory_space<vmem>>, %arg3: memref<64x256xbf16, #tpu.memory_space<vmem>>, %arg4: memref<1x256xf32, #tpu.memory_space<vmem>>, %arg5: memref<4x8x32xf32, #tpu.memory_space<vmem>>, %arg6: memref<4x8x32xf32, #tpu.memory_space<vmem>>) attributes {dimension_semantics = [#tpu.dimension_semantics<parallel>], iteration_bounds = array<i64: 1>, scalar_prefetch = 0 : i64, scratch_operands = 0 : i64, tpu.core_type = #tpu.core_type<tc>, window_params = [{transform_indices = @transform_0, window_bounds = array<i64: 32, 32>}, {pipeline_mode = #tpu.pipeline_mode<synchronous>, transform_indices = @transform_1, window_bounds = array<i64: 32, 256>}, {pipeline_mode = #tpu.pipeline_mode<synchronous>, transform_indices = @transform_2, window_bounds = array<i64: 64, 256>}, {pipeline_mode = #tpu.pipeline_mode<synchronous>, transform_indices = @transform_3, window_bounds = array<i64: 1, 256>}, {transform_indices = @transform_4, window_bounds = array<i64: 4, 8, 32>}, {transform_indices = @transform_5, window_bounds = array<i64: 4, 8, 32>}]} {
    %c0 = arith.constant 0 : index
    %c0_0 = arith.constant 0 : index
    %0 = vector.load %arg1[%c0, %c0_0] : memref<32x32xf32, #tpu.memory_space<vmem>>, vector<32x32xf32>
    %1 = arith.truncf %0 : vector<32x32xf32> to vector<32x32xbf16>
    %c0_1 = arith.constant 0 : index
    %c0_2 = arith.constant 0 : index
    %2 = vector.load %arg2[%c0_1, %c0_2] : memref<32x256xbf16, #tpu.memory_space<vmem>>, vector<32x256xbf16>
    %cst = arith.constant dense<0.000000e+00> : vector<32x256xf32>
    %3 = tpu.matmul %1, %2, %cst {dimension_numbers = #tpu.dot_dimension_numbers<[1], [0], [0], [1], [0, 0, 1, 1], [], []>} : vector<32x32xbf16>, vector<32x256xbf16>, vector<32x256xf32> -> vector<32x256xf32>
    %c0_3 = arith.constant 0 : index
    %c0_4 = arith.constant 0 : index
    %4 = vector.load %arg4[%c0_3, %c0_4] : memref<1x256xf32, #tpu.memory_space<vmem>>, vector<1x256xf32>
    %5 = vector.broadcast %4 : vector<1x256xf32> to vector<32x256xf32>
    %6 = arith.addf %3, %5 : vector<32x256xf32>
    %7 = vector.shape_cast %6 : vector<32x256xf32> to vector<4x8x256xf32>
    %c0_5 = arith.constant 0 : index
    %c0_6 = arith.constant 0 : index
    %8 = vector.load %arg3[%c0_5, %c0_6] : memref<64x256xbf16, #tpu.memory_space<vmem>>, vector<64x256xbf16>
    %9 = tpu.iota {dimensions = array<i32: 1>} : vector<4x256xi32>
    %c64_i32 = arith.constant 64 : i32
    %c0_i32 = arith.constant 0 : i32
    %10 = arith.cmpi eq, %c64_i32, %c0_i32 : i32
    %c1_i32 = arith.constant 1 : i32
    %11 = arith.select %10, %c1_i32, %c64_i32 : i32
    %12 = vector.broadcast %11 : i32 to vector<4x256xi32>
    %13 = arith.remsi %9, %12 : vector<4x256xi32>
    %c0_i32_7 = arith.constant 0 : i32
    %14 = vector.broadcast %c0_i32_7 : i32 to vector<4x256xi32>
    %15 = arith.cmpi ne, %13, %14 : vector<4x256xi32>
    %c0_i32_8 = arith.constant 0 : i32
    %16 = vector.broadcast %c0_i32_8 : i32 to vector<4x256xi32>
    %17 = arith.cmpi slt, %13, %16 : vector<4x256xi32>
    %c0_i32_9 = arith.constant 0 : i32
    %18 = arith.cmpi slt, %11, %c0_i32_9 : i32
    %19 = vector.broadcast %18 : i1 to vector<4x256xi1>
    %20 = vector.broadcast %19 : vector<4x256xi1> to vector<4x256xi1>
    %21 = arith.xori %17, %20 : vector<4x256xi1>
    %22 = arith.andi %21, %15 : vector<4x256xi1>
    %23 = vector.broadcast %11 : i32 to vector<4x256xi32>
    %24 = arith.addi %13, %23 : vector<4x256xi32>
    %25 = arith.select %22, %24, %13 : vector<4x256xi1>, vector<4x256xi32>
    %c32_i32 = arith.constant 32 : i32
    %26 = vector.broadcast %c32_i32 : i32 to vector<4x256xi32>
    %27 = arith.cmpi slt, %25, %26 : vector<4x256xi32>
    %c192_i32 = arith.constant 192 : i32
    %28 = vector.broadcast %c192_i32 : i32 to vector<4x256xi32>
    %29 = arith.cmpi slt, %9, %28 : vector<4x256xi32>
    %cst_10 = arith.constant 0.000000e+00 : f32
    %30 = vector.broadcast %cst_10 : f32 to vector<4x64xf32>
    %cst_11 = arith.constant 0.000000e+00 : f32
    %31 = vector.broadcast %cst_11 : f32 to vector<4x64xf32>
    %32 = vector.extract_strided_slice %7 {offsets = [0, 0, 0], sizes = [4, 1, 256], strides = [1, 1, 1]} : vector<4x8x256xf32> to vector<4x1x256xf32>
    %33 = vector.shape_cast %32 : vector<4x1x256xf32> to vector<4x256xf32>
    %34 = vector.extract_strided_slice %7 {offsets = [0, 7, 0], sizes = [4, 1, 256], strides = [1, 1, 1]} : vector<4x8x256xf32> to vector<4x1x256xf32>
    %35 = vector.shape_cast %34 : vector<4x1x256xf32> to vector<4x256xf32>
    %36 = arith.select %27, %33, %35 : vector<4x256xi1>, vector<4x256xf32>
    %37 = arith.truncf %30 : vector<4x64xf32> to vector<4x64xbf16>
    %cst_12 = arith.constant dense<0.000000e+00> : vector<4x256xf32>
    %38 = tpu.matmul %37, %8, %cst_12 {dimension_numbers = #tpu.dot_dimension_numbers<[1], [0], [0], [1], [0, 0, 1, 1], [], []>} : vector<4x64xbf16>, vector<64x256xbf16>, vector<4x256xf32> -> vector<4x256xf32>
    %39 = arith.addf %36, %38 : vector<4x256xf32>
    %40 = arith.negf %39 : vector<4x256xf32>
    %41 = math.exp %40 : vector<4x256xf32>
    %cst_13 = arith.constant 1.000000e+00 : f32
    %42 = vector.broadcast %cst_13 : f32 to vector<4x256xf32>
    %43 = arith.addf %42, %41 : vector<4x256xf32>
    %44 = arith.divf %42, %43 : vector<4x256xf32>
    %45 = math.tanh %39 : vector<4x256xf32>
    %46 = arith.select %29, %44, %45 : vector<4x256xi1>, vector<4x256xf32>
    %47 = vector.extract_strided_slice %46 {offsets = [0, 0], sizes = [4, 64], strides = [1, 1]} : vector<4x256xf32> to vector<4x64xf32>
    %48 = vector.extract_strided_slice %46 {offsets = [0, 64], sizes = [4, 64], strides = [1, 1]} : vector<4x256xf32> to vector<4x64xf32>
    %49 = vector.extract_strided_slice %46 {offsets = [0, 128], sizes = [4, 64], strides = [1, 1]} : vector<4x256xf32> to vector<4x64xf32>
    %50 = vector.extract_strided_slice %46 {offsets = [0, 192], sizes = [4, 64], strides = [1, 1]} : vector<4x256xf32> to vector<4x64xf32>
    %51 = arith.mulf %48, %31 : vector<4x64xf32>
    %52 = arith.mulf %47, %50 : vector<4x64xf32>
    %53 = arith.addf %51, %52 : vector<4x64xf32>
    %54 = math.tanh %53 : vector<4x64xf32>
    %55 = arith.mulf %49, %54 : vector<4x64xf32>
    %56 = vector.extract_strided_slice %55 {offsets = [0, 0], sizes = [4, 32], strides = [1, 1]} : vector<4x64xf32> to vector<4x32xf32>
    %57 = vector.extract_strided_slice %55 {offsets = [0, 32], sizes = [4, 32], strides = [1, 1]} : vector<4x64xf32> to vector<4x32xf32>
    %58 = vector.extract_strided_slice %7 {offsets = [0, 1, 0], sizes = [4, 1, 256], strides = [1, 1, 1]} : vector<4x8x256xf32> to vector<4x1x256xf32>
    %59 = vector.shape_cast %58 : vector<4x1x256xf32> to vector<4x256xf32>
    %60 = vector.extract_strided_slice %7 {offsets = [0, 6, 0], sizes = [4, 1, 256], strides = [1, 1, 1]} : vector<4x8x256xf32> to vector<4x1x256xf32>
    %61 = vector.shape_cast %60 : vector<4x1x256xf32> to vector<4x256xf32>
    %62 = arith.select %27, %59, %61 : vector<4x256xi1>, vector<4x256xf32>
    %63 = arith.truncf %55 : vector<4x64xf32> to vector<4x64xbf16>
    %cst_14 = arith.constant dense<0.000000e+00> : vector<4x256xf32>
    %64 = tpu.matmul %63, %8, %cst_14 {dimension_numbers = #tpu.dot_dimension_numbers<[1], [0], [0], [1], [0, 0, 1, 1], [], []>} : vector<4x64xbf16>, vector<64x256xbf16>, vector<4x256xf32> -> vector<4x256xf32>
    %65 = arith.addf %62, %64 : vector<4x256xf32>
    %66 = arith.negf %65 : vector<4x256xf32>
    %67 = math.exp %66 : vector<4x256xf32>
    %cst_15 = arith.constant 1.000000e+00 : f32
    %68 = vector.broadcast %cst_15 : f32 to vector<4x256xf32>
    %69 = arith.addf %68, %67 : vector<4x256xf32>
    %70 = arith.divf %68, %69 : vector<4x256xf32>
    %71 = math.tanh %65 : vector<4x256xf32>
    %72 = arith.select %29, %70, %71 : vector<4x256xi1>, vector<4x256xf32>
    %73 = vector.extract_strided_slice %72 {offsets = [0, 0], sizes = [4, 64], strides = [1, 1]} : vector<4x256xf32> to vector<4x64xf32>
    %74 = vector.extract_strided_slice %72 {offsets = [0, 64], sizes = [4, 64], strides = [1, 1]} : vector<4x256xf32> to vector<4x64xf32>
    %75 = vector.extract_strided_slice %72 {offsets = [0, 128], sizes = [4, 64], strides = [1, 1]} : vector<4x256xf32> to vector<4x64xf32>
    %76 = vector.extract_strided_slice %72 {offsets = [0, 192], sizes = [4, 64], strides = [1, 1]} : vector<4x256xf32> to vector<4x64xf32>
    %77 = arith.mulf %74, %53 : vector<4x64xf32>
    %78 = arith.mulf %73, %76 : vector<4x64xf32>
    %79 = arith.addf %77, %78 : vector<4x64xf32>
    %80 = math.tanh %79 : vector<4x64xf32>
    %81 = arith.mulf %75, %80 : vector<4x64xf32>
    %82 = vector.extract_strided_slice %81 {offsets = [0, 0], sizes = [4, 32], strides = [1, 1]} : vector<4x64xf32> to vector<4x32xf32>
    %83 = vector.extract_strided_slice %81 {offsets = [0, 32], sizes = [4, 32], strides = [1, 1]} : vector<4x64xf32> to vector<4x32xf32>
    %84 = vector.extract_strided_slice %7 {offsets = [0, 2, 0], sizes = [4, 1, 256], strides = [1, 1, 1]} : vector<4x8x256xf32> to vector<4x1x256xf32>
    %85 = vector.shape_cast %84 : vector<4x1x256xf32> to vector<4x256xf32>
    %86 = vector.extract_strided_slice %7 {offsets = [0, 5, 0], sizes = [4, 1, 256], strides = [1, 1, 1]} : vector<4x8x256xf32> to vector<4x1x256xf32>
    %87 = vector.shape_cast %86 : vector<4x1x256xf32> to vector<4x256xf32>
    %88 = arith.select %27, %85, %87 : vector<4x256xi1>, vector<4x256xf32>
    %89 = arith.truncf %81 : vector<4x64xf32> to vector<4x64xbf16>
    %cst_16 = arith.constant dense<0.000000e+00> : vector<4x256xf32>
    %90 = tpu.matmul %89, %8, %cst_16 {dimension_numbers = #tpu.dot_dimension_numbers<[1], [0], [0], [1], [0, 0, 1, 1], [], []>} : vector<4x64xbf16>, vector<64x256xbf16>, vector<4x256xf32> -> vector<4x256xf32>
    %91 = arith.addf %88, %90 : vector<4x256xf32>
    %92 = arith.negf %91 : vector<4x256xf32>
    %93 = math.exp %92 : vector<4x256xf32>
    %cst_17 = arith.constant 1.000000e+00 : f32
    %94 = vector.broadcast %cst_17 : f32 to vector<4x256xf32>
    %95 = arith.addf %94, %93 : vector<4x256xf32>
    %96 = arith.divf %94, %95 : vector<4x256xf32>
    %97 = math.tanh %91 : vector<4x256xf32>
    %98 = arith.select %29, %96, %97 : vector<4x256xi1>, vector<4x256xf32>
    %99 = vector.extract_strided_slice %98 {offsets = [0, 0], sizes = [4, 64], strides = [1, 1]} : vector<4x256xf32> to vector<4x64xf32>
    %100 = vector.extract_strided_slice %98 {offsets = [0, 64], sizes = [4, 64], strides = [1, 1]} : vector<4x256xf32> to vector<4x64xf32>
    %101 = vector.extract_strided_slice %98 {offsets = [0, 128], sizes = [4, 64], strides = [1, 1]} : vector<4x256xf32> to vector<4x64xf32>
    %102 = vector.extract_strided_slice %98 {offsets = [0, 192], sizes = [4, 64], strides = [1, 1]} : vector<4x256xf32> to vector<4x64xf32>
    %103 = arith.mulf %100, %79 : vector<4x64xf32>
    %104 = arith.mulf %99, %102 : vector<4x64xf32>
    %105 = arith.addf %103, %104 : vector<4x64xf32>
    %106 = math.tanh %105 : vector<4x64xf32>
    %107 = arith.mulf %101, %106 : vector<4x64xf32>
    %108 = vector.extract_strided_slice %107 {offsets = [0, 0], sizes = [4, 32], strides = [1, 1]} : vector<4x64xf32> to vector<4x32xf32>
    %109 = vector.extract_strided_slice %107 {offsets = [0, 32], sizes = [4, 32], strides = [1, 1]} : vector<4x64xf32> to vector<4x32xf32>
    %110 = vector.extract_strided_slice %7 {offsets = [0, 3, 0], sizes = [4, 1, 256], strides = [1, 1, 1]} : vector<4x8x256xf32> to vector<4x1x256xf32>
    %111 = vector.shape_cast %110 : vector<4x1x256xf32> to vector<4x256xf32>
    %112 = vector.extract_strided_slice %7 {offsets = [0, 4, 0], sizes = [4, 1, 256], strides = [1, 1, 1]} : vector<4x8x256xf32> to vector<4x1x256xf32>
    %113 = vector.shape_cast %112 : vector<4x1x256xf32> to vector<4x256xf32>
    %114 = arith.select %27, %111, %113 : vector<4x256xi1>, vector<4x256xf32>
    %115 = arith.truncf %107 : vector<4x64xf32> to vector<4x64xbf16>
    %cst_18 = arith.constant dense<0.000000e+00> : vector<4x256xf32>
    %116 = tpu.matmul %115, %8, %cst_18 {dimension_numbers = #tpu.dot_dimension_numbers<[1], [0], [0], [1], [0, 0, 1, 1], [], []>} : vector<4x64xbf16>, vector<64x256xbf16>, vector<4x256xf32> -> vector<4x256xf32>
    %117 = arith.addf %114, %116 : vector<4x256xf32>
    %118 = arith.negf %117 : vector<4x256xf32>
    %119 = math.exp %118 : vector<4x256xf32>
    %cst_19 = arith.constant 1.000000e+00 : f32
    %120 = vector.broadcast %cst_19 : f32 to vector<4x256xf32>
    %121 = arith.addf %120, %119 : vector<4x256xf32>
    %122 = arith.divf %120, %121 : vector<4x256xf32>
    %123 = math.tanh %117 : vector<4x256xf32>
    %124 = arith.select %29, %122, %123 : vector<4x256xi1>, vector<4x256xf32>
    %125 = vector.extract_strided_slice %124 {offsets = [0, 0], sizes = [4, 64], strides = [1, 1]} : vector<4x256xf32> to vector<4x64xf32>
    %126 = vector.extract_strided_slice %124 {offsets = [0, 64], sizes = [4, 64], strides = [1, 1]} : vector<4x256xf32> to vector<4x64xf32>
    %127 = vector.extract_strided_slice %124 {offsets = [0, 128], sizes = [4, 64], strides = [1, 1]} : vector<4x256xf32> to vector<4x64xf32>
    %128 = vector.extract_strided_slice %124 {offsets = [0, 192], sizes = [4, 64], strides = [1, 1]} : vector<4x256xf32> to vector<4x64xf32>
    %129 = arith.mulf %126, %105 : vector<4x64xf32>
    %130 = arith.mulf %125, %128 : vector<4x64xf32>
    %131 = arith.addf %129, %130 : vector<4x64xf32>
    %132 = math.tanh %131 : vector<4x64xf32>
    %133 = arith.mulf %127, %132 : vector<4x64xf32>
    %134 = vector.extract_strided_slice %133 {offsets = [0, 0], sizes = [4, 32], strides = [1, 1]} : vector<4x64xf32> to vector<4x32xf32>
    %135 = vector.extract_strided_slice %133 {offsets = [0, 32], sizes = [4, 32], strides = [1, 1]} : vector<4x64xf32> to vector<4x32xf32>
    %136 = vector.extract_strided_slice %7 {offsets = [0, 4, 0], sizes = [4, 1, 256], strides = [1, 1, 1]} : vector<4x8x256xf32> to vector<4x1x256xf32>
    %137 = vector.shape_cast %136 : vector<4x1x256xf32> to vector<4x256xf32>
    %138 = vector.extract_strided_slice %7 {offsets = [0, 3, 0], sizes = [4, 1, 256], strides = [1, 1, 1]} : vector<4x8x256xf32> to vector<4x1x256xf32>
    %139 = vector.shape_cast %138 : vector<4x1x256xf32> to vector<4x256xf32>
    %140 = arith.select %27, %137, %139 : vector<4x256xi1>, vector<4x256xf32>
    %141 = arith.truncf %133 : vector<4x64xf32> to vector<4x64xbf16>
    %cst_20 = arith.constant dense<0.000000e+00> : vector<4x256xf32>
    %142 = tpu.matmul %141, %8, %cst_20 {dimension_numbers = #tpu.dot_dimension_numbers<[1], [0], [0], [1], [0, 0, 1, 1], [], []>} : vector<4x64xbf16>, vector<64x256xbf16>, vector<4x256xf32> -> vector<4x256xf32>
    %143 = arith.addf %140, %142 : vector<4x256xf32>
    %144 = arith.negf %143 : vector<4x256xf32>
    %145 = math.exp %144 : vector<4x256xf32>
    %cst_21 = arith.constant 1.000000e+00 : f32
    %146 = vector.broadcast %cst_21 : f32 to vector<4x256xf32>
    %147 = arith.addf %146, %145 : vector<4x256xf32>
    %148 = arith.divf %146, %147 : vector<4x256xf32>
    %149 = math.tanh %143 : vector<4x256xf32>
    %150 = arith.select %29, %148, %149 : vector<4x256xi1>, vector<4x256xf32>
    %151 = vector.extract_strided_slice %150 {offsets = [0, 0], sizes = [4, 64], strides = [1, 1]} : vector<4x256xf32> to vector<4x64xf32>
    %152 = vector.extract_strided_slice %150 {offsets = [0, 64], sizes = [4, 64], strides = [1, 1]} : vector<4x256xf32> to vector<4x64xf32>
    %153 = vector.extract_strided_slice %150 {offsets = [0, 128], sizes = [4, 64], strides = [1, 1]} : vector<4x256xf32> to vector<4x64xf32>
    %154 = vector.extract_strided_slice %150 {offsets = [0, 192], sizes = [4, 64], strides = [1, 1]} : vector<4x256xf32> to vector<4x64xf32>
    %155 = arith.mulf %152, %131 : vector<4x64xf32>
    %156 = arith.mulf %151, %154 : vector<4x64xf32>
    %157 = arith.addf %155, %156 : vector<4x64xf32>
    %158 = math.tanh %157 : vector<4x64xf32>
    %159 = arith.mulf %153, %158 : vector<4x64xf32>
    %160 = vector.extract_strided_slice %159 {offsets = [0, 0], sizes = [4, 32], strides = [1, 1]} : vector<4x64xf32> to vector<4x32xf32>
    %161 = vector.extract_strided_slice %159 {offsets = [0, 32], sizes = [4, 32], strides = [1, 1]} : vector<4x64xf32> to vector<4x32xf32>
    %162 = vector.extract_strided_slice %7 {offsets = [0, 5, 0], sizes = [4, 1, 256], strides = [1, 1, 1]} : vector<4x8x256xf32> to vector<4x1x256xf32>
    %163 = vector.shape_cast %162 : vector<4x1x256xf32> to vector<4x256xf32>
    %164 = vector.extract_strided_slice %7 {offsets = [0, 2, 0], sizes = [4, 1, 256], strides = [1, 1, 1]} : vector<4x8x256xf32> to vector<4x1x256xf32>
    %165 = vector.shape_cast %164 : vector<4x1x256xf32> to vector<4x256xf32>
    %166 = arith.select %27, %163, %165 : vector<4x256xi1>, vector<4x256xf32>
    %167 = arith.truncf %159 : vector<4x64xf32> to vector<4x64xbf16>
    %cst_22 = arith.constant dense<0.000000e+00> : vector<4x256xf32>
    %168 = tpu.matmul %167, %8, %cst_22 {dimension_numbers = #tpu.dot_dimension_numbers<[1], [0], [0], [1], [0, 0, 1, 1], [], []>} : vector<4x64xbf16>, vector<64x256xbf16>, vector<4x256xf32> -> vector<4x256xf32>
    %169 = arith.addf %166, %168 : vector<4x256xf32>
    %170 = arith.negf %169 : vector<4x256xf32>
    %171 = math.exp %170 : vector<4x256xf32>
    %cst_23 = arith.constant 1.000000e+00 : f32
    %172 = vector.broadcast %cst_23 : f32 to vector<4x256xf32>
    %173 = arith.addf %172, %171 : vector<4x256xf32>
    %174 = arith.divf %172, %173 : vector<4x256xf32>
    %175 = math.tanh %169 : vector<4x256xf32>
    %176 = arith.select %29, %174, %175 : vector<4x256xi1>, vector<4x256xf32>
    %177 = vector.extract_strided_slice %176 {offsets = [0, 0], sizes = [4, 64], strides = [1, 1]} : vector<4x256xf32> to vector<4x64xf32>
    %178 = vector.extract_strided_slice %176 {offsets = [0, 64], sizes = [4, 64], strides = [1, 1]} : vector<4x256xf32> to vector<4x64xf32>
    %179 = vector.extract_strided_slice %176 {offsets = [0, 128], sizes = [4, 64], strides = [1, 1]} : vector<4x256xf32> to vector<4x64xf32>
    %180 = vector.extract_strided_slice %176 {offsets = [0, 192], sizes = [4, 64], strides = [1, 1]} : vector<4x256xf32> to vector<4x64xf32>
    %181 = arith.mulf %178, %157 : vector<4x64xf32>
    %182 = arith.mulf %177, %180 : vector<4x64xf32>
    %183 = arith.addf %181, %182 : vector<4x64xf32>
    %184 = math.tanh %183 : vector<4x64xf32>
    %185 = arith.mulf %179, %184 : vector<4x64xf32>
    %186 = vector.extract_strided_slice %185 {offsets = [0, 0], sizes = [4, 32], strides = [1, 1]} : vector<4x64xf32> to vector<4x32xf32>
    %187 = vector.extract_strided_slice %185 {offsets = [0, 32], sizes = [4, 32], strides = [1, 1]} : vector<4x64xf32> to vector<4x32xf32>
    %188 = vector.extract_strided_slice %7 {offsets = [0, 6, 0], sizes = [4, 1, 256], strides = [1, 1, 1]} : vector<4x8x256xf32> to vector<4x1x256xf32>
    %189 = vector.shape_cast %188 : vector<4x1x256xf32> to vector<4x256xf32>
    %190 = vector.extract_strided_slice %7 {offsets = [0, 1, 0], sizes = [4, 1, 256], strides = [1, 1, 1]} : vector<4x8x256xf32> to vector<4x1x256xf32>
    %191 = vector.shape_cast %190 : vector<4x1x256xf32> to vector<4x256xf32>
    %192 = arith.select %27, %189, %191 : vector<4x256xi1>, vector<4x256xf32>
    %193 = arith.truncf %185 : vector<4x64xf32> to vector<4x64xbf16>
    %cst_24 = arith.constant dense<0.000000e+00> : vector<4x256xf32>
    %194 = tpu.matmul %193, %8, %cst_24 {dimension_numbers = #tpu.dot_dimension_numbers<[1], [0], [0], [1], [0, 0, 1, 1], [], []>} : vector<4x64xbf16>, vector<64x256xbf16>, vector<4x256xf32> -> vector<4x256xf32>
    %195 = arith.addf %192, %194 : vector<4x256xf32>
    %196 = arith.negf %195 : vector<4x256xf32>
    %197 = math.exp %196 : vector<4x256xf32>
    %cst_25 = arith.constant 1.000000e+00 : f32
    %198 = vector.broadcast %cst_25 : f32 to vector<4x256xf32>
    %199 = arith.addf %198, %197 : vector<4x256xf32>
    %200 = arith.divf %198, %199 : vector<4x256xf32>
    %201 = math.tanh %195 : vector<4x256xf32>
    %202 = arith.select %29, %200, %201 : vector<4x256xi1>, vector<4x256xf32>
    %203 = vector.extract_strided_slice %202 {offsets = [0, 0], sizes = [4, 64], strides = [1, 1]} : vector<4x256xf32> to vector<4x64xf32>
    %204 = vector.extract_strided_slice %202 {offsets = [0, 64], sizes = [4, 64], strides = [1, 1]} : vector<4x256xf32> to vector<4x64xf32>
    %205 = vector.extract_strided_slice %202 {offsets = [0, 128], sizes = [4, 64], strides = [1, 1]} : vector<4x256xf32> to vector<4x64xf32>
    %206 = vector.extract_strided_slice %202 {offsets = [0, 192], sizes = [4, 64], strides = [1, 1]} : vector<4x256xf32> to vector<4x64xf32>
    %207 = arith.mulf %204, %183 : vector<4x64xf32>
    %208 = arith.mulf %203, %206 : vector<4x64xf32>
    %209 = arith.addf %207, %208 : vector<4x64xf32>
    %210 = math.tanh %209 : vector<4x64xf32>
    %211 = arith.mulf %205, %210 : vector<4x64xf32>
    %212 = vector.extract_strided_slice %211 {offsets = [0, 0], sizes = [4, 32], strides = [1, 1]} : vector<4x64xf32> to vector<4x32xf32>
    %213 = vector.extract_strided_slice %211 {offsets = [0, 32], sizes = [4, 32], strides = [1, 1]} : vector<4x64xf32> to vector<4x32xf32>
    %214 = vector.extract_strided_slice %7 {offsets = [0, 7, 0], sizes = [4, 1, 256], strides = [1, 1, 1]} : vector<4x8x256xf32> to vector<4x1x256xf32>
    %215 = vector.shape_cast %214 : vector<4x1x256xf32> to vector<4x256xf32>
    %216 = vector.extract_strided_slice %7 {offsets = [0, 0, 0], sizes = [4, 1, 256], strides = [1, 1, 1]} : vector<4x8x256xf32> to vector<4x1x256xf32>
    %217 = vector.shape_cast %216 : vector<4x1x256xf32> to vector<4x256xf32>
    %218 = arith.select %27, %215, %217 : vector<4x256xi1>, vector<4x256xf32>
    %219 = arith.truncf %211 : vector<4x64xf32> to vector<4x64xbf16>
    %cst_26 = arith.constant dense<0.000000e+00> : vector<4x256xf32>
    %220 = tpu.matmul %219, %8, %cst_26 {dimension_numbers = #tpu.dot_dimension_numbers<[1], [0], [0], [1], [0, 0, 1, 1], [], []>} : vector<4x64xbf16>, vector<64x256xbf16>, vector<4x256xf32> -> vector<4x256xf32>
    %221 = arith.addf %218, %220 : vector<4x256xf32>
    %222 = arith.negf %221 : vector<4x256xf32>
    %223 = math.exp %222 : vector<4x256xf32>
    %cst_27 = arith.constant 1.000000e+00 : f32
    %224 = vector.broadcast %cst_27 : f32 to vector<4x256xf32>
    %225 = arith.addf %224, %223 : vector<4x256xf32>
    %226 = arith.divf %224, %225 : vector<4x256xf32>
    %227 = math.tanh %221 : vector<4x256xf32>
    %228 = arith.select %29, %226, %227 : vector<4x256xi1>, vector<4x256xf32>
    %229 = vector.extract_strided_slice %228 {offsets = [0, 0], sizes = [4, 64], strides = [1, 1]} : vector<4x256xf32> to vector<4x64xf32>
    %230 = vector.extract_strided_slice %228 {offsets = [0, 64], sizes = [4, 64], strides = [1, 1]} : vector<4x256xf32> to vector<4x64xf32>
    %231 = vector.extract_strided_slice %228 {offsets = [0, 128], sizes = [4, 64], strides = [1, 1]} : vector<4x256xf32> to vector<4x64xf32>
    %232 = vector.extract_strided_slice %228 {offsets = [0, 192], sizes = [4, 64], strides = [1, 1]} : vector<4x256xf32> to vector<4x64xf32>
    %233 = arith.mulf %230, %209 : vector<4x64xf32>
    %234 = arith.mulf %229, %232 : vector<4x64xf32>
    %235 = arith.addf %233, %234 : vector<4x64xf32>
    %236 = math.tanh %235 : vector<4x64xf32>
    %237 = arith.mulf %231, %236 : vector<4x64xf32>
    %238 = vector.extract_strided_slice %237 {offsets = [0, 0], sizes = [4, 32], strides = [1, 1]} : vector<4x64xf32> to vector<4x32xf32>
    %239 = vector.extract_strided_slice %237 {offsets = [0, 32], sizes = [4, 32], strides = [1, 1]} : vector<4x64xf32> to vector<4x32xf32>
    %240 = vector.shape_cast %56 : vector<4x32xf32> to vector<4x1x32xf32>
    %241 = vector.shape_cast %82 : vector<4x32xf32> to vector<4x1x32xf32>
    %242 = vector.shape_cast %108 : vector<4x32xf32> to vector<4x1x32xf32>
    %243 = vector.shape_cast %134 : vector<4x32xf32> to vector<4x1x32xf32>
    %244 = vector.shape_cast %160 : vector<4x32xf32> to vector<4x1x32xf32>
    %245 = vector.shape_cast %186 : vector<4x32xf32> to vector<4x1x32xf32>
    %246 = vector.shape_cast %212 : vector<4x32xf32> to vector<4x1x32xf32>
    %247 = vector.shape_cast %238 : vector<4x32xf32> to vector<4x1x32xf32>
    %248 = tpu.concatenate %240, %241, %242, %243, %244, %245, %246, %247 in 1 : vector<4x1x32xf32>, vector<4x1x32xf32>, vector<4x1x32xf32>, vector<4x1x32xf32>, vector<4x1x32xf32>, vector<4x1x32xf32>, vector<4x1x32xf32>, vector<4x1x32xf32> -> vector<4x8x32xf32>
    %c0_28 = arith.constant 0 : index
    %c0_29 = arith.constant 0 : index
    %c0_30 = arith.constant 0 : index
    %249 = vector.load %arg5[%c0_28, %c0_29, %c0_30] : memref<4x8x32xf32, #tpu.memory_space<vmem>>, vector<4x8x32xf32>
    tpu.vector_store %arg5[%c0_28, %c0_29, %c0_30], %248 {strides = array<i32>} : memref<4x8x32xf32, #tpu.memory_space<vmem>>, vector<4x8x32xf32>,
    %250 = vector.shape_cast %239 : vector<4x32xf32> to vector<4x1x32xf32>
    %251 = vector.shape_cast %213 : vector<4x32xf32> to vector<4x1x32xf32>
    %252 = vector.shape_cast %187 : vector<4x32xf32> to vector<4x1x32xf32>
    %253 = vector.shape_cast %161 : vector<4x32xf32> to vector<4x1x32xf32>
    %254 = vector.shape_cast %135 : vector<4x32xf32> to vector<4x1x32xf32>
    %255 = vector.shape_cast %109 : vector<4x32xf32> to vector<4x1x32xf32>
    %256 = vector.shape_cast %83 : vector<4x32xf32> to vector<4x1x32xf32>
    %257 = vector.shape_cast %57 : vector<4x32xf32> to vector<4x1x32xf32>
    %258 = tpu.concatenate %250, %251, %252, %253, %254, %255, %256, %257 in 1 : vector<4x1x32xf32>, vector<4x1x32xf32>, vector<4x1x32xf32>, vector<4x1x32xf32>, vector<4x1x32xf32>, vector<4x1x32xf32>, vector<4x1x32xf32>, vector<4x1x32xf32> -> vector<4x8x32xf32>
    %c0_31 = arith.constant 0 : index
    %c0_32 = arith.constant 0 : index
    %c0_33 = arith.constant 0 : index
    %259 = vector.load %arg6[%c0_31, %c0_32, %c0_33] : memref<4x8x32xf32, #tpu.memory_space<vmem>>, vector<4x8x32xf32>
    tpu.vector_store %arg6[%c0_31, %c0_32, %c0_33], %258 {strides = array<i32>} : memref<4x8x32xf32, #tpu.memory_space<vmem>>, vector<4x8x32xf32>,
    return
  }
  func.func @transform_0(%arg0: i32) -> (i32, i32) {
    %c0_i32 = arith.constant 0 : i32
    %c0_i32_0 = arith.constant 0 : i32
    return %arg0, %c0_i32 : i32, i32
  }
  func.func @transform_1(%arg0: i32) -> (i32, i32) {
    %c0_i32 = arith.constant 0 : i32
    %c0_i32_0 = arith.constant 0 : i32
    %c0_i32_1 = arith.constant 0 : i32
    return %c0_i32, %c0_i32_0 : i32, i32
  }
  func.func @transform_2(%arg0: i32) -> (i32, i32) {
    %c0_i32 = arith.constant 0 : i32
    %c0_i32_0 = arith.constant 0 : i32
    %c0_i32_1 = arith.constant 0 : i32
    return %c0_i32, %c0_i32_0 : i32, i32
  }
  func.func @transform_3(%arg0: i32) -> (i32, i32) {
    %c0_i32 = arith.constant 0 : i32
    %c0_i32_0 = arith.constant 0 : i32
    %c0_i32_1 = arith.constant 0 : i32
    return %c0_i32, %c0_i32_0 : i32, i32
  }
  func.func @transform_4(%arg0: i32) -> (i32, i32, i32) {
    %c0_i32 = arith.constant 0 : i32
    %c0_i32_0 = arith.constant 0 : i32
    %c0_i32_1 = arith.constant 0 : i32
    return %arg0, %c0_i32, %c0_i32_0 : i32, i32, i32
  }
  func.func @transform_5(%arg0: i32) -> (i32, i32, i32) {
    %c0_i32 = arith.constant 0 : i32
    %c0_i32_0 = arith.constant 0 : i32
    %c0_i32_1 = arith.constant 0 : i32
    return %arg0, %c0_i32, %c0_i32_0 : i32, i32, i32
  }
}

module attributes {stable_mosaic.version = 11 : i64} {
  func.func @agg_ff_kernel(%arg0: memref<32x32xf32, #tpu.memory_space<vmem>>, %arg1: memref<32x256xbf16, #tpu.memory_space<vmem>>, %arg2: memref<64x256xbf16, #tpu.memory_space<vmem>>, %arg3: memref<1x256xf32, #tpu.memory_space<vmem>>, %arg4: memref<64x64xbf16, #tpu.memory_space<vmem>>, %arg5: memref<64x64xbf16, #tpu.memory_space<vmem>>, %arg6: memref<1x64xf32, #tpu.memory_space<vmem>>, %arg7: memref<64x2xbf16, #tpu.memory_space<vmem>>, %arg8: memref<1x2xf32, #tpu.memory_space<vmem>>, %arg9: memref<2x2xf32, #tpu.memory_space<vmem>>) attributes {dimension_semantics = [], scalar_prefetch = 0 : i64, scratch_operands = 0 : i64, tpu.core_type = #tpu.core_type<tc>} {
    %c0 = arith.constant 0 : index
    %c0_0 = arith.constant 0 : index
    %0 = vector.load %arg0[%c0, %c0_0] : memref<32x32xf32, #tpu.memory_space<vmem>>, vector<32x32xf32>
    %1 = arith.truncf %0 : vector<32x32xf32> to vector<32x32xbf16>
    %c0_1 = arith.constant 0 : index
    %c0_2 = arith.constant 0 : index
    %2 = vector.load %arg1[%c0_1, %c0_2] : memref<32x256xbf16, #tpu.memory_space<vmem>>, vector<32x256xbf16>
    %cst = arith.constant dense<0.000000e+00> : vector<32x256xf32>
    %3 = tpu.matmul %1, %2, %cst {dimension_numbers = #tpu.dot_dimension_numbers<[1], [0], [0], [1], [0, 0, 1, 1], [], []>} : vector<32x32xbf16>, vector<32x256xbf16>, vector<32x256xf32> -> vector<32x256xf32>
    %c0_3 = arith.constant 0 : index
    %c0_4 = arith.constant 0 : index
    %4 = vector.load %arg3[%c0_3, %c0_4] : memref<1x256xf32, #tpu.memory_space<vmem>>, vector<1x256xf32>
    %5 = vector.broadcast %4 : vector<1x256xf32> to vector<32x256xf32>
    %6 = arith.addf %3, %5 : vector<32x256xf32>
    %7 = vector.shape_cast %6 : vector<32x256xf32> to vector<4x8x256xf32>
    %c0_5 = arith.constant 0 : index
    %c0_6 = arith.constant 0 : index
    %8 = vector.load %arg2[%c0_5, %c0_6] : memref<64x256xbf16, #tpu.memory_space<vmem>>, vector<64x256xbf16>
    %9 = tpu.iota {dimensions = array<i32: 1>} : vector<4x256xi32>
    %c64_i32 = arith.constant 64 : i32
    %c0_i32 = arith.constant 0 : i32
    %10 = arith.cmpi eq, %c64_i32, %c0_i32 : i32
    %c1_i32 = arith.constant 1 : i32
    %11 = arith.select %10, %c1_i32, %c64_i32 : i32
    %12 = vector.broadcast %11 : i32 to vector<4x256xi32>
    %13 = arith.remsi %9, %12 : vector<4x256xi32>
    %c0_i32_7 = arith.constant 0 : i32
    %14 = vector.broadcast %c0_i32_7 : i32 to vector<4x256xi32>
    %15 = arith.cmpi ne, %13, %14 : vector<4x256xi32>
    %c0_i32_8 = arith.constant 0 : i32
    %16 = vector.broadcast %c0_i32_8 : i32 to vector<4x256xi32>
    %17 = arith.cmpi slt, %13, %16 : vector<4x256xi32>
    %c0_i32_9 = arith.constant 0 : i32
    %18 = arith.cmpi slt, %11, %c0_i32_9 : i32
    %19 = vector.broadcast %18 : i1 to vector<4x256xi1>
    %20 = vector.broadcast %19 : vector<4x256xi1> to vector<4x256xi1>
    %21 = arith.xori %17, %20 : vector<4x256xi1>
    %22 = arith.andi %21, %15 : vector<4x256xi1>
    %23 = vector.broadcast %11 : i32 to vector<4x256xi32>
    %24 = arith.addi %13, %23 : vector<4x256xi32>
    %25 = arith.select %22, %24, %13 : vector<4x256xi1>, vector<4x256xi32>
    %c32_i32 = arith.constant 32 : i32
    %26 = vector.broadcast %c32_i32 : i32 to vector<4x256xi32>
    %27 = arith.cmpi slt, %25, %26 : vector<4x256xi32>
    %c192_i32 = arith.constant 192 : i32
    %28 = vector.broadcast %c192_i32 : i32 to vector<4x256xi32>
    %29 = arith.cmpi slt, %9, %28 : vector<4x256xi32>
    %cst_10 = arith.constant 0.000000e+00 : f32
    %30 = vector.broadcast %cst_10 : f32 to vector<4x64xf32>
    %cst_11 = arith.constant 0.000000e+00 : f32
    %31 = vector.broadcast %cst_11 : f32 to vector<4x64xf32>
    %32 = vector.extract_strided_slice %7 {offsets = [0, 0, 0], sizes = [4, 1, 256], strides = [1, 1, 1]} : vector<4x8x256xf32> to vector<4x1x256xf32>
    %33 = vector.shape_cast %32 : vector<4x1x256xf32> to vector<4x256xf32>
    %34 = vector.extract_strided_slice %7 {offsets = [0, 7, 0], sizes = [4, 1, 256], strides = [1, 1, 1]} : vector<4x8x256xf32> to vector<4x1x256xf32>
    %35 = vector.shape_cast %34 : vector<4x1x256xf32> to vector<4x256xf32>
    %36 = arith.select %27, %33, %35 : vector<4x256xi1>, vector<4x256xf32>
    %37 = arith.truncf %30 : vector<4x64xf32> to vector<4x64xbf16>
    %cst_12 = arith.constant dense<0.000000e+00> : vector<4x256xf32>
    %38 = tpu.matmul %37, %8, %cst_12 {dimension_numbers = #tpu.dot_dimension_numbers<[1], [0], [0], [1], [0, 0, 1, 1], [], []>} : vector<4x64xbf16>, vector<64x256xbf16>, vector<4x256xf32> -> vector<4x256xf32>
    %39 = arith.addf %36, %38 : vector<4x256xf32>
    %40 = arith.negf %39 : vector<4x256xf32>
    %41 = math.exp %40 : vector<4x256xf32>
    %cst_13 = arith.constant 1.000000e+00 : f32
    %42 = vector.broadcast %cst_13 : f32 to vector<4x256xf32>
    %43 = arith.addf %42, %41 : vector<4x256xf32>
    %44 = arith.divf %42, %43 : vector<4x256xf32>
    %45 = math.tanh %39 : vector<4x256xf32>
    %46 = arith.select %29, %44, %45 : vector<4x256xi1>, vector<4x256xf32>
    %47 = vector.extract_strided_slice %46 {offsets = [0, 0], sizes = [4, 64], strides = [1, 1]} : vector<4x256xf32> to vector<4x64xf32>
    %48 = vector.extract_strided_slice %46 {offsets = [0, 64], sizes = [4, 64], strides = [1, 1]} : vector<4x256xf32> to vector<4x64xf32>
    %49 = vector.extract_strided_slice %46 {offsets = [0, 128], sizes = [4, 64], strides = [1, 1]} : vector<4x256xf32> to vector<4x64xf32>
    %50 = vector.extract_strided_slice %46 {offsets = [0, 192], sizes = [4, 64], strides = [1, 1]} : vector<4x256xf32> to vector<4x64xf32>
    %51 = arith.mulf %48, %31 : vector<4x64xf32>
    %52 = arith.mulf %47, %50 : vector<4x64xf32>
    %53 = arith.addf %51, %52 : vector<4x64xf32>
    %54 = math.tanh %53 : vector<4x64xf32>
    %55 = arith.mulf %49, %54 : vector<4x64xf32>
    %56 = vector.extract_strided_slice %7 {offsets = [0, 1, 0], sizes = [4, 1, 256], strides = [1, 1, 1]} : vector<4x8x256xf32> to vector<4x1x256xf32>
    %57 = vector.shape_cast %56 : vector<4x1x256xf32> to vector<4x256xf32>
    %58 = vector.extract_strided_slice %7 {offsets = [0, 6, 0], sizes = [4, 1, 256], strides = [1, 1, 1]} : vector<4x8x256xf32> to vector<4x1x256xf32>
    %59 = vector.shape_cast %58 : vector<4x1x256xf32> to vector<4x256xf32>
    %60 = arith.select %27, %57, %59 : vector<4x256xi1>, vector<4x256xf32>
    %61 = arith.truncf %55 : vector<4x64xf32> to vector<4x64xbf16>
    %cst_14 = arith.constant dense<0.000000e+00> : vector<4x256xf32>
    %62 = tpu.matmul %61, %8, %cst_14 {dimension_numbers = #tpu.dot_dimension_numbers<[1], [0], [0], [1], [0, 0, 1, 1], [], []>} : vector<4x64xbf16>, vector<64x256xbf16>, vector<4x256xf32> -> vector<4x256xf32>
    %63 = arith.addf %60, %62 : vector<4x256xf32>
    %64 = arith.negf %63 : vector<4x256xf32>
    %65 = math.exp %64 : vector<4x256xf32>
    %cst_15 = arith.constant 1.000000e+00 : f32
    %66 = vector.broadcast %cst_15 : f32 to vector<4x256xf32>
    %67 = arith.addf %66, %65 : vector<4x256xf32>
    %68 = arith.divf %66, %67 : vector<4x256xf32>
    %69 = math.tanh %63 : vector<4x256xf32>
    %70 = arith.select %29, %68, %69 : vector<4x256xi1>, vector<4x256xf32>
    %71 = vector.extract_strided_slice %70 {offsets = [0, 0], sizes = [4, 64], strides = [1, 1]} : vector<4x256xf32> to vector<4x64xf32>
    %72 = vector.extract_strided_slice %70 {offsets = [0, 64], sizes = [4, 64], strides = [1, 1]} : vector<4x256xf32> to vector<4x64xf32>
    %73 = vector.extract_strided_slice %70 {offsets = [0, 128], sizes = [4, 64], strides = [1, 1]} : vector<4x256xf32> to vector<4x64xf32>
    %74 = vector.extract_strided_slice %70 {offsets = [0, 192], sizes = [4, 64], strides = [1, 1]} : vector<4x256xf32> to vector<4x64xf32>
    %75 = arith.mulf %72, %53 : vector<4x64xf32>
    %76 = arith.mulf %71, %74 : vector<4x64xf32>
    %77 = arith.addf %75, %76 : vector<4x64xf32>
    %78 = math.tanh %77 : vector<4x64xf32>
    %79 = arith.mulf %73, %78 : vector<4x64xf32>
    %80 = vector.extract_strided_slice %7 {offsets = [0, 2, 0], sizes = [4, 1, 256], strides = [1, 1, 1]} : vector<4x8x256xf32> to vector<4x1x256xf32>
    %81 = vector.shape_cast %80 : vector<4x1x256xf32> to vector<4x256xf32>
    %82 = vector.extract_strided_slice %7 {offsets = [0, 5, 0], sizes = [4, 1, 256], strides = [1, 1, 1]} : vector<4x8x256xf32> to vector<4x1x256xf32>
    %83 = vector.shape_cast %82 : vector<4x1x256xf32> to vector<4x256xf32>
    %84 = arith.select %27, %81, %83 : vector<4x256xi1>, vector<4x256xf32>
    %85 = arith.truncf %79 : vector<4x64xf32> to vector<4x64xbf16>
    %cst_16 = arith.constant dense<0.000000e+00> : vector<4x256xf32>
    %86 = tpu.matmul %85, %8, %cst_16 {dimension_numbers = #tpu.dot_dimension_numbers<[1], [0], [0], [1], [0, 0, 1, 1], [], []>} : vector<4x64xbf16>, vector<64x256xbf16>, vector<4x256xf32> -> vector<4x256xf32>
    %87 = arith.addf %84, %86 : vector<4x256xf32>
    %88 = arith.negf %87 : vector<4x256xf32>
    %89 = math.exp %88 : vector<4x256xf32>
    %cst_17 = arith.constant 1.000000e+00 : f32
    %90 = vector.broadcast %cst_17 : f32 to vector<4x256xf32>
    %91 = arith.addf %90, %89 : vector<4x256xf32>
    %92 = arith.divf %90, %91 : vector<4x256xf32>
    %93 = math.tanh %87 : vector<4x256xf32>
    %94 = arith.select %29, %92, %93 : vector<4x256xi1>, vector<4x256xf32>
    %95 = vector.extract_strided_slice %94 {offsets = [0, 0], sizes = [4, 64], strides = [1, 1]} : vector<4x256xf32> to vector<4x64xf32>
    %96 = vector.extract_strided_slice %94 {offsets = [0, 64], sizes = [4, 64], strides = [1, 1]} : vector<4x256xf32> to vector<4x64xf32>
    %97 = vector.extract_strided_slice %94 {offsets = [0, 128], sizes = [4, 64], strides = [1, 1]} : vector<4x256xf32> to vector<4x64xf32>
    %98 = vector.extract_strided_slice %94 {offsets = [0, 192], sizes = [4, 64], strides = [1, 1]} : vector<4x256xf32> to vector<4x64xf32>
    %99 = arith.mulf %96, %77 : vector<4x64xf32>
    %100 = arith.mulf %95, %98 : vector<4x64xf32>
    %101 = arith.addf %99, %100 : vector<4x64xf32>
    %102 = math.tanh %101 : vector<4x64xf32>
    %103 = arith.mulf %97, %102 : vector<4x64xf32>
    %104 = vector.extract_strided_slice %7 {offsets = [0, 3, 0], sizes = [4, 1, 256], strides = [1, 1, 1]} : vector<4x8x256xf32> to vector<4x1x256xf32>
    %105 = vector.shape_cast %104 : vector<4x1x256xf32> to vector<4x256xf32>
    %106 = vector.extract_strided_slice %7 {offsets = [0, 4, 0], sizes = [4, 1, 256], strides = [1, 1, 1]} : vector<4x8x256xf32> to vector<4x1x256xf32>
    %107 = vector.shape_cast %106 : vector<4x1x256xf32> to vector<4x256xf32>
    %108 = arith.select %27, %105, %107 : vector<4x256xi1>, vector<4x256xf32>
    %109 = arith.truncf %103 : vector<4x64xf32> to vector<4x64xbf16>
    %cst_18 = arith.constant dense<0.000000e+00> : vector<4x256xf32>
    %110 = tpu.matmul %109, %8, %cst_18 {dimension_numbers = #tpu.dot_dimension_numbers<[1], [0], [0], [1], [0, 0, 1, 1], [], []>} : vector<4x64xbf16>, vector<64x256xbf16>, vector<4x256xf32> -> vector<4x256xf32>
    %111 = arith.addf %108, %110 : vector<4x256xf32>
    %112 = arith.negf %111 : vector<4x256xf32>
    %113 = math.exp %112 : vector<4x256xf32>
    %cst_19 = arith.constant 1.000000e+00 : f32
    %114 = vector.broadcast %cst_19 : f32 to vector<4x256xf32>
    %115 = arith.addf %114, %113 : vector<4x256xf32>
    %116 = arith.divf %114, %115 : vector<4x256xf32>
    %117 = math.tanh %111 : vector<4x256xf32>
    %118 = arith.select %29, %116, %117 : vector<4x256xi1>, vector<4x256xf32>
    %119 = vector.extract_strided_slice %118 {offsets = [0, 0], sizes = [4, 64], strides = [1, 1]} : vector<4x256xf32> to vector<4x64xf32>
    %120 = vector.extract_strided_slice %118 {offsets = [0, 64], sizes = [4, 64], strides = [1, 1]} : vector<4x256xf32> to vector<4x64xf32>
    %121 = vector.extract_strided_slice %118 {offsets = [0, 128], sizes = [4, 64], strides = [1, 1]} : vector<4x256xf32> to vector<4x64xf32>
    %122 = vector.extract_strided_slice %118 {offsets = [0, 192], sizes = [4, 64], strides = [1, 1]} : vector<4x256xf32> to vector<4x64xf32>
    %123 = arith.mulf %120, %101 : vector<4x64xf32>
    %124 = arith.mulf %119, %122 : vector<4x64xf32>
    %125 = arith.addf %123, %124 : vector<4x64xf32>
    %126 = math.tanh %125 : vector<4x64xf32>
    %127 = arith.mulf %121, %126 : vector<4x64xf32>
    %128 = vector.extract_strided_slice %7 {offsets = [0, 4, 0], sizes = [4, 1, 256], strides = [1, 1, 1]} : vector<4x8x256xf32> to vector<4x1x256xf32>
    %129 = vector.shape_cast %128 : vector<4x1x256xf32> to vector<4x256xf32>
    %130 = vector.extract_strided_slice %7 {offsets = [0, 3, 0], sizes = [4, 1, 256], strides = [1, 1, 1]} : vector<4x8x256xf32> to vector<4x1x256xf32>
    %131 = vector.shape_cast %130 : vector<4x1x256xf32> to vector<4x256xf32>
    %132 = arith.select %27, %129, %131 : vector<4x256xi1>, vector<4x256xf32>
    %133 = arith.truncf %127 : vector<4x64xf32> to vector<4x64xbf16>
    %cst_20 = arith.constant dense<0.000000e+00> : vector<4x256xf32>
    %134 = tpu.matmul %133, %8, %cst_20 {dimension_numbers = #tpu.dot_dimension_numbers<[1], [0], [0], [1], [0, 0, 1, 1], [], []>} : vector<4x64xbf16>, vector<64x256xbf16>, vector<4x256xf32> -> vector<4x256xf32>
    %135 = arith.addf %132, %134 : vector<4x256xf32>
    %136 = arith.negf %135 : vector<4x256xf32>
    %137 = math.exp %136 : vector<4x256xf32>
    %cst_21 = arith.constant 1.000000e+00 : f32
    %138 = vector.broadcast %cst_21 : f32 to vector<4x256xf32>
    %139 = arith.addf %138, %137 : vector<4x256xf32>
    %140 = arith.divf %138, %139 : vector<4x256xf32>
    %141 = math.tanh %135 : vector<4x256xf32>
    %142 = arith.select %29, %140, %141 : vector<4x256xi1>, vector<4x256xf32>
    %143 = vector.extract_strided_slice %142 {offsets = [0, 0], sizes = [4, 64], strides = [1, 1]} : vector<4x256xf32> to vector<4x64xf32>
    %144 = vector.extract_strided_slice %142 {offsets = [0, 64], sizes = [4, 64], strides = [1, 1]} : vector<4x256xf32> to vector<4x64xf32>
    %145 = vector.extract_strided_slice %142 {offsets = [0, 128], sizes = [4, 64], strides = [1, 1]} : vector<4x256xf32> to vector<4x64xf32>
    %146 = vector.extract_strided_slice %142 {offsets = [0, 192], sizes = [4, 64], strides = [1, 1]} : vector<4x256xf32> to vector<4x64xf32>
    %147 = arith.mulf %144, %125 : vector<4x64xf32>
    %148 = arith.mulf %143, %146 : vector<4x64xf32>
    %149 = arith.addf %147, %148 : vector<4x64xf32>
    %150 = math.tanh %149 : vector<4x64xf32>
    %151 = arith.mulf %145, %150 : vector<4x64xf32>
    %152 = vector.extract_strided_slice %7 {offsets = [0, 5, 0], sizes = [4, 1, 256], strides = [1, 1, 1]} : vector<4x8x256xf32> to vector<4x1x256xf32>
    %153 = vector.shape_cast %152 : vector<4x1x256xf32> to vector<4x256xf32>
    %154 = vector.extract_strided_slice %7 {offsets = [0, 2, 0], sizes = [4, 1, 256], strides = [1, 1, 1]} : vector<4x8x256xf32> to vector<4x1x256xf32>
    %155 = vector.shape_cast %154 : vector<4x1x256xf32> to vector<4x256xf32>
    %156 = arith.select %27, %153, %155 : vector<4x256xi1>, vector<4x256xf32>
    %157 = arith.truncf %151 : vector<4x64xf32> to vector<4x64xbf16>
    %cst_22 = arith.constant dense<0.000000e+00> : vector<4x256xf32>
    %158 = tpu.matmul %157, %8, %cst_22 {dimension_numbers = #tpu.dot_dimension_numbers<[1], [0], [0], [1], [0, 0, 1, 1], [], []>} : vector<4x64xbf16>, vector<64x256xbf16>, vector<4x256xf32> -> vector<4x256xf32>
    %159 = arith.addf %156, %158 : vector<4x256xf32>
    %160 = arith.negf %159 : vector<4x256xf32>
    %161 = math.exp %160 : vector<4x256xf32>
    %cst_23 = arith.constant 1.000000e+00 : f32
    %162 = vector.broadcast %cst_23 : f32 to vector<4x256xf32>
    %163 = arith.addf %162, %161 : vector<4x256xf32>
    %164 = arith.divf %162, %163 : vector<4x256xf32>
    %165 = math.tanh %159 : vector<4x256xf32>
    %166 = arith.select %29, %164, %165 : vector<4x256xi1>, vector<4x256xf32>
    %167 = vector.extract_strided_slice %166 {offsets = [0, 0], sizes = [4, 64], strides = [1, 1]} : vector<4x256xf32> to vector<4x64xf32>
    %168 = vector.extract_strided_slice %166 {offsets = [0, 64], sizes = [4, 64], strides = [1, 1]} : vector<4x256xf32> to vector<4x64xf32>
    %169 = vector.extract_strided_slice %166 {offsets = [0, 128], sizes = [4, 64], strides = [1, 1]} : vector<4x256xf32> to vector<4x64xf32>
    %170 = vector.extract_strided_slice %166 {offsets = [0, 192], sizes = [4, 64], strides = [1, 1]} : vector<4x256xf32> to vector<4x64xf32>
    %171 = arith.mulf %168, %149 : vector<4x64xf32>
    %172 = arith.mulf %167, %170 : vector<4x64xf32>
    %173 = arith.addf %171, %172 : vector<4x64xf32>
    %174 = math.tanh %173 : vector<4x64xf32>
    %175 = arith.mulf %169, %174 : vector<4x64xf32>
    %176 = vector.extract_strided_slice %7 {offsets = [0, 6, 0], sizes = [4, 1, 256], strides = [1, 1, 1]} : vector<4x8x256xf32> to vector<4x1x256xf32>
    %177 = vector.shape_cast %176 : vector<4x1x256xf32> to vector<4x256xf32>
    %178 = vector.extract_strided_slice %7 {offsets = [0, 1, 0], sizes = [4, 1, 256], strides = [1, 1, 1]} : vector<4x8x256xf32> to vector<4x1x256xf32>
    %179 = vector.shape_cast %178 : vector<4x1x256xf32> to vector<4x256xf32>
    %180 = arith.select %27, %177, %179 : vector<4x256xi1>, vector<4x256xf32>
    %181 = arith.truncf %175 : vector<4x64xf32> to vector<4x64xbf16>
    %cst_24 = arith.constant dense<0.000000e+00> : vector<4x256xf32>
    %182 = tpu.matmul %181, %8, %cst_24 {dimension_numbers = #tpu.dot_dimension_numbers<[1], [0], [0], [1], [0, 0, 1, 1], [], []>} : vector<4x64xbf16>, vector<64x256xbf16>, vector<4x256xf32> -> vector<4x256xf32>
    %183 = arith.addf %180, %182 : vector<4x256xf32>
    %184 = arith.negf %183 : vector<4x256xf32>
    %185 = math.exp %184 : vector<4x256xf32>
    %cst_25 = arith.constant 1.000000e+00 : f32
    %186 = vector.broadcast %cst_25 : f32 to vector<4x256xf32>
    %187 = arith.addf %186, %185 : vector<4x256xf32>
    %188 = arith.divf %186, %187 : vector<4x256xf32>
    %189 = math.tanh %183 : vector<4x256xf32>
    %190 = arith.select %29, %188, %189 : vector<4x256xi1>, vector<4x256xf32>
    %191 = vector.extract_strided_slice %190 {offsets = [0, 0], sizes = [4, 64], strides = [1, 1]} : vector<4x256xf32> to vector<4x64xf32>
    %192 = vector.extract_strided_slice %190 {offsets = [0, 64], sizes = [4, 64], strides = [1, 1]} : vector<4x256xf32> to vector<4x64xf32>
    %193 = vector.extract_strided_slice %190 {offsets = [0, 128], sizes = [4, 64], strides = [1, 1]} : vector<4x256xf32> to vector<4x64xf32>
    %194 = vector.extract_strided_slice %190 {offsets = [0, 192], sizes = [4, 64], strides = [1, 1]} : vector<4x256xf32> to vector<4x64xf32>
    %195 = arith.mulf %192, %173 : vector<4x64xf32>
    %196 = arith.mulf %191, %194 : vector<4x64xf32>
    %197 = arith.addf %195, %196 : vector<4x64xf32>
    %198 = math.tanh %197 : vector<4x64xf32>
    %199 = arith.mulf %193, %198 : vector<4x64xf32>
    %200 = vector.extract_strided_slice %7 {offsets = [0, 7, 0], sizes = [4, 1, 256], strides = [1, 1, 1]} : vector<4x8x256xf32> to vector<4x1x256xf32>
    %201 = vector.shape_cast %200 : vector<4x1x256xf32> to vector<4x256xf32>
    %202 = vector.extract_strided_slice %7 {offsets = [0, 0, 0], sizes = [4, 1, 256], strides = [1, 1, 1]} : vector<4x8x256xf32> to vector<4x1x256xf32>
    %203 = vector.shape_cast %202 : vector<4x1x256xf32> to vector<4x256xf32>
    %204 = arith.select %27, %201, %203 : vector<4x256xi1>, vector<4x256xf32>
    %205 = arith.truncf %199 : vector<4x64xf32> to vector<4x64xbf16>
    %cst_26 = arith.constant dense<0.000000e+00> : vector<4x256xf32>
    %206 = tpu.matmul %205, %8, %cst_26 {dimension_numbers = #tpu.dot_dimension_numbers<[1], [0], [0], [1], [0, 0, 1, 1], [], []>} : vector<4x64xbf16>, vector<64x256xbf16>, vector<4x256xf32> -> vector<4x256xf32>
    %207 = arith.addf %204, %206 : vector<4x256xf32>
    %208 = arith.negf %207 : vector<4x256xf32>
    %209 = math.exp %208 : vector<4x256xf32>
    %cst_27 = arith.constant 1.000000e+00 : f32
    %210 = vector.broadcast %cst_27 : f32 to vector<4x256xf32>
    %211 = arith.addf %210, %209 : vector<4x256xf32>
    %212 = arith.divf %210, %211 : vector<4x256xf32>
    %213 = math.tanh %207 : vector<4x256xf32>
    %214 = arith.select %29, %212, %213 : vector<4x256xi1>, vector<4x256xf32>
    %215 = vector.extract_strided_slice %214 {offsets = [0, 0], sizes = [4, 64], strides = [1, 1]} : vector<4x256xf32> to vector<4x64xf32>
    %216 = vector.extract_strided_slice %214 {offsets = [0, 64], sizes = [4, 64], strides = [1, 1]} : vector<4x256xf32> to vector<4x64xf32>
    %217 = vector.extract_strided_slice %214 {offsets = [0, 128], sizes = [4, 64], strides = [1, 1]} : vector<4x256xf32> to vector<4x64xf32>
    %218 = vector.extract_strided_slice %214 {offsets = [0, 192], sizes = [4, 64], strides = [1, 1]} : vector<4x256xf32> to vector<4x64xf32>
    %219 = arith.mulf %216, %197 : vector<4x64xf32>
    %220 = arith.mulf %215, %218 : vector<4x64xf32>
    %221 = arith.addf %219, %220 : vector<4x64xf32>
    %222 = math.tanh %221 : vector<4x64xf32>
    %223 = arith.mulf %217, %222 : vector<4x64xf32>
    %224 = vector.extract_strided_slice %223 {offsets = [0, 0], sizes = [2, 64], strides = [1, 1]} : vector<4x64xf32> to vector<2x64xf32>
    %225 = arith.truncf %224 : vector<2x64xf32> to vector<2x64xbf16>
    %226 = vector.extract_strided_slice %223 {offsets = [2, 0], sizes = [2, 64], strides = [1, 1]} : vector<4x64xf32> to vector<2x64xf32>
    %227 = arith.truncf %226 : vector<2x64xf32> to vector<2x64xbf16>
    %c0_28 = arith.constant 0 : index
    %c0_29 = arith.constant 0 : index
    %228 = vector.load %arg4[%c0_28, %c0_29] : memref<64x64xbf16, #tpu.memory_space<vmem>>, vector<64x64xbf16>
    %cst_30 = arith.constant dense<0.000000e+00> : vector<2x64xf32>
    %229 = tpu.matmul %225, %228, %cst_30 {dimension_numbers = #tpu.dot_dimension_numbers<[1], [0], [0], [1], [0, 0, 1, 1], [], []>} : vector<2x64xbf16>, vector<64x64xbf16>, vector<2x64xf32> -> vector<2x64xf32>
    %c0_31 = arith.constant 0 : index
    %c0_32 = arith.constant 0 : index
    %230 = vector.load %arg5[%c0_31, %c0_32] : memref<64x64xbf16, #tpu.memory_space<vmem>>, vector<64x64xbf16>
    %cst_33 = arith.constant dense<0.000000e+00> : vector<2x64xf32>
    %231 = tpu.matmul %227, %230, %cst_33 {dimension_numbers = #tpu.dot_dimension_numbers<[1], [0], [0], [1], [0, 0, 1, 1], [], []>} : vector<2x64xbf16>, vector<64x64xbf16>, vector<2x64xf32> -> vector<2x64xf32>
    %232 = arith.addf %229, %231 : vector<2x64xf32>
    %c0_34 = arith.constant 0 : index
    %c0_35 = arith.constant 0 : index
    %233 = vector.load %arg6[%c0_34, %c0_35] : memref<1x64xf32, #tpu.memory_space<vmem>>, vector<1x64xf32>
    %234 = vector.broadcast %233 : vector<1x64xf32> to vector<2x64xf32>
    %235 = arith.addf %232, %234 : vector<2x64xf32>
    %236 = math.tanh %235 : vector<2x64xf32>
    %237 = arith.truncf %236 : vector<2x64xf32> to vector<2x64xbf16>
    %c0_36 = arith.constant 0 : index
    %c0_37 = arith.constant 0 : index
    %238 = vector.load %arg7[%c0_36, %c0_37] : memref<64x2xbf16, #tpu.memory_space<vmem>>, vector<64x2xbf16>
    %cst_38 = arith.constant dense<0.000000e+00> : vector<2x2xf32>
    %239 = tpu.matmul %237, %238, %cst_38 {dimension_numbers = #tpu.dot_dimension_numbers<[1], [0], [0], [1], [0, 0, 1, 1], [], []>} : vector<2x64xbf16>, vector<64x2xbf16>, vector<2x2xf32> -> vector<2x2xf32>
    %c0_39 = arith.constant 0 : index
    %c0_40 = arith.constant 0 : index
    %240 = vector.load %arg8[%c0_39, %c0_40] : memref<1x2xf32, #tpu.memory_space<vmem>>, vector<1x2xf32>
    %241 = vector.broadcast %240 : vector<1x2xf32> to vector<2x2xf32>
    %242 = arith.addf %239, %241 : vector<2x2xf32>
    %c0_41 = arith.constant 0 : index
    %c0_42 = arith.constant 0 : index
    %243 = vector.load %arg9[%c0_41, %c0_42] : memref<2x2xf32, #tpu.memory_space<vmem>>, vector<2x2xf32>
    tpu.vector_store %arg9[%c0_41, %c0_42], %242 {strides = array<i32>} : memref<2x2xf32, #tpu.memory_space<vmem>>, vector<2x2xf32>,
    return
  }
}

module attributes {stable_mosaic.version = 11 : i64} {
  func.func @matching_kernel(%arg0: i32, %arg1: memref<2x8x32xf32, #tpu.memory_space<vmem>>, %arg2: memref<2x8x32xf32, #tpu.memory_space<vmem>>, %arg3: memref<2x8x32xf32, #tpu.memory_space<vmem>>, %arg4: memref<2x8x32xf32, #tpu.memory_space<vmem>>, %arg5: memref<4x32xf32, #tpu.memory_space<vmem>>, %arg6: memref<4x32xf32, #tpu.memory_space<vmem>>, %arg7: memref<4x32xf32, #tpu.memory_space<vmem>>, %arg8: memref<4x32xf32, #tpu.memory_space<vmem>>, %arg9: memref<4x32xf32, #tpu.memory_space<vmem>>, %arg10: memref<4x32xf32, #tpu.memory_space<vmem>>, %arg11: memref<4x32xf32, #tpu.memory_space<vmem>>, %arg12: memref<4x32xf32, #tpu.memory_space<vmem>>, %arg13: memref<2x2x8x32xf32, #tpu.memory_space<vmem>>) attributes {dimension_semantics = [#tpu.dimension_semantics<parallel>], iteration_bounds = array<i64: 1>, scalar_prefetch = 0 : i64, scratch_operands = 0 : i64, tpu.core_type = #tpu.core_type<tc>, window_params = [{transform_indices = @transform_0, window_bounds = array<i64: 2, 8, 32>}, {transform_indices = @transform_1, window_bounds = array<i64: 2, 8, 32>}, {transform_indices = @transform_2, window_bounds = array<i64: 2, 8, 32>}, {transform_indices = @transform_3, window_bounds = array<i64: 2, 8, 32>}, {pipeline_mode = #tpu.pipeline_mode<synchronous>, transform_indices = @transform_4, window_bounds = array<i64: 4, 32>}, {pipeline_mode = #tpu.pipeline_mode<synchronous>, transform_indices = @transform_5, window_bounds = array<i64: 4, 32>}, {pipeline_mode = #tpu.pipeline_mode<synchronous>, transform_indices = @transform_6, window_bounds = array<i64: 4, 32>}, {pipeline_mode = #tpu.pipeline_mode<synchronous>, transform_indices = @transform_7, window_bounds = array<i64: 4, 32>}, {pipeline_mode = #tpu.pipeline_mode<synchronous>, transform_indices = @transform_8, window_bounds = array<i64: 4, 32>}, {pipeline_mode = #tpu.pipeline_mode<synchronous>, transform_indices = @transform_9, window_bounds = array<i64: 4, 32>}, {pipeline_mode = #tpu.pipeline_mode<synchronous>, transform_indices = @transform_10, window_bounds = array<i64: 4, 32>}, {pipeline_mode = #tpu.pipeline_mode<synchronous>, transform_indices = @transform_11, window_bounds = array<i64: 4, 32>}, {transform_indices = @transform_12, window_bounds = array<i64: 2, 2, 8, 32>}]} {
    %c0 = arith.constant 0 : index
    %c0_0 = arith.constant 0 : index
    %0 = vector.load %arg5[%c0, %c0_0] : memref<4x32xf32, #tpu.memory_space<vmem>>, vector<4x32xf32>
    %c0_1 = arith.constant 0 : index
    %c0_2 = arith.constant 0 : index
    %1 = vector.load %arg5[%c0_1, %c0_2] : memref<4x32xf32, #tpu.memory_space<vmem>>, vector<4x32xf32>
    %2 = arith.mulf %0, %1 : vector<4x32xf32>
    %c0_3 = arith.constant 0 : index
    %c0_4 = arith.constant 0 : index
    %3 = vector.load %arg6[%c0_3, %c0_4] : memref<4x32xf32, #tpu.memory_space<vmem>>, vector<4x32xf32>
    %c0_5 = arith.constant 0 : index
    %c0_6 = arith.constant 0 : index
    %4 = vector.load %arg6[%c0_5, %c0_6] : memref<4x32xf32, #tpu.memory_space<vmem>>, vector<4x32xf32>
    %5 = arith.mulf %3, %4 : vector<4x32xf32>
    %c0_7 = arith.constant 0 : index
    %c0_8 = arith.constant 0 : index
    %6 = vector.load %arg7[%c0_7, %c0_8] : memref<4x32xf32, #tpu.memory_space<vmem>>, vector<4x32xf32>
    %c0_9 = arith.constant 0 : index
    %c0_10 = arith.constant 0 : index
    %7 = vector.load %arg7[%c0_9, %c0_10] : memref<4x32xf32, #tpu.memory_space<vmem>>, vector<4x32xf32>
    %8 = arith.mulf %6, %7 : vector<4x32xf32>
    %c0_11 = arith.constant 0 : index
    %c0_12 = arith.constant 0 : index
    %9 = vector.load %arg8[%c0_11, %c0_12] : memref<4x32xf32, #tpu.memory_space<vmem>>, vector<4x32xf32>
    %c0_13 = arith.constant 0 : index
    %c0_14 = arith.constant 0 : index
    %10 = vector.load %arg8[%c0_13, %c0_14] : memref<4x32xf32, #tpu.memory_space<vmem>>, vector<4x32xf32>
    %11 = arith.mulf %9, %10 : vector<4x32xf32>
    %c0_15 = arith.constant 0 : index
    %c0_16 = arith.constant 0 : index
    %12 = vector.load %arg9[%c0_15, %c0_16] : memref<4x32xf32, #tpu.memory_space<vmem>>, vector<4x32xf32>
    %c0_17 = arith.constant 0 : index
    %c0_18 = arith.constant 0 : index
    %13 = vector.load %arg9[%c0_17, %c0_18] : memref<4x32xf32, #tpu.memory_space<vmem>>, vector<4x32xf32>
    %14 = arith.mulf %12, %13 : vector<4x32xf32>
    %c0_19 = arith.constant 0 : index
    %c0_20 = arith.constant 0 : index
    %15 = vector.load %arg10[%c0_19, %c0_20] : memref<4x32xf32, #tpu.memory_space<vmem>>, vector<4x32xf32>
    %c0_21 = arith.constant 0 : index
    %c0_22 = arith.constant 0 : index
    %16 = vector.load %arg10[%c0_21, %c0_22] : memref<4x32xf32, #tpu.memory_space<vmem>>, vector<4x32xf32>
    %17 = arith.mulf %15, %16 : vector<4x32xf32>
    %c0_23 = arith.constant 0 : index
    %c0_24 = arith.constant 0 : index
    %18 = vector.load %arg11[%c0_23, %c0_24] : memref<4x32xf32, #tpu.memory_space<vmem>>, vector<4x32xf32>
    %c0_25 = arith.constant 0 : index
    %c0_26 = arith.constant 0 : index
    %19 = vector.load %arg11[%c0_25, %c0_26] : memref<4x32xf32, #tpu.memory_space<vmem>>, vector<4x32xf32>
    %20 = arith.mulf %18, %19 : vector<4x32xf32>
    %c0_27 = arith.constant 0 : index
    %c0_28 = arith.constant 0 : index
    %21 = vector.load %arg12[%c0_27, %c0_28] : memref<4x32xf32, #tpu.memory_space<vmem>>, vector<4x32xf32>
    %c0_29 = arith.constant 0 : index
    %c0_30 = arith.constant 0 : index
    %22 = vector.load %arg12[%c0_29, %c0_30] : memref<4x32xf32, #tpu.memory_space<vmem>>, vector<4x32xf32>
    %23 = arith.mulf %21, %22 : vector<4x32xf32>
    %c0_31 = arith.constant 0 : index
    %c0_32 = arith.constant 0 : index
    %c0_33 = arith.constant 0 : index
    %24 = vector.load %arg1[%c0_31, %c0_32, %c0_33] : memref<2x8x32xf32, #tpu.memory_space<vmem>>, vector<1x8x32xf32>
    %25 = vector.shape_cast %24 : vector<1x8x32xf32> to vector<8x32xf32>
    %c0_34 = arith.constant 0 : index
    %c0_35 = arith.constant 0 : index
    %c0_36 = arith.constant 0 : index
    %26 = vector.load %arg2[%c0_34, %c0_35, %c0_36] : memref<2x8x32xf32, #tpu.memory_space<vmem>>, vector<1x8x32xf32>
    %27 = vector.shape_cast %26 : vector<1x8x32xf32> to vector<8x32xf32>
    %c0_37 = arith.constant 0 : index
    %c0_38 = arith.constant 0 : index
    %c0_39 = arith.constant 0 : index
    %28 = vector.load %arg3[%c0_37, %c0_38, %c0_39] : memref<2x8x32xf32, #tpu.memory_space<vmem>>, vector<1x8x32xf32>
    %29 = vector.shape_cast %28 : vector<1x8x32xf32> to vector<8x32xf32>
    %c0_40 = arith.constant 0 : index
    %c0_41 = arith.constant 0 : index
    %c0_42 = arith.constant 0 : index
    %30 = vector.load %arg4[%c0_40, %c0_41, %c0_42] : memref<2x8x32xf32, #tpu.memory_space<vmem>>, vector<1x8x32xf32>
    %31 = vector.shape_cast %30 : vector<1x8x32xf32> to vector<8x32xf32>
    %32 = vector.extract_strided_slice %25 {offsets = [7, 0], sizes = [1, 32], strides = [1, 1]} : vector<8x32xf32> to vector<1x32xf32>
    %33 = vector.extract_strided_slice %27 {offsets = [7, 0], sizes = [1, 32], strides = [1, 1]} : vector<8x32xf32> to vector<1x32xf32>
    %34 = vector.extract_strided_slice %29 {offsets = [7, 0], sizes = [1, 32], strides = [1, 1]} : vector<8x32xf32> to vector<1x32xf32>
    %35 = vector.extract_strided_slice %31 {offsets = [7, 0], sizes = [1, 32], strides = [1, 1]} : vector<8x32xf32> to vector<1x32xf32>
    %36 = vector.broadcast %34 : vector<1x32xf32> to vector<4x32xf32>
    %37 = arith.mulf %2, %36 : vector<4x32xf32>
    %cst = arith.constant dense<0.000000e+00> : vector<8x4xf32>
    %38 = tpu.matmul %25, %37, %cst {dimension_numbers = #tpu.dot_dimension_numbers<[1], [1], [0], [0], [0, 0, 1, 0], [], []>} : vector<8x32xf32>, vector<4x32xf32>, vector<8x4xf32> -> vector<8x4xf32>
    %39 = arith.mulf %25, %25 : vector<8x32xf32>
    %cst_43 = arith.constant dense<0.000000e+00> : vector<8x4xf32>
    %40 = tpu.matmul %39, %2, %cst_43 {dimension_numbers = #tpu.dot_dimension_numbers<[1], [1], [0], [0], [0, 0, 1, 0], [], []>} : vector<8x32xf32>, vector<4x32xf32>, vector<8x4xf32> -> vector<8x4xf32>
    %41 = arith.mulf %34, %34 : vector<1x32xf32>
    %cst_44 = arith.constant dense<0.000000e+00> : vector<1x4xf32>
    %42 = tpu.matmul %41, %2, %cst_44 {dimension_numbers = #tpu.dot_dimension_numbers<[1], [1], [0], [0], [0, 0, 1, 0], [], []>} : vector<1x32xf32>, vector<4x32xf32>, vector<1x4xf32> -> vector<1x4xf32>
    %cst_45 = arith.constant 1.000000e-16 : f32
    %43 = vector.broadcast %cst_45 : f32 to vector<8x4xf32>
    %44 = arith.maximumf %40, %43 : vector<8x4xf32>
    %45 = math.rsqrt %44 : vector<8x4xf32>
    %46 = arith.mulf %38, %45 : vector<8x4xf32>
    %cst_46 = arith.constant 1.000000e-16 : f32
    %47 = vector.broadcast %cst_46 : f32 to vector<1x4xf32>
    %48 = arith.maximumf %42, %47 : vector<1x4xf32>
    %49 = math.rsqrt %48 : vector<1x4xf32>
    %50 = vector.broadcast %49 : vector<1x4xf32> to vector<8x4xf32>
    %51 = arith.mulf %46, %50 : vector<8x4xf32>
    %c0_47 = arith.constant 0 : index
    %c0_48 = arith.constant 0 : index
    %c0_49 = arith.constant 0 : index
    %c0_50 = arith.constant 0 : index
    %52 = vector.load %arg13[%c0_47, %c0_48, %c0_49, %c0_50] : memref<2x2x8x32xf32, #tpu.memory_space<vmem>>, vector<1x1x8x4xf32>
    %53 = vector.shape_cast %52 : vector<1x1x8x4xf32> to vector<8x4xf32>
    %54 = vector.shape_cast %51 : vector<8x4xf32> to vector<1x1x8x4xf32>
    tpu.vector_store %arg13[%c0_47, %c0_48, %c0_49, %c0_50], %54 {strides = array<i32>} : memref<2x2x8x32xf32, #tpu.memory_space<vmem>>, vector<1x1x8x4xf32>,
    %55 = vector.broadcast %35 : vector<1x32xf32> to vector<4x32xf32>
    %56 = arith.mulf %5, %55 : vector<4x32xf32>
    %cst_51 = arith.constant dense<0.000000e+00> : vector<8x4xf32>
    %57 = tpu.matmul %27, %56, %cst_51 {dimension_numbers = #tpu.dot_dimension_numbers<[1], [1], [0], [0], [0, 0, 1, 0], [], []>} : vector<8x32xf32>, vector<4x32xf32>, vector<8x4xf32> -> vector<8x4xf32>
    %58 = arith.mulf %27, %27 : vector<8x32xf32>
    %cst_52 = arith.constant dense<0.000000e+00> : vector<8x4xf32>
    %59 = tpu.matmul %58, %5, %cst_52 {dimension_numbers = #tpu.dot_dimension_numbers<[1], [1], [0], [0], [0, 0, 1, 0], [], []>} : vector<8x32xf32>, vector<4x32xf32>, vector<8x4xf32> -> vector<8x4xf32>
    %60 = arith.mulf %35, %35 : vector<1x32xf32>
    %cst_53 = arith.constant dense<0.000000e+00> : vector<1x4xf32>
    %61 = tpu.matmul %60, %5, %cst_53 {dimension_numbers = #tpu.dot_dimension_numbers<[1], [1], [0], [0], [0, 0, 1, 0], [], []>} : vector<1x32xf32>, vector<4x32xf32>, vector<1x4xf32> -> vector<1x4xf32>
    %cst_54 = arith.constant 1.000000e-16 : f32
    %62 = vector.broadcast %cst_54 : f32 to vector<8x4xf32>
    %63 = arith.maximumf %59, %62 : vector<8x4xf32>
    %64 = math.rsqrt %63 : vector<8x4xf32>
    %65 = arith.mulf %57, %64 : vector<8x4xf32>
    %cst_55 = arith.constant 1.000000e-16 : f32
    %66 = vector.broadcast %cst_55 : f32 to vector<1x4xf32>
    %67 = arith.maximumf %61, %66 : vector<1x4xf32>
    %68 = math.rsqrt %67 : vector<1x4xf32>
    %69 = vector.broadcast %68 : vector<1x4xf32> to vector<8x4xf32>
    %70 = arith.mulf %65, %69 : vector<8x4xf32>
    %c0_56 = arith.constant 0 : index
    %c0_57 = arith.constant 0 : index
    %c0_58 = arith.constant 0 : index
    %c4 = arith.constant 4 : index
    %71 = vector.load %arg13[%c0_56, %c0_57, %c0_58, %c4] : memref<2x2x8x32xf32, #tpu.memory_space<vmem>>, vector<1x1x8x4xf32>
    %72 = vector.shape_cast %71 : vector<1x1x8x4xf32> to vector<8x4xf32>
    %73 = vector.shape_cast %70 : vector<8x4xf32> to vector<1x1x8x4xf32>
    tpu.vector_store %arg13[%c0_56, %c0_57, %c0_58, %c4], %73 {strides = array<i32>} : memref<2x2x8x32xf32, #tpu.memory_space<vmem>>, vector<1x1x8x4xf32>,
    %74 = vector.broadcast %32 : vector<1x32xf32> to vector<4x32xf32>
    %75 = arith.mulf %2, %74 : vector<4x32xf32>
    %cst_59 = arith.constant dense<0.000000e+00> : vector<8x4xf32>
    %76 = tpu.matmul %29, %75, %cst_59 {dimension_numbers = #tpu.dot_dimension_numbers<[1], [1], [0], [0], [0, 0, 1, 0], [], []>} : vector<8x32xf32>, vector<4x32xf32>, vector<8x4xf32> -> vector<8x4xf32>
    %77 = arith.mulf %29, %29 : vector<8x32xf32>
    %cst_60 = arith.constant dense<0.000000e+00> : vector<8x4xf32>
    %78 = tpu.matmul %77, %2, %cst_60 {dimension_numbers = #tpu.dot_dimension_numbers<[1], [1], [0], [0], [0, 0, 1, 0], [], []>} : vector<8x32xf32>, vector<4x32xf32>, vector<8x4xf32> -> vector<8x4xf32>
    %79 = arith.mulf %32, %32 : vector<1x32xf32>
    %cst_61 = arith.constant dense<0.000000e+00> : vector<1x4xf32>
    %80 = tpu.matmul %79, %2, %cst_61 {dimension_numbers = #tpu.dot_dimension_numbers<[1], [1], [0], [0], [0, 0, 1, 0], [], []>} : vector<1x32xf32>, vector<4x32xf32>, vector<1x4xf32> -> vector<1x4xf32>
    %cst_62 = arith.constant 1.000000e-16 : f32
    %81 = vector.broadcast %cst_62 : f32 to vector<8x4xf32>
    %82 = arith.maximumf %78, %81 : vector<8x4xf32>
    %83 = math.rsqrt %82 : vector<8x4xf32>
    %84 = arith.mulf %76, %83 : vector<8x4xf32>
    %cst_63 = arith.constant 1.000000e-16 : f32
    %85 = vector.broadcast %cst_63 : f32 to vector<1x4xf32>
    %86 = arith.maximumf %80, %85 : vector<1x4xf32>
    %87 = math.rsqrt %86 : vector<1x4xf32>
    %88 = vector.broadcast %87 : vector<1x4xf32> to vector<8x4xf32>
    %89 = arith.mulf %84, %88 : vector<8x4xf32>
    %c1 = arith.constant 1 : index
    %c0_64 = arith.constant 0 : index
    %c0_65 = arith.constant 0 : index
    %c0_66 = arith.constant 0 : index
    %90 = vector.load %arg13[%c1, %c0_64, %c0_65, %c0_66] : memref<2x2x8x32xf32, #tpu.memory_space<vmem>>, vector<1x1x8x4xf32>
    %91 = vector.shape_cast %90 : vector<1x1x8x4xf32> to vector<8x4xf32>
    %92 = vector.shape_cast %89 : vector<8x4xf32> to vector<1x1x8x4xf32>
    tpu.vector_store %arg13[%c1, %c0_64, %c0_65, %c0_66], %92 {strides = array<i32>} : memref<2x2x8x32xf32, #tpu.memory_space<vmem>>, vector<1x1x8x4xf32>,
    %93 = vector.broadcast %33 : vector<1x32xf32> to vector<4x32xf32>
    %94 = arith.mulf %5, %93 : vector<4x32xf32>
    %cst_67 = arith.constant dense<0.000000e+00> : vector<8x4xf32>
    %95 = tpu.matmul %31, %94, %cst_67 {dimension_numbers = #tpu.dot_dimension_numbers<[1], [1], [0], [0], [0, 0, 1, 0], [], []>} : vector<8x32xf32>, vector<4x32xf32>, vector<8x4xf32> -> vector<8x4xf32>
    %96 = arith.mulf %31, %31 : vector<8x32xf32>
    %cst_68 = arith.constant dense<0.000000e+00> : vector<8x4xf32>
    %97 = tpu.matmul %96, %5, %cst_68 {dimension_numbers = #tpu.dot_dimension_numbers<[1], [1], [0], [0], [0, 0, 1, 0], [], []>} : vector<8x32xf32>, vector<4x32xf32>, vector<8x4xf32> -> vector<8x4xf32>
    %98 = arith.mulf %33, %33 : vector<1x32xf32>
    %cst_69 = arith.constant dense<0.000000e+00> : vector<1x4xf32>
    %99 = tpu.matmul %98, %5, %cst_69 {dimension_numbers = #tpu.dot_dimension_numbers<[1], [1], [0], [0], [0, 0, 1, 0], [], []>} : vector<1x32xf32>, vector<4x32xf32>, vector<1x4xf32> -> vector<1x4xf32>
    %cst_70 = arith.constant 1.000000e-16 : f32
    %100 = vector.broadcast %cst_70 : f32 to vector<8x4xf32>
    %101 = arith.maximumf %97, %100 : vector<8x4xf32>
    %102 = math.rsqrt %101 : vector<8x4xf32>
    %103 = arith.mulf %95, %102 : vector<8x4xf32>
    %cst_71 = arith.constant 1.000000e-16 : f32
    %104 = vector.broadcast %cst_71 : f32 to vector<1x4xf32>
    %105 = arith.maximumf %99, %104 : vector<1x4xf32>
    %106 = math.rsqrt %105 : vector<1x4xf32>
    %107 = vector.broadcast %106 : vector<1x4xf32> to vector<8x4xf32>
    %108 = arith.mulf %103, %107 : vector<8x4xf32>
    %c1_72 = arith.constant 1 : index
    %c0_73 = arith.constant 0 : index
    %c0_74 = arith.constant 0 : index
    %c4_75 = arith.constant 4 : index
    %109 = vector.load %arg13[%c1_72, %c0_73, %c0_74, %c4_75] : memref<2x2x8x32xf32, #tpu.memory_space<vmem>>, vector<1x1x8x4xf32>
    %110 = vector.shape_cast %109 : vector<1x1x8x4xf32> to vector<8x4xf32>
    %111 = vector.shape_cast %108 : vector<8x4xf32> to vector<1x1x8x4xf32>
    tpu.vector_store %arg13[%c1_72, %c0_73, %c0_74, %c4_75], %111 {strides = array<i32>} : memref<2x2x8x32xf32, #tpu.memory_space<vmem>>, vector<1x1x8x4xf32>,
    %112 = vector.shape_cast %8 : vector<4x32xf32> to vector<4x1x32xf32>
    %113 = vector.shape_cast %25 : vector<8x32xf32> to vector<1x8x32xf32>
    %114 = vector.broadcast %112 : vector<4x1x32xf32> to vector<4x8x32xf32>
    %115 = vector.broadcast %113 : vector<1x8x32xf32> to vector<4x8x32xf32>
    %116 = arith.mulf %114, %115 : vector<4x8x32xf32>
    %117 = vector.shape_cast %116 : vector<4x8x32xf32> to vector<32x32xf32>
    %cst_76 = arith.constant dense<0.000000e+00> : vector<32x8xf32>
    %118 = tpu.matmul %117, %29, %cst_76 {dimension_numbers = #tpu.dot_dimension_numbers<[1], [1], [0], [0], [0, 0, 1, 0], [], []>} : vector<32x32xf32>, vector<8x32xf32>, vector<32x8xf32> -> vector<32x8xf32>
    %119 = vector.shape_cast %118 : vector<32x8xf32> to vector<4x8x8xf32>
    %120 = arith.mulf %25, %25 : vector<8x32xf32>
    %cst_77 = arith.constant dense<0.000000e+00> : vector<4x8xf32>
    %121 = tpu.matmul %8, %120, %cst_77 {dimension_numbers = #tpu.dot_dimension_numbers<[1], [1], [0], [0], [0, 0, 1, 0], [], []>} : vector<4x32xf32>, vector<8x32xf32>, vector<4x8xf32> -> vector<4x8xf32>
    %122 = arith.mulf %29, %29 : vector<8x32xf32>
    %cst_78 = arith.constant dense<0.000000e+00> : vector<4x8xf32>
    %123 = tpu.matmul %8, %122, %cst_78 {dimension_numbers = #tpu.dot_dimension_numbers<[1], [1], [0], [0], [0, 0, 1, 0], [], []>} : vector<4x32xf32>, vector<8x32xf32>, vector<4x8xf32> -> vector<4x8xf32>
    %124 = vector.shape_cast %121 : vector<4x8xf32> to vector<4x8x1xf32>
    %125 = vector.shape_cast %123 : vector<4x8xf32> to vector<4x1x8xf32>
    %126 = vector.broadcast %124 : vector<4x8x1xf32> to vector<4x8x8xf32>
    %127 = vector.broadcast %125 : vector<4x1x8xf32> to vector<4x8x8xf32>
    %128 = arith.mulf %126, %127 : vector<4x8x8xf32>
    %cst_79 = arith.constant 1.000000e-16 : f32
    %129 = vector.broadcast %cst_79 : f32 to vector<4x8x8xf32>
    %130 = arith.maximumf %128, %129 : vector<4x8x8xf32>
    %131 = math.rsqrt %130 : vector<4x8x8xf32>
    %132 = arith.mulf %119, %131 : vector<4x8x8xf32>
    %cst_80 = arith.constant dense<0xFF800000> : vector<4x8xf32>
    %133 = vector.multi_reduction <maximumf>, %132, %cst_80 [2] : vector<4x8x8xf32> to vector<4x8xf32>
    %134 = tpu.transpose %133, [1, 0] : vector<4x8xf32> -> vector<8x4xf32>
    %cst_81 = arith.constant dense<0xFF800000> : vector<4x8xf32>
    %135 = vector.multi_reduction <maximumf>, %132, %cst_81 [1] : vector<4x8x8xf32> to vector<4x8xf32>
    %136 = tpu.transpose %135, [1, 0] : vector<4x8xf32> -> vector<8x4xf32>
    %137 = vector.shape_cast %11 : vector<4x32xf32> to vector<4x1x32xf32>
    %138 = vector.shape_cast %27 : vector<8x32xf32> to vector<1x8x32xf32>
    %139 = vector.broadcast %137 : vector<4x1x32xf32> to vector<4x8x32xf32>
    %140 = vector.broadcast %138 : vector<1x8x32xf32> to vector<4x8x32xf32>
    %141 = arith.mulf %139, %140 : vector<4x8x32xf32>
    %142 = vector.shape_cast %141 : vector<4x8x32xf32> to vector<32x32xf32>
    %cst_82 = arith.constant dense<0.000000e+00> : vector<32x8xf32>
    %143 = tpu.matmul %142, %31, %cst_82 {dimension_numbers = #tpu.dot_dimension_numbers<[1], [1], [0], [0], [0, 0, 1, 0], [], []>} : vector<32x32xf32>, vector<8x32xf32>, vector<32x8xf32> -> vector<32x8xf32>
    %144 = vector.shape_cast %143 : vector<32x8xf32> to vector<4x8x8xf32>
    %145 = arith.mulf %27, %27 : vector<8x32xf32>
    %cst_83 = arith.constant dense<0.000000e+00> : vector<4x8xf32>
    %146 = tpu.matmul %11, %145, %cst_83 {dimension_numbers = #tpu.dot_dimension_numbers<[1], [1], [0], [0], [0, 0, 1, 0], [], []>} : vector<4x32xf32>, vector<8x32xf32>, vector<4x8xf32> -> vector<4x8xf32>
    %147 = arith.mulf %31, %31 : vector<8x32xf32>
    %cst_84 = arith.constant dense<0.000000e+00> : vector<4x8xf32>
    %148 = tpu.matmul %11, %147, %cst_84 {dimension_numbers = #tpu.dot_dimension_numbers<[1], [1], [0], [0], [0, 0, 1, 0], [], []>} : vector<4x32xf32>, vector<8x32xf32>, vector<4x8xf32> -> vector<4x8xf32>
    %149 = vector.shape_cast %146 : vector<4x8xf32> to vector<4x8x1xf32>
    %150 = vector.shape_cast %148 : vector<4x8xf32> to vector<4x1x8xf32>
    %151 = vector.broadcast %149 : vector<4x8x1xf32> to vector<4x8x8xf32>
    %152 = vector.broadcast %150 : vector<4x1x8xf32> to vector<4x8x8xf32>
    %153 = arith.mulf %151, %152 : vector<4x8x8xf32>
    %cst_85 = arith.constant 1.000000e-16 : f32
    %154 = vector.broadcast %cst_85 : f32 to vector<4x8x8xf32>
    %155 = arith.maximumf %153, %154 : vector<4x8x8xf32>
    %156 = math.rsqrt %155 : vector<4x8x8xf32>
    %157 = arith.mulf %144, %156 : vector<4x8x8xf32>
    %cst_86 = arith.constant dense<0xFF800000> : vector<4x8xf32>
    %158 = vector.multi_reduction <maximumf>, %157, %cst_86 [2] : vector<4x8x8xf32> to vector<4x8xf32>
    %159 = tpu.transpose %158, [1, 0] : vector<4x8xf32> -> vector<8x4xf32>
    %cst_87 = arith.constant dense<0xFF800000> : vector<4x8xf32>
    %160 = vector.multi_reduction <maximumf>, %157, %cst_87 [1] : vector<4x8x8xf32> to vector<4x8xf32>
    %161 = tpu.transpose %160, [1, 0] : vector<4x8xf32> -> vector<8x4xf32>
    %c0_88 = arith.constant 0 : index
    %c0_89 = arith.constant 0 : index
    %c0_90 = arith.constant 0 : index
    %c8 = arith.constant 8 : index
    %162 = vector.load %arg13[%c0_88, %c0_89, %c0_90, %c8] : memref<2x2x8x32xf32, #tpu.memory_space<vmem>>, vector<1x1x8x4xf32>
    %163 = vector.shape_cast %162 : vector<1x1x8x4xf32> to vector<8x4xf32>
    %164 = vector.shape_cast %134 : vector<8x4xf32> to vector<1x1x8x4xf32>
    tpu.vector_store %arg13[%c0_88, %c0_89, %c0_90, %c8], %164 {strides = array<i32>} : memref<2x2x8x32xf32, #tpu.memory_space<vmem>>, vector<1x1x8x4xf32>,
    %c0_91 = arith.constant 0 : index
    %c0_92 = arith.constant 0 : index
    %c0_93 = arith.constant 0 : index
    %c12 = arith.constant 12 : index
    %165 = vector.load %arg13[%c0_91, %c0_92, %c0_93, %c12] : memref<2x2x8x32xf32, #tpu.memory_space<vmem>>, vector<1x1x8x4xf32>
    %166 = vector.shape_cast %165 : vector<1x1x8x4xf32> to vector<8x4xf32>
    %167 = vector.shape_cast %159 : vector<8x4xf32> to vector<1x1x8x4xf32>
    tpu.vector_store %arg13[%c0_91, %c0_92, %c0_93, %c12], %167 {strides = array<i32>} : memref<2x2x8x32xf32, #tpu.memory_space<vmem>>, vector<1x1x8x4xf32>,
    %c1_94 = arith.constant 1 : index
    %c0_95 = arith.constant 0 : index
    %c0_96 = arith.constant 0 : index
    %c8_97 = arith.constant 8 : index
    %168 = vector.load %arg13[%c1_94, %c0_95, %c0_96, %c8_97] : memref<2x2x8x32xf32, #tpu.memory_space<vmem>>, vector<1x1x8x4xf32>
    %169 = vector.shape_cast %168 : vector<1x1x8x4xf32> to vector<8x4xf32>
    %170 = vector.shape_cast %136 : vector<8x4xf32> to vector<1x1x8x4xf32>
    tpu.vector_store %arg13[%c1_94, %c0_95, %c0_96, %c8_97], %170 {strides = array<i32>} : memref<2x2x8x32xf32, #tpu.memory_space<vmem>>, vector<1x1x8x4xf32>,
    %c1_98 = arith.constant 1 : index
    %c0_99 = arith.constant 0 : index
    %c0_100 = arith.constant 0 : index
    %c12_101 = arith.constant 12 : index
    %171 = vector.load %arg13[%c1_98, %c0_99, %c0_100, %c12_101] : memref<2x2x8x32xf32, #tpu.memory_space<vmem>>, vector<1x1x8x4xf32>
    %172 = vector.shape_cast %171 : vector<1x1x8x4xf32> to vector<8x4xf32>
    %173 = vector.shape_cast %161 : vector<8x4xf32> to vector<1x1x8x4xf32>
    tpu.vector_store %arg13[%c1_98, %c0_99, %c0_100, %c12_101], %173 {strides = array<i32>} : memref<2x2x8x32xf32, #tpu.memory_space<vmem>>, vector<1x1x8x4xf32>,
    %cst_102 = arith.constant dense<0.000000e+00> : vector<8x8xf32>
    %174 = tpu.matmul %25, %29, %cst_102 {dimension_numbers = #tpu.dot_dimension_numbers<[1], [1], [0], [0], [0, 0, 1, 0], [], []>} : vector<8x32xf32>, vector<8x32xf32>, vector<8x8xf32> -> vector<8x8xf32>
    %175 = arith.mulf %25, %25 : vector<8x32xf32>
    %cst_103 = arith.constant dense<0.000000e+00> : vector<8xf32>
    %176 = vector.multi_reduction <add>, %175, %cst_103 [1] : vector<8x32xf32> to vector<8xf32>
    %177 = vector.shape_cast %176 : vector<8xf32> to vector<8x1xf32>
    %178 = arith.mulf %29, %29 : vector<8x32xf32>
    %cst_104 = arith.constant dense<0.000000e+00> : vector<8xf32>
    %179 = vector.multi_reduction <add>, %178, %cst_104 [1] : vector<8x32xf32> to vector<8xf32>
    %180 = vector.shape_cast %179 : vector<8xf32> to vector<8x1xf32>
    %181 = tpu.transpose %180, [1, 0] : vector<8x1xf32> -> vector<1x8xf32>
    %182 = vector.broadcast %177 : vector<8x1xf32> to vector<8x8xf32>
    %183 = vector.broadcast %181 : vector<1x8xf32> to vector<8x8xf32>
    %184 = arith.mulf %182, %183 : vector<8x8xf32>
    %cst_105 = arith.constant 1.000000e-16 : f32
    %185 = vector.broadcast %cst_105 : f32 to vector<8x8xf32>
    %186 = arith.maximumf %184, %185 : vector<8x8xf32>
    %187 = math.rsqrt %186 : vector<8x8xf32>
    %188 = arith.mulf %174, %187 : vector<8x8xf32>
    %cst_106 = arith.constant dense<0.000000e+00> : vector<8x32xf32>
    %189 = tpu.matmul %188, %29, %cst_106 {dimension_numbers = #tpu.dot_dimension_numbers<[1], [0], [0], [1], [0, 0, 1, 1], [], []>} : vector<8x8xf32>, vector<8x32xf32>, vector<8x32xf32> -> vector<8x32xf32>
    %cst_107 = arith.constant dense<0.000000e+00> : vector<8xf32>
    %190 = vector.multi_reduction <add>, %188, %cst_107 [1] : vector<8x8xf32> to vector<8xf32>
    %191 = vector.shape_cast %190 : vector<8xf32> to vector<8x1xf32>
    %192 = vector.broadcast %191 : vector<8x1xf32> to vector<8x32xf32>
    %193 = arith.divf %189, %192 : vector<8x32xf32>
    %194 = arith.mulf %193, %25 : vector<8x32xf32>
    %cst_108 = arith.constant dense<0.000000e+00> : vector<8x4xf32>
    %195 = tpu.matmul %194, %14, %cst_108 {dimension_numbers = #tpu.dot_dimension_numbers<[1], [1], [0], [0], [0, 0, 1, 0], [], []>} : vector<8x32xf32>, vector<4x32xf32>, vector<8x4xf32> -> vector<8x4xf32>
    %196 = arith.mulf %193, %193 : vector<8x32xf32>
    %cst_109 = arith.constant dense<0.000000e+00> : vector<8x4xf32>
    %197 = tpu.matmul %196, %14, %cst_109 {dimension_numbers = #tpu.dot_dimension_numbers<[1], [1], [0], [0], [0, 0, 1, 0], [], []>} : vector<8x32xf32>, vector<4x32xf32>, vector<8x4xf32> -> vector<8x4xf32>
    %198 = arith.mulf %25, %25 : vector<8x32xf32>
    %cst_110 = arith.constant dense<0.000000e+00> : vector<8x4xf32>
    %199 = tpu.matmul %198, %14, %cst_110 {dimension_numbers = #tpu.dot_dimension_numbers<[1], [1], [0], [0], [0, 0, 1, 0], [], []>} : vector<8x32xf32>, vector<4x32xf32>, vector<8x4xf32> -> vector<8x4xf32>
    %cst_111 = arith.constant 1.000000e-16 : f32
    %200 = vector.broadcast %cst_111 : f32 to vector<8x4xf32>
    %201 = arith.maximumf %197, %200 : vector<8x4xf32>
    %202 = math.rsqrt %201 : vector<8x4xf32>
    %203 = arith.mulf %195, %202 : vector<8x4xf32>
    %cst_112 = arith.constant 1.000000e-16 : f32
    %204 = vector.broadcast %cst_112 : f32 to vector<8x4xf32>
    %205 = arith.maximumf %199, %204 : vector<8x4xf32>
    %206 = math.rsqrt %205 : vector<8x4xf32>
    %207 = arith.mulf %203, %206 : vector<8x4xf32>
    %cst_113 = arith.constant dense<0xFF800000> : vector<8xf32>
    %208 = vector.multi_reduction <maximumf>, %188, %cst_113 [1] : vector<8x8xf32> to vector<8xf32>
    %209 = vector.shape_cast %208 : vector<8xf32> to vector<8x1xf32>
    %210 = tpu.iota {dimensions = array<i32: 1>} : vector<8x8xi32>
    %211 = vector.broadcast %209 : vector<8x1xf32> to vector<8x8xf32>
    %212 = arith.cmpf oeq, %188, %211 : vector<8x8xf32>
    %c8_i32 = arith.constant 8 : i32
    %213 = vector.broadcast %c8_i32 : i32 to vector<8x8xi32>
    %214 = arith.select %212, %210, %213 : vector<8x8xi1>, vector<8x8xi32>
    %cst_114 = arith.constant dense<2147483647> : vector<8xi32>
    %215 = vector.multi_reduction <minsi>, %214, %cst_114 [1] : vector<8x8xi32> to vector<8xi32>
    %216 = vector.shape_cast %215 : vector<8xi32> to vector<8x1xi32>
    %217 = vector.broadcast %216 : vector<8x1xi32> to vector<8x8xi32>
    %218 = arith.cmpi eq, %210, %217 : vector<8x8xi32>
    %219 = arith.extui %218 : vector<8x8xi1> to vector<8x8xi32>
    %220 = arith.sitofp %219 : vector<8x8xi32> to vector<8x8xf32>
    %cst_115 = arith.constant dense<0.000000e+00> : vector<8x32xf32>
    %221 = tpu.matmul %220, %29, %cst_115 {dimension_numbers = #tpu.dot_dimension_numbers<[1], [0], [0], [1], [0, 0, 1, 1], [], []>} : vector<8x8xf32>, vector<8x32xf32>, vector<8x32xf32> -> vector<8x32xf32>
    %222 = arith.mulf %221, %25 : vector<8x32xf32>
    %cst_116 = arith.constant dense<0.000000e+00> : vector<8x4xf32>
    %223 = tpu.matmul %222, %20, %cst_116 {dimension_numbers = #tpu.dot_dimension_numbers<[1], [1], [0], [0], [0, 0, 1, 0], [], []>} : vector<8x32xf32>, vector<4x32xf32>, vector<8x4xf32> -> vector<8x4xf32>
    %224 = arith.mulf %221, %221 : vector<8x32xf32>
    %cst_117 = arith.constant dense<0.000000e+00> : vector<8x4xf32>
    %225 = tpu.matmul %224, %20, %cst_117 {dimension_numbers = #tpu.dot_dimension_numbers<[1], [1], [0], [0], [0, 0, 1, 0], [], []>} : vector<8x32xf32>, vector<4x32xf32>, vector<8x4xf32> -> vector<8x4xf32>
    %226 = arith.mulf %25, %25 : vector<8x32xf32>
    %cst_118 = arith.constant dense<0.000000e+00> : vector<8x4xf32>
    %227 = tpu.matmul %226, %20, %cst_118 {dimension_numbers = #tpu.dot_dimension_numbers<[1], [1], [0], [0], [0, 0, 1, 0], [], []>} : vector<8x32xf32>, vector<4x32xf32>, vector<8x4xf32> -> vector<8x4xf32>
    %cst_119 = arith.constant 1.000000e-16 : f32
    %228 = vector.broadcast %cst_119 : f32 to vector<8x4xf32>
    %229 = arith.maximumf %225, %228 : vector<8x4xf32>
    %230 = math.rsqrt %229 : vector<8x4xf32>
    %231 = arith.mulf %223, %230 : vector<8x4xf32>
    %cst_120 = arith.constant 1.000000e-16 : f32
    %232 = vector.broadcast %cst_120 : f32 to vector<8x4xf32>
    %233 = arith.maximumf %227, %232 : vector<8x4xf32>
    %234 = math.rsqrt %233 : vector<8x4xf32>
    %235 = arith.mulf %231, %234 : vector<8x4xf32>
    %cst_121 = arith.constant dense<0.000000e+00> : vector<8x8xf32>
    %236 = tpu.matmul %27, %31, %cst_121 {dimension_numbers = #tpu.dot_dimension_numbers<[1], [1], [0], [0], [0, 0, 1, 0], [], []>} : vector<8x32xf32>, vector<8x32xf32>, vector<8x8xf32> -> vector<8x8xf32>
    %237 = arith.mulf %27, %27 : vector<8x32xf32>
    %cst_122 = arith.constant dense<0.000000e+00> : vector<8xf32>
    %238 = vector.multi_reduction <add>, %237, %cst_122 [1] : vector<8x32xf32> to vector<8xf32>
    %239 = vector.shape_cast %238 : vector<8xf32> to vector<8x1xf32>
    %240 = arith.mulf %31, %31 : vector<8x32xf32>
    %cst_123 = arith.constant dense<0.000000e+00> : vector<8xf32>
    %241 = vector.multi_reduction <add>, %240, %cst_123 [1] : vector<8x32xf32> to vector<8xf32>
    %242 = vector.shape_cast %241 : vector<8xf32> to vector<8x1xf32>
    %243 = tpu.transpose %242, [1, 0] : vector<8x1xf32> -> vector<1x8xf32>
    %244 = vector.broadcast %239 : vector<8x1xf32> to vector<8x8xf32>
    %245 = vector.broadcast %243 : vector<1x8xf32> to vector<8x8xf32>
    %246 = arith.mulf %244, %245 : vector<8x8xf32>
    %cst_124 = arith.constant 1.000000e-16 : f32
    %247 = vector.broadcast %cst_124 : f32 to vector<8x8xf32>
    %248 = arith.maximumf %246, %247 : vector<8x8xf32>
    %249 = math.rsqrt %248 : vector<8x8xf32>
    %250 = arith.mulf %236, %249 : vector<8x8xf32>
    %cst_125 = arith.constant dense<0.000000e+00> : vector<8x32xf32>
    %251 = tpu.matmul %250, %31, %cst_125 {dimension_numbers = #tpu.dot_dimension_numbers<[1], [0], [0], [1], [0, 0, 1, 1], [], []>} : vector<8x8xf32>, vector<8x32xf32>, vector<8x32xf32> -> vector<8x32xf32>
    %cst_126 = arith.constant dense<0.000000e+00> : vector<8xf32>
    %252 = vector.multi_reduction <add>, %250, %cst_126 [1] : vector<8x8xf32> to vector<8xf32>
    %253 = vector.shape_cast %252 : vector<8xf32> to vector<8x1xf32>
    %254 = vector.broadcast %253 : vector<8x1xf32> to vector<8x32xf32>
    %255 = arith.divf %251, %254 : vector<8x32xf32>
    %256 = arith.mulf %255, %27 : vector<8x32xf32>
    %cst_127 = arith.constant dense<0.000000e+00> : vector<8x4xf32>
    %257 = tpu.matmul %256, %17, %cst_127 {dimension_numbers = #tpu.dot_dimension_numbers<[1], [1], [0], [0], [0, 0, 1, 0], [], []>} : vector<8x32xf32>, vector<4x32xf32>, vector<8x4xf32> -> vector<8x4xf32>
    %258 = arith.mulf %255, %255 : vector<8x32xf32>
    %cst_128 = arith.constant dense<0.000000e+00> : vector<8x4xf32>
    %259 = tpu.matmul %258, %17, %cst_128 {dimension_numbers = #tpu.dot_dimension_numbers<[1], [1], [0], [0], [0, 0, 1, 0], [], []>} : vector<8x32xf32>, vector<4x32xf32>, vector<8x4xf32> -> vector<8x4xf32>
    %260 = arith.mulf %27, %27 : vector<8x32xf32>
    %cst_129 = arith.constant dense<0.000000e+00> : vector<8x4xf32>
    %261 = tpu.matmul %260, %17, %cst_129 {dimension_numbers = #tpu.dot_dimension_numbers<[1], [1], [0], [0], [0, 0, 1, 0], [], []>} : vector<8x32xf32>, vector<4x32xf32>, vector<8x4xf32> -> vector<8x4xf32>
    %cst_130 = arith.constant 1.000000e-16 : f32
    %262 = vector.broadcast %cst_130 : f32 to vector<8x4xf32>
    %263 = arith.maximumf %259, %262 : vector<8x4xf32>
    %264 = math.rsqrt %263 : vector<8x4xf32>
    %265 = arith.mulf %257, %264 : vector<8x4xf32>
    %cst_131 = arith.constant 1.000000e-16 : f32
    %266 = vector.broadcast %cst_131 : f32 to vector<8x4xf32>
    %267 = arith.maximumf %261, %266 : vector<8x4xf32>
    %268 = math.rsqrt %267 : vector<8x4xf32>
    %269 = arith.mulf %265, %268 : vector<8x4xf32>
    %cst_132 = arith.constant dense<0xFF800000> : vector<8xf32>
    %270 = vector.multi_reduction <maximumf>, %250, %cst_132 [1] : vector<8x8xf32> to vector<8xf32>
    %271 = vector.shape_cast %270 : vector<8xf32> to vector<8x1xf32>
    %272 = tpu.iota {dimensions = array<i32: 1>} : vector<8x8xi32>
    %273 = vector.broadcast %271 : vector<8x1xf32> to vector<8x8xf32>
    %274 = arith.cmpf oeq, %250, %273 : vector<8x8xf32>
    %c8_i32_133 = arith.constant 8 : i32
    %275 = vector.broadcast %c8_i32_133 : i32 to vector<8x8xi32>
    %276 = arith.select %274, %272, %275 : vector<8x8xi1>, vector<8x8xi32>
    %cst_134 = arith.constant dense<2147483647> : vector<8xi32>
    %277 = vector.multi_reduction <minsi>, %276, %cst_134 [1] : vector<8x8xi32> to vector<8xi32>
    %278 = vector.shape_cast %277 : vector<8xi32> to vector<8x1xi32>
    %279 = vector.broadcast %278 : vector<8x1xi32> to vector<8x8xi32>
    %280 = arith.cmpi eq, %272, %279 : vector<8x8xi32>
    %281 = arith.extui %280 : vector<8x8xi1> to vector<8x8xi32>
    %282 = arith.sitofp %281 : vector<8x8xi32> to vector<8x8xf32>
    %cst_135 = arith.constant dense<0.000000e+00> : vector<8x32xf32>
    %283 = tpu.matmul %282, %31, %cst_135 {dimension_numbers = #tpu.dot_dimension_numbers<[1], [0], [0], [1], [0, 0, 1, 1], [], []>} : vector<8x8xf32>, vector<8x32xf32>, vector<8x32xf32> -> vector<8x32xf32>
    %284 = arith.mulf %283, %27 : vector<8x32xf32>
    %cst_136 = arith.constant dense<0.000000e+00> : vector<8x4xf32>
    %285 = tpu.matmul %284, %23, %cst_136 {dimension_numbers = #tpu.dot_dimension_numbers<[1], [1], [0], [0], [0, 0, 1, 0], [], []>} : vector<8x32xf32>, vector<4x32xf32>, vector<8x4xf32> -> vector<8x4xf32>
    %286 = arith.mulf %283, %283 : vector<8x32xf32>
    %cst_137 = arith.constant dense<0.000000e+00> : vector<8x4xf32>
    %287 = tpu.matmul %286, %23, %cst_137 {dimension_numbers = #tpu.dot_dimension_numbers<[1], [1], [0], [0], [0, 0, 1, 0], [], []>} : vector<8x32xf32>, vector<4x32xf32>, vector<8x4xf32> -> vector<8x4xf32>
    %288 = arith.mulf %27, %27 : vector<8x32xf32>
    %cst_138 = arith.constant dense<0.000000e+00> : vector<8x4xf32>
    %289 = tpu.matmul %288, %23, %cst_138 {dimension_numbers = #tpu.dot_dimension_numbers<[1], [1], [0], [0], [0, 0, 1, 0], [], []>} : vector<8x32xf32>, vector<4x32xf32>, vector<8x4xf32> -> vector<8x4xf32>
    %cst_139 = arith.constant 1.000000e-16 : f32
    %290 = vector.broadcast %cst_139 : f32 to vector<8x4xf32>
    %291 = arith.maximumf %287, %290 : vector<8x4xf32>
    %292 = math.rsqrt %291 : vector<8x4xf32>
    %293 = arith.mulf %285, %292 : vector<8x4xf32>
    %cst_140 = arith.constant 1.000000e-16 : f32
    %294 = vector.broadcast %cst_140 : f32 to vector<8x4xf32>
    %295 = arith.maximumf %289, %294 : vector<8x4xf32>
    %296 = math.rsqrt %295 : vector<8x4xf32>
    %297 = arith.mulf %293, %296 : vector<8x4xf32>
    %cst_141 = arith.constant dense<0.000000e+00> : vector<8x8xf32>
    %298 = tpu.matmul %29, %25, %cst_141 {dimension_numbers = #tpu.dot_dimension_numbers<[1], [1], [0], [0], [0, 0, 1, 0], [], []>} : vector<8x32xf32>, vector<8x32xf32>, vector<8x8xf32> -> vector<8x8xf32>
    %299 = arith.mulf %29, %29 : vector<8x32xf32>
    %cst_142 = arith.constant dense<0.000000e+00> : vector<8xf32>
    %300 = vector.multi_reduction <add>, %299, %cst_142 [1] : vector<8x32xf32> to vector<8xf32>
    %301 = vector.shape_cast %300 : vector<8xf32> to vector<8x1xf32>
    %302 = arith.mulf %25, %25 : vector<8x32xf32>
    %cst_143 = arith.constant dense<0.000000e+00> : vector<8xf32>
    %303 = vector.multi_reduction <add>, %302, %cst_143 [1] : vector<8x32xf32> to vector<8xf32>
    %304 = vector.shape_cast %303 : vector<8xf32> to vector<8x1xf32>
    %305 = tpu.transpose %304, [1, 0] : vector<8x1xf32> -> vector<1x8xf32>
    %306 = vector.broadcast %301 : vector<8x1xf32> to vector<8x8xf32>
    %307 = vector.broadcast %305 : vector<1x8xf32> to vector<8x8xf32>
    %308 = arith.mulf %306, %307 : vector<8x8xf32>
    %cst_144 = arith.constant 1.000000e-16 : f32
    %309 = vector.broadcast %cst_144 : f32 to vector<8x8xf32>
    %310 = arith.maximumf %308, %309 : vector<8x8xf32>
    %311 = math.rsqrt %310 : vector<8x8xf32>
    %312 = arith.mulf %298, %311 : vector<8x8xf32>
    %cst_145 = arith.constant dense<0.000000e+00> : vector<8x32xf32>
    %313 = tpu.matmul %312, %25, %cst_145 {dimension_numbers = #tpu.dot_dimension_numbers<[1], [0], [0], [1], [0, 0, 1, 1], [], []>} : vector<8x8xf32>, vector<8x32xf32>, vector<8x32xf32> -> vector<8x32xf32>
    %cst_146 = arith.constant dense<0.000000e+00> : vector<8xf32>
    %314 = vector.multi_reduction <add>, %312, %cst_146 [1] : vector<8x8xf32> to vector<8xf32>
    %315 = vector.shape_cast %314 : vector<8xf32> to vector<8x1xf32>
    %316 = vector.broadcast %315 : vector<8x1xf32> to vector<8x32xf32>
    %317 = arith.divf %313, %316 : vector<8x32xf32>
    %318 = arith.mulf %317, %29 : vector<8x32xf32>
    %cst_147 = arith.constant dense<0.000000e+00> : vector<8x4xf32>
    %319 = tpu.matmul %318, %14, %cst_147 {dimension_numbers = #tpu.dot_dimension_numbers<[1], [1], [0], [0], [0, 0, 1, 0], [], []>} : vector<8x32xf32>, vector<4x32xf32>, vector<8x4xf32> -> vector<8x4xf32>
    %320 = arith.mulf %317, %317 : vector<8x32xf32>
    %cst_148 = arith.constant dense<0.000000e+00> : vector<8x4xf32>
    %321 = tpu.matmul %320, %14, %cst_148 {dimension_numbers = #tpu.dot_dimension_numbers<[1], [1], [0], [0], [0, 0, 1, 0], [], []>} : vector<8x32xf32>, vector<4x32xf32>, vector<8x4xf32> -> vector<8x4xf32>
    %322 = arith.mulf %29, %29 : vector<8x32xf32>
    %cst_149 = arith.constant dense<0.000000e+00> : vector<8x4xf32>
    %323 = tpu.matmul %322, %14, %cst_149 {dimension_numbers = #tpu.dot_dimension_numbers<[1], [1], [0], [0], [0, 0, 1, 0], [], []>} : vector<8x32xf32>, vector<4x32xf32>, vector<8x4xf32> -> vector<8x4xf32>
    %cst_150 = arith.constant 1.000000e-16 : f32
    %324 = vector.broadcast %cst_150 : f32 to vector<8x4xf32>
    %325 = arith.maximumf %321, %324 : vector<8x4xf32>
    %326 = math.rsqrt %325 : vector<8x4xf32>
    %327 = arith.mulf %319, %326 : vector<8x4xf32>
    %cst_151 = arith.constant 1.000000e-16 : f32
    %328 = vector.broadcast %cst_151 : f32 to vector<8x4xf32>
    %329 = arith.maximumf %323, %328 : vector<8x4xf32>
    %330 = math.rsqrt %329 : vector<8x4xf32>
    %331 = arith.mulf %327, %330 : vector<8x4xf32>
    %cst_152 = arith.constant dense<0xFF800000> : vector<8xf32>
    %332 = vector.multi_reduction <maximumf>, %312, %cst_152 [1] : vector<8x8xf32> to vector<8xf32>
    %333 = vector.shape_cast %332 : vector<8xf32> to vector<8x1xf32>
    %334 = tpu.iota {dimensions = array<i32: 1>} : vector<8x8xi32>
    %335 = vector.broadcast %333 : vector<8x1xf32> to vector<8x8xf32>
    %336 = arith.cmpf oeq, %312, %335 : vector<8x8xf32>
    %c8_i32_153 = arith.constant 8 : i32
    %337 = vector.broadcast %c8_i32_153 : i32 to vector<8x8xi32>
    %338 = arith.select %336, %334, %337 : vector<8x8xi1>, vector<8x8xi32>
    %cst_154 = arith.constant dense<2147483647> : vector<8xi32>
    %339 = vector.multi_reduction <minsi>, %338, %cst_154 [1] : vector<8x8xi32> to vector<8xi32>
    %340 = vector.shape_cast %339 : vector<8xi32> to vector<8x1xi32>
    %341 = vector.broadcast %340 : vector<8x1xi32> to vector<8x8xi32>
    %342 = arith.cmpi eq, %334, %341 : vector<8x8xi32>
    %343 = arith.extui %342 : vector<8x8xi1> to vector<8x8xi32>
    %344 = arith.sitofp %343 : vector<8x8xi32> to vector<8x8xf32>
    %cst_155 = arith.constant dense<0.000000e+00> : vector<8x32xf32>
    %345 = tpu.matmul %344, %25, %cst_155 {dimension_numbers = #tpu.dot_dimension_numbers<[1], [0], [0], [1], [0, 0, 1, 1], [], []>} : vector<8x8xf32>, vector<8x32xf32>, vector<8x32xf32> -> vector<8x32xf32>
    %346 = arith.mulf %345, %29 : vector<8x32xf32>
    %cst_156 = arith.constant dense<0.000000e+00> : vector<8x4xf32>
    %347 = tpu.matmul %346, %20, %cst_156 {dimension_numbers = #tpu.dot_dimension_numbers<[1], [1], [0], [0], [0, 0, 1, 0], [], []>} : vector<8x32xf32>, vector<4x32xf32>, vector<8x4xf32> -> vector<8x4xf32>
    %348 = arith.mulf %345, %345 : vector<8x32xf32>
    %cst_157 = arith.constant dense<0.000000e+00> : vector<8x4xf32>
    %349 = tpu.matmul %348, %20, %cst_157 {dimension_numbers = #tpu.dot_dimension_numbers<[1], [1], [0], [0], [0, 0, 1, 0], [], []>} : vector<8x32xf32>, vector<4x32xf32>, vector<8x4xf32> -> vector<8x4xf32>
    %350 = arith.mulf %29, %29 : vector<8x32xf32>
    %cst_158 = arith.constant dense<0.000000e+00> : vector<8x4xf32>
    %351 = tpu.matmul %350, %20, %cst_158 {dimension_numbers = #tpu.dot_dimension_numbers<[1], [1], [0], [0], [0, 0, 1, 0], [], []>} : vector<8x32xf32>, vector<4x32xf32>, vector<8x4xf32> -> vector<8x4xf32>
    %cst_159 = arith.constant 1.000000e-16 : f32
    %352 = vector.broadcast %cst_159 : f32 to vector<8x4xf32>
    %353 = arith.maximumf %349, %352 : vector<8x4xf32>
    %354 = math.rsqrt %353 : vector<8x4xf32>
    %355 = arith.mulf %347, %354 : vector<8x4xf32>
    %cst_160 = arith.constant 1.000000e-16 : f32
    %356 = vector.broadcast %cst_160 : f32 to vector<8x4xf32>
    %357 = arith.maximumf %351, %356 : vector<8x4xf32>
    %358 = math.rsqrt %357 : vector<8x4xf32>
    %359 = arith.mulf %355, %358 : vector<8x4xf32>
    %cst_161 = arith.constant dense<0.000000e+00> : vector<8x8xf32>
    %360 = tpu.matmul %31, %27, %cst_161 {dimension_numbers = #tpu.dot_dimension_numbers<[1], [1], [0], [0], [0, 0, 1, 0], [], []>} : vector<8x32xf32>, vector<8x32xf32>, vector<8x8xf32> -> vector<8x8xf32>
    %361 = arith.mulf %31, %31 : vector<8x32xf32>
    %cst_162 = arith.constant dense<0.000000e+00> : vector<8xf32>
    %362 = vector.multi_reduction <add>, %361, %cst_162 [1] : vector<8x32xf32> to vector<8xf32>
    %363 = vector.shape_cast %362 : vector<8xf32> to vector<8x1xf32>
    %364 = arith.mulf %27, %27 : vector<8x32xf32>
    %cst_163 = arith.constant dense<0.000000e+00> : vector<8xf32>
    %365 = vector.multi_reduction <add>, %364, %cst_163 [1] : vector<8x32xf32> to vector<8xf32>
    %366 = vector.shape_cast %365 : vector<8xf32> to vector<8x1xf32>
    %367 = tpu.transpose %366, [1, 0] : vector<8x1xf32> -> vector<1x8xf32>
    %368 = vector.broadcast %363 : vector<8x1xf32> to vector<8x8xf32>
    %369 = vector.broadcast %367 : vector<1x8xf32> to vector<8x8xf32>
    %370 = arith.mulf %368, %369 : vector<8x8xf32>
    %cst_164 = arith.constant 1.000000e-16 : f32
    %371 = vector.broadcast %cst_164 : f32 to vector<8x8xf32>
    %372 = arith.maximumf %370, %371 : vector<8x8xf32>
    %373 = math.rsqrt %372 : vector<8x8xf32>
    %374 = arith.mulf %360, %373 : vector<8x8xf32>
    %cst_165 = arith.constant dense<0.000000e+00> : vector<8x32xf32>
    %375 = tpu.matmul %374, %27, %cst_165 {dimension_numbers = #tpu.dot_dimension_numbers<[1], [0], [0], [1], [0, 0, 1, 1], [], []>} : vector<8x8xf32>, vector<8x32xf32>, vector<8x32xf32> -> vector<8x32xf32>
    %cst_166 = arith.constant dense<0.000000e+00> : vector<8xf32>
    %376 = vector.multi_reduction <add>, %374, %cst_166 [1] : vector<8x8xf32> to vector<8xf32>
    %377 = vector.shape_cast %376 : vector<8xf32> to vector<8x1xf32>
    %378 = vector.broadcast %377 : vector<8x1xf32> to vector<8x32xf32>
    %379 = arith.divf %375, %378 : vector<8x32xf32>
    %380 = arith.mulf %379, %31 : vector<8x32xf32>
    %cst_167 = arith.constant dense<0.000000e+00> : vector<8x4xf32>
    %381 = tpu.matmul %380, %17, %cst_167 {dimension_numbers = #tpu.dot_dimension_numbers<[1], [1], [0], [0], [0, 0, 1, 0], [], []>} : vector<8x32xf32>, vector<4x32xf32>, vector<8x4xf32> -> vector<8x4xf32>
    %382 = arith.mulf %379, %379 : vector<8x32xf32>
    %cst_168 = arith.constant dense<0.000000e+00> : vector<8x4xf32>
    %383 = tpu.matmul %382, %17, %cst_168 {dimension_numbers = #tpu.dot_dimension_numbers<[1], [1], [0], [0], [0, 0, 1, 0], [], []>} : vector<8x32xf32>, vector<4x32xf32>, vector<8x4xf32> -> vector<8x4xf32>
    %384 = arith.mulf %31, %31 : vector<8x32xf32>
    %cst_169 = arith.constant dense<0.000000e+00> : vector<8x4xf32>
    %385 = tpu.matmul %384, %17, %cst_169 {dimension_numbers = #tpu.dot_dimension_numbers<[1], [1], [0], [0], [0, 0, 1, 0], [], []>} : vector<8x32xf32>, vector<4x32xf32>, vector<8x4xf32> -> vector<8x4xf32>
    %cst_170 = arith.constant 1.000000e-16 : f32
    %386 = vector.broadcast %cst_170 : f32 to vector<8x4xf32>
    %387 = arith.maximumf %383, %386 : vector<8x4xf32>
    %388 = math.rsqrt %387 : vector<8x4xf32>
    %389 = arith.mulf %381, %388 : vector<8x4xf32>
    %cst_171 = arith.constant 1.000000e-16 : f32
    %390 = vector.broadcast %cst_171 : f32 to vector<8x4xf32>
    %391 = arith.maximumf %385, %390 : vector<8x4xf32>
    %392 = math.rsqrt %391 : vector<8x4xf32>
    %393 = arith.mulf %389, %392 : vector<8x4xf32>
    %cst_172 = arith.constant dense<0xFF800000> : vector<8xf32>
    %394 = vector.multi_reduction <maximumf>, %374, %cst_172 [1] : vector<8x8xf32> to vector<8xf32>
    %395 = vector.shape_cast %394 : vector<8xf32> to vector<8x1xf32>
    %396 = tpu.iota {dimensions = array<i32: 1>} : vector<8x8xi32>
    %397 = vector.broadcast %395 : vector<8x1xf32> to vector<8x8xf32>
    %398 = arith.cmpf oeq, %374, %397 : vector<8x8xf32>
    %c8_i32_173 = arith.constant 8 : i32
    %399 = vector.broadcast %c8_i32_173 : i32 to vector<8x8xi32>
    %400 = arith.select %398, %396, %399 : vector<8x8xi1>, vector<8x8xi32>
    %cst_174 = arith.constant dense<2147483647> : vector<8xi32>
    %401 = vector.multi_reduction <minsi>, %400, %cst_174 [1] : vector<8x8xi32> to vector<8xi32>
    %402 = vector.shape_cast %401 : vector<8xi32> to vector<8x1xi32>
    %403 = vector.broadcast %402 : vector<8x1xi32> to vector<8x8xi32>
    %404 = arith.cmpi eq, %396, %403 : vector<8x8xi32>
    %405 = arith.extui %404 : vector<8x8xi1> to vector<8x8xi32>
    %406 = arith.sitofp %405 : vector<8x8xi32> to vector<8x8xf32>
    %cst_175 = arith.constant dense<0.000000e+00> : vector<8x32xf32>
    %407 = tpu.matmul %406, %27, %cst_175 {dimension_numbers = #tpu.dot_dimension_numbers<[1], [0], [0], [1], [0, 0, 1, 1], [], []>} : vector<8x8xf32>, vector<8x32xf32>, vector<8x32xf32> -> vector<8x32xf32>
    %408 = arith.mulf %407, %31 : vector<8x32xf32>
    %cst_176 = arith.constant dense<0.000000e+00> : vector<8x4xf32>
    %409 = tpu.matmul %408, %23, %cst_176 {dimension_numbers = #tpu.dot_dimension_numbers<[1], [1], [0], [0], [0, 0, 1, 0], [], []>} : vector<8x32xf32>, vector<4x32xf32>, vector<8x4xf32> -> vector<8x4xf32>
    %410 = arith.mulf %407, %407 : vector<8x32xf32>
    %cst_177 = arith.constant dense<0.000000e+00> : vector<8x4xf32>
    %411 = tpu.matmul %410, %23, %cst_177 {dimension_numbers = #tpu.dot_dimension_numbers<[1], [1], [0], [0], [0, 0, 1, 0], [], []>} : vector<8x32xf32>, vector<4x32xf32>, vector<8x4xf32> -> vector<8x4xf32>
    %412 = arith.mulf %31, %31 : vector<8x32xf32>
    %cst_178 = arith.constant dense<0.000000e+00> : vector<8x4xf32>
    %413 = tpu.matmul %412, %23, %cst_178 {dimension_numbers = #tpu.dot_dimension_numbers<[1], [1], [0], [0], [0, 0, 1, 0], [], []>} : vector<8x32xf32>, vector<4x32xf32>, vector<8x4xf32> -> vector<8x4xf32>
    %cst_179 = arith.constant 1.000000e-16 : f32
    %414 = vector.broadcast %cst_179 : f32 to vector<8x4xf32>
    %415 = arith.maximumf %411, %414 : vector<8x4xf32>
    %416 = math.rsqrt %415 : vector<8x4xf32>
    %417 = arith.mulf %409, %416 : vector<8x4xf32>
    %cst_180 = arith.constant 1.000000e-16 : f32
    %418 = vector.broadcast %cst_180 : f32 to vector<8x4xf32>
    %419 = arith.maximumf %413, %418 : vector<8x4xf32>
    %420 = math.rsqrt %419 : vector<8x4xf32>
    %421 = arith.mulf %417, %420 : vector<8x4xf32>
    %c0_181 = arith.constant 0 : index
    %c0_182 = arith.constant 0 : index
    %c0_183 = arith.constant 0 : index
    %c16 = arith.constant 16 : index
    %422 = vector.load %arg13[%c0_181, %c0_182, %c0_183, %c16] : memref<2x2x8x32xf32, #tpu.memory_space<vmem>>, vector<1x1x8x4xf32>
    %423 = vector.shape_cast %422 : vector<1x1x8x4xf32> to vector<8x4xf32>
    %424 = vector.shape_cast %207 : vector<8x4xf32> to vector<1x1x8x4xf32>
    tpu.vector_store %arg13[%c0_181, %c0_182, %c0_183, %c16], %424 {strides = array<i32>} : memref<2x2x8x32xf32, #tpu.memory_space<vmem>>, vector<1x1x8x4xf32>,
    %c0_184 = arith.constant 0 : index
    %c0_185 = arith.constant 0 : index
    %c0_186 = arith.constant 0 : index
    %c20 = arith.constant 20 : index
    %425 = vector.load %arg13[%c0_184, %c0_185, %c0_186, %c20] : memref<2x2x8x32xf32, #tpu.memory_space<vmem>>, vector<1x1x8x4xf32>
    %426 = vector.shape_cast %425 : vector<1x1x8x4xf32> to vector<8x4xf32>
    %427 = vector.shape_cast %269 : vector<8x4xf32> to vector<1x1x8x4xf32>
    tpu.vector_store %arg13[%c0_184, %c0_185, %c0_186, %c20], %427 {strides = array<i32>} : memref<2x2x8x32xf32, #tpu.memory_space<vmem>>, vector<1x1x8x4xf32>,
    %c0_187 = arith.constant 0 : index
    %c0_188 = arith.constant 0 : index
    %c0_189 = arith.constant 0 : index
    %c24 = arith.constant 24 : index
    %428 = vector.load %arg13[%c0_187, %c0_188, %c0_189, %c24] : memref<2x2x8x32xf32, #tpu.memory_space<vmem>>, vector<1x1x8x4xf32>
    %429 = vector.shape_cast %428 : vector<1x1x8x4xf32> to vector<8x4xf32>
    %430 = vector.shape_cast %235 : vector<8x4xf32> to vector<1x1x8x4xf32>
    tpu.vector_store %arg13[%c0_187, %c0_188, %c0_189, %c24], %430 {strides = array<i32>} : memref<2x2x8x32xf32, #tpu.memory_space<vmem>>, vector<1x1x8x4xf32>,
    %c0_190 = arith.constant 0 : index
    %c0_191 = arith.constant 0 : index
    %c0_192 = arith.constant 0 : index
    %c28 = arith.constant 28 : index
    %431 = vector.load %arg13[%c0_190, %c0_191, %c0_192, %c28] : memref<2x2x8x32xf32, #tpu.memory_space<vmem>>, vector<1x1x8x4xf32>
    %432 = vector.shape_cast %431 : vector<1x1x8x4xf32> to vector<8x4xf32>
    %433 = vector.shape_cast %297 : vector<8x4xf32> to vector<1x1x8x4xf32>
    tpu.vector_store %arg13[%c0_190, %c0_191, %c0_192, %c28], %433 {strides = array<i32>} : memref<2x2x8x32xf32, #tpu.memory_space<vmem>>, vector<1x1x8x4xf32>,
    %c1_193 = arith.constant 1 : index
    %c0_194 = arith.constant 0 : index
    %c0_195 = arith.constant 0 : index
    %c16_196 = arith.constant 16 : index
    %434 = vector.load %arg13[%c1_193, %c0_194, %c0_195, %c16_196] : memref<2x2x8x32xf32, #tpu.memory_space<vmem>>, vector<1x1x8x4xf32>
    %435 = vector.shape_cast %434 : vector<1x1x8x4xf32> to vector<8x4xf32>
    %436 = vector.shape_cast %331 : vector<8x4xf32> to vector<1x1x8x4xf32>
    tpu.vector_store %arg13[%c1_193, %c0_194, %c0_195, %c16_196], %436 {strides = array<i32>} : memref<2x2x8x32xf32, #tpu.memory_space<vmem>>, vector<1x1x8x4xf32>,
    %c1_197 = arith.constant 1 : index
    %c0_198 = arith.constant 0 : index
    %c0_199 = arith.constant 0 : index
    %c20_200 = arith.constant 20 : index
    %437 = vector.load %arg13[%c1_197, %c0_198, %c0_199, %c20_200] : memref<2x2x8x32xf32, #tpu.memory_space<vmem>>, vector<1x1x8x4xf32>
    %438 = vector.shape_cast %437 : vector<1x1x8x4xf32> to vector<8x4xf32>
    %439 = vector.shape_cast %393 : vector<8x4xf32> to vector<1x1x8x4xf32>
    tpu.vector_store %arg13[%c1_197, %c0_198, %c0_199, %c20_200], %439 {strides = array<i32>} : memref<2x2x8x32xf32, #tpu.memory_space<vmem>>, vector<1x1x8x4xf32>,
    %c1_201 = arith.constant 1 : index
    %c0_202 = arith.constant 0 : index
    %c0_203 = arith.constant 0 : index
    %c24_204 = arith.constant 24 : index
    %440 = vector.load %arg13[%c1_201, %c0_202, %c0_203, %c24_204] : memref<2x2x8x32xf32, #tpu.memory_space<vmem>>, vector<1x1x8x4xf32>
    %441 = vector.shape_cast %440 : vector<1x1x8x4xf32> to vector<8x4xf32>
    %442 = vector.shape_cast %359 : vector<8x4xf32> to vector<1x1x8x4xf32>
    tpu.vector_store %arg13[%c1_201, %c0_202, %c0_203, %c24_204], %442 {strides = array<i32>} : memref<2x2x8x32xf32, #tpu.memory_space<vmem>>, vector<1x1x8x4xf32>,
    %c1_205 = arith.constant 1 : index
    %c0_206 = arith.constant 0 : index
    %c0_207 = arith.constant 0 : index
    %c28_208 = arith.constant 28 : index
    %443 = vector.load %arg13[%c1_205, %c0_206, %c0_207, %c28_208] : memref<2x2x8x32xf32, #tpu.memory_space<vmem>>, vector<1x1x8x4xf32>
    %444 = vector.shape_cast %443 : vector<1x1x8x4xf32> to vector<8x4xf32>
    %445 = vector.shape_cast %421 : vector<8x4xf32> to vector<1x1x8x4xf32>
    tpu.vector_store %arg13[%c1_205, %c0_206, %c0_207, %c28_208], %445 {strides = array<i32>} : memref<2x2x8x32xf32, #tpu.memory_space<vmem>>, vector<1x1x8x4xf32>,
    %c1_209 = arith.constant 1 : index
    %c0_210 = arith.constant 0 : index
    %c0_211 = arith.constant 0 : index
    %446 = vector.load %arg1[%c1_209, %c0_210, %c0_211] : memref<2x8x32xf32, #tpu.memory_space<vmem>>, vector<1x8x32xf32>
    %447 = vector.shape_cast %446 : vector<1x8x32xf32> to vector<8x32xf32>
    %c1_212 = arith.constant 1 : index
    %c0_213 = arith.constant 0 : index
    %c0_214 = arith.constant 0 : index
    %448 = vector.load %arg2[%c1_212, %c0_213, %c0_214] : memref<2x8x32xf32, #tpu.memory_space<vmem>>, vector<1x8x32xf32>
    %449 = vector.shape_cast %448 : vector<1x8x32xf32> to vector<8x32xf32>
    %c1_215 = arith.constant 1 : index
    %c0_216 = arith.constant 0 : index
    %c0_217 = arith.constant 0 : index
    %450 = vector.load %arg3[%c1_215, %c0_216, %c0_217] : memref<2x8x32xf32, #tpu.memory_space<vmem>>, vector<1x8x32xf32>
    %451 = vector.shape_cast %450 : vector<1x8x32xf32> to vector<8x32xf32>
    %c1_218 = arith.constant 1 : index
    %c0_219 = arith.constant 0 : index
    %c0_220 = arith.constant 0 : index
    %452 = vector.load %arg4[%c1_218, %c0_219, %c0_220] : memref<2x8x32xf32, #tpu.memory_space<vmem>>, vector<1x8x32xf32>
    %453 = vector.shape_cast %452 : vector<1x8x32xf32> to vector<8x32xf32>
    %454 = vector.extract_strided_slice %447 {offsets = [7, 0], sizes = [1, 32], strides = [1, 1]} : vector<8x32xf32> to vector<1x32xf32>
    %455 = vector.extract_strided_slice %449 {offsets = [7, 0], sizes = [1, 32], strides = [1, 1]} : vector<8x32xf32> to vector<1x32xf32>
    %456 = vector.extract_strided_slice %451 {offsets = [7, 0], sizes = [1, 32], strides = [1, 1]} : vector<8x32xf32> to vector<1x32xf32>
    %457 = vector.extract_strided_slice %453 {offsets = [7, 0], sizes = [1, 32], strides = [1, 1]} : vector<8x32xf32> to vector<1x32xf32>
    %458 = vector.broadcast %456 : vector<1x32xf32> to vector<4x32xf32>
    %459 = arith.mulf %2, %458 : vector<4x32xf32>
    %cst_221 = arith.constant dense<0.000000e+00> : vector<8x4xf32>
    %460 = tpu.matmul %447, %459, %cst_221 {dimension_numbers = #tpu.dot_dimension_numbers<[1], [1], [0], [0], [0, 0, 1, 0], [], []>} : vector<8x32xf32>, vector<4x32xf32>, vector<8x4xf32> -> vector<8x4xf32>
    %461 = arith.mulf %447, %447 : vector<8x32xf32>
    %cst_222 = arith.constant dense<0.000000e+00> : vector<8x4xf32>
    %462 = tpu.matmul %461, %2, %cst_222 {dimension_numbers = #tpu.dot_dimension_numbers<[1], [1], [0], [0], [0, 0, 1, 0], [], []>} : vector<8x32xf32>, vector<4x32xf32>, vector<8x4xf32> -> vector<8x4xf32>
    %463 = arith.mulf %456, %456 : vector<1x32xf32>
    %cst_223 = arith.constant dense<0.000000e+00> : vector<1x4xf32>
    %464 = tpu.matmul %463, %2, %cst_223 {dimension_numbers = #tpu.dot_dimension_numbers<[1], [1], [0], [0], [0, 0, 1, 0], [], []>} : vector<1x32xf32>, vector<4x32xf32>, vector<1x4xf32> -> vector<1x4xf32>
    %cst_224 = arith.constant 1.000000e-16 : f32
    %465 = vector.broadcast %cst_224 : f32 to vector<8x4xf32>
    %466 = arith.maximumf %462, %465 : vector<8x4xf32>
    %467 = math.rsqrt %466 : vector<8x4xf32>
    %468 = arith.mulf %460, %467 : vector<8x4xf32>
    %cst_225 = arith.constant 1.000000e-16 : f32
    %469 = vector.broadcast %cst_225 : f32 to vector<1x4xf32>
    %470 = arith.maximumf %464, %469 : vector<1x4xf32>
    %471 = math.rsqrt %470 : vector<1x4xf32>
    %472 = vector.broadcast %471 : vector<1x4xf32> to vector<8x4xf32>
    %473 = arith.mulf %468, %472 : vector<8x4xf32>
    %c0_226 = arith.constant 0 : index
    %c1_227 = arith.constant 1 : index
    %c0_228 = arith.constant 0 : index
    %c0_229 = arith.constant 0 : index
    %474 = vector.load %arg13[%c0_226, %c1_227, %c0_228, %c0_229] : memref<2x2x8x32xf32, #tpu.memory_space<vmem>>, vector<1x1x8x4xf32>
    %475 = vector.shape_cast %474 : vector<1x1x8x4xf32> to vector<8x4xf32>
    %476 = vector.shape_cast %473 : vector<8x4xf32> to vector<1x1x8x4xf32>
    tpu.vector_store %arg13[%c0_226, %c1_227, %c0_228, %c0_229], %476 {strides = array<i32>} : memref<2x2x8x32xf32, #tpu.memory_space<vmem>>, vector<1x1x8x4xf32>,
    %477 = vector.broadcast %457 : vector<1x32xf32> to vector<4x32xf32>
    %478 = arith.mulf %5, %477 : vector<4x32xf32>
    %cst_230 = arith.constant dense<0.000000e+00> : vector<8x4xf32>
    %479 = tpu.matmul %449, %478, %cst_230 {dimension_numbers = #tpu.dot_dimension_numbers<[1], [1], [0], [0], [0, 0, 1, 0], [], []>} : vector<8x32xf32>, vector<4x32xf32>, vector<8x4xf32> -> vector<8x4xf32>
    %480 = arith.mulf %449, %449 : vector<8x32xf32>
    %cst_231 = arith.constant dense<0.000000e+00> : vector<8x4xf32>
    %481 = tpu.matmul %480, %5, %cst_231 {dimension_numbers = #tpu.dot_dimension_numbers<[1], [1], [0], [0], [0, 0, 1, 0], [], []>} : vector<8x32xf32>, vector<4x32xf32>, vector<8x4xf32> -> vector<8x4xf32>
    %482 = arith.mulf %457, %457 : vector<1x32xf32>
    %cst_232 = arith.constant dense<0.000000e+00> : vector<1x4xf32>
    %483 = tpu.matmul %482, %5, %cst_232 {dimension_numbers = #tpu.dot_dimension_numbers<[1], [1], [0], [0], [0, 0, 1, 0], [], []>} : vector<1x32xf32>, vector<4x32xf32>, vector<1x4xf32> -> vector<1x4xf32>
    %cst_233 = arith.constant 1.000000e-16 : f32
    %484 = vector.broadcast %cst_233 : f32 to vector<8x4xf32>
    %485 = arith.maximumf %481, %484 : vector<8x4xf32>
    %486 = math.rsqrt %485 : vector<8x4xf32>
    %487 = arith.mulf %479, %486 : vector<8x4xf32>
    %cst_234 = arith.constant 1.000000e-16 : f32
    %488 = vector.broadcast %cst_234 : f32 to vector<1x4xf32>
    %489 = arith.maximumf %483, %488 : vector<1x4xf32>
    %490 = math.rsqrt %489 : vector<1x4xf32>
    %491 = vector.broadcast %490 : vector<1x4xf32> to vector<8x4xf32>
    %492 = arith.mulf %487, %491 : vector<8x4xf32>
    %c0_235 = arith.constant 0 : index
    %c1_236 = arith.constant 1 : index
    %c0_237 = arith.constant 0 : index
    %c4_238 = arith.constant 4 : index
    %493 = vector.load %arg13[%c0_235, %c1_236, %c0_237, %c4_238] : memref<2x2x8x32xf32, #tpu.memory_space<vmem>>, vector<1x1x8x4xf32>
    %494 = vector.shape_cast %493 : vector<1x1x8x4xf32> to vector<8x4xf32>
    %495 = vector.shape_cast %492 : vector<8x4xf32> to vector<1x1x8x4xf32>
    tpu.vector_store %arg13[%c0_235, %c1_236, %c0_237, %c4_238], %495 {strides = array<i32>} : memref<2x2x8x32xf32, #tpu.memory_space<vmem>>, vector<1x1x8x4xf32>,
    %496 = vector.broadcast %454 : vector<1x32xf32> to vector<4x32xf32>
    %497 = arith.mulf %2, %496 : vector<4x32xf32>
    %cst_239 = arith.constant dense<0.000000e+00> : vector<8x4xf32>
    %498 = tpu.matmul %451, %497, %cst_239 {dimension_numbers = #tpu.dot_dimension_numbers<[1], [1], [0], [0], [0, 0, 1, 0], [], []>} : vector<8x32xf32>, vector<4x32xf32>, vector<8x4xf32> -> vector<8x4xf32>
    %499 = arith.mulf %451, %451 : vector<8x32xf32>
    %cst_240 = arith.constant dense<0.000000e+00> : vector<8x4xf32>
    %500 = tpu.matmul %499, %2, %cst_240 {dimension_numbers = #tpu.dot_dimension_numbers<[1], [1], [0], [0], [0, 0, 1, 0], [], []>} : vector<8x32xf32>, vector<4x32xf32>, vector<8x4xf32> -> vector<8x4xf32>
    %501 = arith.mulf %454, %454 : vector<1x32xf32>
    %cst_241 = arith.constant dense<0.000000e+00> : vector<1x4xf32>
    %502 = tpu.matmul %501, %2, %cst_241 {dimension_numbers = #tpu.dot_dimension_numbers<[1], [1], [0], [0], [0, 0, 1, 0], [], []>} : vector<1x32xf32>, vector<4x32xf32>, vector<1x4xf32> -> vector<1x4xf32>
    %cst_242 = arith.constant 1.000000e-16 : f32
    %503 = vector.broadcast %cst_242 : f32 to vector<8x4xf32>
    %504 = arith.maximumf %500, %503 : vector<8x4xf32>
    %505 = math.rsqrt %504 : vector<8x4xf32>
    %506 = arith.mulf %498, %505 : vector<8x4xf32>
    %cst_243 = arith.constant 1.000000e-16 : f32
    %507 = vector.broadcast %cst_243 : f32 to vector<1x4xf32>
    %508 = arith.maximumf %502, %507 : vector<1x4xf32>
    %509 = math.rsqrt %508 : vector<1x4xf32>
    %510 = vector.broadcast %509 : vector<1x4xf32> to vector<8x4xf32>
    %511 = arith.mulf %506, %510 : vector<8x4xf32>
    %c1_244 = arith.constant 1 : index
    %c1_245 = arith.constant 1 : index
    %c0_246 = arith.constant 0 : index
    %c0_247 = arith.constant 0 : index
    %512 = vector.load %arg13[%c1_244, %c1_245, %c0_246, %c0_247] : memref<2x2x8x32xf32, #tpu.memory_space<vmem>>, vector<1x1x8x4xf32>
    %513 = vector.shape_cast %512 : vector<1x1x8x4xf32> to vector<8x4xf32>
    %514 = vector.shape_cast %511 : vector<8x4xf32> to vector<1x1x8x4xf32>
    tpu.vector_store %arg13[%c1_244, %c1_245, %c0_246, %c0_247], %514 {strides = array<i32>} : memref<2x2x8x32xf32, #tpu.memory_space<vmem>>, vector<1x1x8x4xf32>,
    %515 = vector.broadcast %455 : vector<1x32xf32> to vector<4x32xf32>
    %516 = arith.mulf %5, %515 : vector<4x32xf32>
    %cst_248 = arith.constant dense<0.000000e+00> : vector<8x4xf32>
    %517 = tpu.matmul %453, %516, %cst_248 {dimension_numbers = #tpu.dot_dimension_numbers<[1], [1], [0], [0], [0, 0, 1, 0], [], []>} : vector<8x32xf32>, vector<4x32xf32>, vector<8x4xf32> -> vector<8x4xf32>
    %518 = arith.mulf %453, %453 : vector<8x32xf32>
    %cst_249 = arith.constant dense<0.000000e+00> : vector<8x4xf32>
    %519 = tpu.matmul %518, %5, %cst_249 {dimension_numbers = #tpu.dot_dimension_numbers<[1], [1], [0], [0], [0, 0, 1, 0], [], []>} : vector<8x32xf32>, vector<4x32xf32>, vector<8x4xf32> -> vector<8x4xf32>
    %520 = arith.mulf %455, %455 : vector<1x32xf32>
    %cst_250 = arith.constant dense<0.000000e+00> : vector<1x4xf32>
    %521 = tpu.matmul %520, %5, %cst_250 {dimension_numbers = #tpu.dot_dimension_numbers<[1], [1], [0], [0], [0, 0, 1, 0], [], []>} : vector<1x32xf32>, vector<4x32xf32>, vector<1x4xf32> -> vector<1x4xf32>
    %cst_251 = arith.constant 1.000000e-16 : f32
    %522 = vector.broadcast %cst_251 : f32 to vector<8x4xf32>
    %523 = arith.maximumf %519, %522 : vector<8x4xf32>
    %524 = math.rsqrt %523 : vector<8x4xf32>
    %525 = arith.mulf %517, %524 : vector<8x4xf32>
    %cst_252 = arith.constant 1.000000e-16 : f32
    %526 = vector.broadcast %cst_252 : f32 to vector<1x4xf32>
    %527 = arith.maximumf %521, %526 : vector<1x4xf32>
    %528 = math.rsqrt %527 : vector<1x4xf32>
    %529 = vector.broadcast %528 : vector<1x4xf32> to vector<8x4xf32>
    %530 = arith.mulf %525, %529 : vector<8x4xf32>
    %c1_253 = arith.constant 1 : index
    %c1_254 = arith.constant 1 : index
    %c0_255 = arith.constant 0 : index
    %c4_256 = arith.constant 4 : index
    %531 = vector.load %arg13[%c1_253, %c1_254, %c0_255, %c4_256] : memref<2x2x8x32xf32, #tpu.memory_space<vmem>>, vector<1x1x8x4xf32>
    %532 = vector.shape_cast %531 : vector<1x1x8x4xf32> to vector<8x4xf32>
    %533 = vector.shape_cast %530 : vector<8x4xf32> to vector<1x1x8x4xf32>
    tpu.vector_store %arg13[%c1_253, %c1_254, %c0_255, %c4_256], %533 {strides = array<i32>} : memref<2x2x8x32xf32, #tpu.memory_space<vmem>>, vector<1x1x8x4xf32>,
    %534 = vector.shape_cast %8 : vector<4x32xf32> to vector<4x1x32xf32>
    %535 = vector.shape_cast %447 : vector<8x32xf32> to vector<1x8x32xf32>
    %536 = vector.broadcast %534 : vector<4x1x32xf32> to vector<4x8x32xf32>
    %537 = vector.broadcast %535 : vector<1x8x32xf32> to vector<4x8x32xf32>
    %538 = arith.mulf %536, %537 : vector<4x8x32xf32>
    %539 = vector.shape_cast %538 : vector<4x8x32xf32> to vector<32x32xf32>
    %cst_257 = arith.constant dense<0.000000e+00> : vector<32x8xf32>
    %540 = tpu.matmul %539, %451, %cst_257 {dimension_numbers = #tpu.dot_dimension_numbers<[1], [1], [0], [0], [0, 0, 1, 0], [], []>} : vector<32x32xf32>, vector<8x32xf32>, vector<32x8xf32> -> vector<32x8xf32>
    %541 = vector.shape_cast %540 : vector<32x8xf32> to vector<4x8x8xf32>
    %542 = arith.mulf %447, %447 : vector<8x32xf32>
    %cst_258 = arith.constant dense<0.000000e+00> : vector<4x8xf32>
    %543 = tpu.matmul %8, %542, %cst_258 {dimension_numbers = #tpu.dot_dimension_numbers<[1], [1], [0], [0], [0, 0, 1, 0], [], []>} : vector<4x32xf32>, vector<8x32xf32>, vector<4x8xf32> -> vector<4x8xf32>
    %544 = arith.mulf %451, %451 : vector<8x32xf32>
    %cst_259 = arith.constant dense<0.000000e+00> : vector<4x8xf32>
    %545 = tpu.matmul %8, %544, %cst_259 {dimension_numbers = #tpu.dot_dimension_numbers<[1], [1], [0], [0], [0, 0, 1, 0], [], []>} : vector<4x32xf32>, vector<8x32xf32>, vector<4x8xf32> -> vector<4x8xf32>
    %546 = vector.shape_cast %543 : vector<4x8xf32> to vector<4x8x1xf32>
    %547 = vector.shape_cast %545 : vector<4x8xf32> to vector<4x1x8xf32>
    %548 = vector.broadcast %546 : vector<4x8x1xf32> to vector<4x8x8xf32>
    %549 = vector.broadcast %547 : vector<4x1x8xf32> to vector<4x8x8xf32>
    %550 = arith.mulf %548, %549 : vector<4x8x8xf32>
    %cst_260 = arith.constant 1.000000e-16 : f32
    %551 = vector.broadcast %cst_260 : f32 to vector<4x8x8xf32>
    %552 = arith.maximumf %550, %551 : vector<4x8x8xf32>
    %553 = math.rsqrt %552 : vector<4x8x8xf32>
    %554 = arith.mulf %541, %553 : vector<4x8x8xf32>
    %cst_261 = arith.constant dense<0xFF800000> : vector<4x8xf32>
    %555 = vector.multi_reduction <maximumf>, %554, %cst_261 [2] : vector<4x8x8xf32> to vector<4x8xf32>
    %556 = tpu.transpose %555, [1, 0] : vector<4x8xf32> -> vector<8x4xf32>
    %cst_262 = arith.constant dense<0xFF800000> : vector<4x8xf32>
    %557 = vector.multi_reduction <maximumf>, %554, %cst_262 [1] : vector<4x8x8xf32> to vector<4x8xf32>
    %558 = tpu.transpose %557, [1, 0] : vector<4x8xf32> -> vector<8x4xf32>
    %559 = vector.shape_cast %11 : vector<4x32xf32> to vector<4x1x32xf32>
    %560 = vector.shape_cast %449 : vector<8x32xf32> to vector<1x8x32xf32>
    %561 = vector.broadcast %559 : vector<4x1x32xf32> to vector<4x8x32xf32>
    %562 = vector.broadcast %560 : vector<1x8x32xf32> to vector<4x8x32xf32>
    %563 = arith.mulf %561, %562 : vector<4x8x32xf32>
    %564 = vector.shape_cast %563 : vector<4x8x32xf32> to vector<32x32xf32>
    %cst_263 = arith.constant dense<0.000000e+00> : vector<32x8xf32>
    %565 = tpu.matmul %564, %453, %cst_263 {dimension_numbers = #tpu.dot_dimension_numbers<[1], [1], [0], [0], [0, 0, 1, 0], [], []>} : vector<32x32xf32>, vector<8x32xf32>, vector<32x8xf32> -> vector<32x8xf32>
    %566 = vector.shape_cast %565 : vector<32x8xf32> to vector<4x8x8xf32>
    %567 = arith.mulf %449, %449 : vector<8x32xf32>
    %cst_264 = arith.constant dense<0.000000e+00> : vector<4x8xf32>
    %568 = tpu.matmul %11, %567, %cst_264 {dimension_numbers = #tpu.dot_dimension_numbers<[1], [1], [0], [0], [0, 0, 1, 0], [], []>} : vector<4x32xf32>, vector<8x32xf32>, vector<4x8xf32> -> vector<4x8xf32>
    %569 = arith.mulf %453, %453 : vector<8x32xf32>
    %cst_265 = arith.constant dense<0.000000e+00> : vector<4x8xf32>
    %570 = tpu.matmul %11, %569, %cst_265 {dimension_numbers = #tpu.dot_dimension_numbers<[1], [1], [0], [0], [0, 0, 1, 0], [], []>} : vector<4x32xf32>, vector<8x32xf32>, vector<4x8xf32> -> vector<4x8xf32>
    %571 = vector.shape_cast %568 : vector<4x8xf32> to vector<4x8x1xf32>
    %572 = vector.shape_cast %570 : vector<4x8xf32> to vector<4x1x8xf32>
    %573 = vector.broadcast %571 : vector<4x8x1xf32> to vector<4x8x8xf32>
    %574 = vector.broadcast %572 : vector<4x1x8xf32> to vector<4x8x8xf32>
    %575 = arith.mulf %573, %574 : vector<4x8x8xf32>
    %cst_266 = arith.constant 1.000000e-16 : f32
    %576 = vector.broadcast %cst_266 : f32 to vector<4x8x8xf32>
    %577 = arith.maximumf %575, %576 : vector<4x8x8xf32>
    %578 = math.rsqrt %577 : vector<4x8x8xf32>
    %579 = arith.mulf %566, %578 : vector<4x8x8xf32>
    %cst_267 = arith.constant dense<0xFF800000> : vector<4x8xf32>
    %580 = vector.multi_reduction <maximumf>, %579, %cst_267 [2] : vector<4x8x8xf32> to vector<4x8xf32>
    %581 = tpu.transpose %580, [1, 0] : vector<4x8xf32> -> vector<8x4xf32>
    %cst_268 = arith.constant dense<0xFF800000> : vector<4x8xf32>
    %582 = vector.multi_reduction <maximumf>, %579, %cst_268 [1] : vector<4x8x8xf32> to vector<4x8xf32>
    %583 = tpu.transpose %582, [1, 0] : vector<4x8xf32> -> vector<8x4xf32>
    %c0_269 = arith.constant 0 : index
    %c1_270 = arith.constant 1 : index
    %c0_271 = arith.constant 0 : index
    %c8_272 = arith.constant 8 : index
    %584 = vector.load %arg13[%c0_269, %c1_270, %c0_271, %c8_272] : memref<2x2x8x32xf32, #tpu.memory_space<vmem>>, vector<1x1x8x4xf32>
    %585 = vector.shape_cast %584 : vector<1x1x8x4xf32> to vector<8x4xf32>
    %586 = vector.shape_cast %556 : vector<8x4xf32> to vector<1x1x8x4xf32>
    tpu.vector_store %arg13[%c0_269, %c1_270, %c0_271, %c8_272], %586 {strides = array<i32>} : memref<2x2x8x32xf32, #tpu.memory_space<vmem>>, vector<1x1x8x4xf32>,
    %c0_273 = arith.constant 0 : index
    %c1_274 = arith.constant 1 : index
    %c0_275 = arith.constant 0 : index
    %c12_276 = arith.constant 12 : index
    %587 = vector.load %arg13[%c0_273, %c1_274, %c0_275, %c12_276] : memref<2x2x8x32xf32, #tpu.memory_space<vmem>>, vector<1x1x8x4xf32>
    %588 = vector.shape_cast %587 : vector<1x1x8x4xf32> to vector<8x4xf32>
    %589 = vector.shape_cast %581 : vector<8x4xf32> to vector<1x1x8x4xf32>
    tpu.vector_store %arg13[%c0_273, %c1_274, %c0_275, %c12_276], %589 {strides = array<i32>} : memref<2x2x8x32xf32, #tpu.memory_space<vmem>>, vector<1x1x8x4xf32>,
    %c1_277 = arith.constant 1 : index
    %c1_278 = arith.constant 1 : index
    %c0_279 = arith.constant 0 : index
    %c8_280 = arith.constant 8 : index
    %590 = vector.load %arg13[%c1_277, %c1_278, %c0_279, %c8_280] : memref<2x2x8x32xf32, #tpu.memory_space<vmem>>, vector<1x1x8x4xf32>
    %591 = vector.shape_cast %590 : vector<1x1x8x4xf32> to vector<8x4xf32>
    %592 = vector.shape_cast %558 : vector<8x4xf32> to vector<1x1x8x4xf32>
    tpu.vector_store %arg13[%c1_277, %c1_278, %c0_279, %c8_280], %592 {strides = array<i32>} : memref<2x2x8x32xf32, #tpu.memory_space<vmem>>, vector<1x1x8x4xf32>,
    %c1_281 = arith.constant 1 : index
    %c1_282 = arith.constant 1 : index
    %c0_283 = arith.constant 0 : index
    %c12_284 = arith.constant 12 : index
    %593 = vector.load %arg13[%c1_281, %c1_282, %c0_283, %c12_284] : memref<2x2x8x32xf32, #tpu.memory_space<vmem>>, vector<1x1x8x4xf32>
    %594 = vector.shape_cast %593 : vector<1x1x8x4xf32> to vector<8x4xf32>
    %595 = vector.shape_cast %583 : vector<8x4xf32> to vector<1x1x8x4xf32>
    tpu.vector_store %arg13[%c1_281, %c1_282, %c0_283, %c12_284], %595 {strides = array<i32>} : memref<2x2x8x32xf32, #tpu.memory_space<vmem>>, vector<1x1x8x4xf32>,
    %cst_285 = arith.constant dense<0.000000e+00> : vector<8x8xf32>
    %596 = tpu.matmul %447, %451, %cst_285 {dimension_numbers = #tpu.dot_dimension_numbers<[1], [1], [0], [0], [0, 0, 1, 0], [], []>} : vector<8x32xf32>, vector<8x32xf32>, vector<8x8xf32> -> vector<8x8xf32>
    %597 = arith.mulf %447, %447 : vector<8x32xf32>
    %cst_286 = arith.constant dense<0.000000e+00> : vector<8xf32>
    %598 = vector.multi_reduction <add>, %597, %cst_286 [1] : vector<8x32xf32> to vector<8xf32>
    %599 = vector.shape_cast %598 : vector<8xf32> to vector<8x1xf32>
    %600 = arith.mulf %451, %451 : vector<8x32xf32>
    %cst_287 = arith.constant dense<0.000000e+00> : vector<8xf32>
    %601 = vector.multi_reduction <add>, %600, %cst_287 [1] : vector<8x32xf32> to vector<8xf32>
    %602 = vector.shape_cast %601 : vector<8xf32> to vector<8x1xf32>
    %603 = tpu.transpose %602, [1, 0] : vector<8x1xf32> -> vector<1x8xf32>
    %604 = vector.broadcast %599 : vector<8x1xf32> to vector<8x8xf32>
    %605 = vector.broadcast %603 : vector<1x8xf32> to vector<8x8xf32>
    %606 = arith.mulf %604, %605 : vector<8x8xf32>
    %cst_288 = arith.constant 1.000000e-16 : f32
    %607 = vector.broadcast %cst_288 : f32 to vector<8x8xf32>
    %608 = arith.maximumf %606, %607 : vector<8x8xf32>
    %609 = math.rsqrt %608 : vector<8x8xf32>
    %610 = arith.mulf %596, %609 : vector<8x8xf32>
    %cst_289 = arith.constant dense<0.000000e+00> : vector<8x32xf32>
    %611 = tpu.matmul %610, %451, %cst_289 {dimension_numbers = #tpu.dot_dimension_numbers<[1], [0], [0], [1], [0, 0, 1, 1], [], []>} : vector<8x8xf32>, vector<8x32xf32>, vector<8x32xf32> -> vector<8x32xf32>
    %cst_290 = arith.constant dense<0.000000e+00> : vector<8xf32>
    %612 = vector.multi_reduction <add>, %610, %cst_290 [1] : vector<8x8xf32> to vector<8xf32>
    %613 = vector.shape_cast %612 : vector<8xf32> to vector<8x1xf32>
    %614 = vector.broadcast %613 : vector<8x1xf32> to vector<8x32xf32>
    %615 = arith.divf %611, %614 : vector<8x32xf32>
    %616 = arith.mulf %615, %447 : vector<8x32xf32>
    %cst_291 = arith.constant dense<0.000000e+00> : vector<8x4xf32>
    %617 = tpu.matmul %616, %14, %cst_291 {dimension_numbers = #tpu.dot_dimension_numbers<[1], [1], [0], [0], [0, 0, 1, 0], [], []>} : vector<8x32xf32>, vector<4x32xf32>, vector<8x4xf32> -> vector<8x4xf32>
    %618 = arith.mulf %615, %615 : vector<8x32xf32>
    %cst_292 = arith.constant dense<0.000000e+00> : vector<8x4xf32>
    %619 = tpu.matmul %618, %14, %cst_292 {dimension_numbers = #tpu.dot_dimension_numbers<[1], [1], [0], [0], [0, 0, 1, 0], [], []>} : vector<8x32xf32>, vector<4x32xf32>, vector<8x4xf32> -> vector<8x4xf32>
    %620 = arith.mulf %447, %447 : vector<8x32xf32>
    %cst_293 = arith.constant dense<0.000000e+00> : vector<8x4xf32>
    %621 = tpu.matmul %620, %14, %cst_293 {dimension_numbers = #tpu.dot_dimension_numbers<[1], [1], [0], [0], [0, 0, 1, 0], [], []>} : vector<8x32xf32>, vector<4x32xf32>, vector<8x4xf32> -> vector<8x4xf32>
    %cst_294 = arith.constant 1.000000e-16 : f32
    %622 = vector.broadcast %cst_294 : f32 to vector<8x4xf32>
    %623 = arith.maximumf %619, %622 : vector<8x4xf32>
    %624 = math.rsqrt %623 : vector<8x4xf32>
    %625 = arith.mulf %617, %624 : vector<8x4xf32>
    %cst_295 = arith.constant 1.000000e-16 : f32
    %626 = vector.broadcast %cst_295 : f32 to vector<8x4xf32>
    %627 = arith.maximumf %621, %626 : vector<8x4xf32>
    %628 = math.rsqrt %627 : vector<8x4xf32>
    %629 = arith.mulf %625, %628 : vector<8x4xf32>
    %cst_296 = arith.constant dense<0xFF800000> : vector<8xf32>
    %630 = vector.multi_reduction <maximumf>, %610, %cst_296 [1] : vector<8x8xf32> to vector<8xf32>
    %631 = vector.shape_cast %630 : vector<8xf32> to vector<8x1xf32>
    %632 = tpu.iota {dimensions = array<i32: 1>} : vector<8x8xi32>
    %633 = vector.broadcast %631 : vector<8x1xf32> to vector<8x8xf32>
    %634 = arith.cmpf oeq, %610, %633 : vector<8x8xf32>
    %c8_i32_297 = arith.constant 8 : i32
    %635 = vector.broadcast %c8_i32_297 : i32 to vector<8x8xi32>
    %636 = arith.select %634, %632, %635 : vector<8x8xi1>, vector<8x8xi32>
    %cst_298 = arith.constant dense<2147483647> : vector<8xi32>
    %637 = vector.multi_reduction <minsi>, %636, %cst_298 [1] : vector<8x8xi32> to vector<8xi32>
    %638 = vector.shape_cast %637 : vector<8xi32> to vector<8x1xi32>
    %639 = vector.broadcast %638 : vector<8x1xi32> to vector<8x8xi32>
    %640 = arith.cmpi eq, %632, %639 : vector<8x8xi32>
    %641 = arith.extui %640 : vector<8x8xi1> to vector<8x8xi32>
    %642 = arith.sitofp %641 : vector<8x8xi32> to vector<8x8xf32>
    %cst_299 = arith.constant dense<0.000000e+00> : vector<8x32xf32>
    %643 = tpu.matmul %642, %451, %cst_299 {dimension_numbers = #tpu.dot_dimension_numbers<[1], [0], [0], [1], [0, 0, 1, 1], [], []>} : vector<8x8xf32>, vector<8x32xf32>, vector<8x32xf32> -> vector<8x32xf32>
    %644 = arith.mulf %643, %447 : vector<8x32xf32>
    %cst_300 = arith.constant dense<0.000000e+00> : vector<8x4xf32>
    %645 = tpu.matmul %644, %20, %cst_300 {dimension_numbers = #tpu.dot_dimension_numbers<[1], [1], [0], [0], [0, 0, 1, 0], [], []>} : vector<8x32xf32>, vector<4x32xf32>, vector<8x4xf32> -> vector<8x4xf32>
    %646 = arith.mulf %643, %643 : vector<8x32xf32>
    %cst_301 = arith.constant dense<0.000000e+00> : vector<8x4xf32>
    %647 = tpu.matmul %646, %20, %cst_301 {dimension_numbers = #tpu.dot_dimension_numbers<[1], [1], [0], [0], [0, 0, 1, 0], [], []>} : vector<8x32xf32>, vector<4x32xf32>, vector<8x4xf32> -> vector<8x4xf32>
    %648 = arith.mulf %447, %447 : vector<8x32xf32>
    %cst_302 = arith.constant dense<0.000000e+00> : vector<8x4xf32>
    %649 = tpu.matmul %648, %20, %cst_302 {dimension_numbers = #tpu.dot_dimension_numbers<[1], [1], [0], [0], [0, 0, 1, 0], [], []>} : vector<8x32xf32>, vector<4x32xf32>, vector<8x4xf32> -> vector<8x4xf32>
    %cst_303 = arith.constant 1.000000e-16 : f32
    %650 = vector.broadcast %cst_303 : f32 to vector<8x4xf32>
    %651 = arith.maximumf %647, %650 : vector<8x4xf32>
    %652 = math.rsqrt %651 : vector<8x4xf32>
    %653 = arith.mulf %645, %652 : vector<8x4xf32>
    %cst_304 = arith.constant 1.000000e-16 : f32
    %654 = vector.broadcast %cst_304 : f32 to vector<8x4xf32>
    %655 = arith.maximumf %649, %654 : vector<8x4xf32>
    %656 = math.rsqrt %655 : vector<8x4xf32>
    %657 = arith.mulf %653, %656 : vector<8x4xf32>
    %cst_305 = arith.constant dense<0.000000e+00> : vector<8x8xf32>
    %658 = tpu.matmul %449, %453, %cst_305 {dimension_numbers = #tpu.dot_dimension_numbers<[1], [1], [0], [0], [0, 0, 1, 0], [], []>} : vector<8x32xf32>, vector<8x32xf32>, vector<8x8xf32> -> vector<8x8xf32>
    %659 = arith.mulf %449, %449 : vector<8x32xf32>
    %cst_306 = arith.constant dense<0.000000e+00> : vector<8xf32>
    %660 = vector.multi_reduction <add>, %659, %cst_306 [1] : vector<8x32xf32> to vector<8xf32>
    %661 = vector.shape_cast %660 : vector<8xf32> to vector<8x1xf32>
    %662 = arith.mulf %453, %453 : vector<8x32xf32>
    %cst_307 = arith.constant dense<0.000000e+00> : vector<8xf32>
    %663 = vector.multi_reduction <add>, %662, %cst_307 [1] : vector<8x32xf32> to vector<8xf32>
    %664 = vector.shape_cast %663 : vector<8xf32> to vector<8x1xf32>
    %665 = tpu.transpose %664, [1, 0] : vector<8x1xf32> -> vector<1x8xf32>
    %666 = vector.broadcast %661 : vector<8x1xf32> to vector<8x8xf32>
    %667 = vector.broadcast %665 : vector<1x8xf32> to vector<8x8xf32>
    %668 = arith.mulf %666, %667 : vector<8x8xf32>
    %cst_308 = arith.constant 1.000000e-16 : f32
    %669 = vector.broadcast %cst_308 : f32 to vector<8x8xf32>
    %670 = arith.maximumf %668, %669 : vector<8x8xf32>
    %671 = math.rsqrt %670 : vector<8x8xf32>
    %672 = arith.mulf %658, %671 : vector<8x8xf32>
    %cst_309 = arith.constant dense<0.000000e+00> : vector<8x32xf32>
    %673 = tpu.matmul %672, %453, %cst_309 {dimension_numbers = #tpu.dot_dimension_numbers<[1], [0], [0], [1], [0, 0, 1, 1], [], []>} : vector<8x8xf32>, vector<8x32xf32>, vector<8x32xf32> -> vector<8x32xf32>
    %cst_310 = arith.constant dense<0.000000e+00> : vector<8xf32>
    %674 = vector.multi_reduction <add>, %672, %cst_310 [1] : vector<8x8xf32> to vector<8xf32>
    %675 = vector.shape_cast %674 : vector<8xf32> to vector<8x1xf32>
    %676 = vector.broadcast %675 : vector<8x1xf32> to vector<8x32xf32>
    %677 = arith.divf %673, %676 : vector<8x32xf32>
    %678 = arith.mulf %677, %449 : vector<8x32xf32>
    %cst_311 = arith.constant dense<0.000000e+00> : vector<8x4xf32>
    %679 = tpu.matmul %678, %17, %cst_311 {dimension_numbers = #tpu.dot_dimension_numbers<[1], [1], [0], [0], [0, 0, 1, 0], [], []>} : vector<8x32xf32>, vector<4x32xf32>, vector<8x4xf32> -> vector<8x4xf32>
    %680 = arith.mulf %677, %677 : vector<8x32xf32>
    %cst_312 = arith.constant dense<0.000000e+00> : vector<8x4xf32>
    %681 = tpu.matmul %680, %17, %cst_312 {dimension_numbers = #tpu.dot_dimension_numbers<[1], [1], [0], [0], [0, 0, 1, 0], [], []>} : vector<8x32xf32>, vector<4x32xf32>, vector<8x4xf32> -> vector<8x4xf32>
    %682 = arith.mulf %449, %449 : vector<8x32xf32>
    %cst_313 = arith.constant dense<0.000000e+00> : vector<8x4xf32>
    %683 = tpu.matmul %682, %17, %cst_313 {dimension_numbers = #tpu.dot_dimension_numbers<[1], [1], [0], [0], [0, 0, 1, 0], [], []>} : vector<8x32xf32>, vector<4x32xf32>, vector<8x4xf32> -> vector<8x4xf32>
    %cst_314 = arith.constant 1.000000e-16 : f32
    %684 = vector.broadcast %cst_314 : f32 to vector<8x4xf32>
    %685 = arith.maximumf %681, %684 : vector<8x4xf32>
    %686 = math.rsqrt %685 : vector<8x4xf32>
    %687 = arith.mulf %679, %686 : vector<8x4xf32>
    %cst_315 = arith.constant 1.000000e-16 : f32
    %688 = vector.broadcast %cst_315 : f32 to vector<8x4xf32>
    %689 = arith.maximumf %683, %688 : vector<8x4xf32>
    %690 = math.rsqrt %689 : vector<8x4xf32>
    %691 = arith.mulf %687, %690 : vector<8x4xf32>
    %cst_316 = arith.constant dense<0xFF800000> : vector<8xf32>
    %692 = vector.multi_reduction <maximumf>, %672, %cst_316 [1] : vector<8x8xf32> to vector<8xf32>
    %693 = vector.shape_cast %692 : vector<8xf32> to vector<8x1xf32>
    %694 = tpu.iota {dimensions = array<i32: 1>} : vector<8x8xi32>
    %695 = vector.broadcast %693 : vector<8x1xf32> to vector<8x8xf32>
    %696 = arith.cmpf oeq, %672, %695 : vector<8x8xf32>
    %c8_i32_317 = arith.constant 8 : i32
    %697 = vector.broadcast %c8_i32_317 : i32 to vector<8x8xi32>
    %698 = arith.select %696, %694, %697 : vector<8x8xi1>, vector<8x8xi32>
    %cst_318 = arith.constant dense<2147483647> : vector<8xi32>
    %699 = vector.multi_reduction <minsi>, %698, %cst_318 [1] : vector<8x8xi32> to vector<8xi32>
    %700 = vector.shape_cast %699 : vector<8xi32> to vector<8x1xi32>
    %701 = vector.broadcast %700 : vector<8x1xi32> to vector<8x8xi32>
    %702 = arith.cmpi eq, %694, %701 : vector<8x8xi32>
    %703 = arith.extui %702 : vector<8x8xi1> to vector<8x8xi32>
    %704 = arith.sitofp %703 : vector<8x8xi32> to vector<8x8xf32>
    %cst_319 = arith.constant dense<0.000000e+00> : vector<8x32xf32>
    %705 = tpu.matmul %704, %453, %cst_319 {dimension_numbers = #tpu.dot_dimension_numbers<[1], [0], [0], [1], [0, 0, 1, 1], [], []>} : vector<8x8xf32>, vector<8x32xf32>, vector<8x32xf32> -> vector<8x32xf32>
    %706 = arith.mulf %705, %449 : vector<8x32xf32>
    %cst_320 = arith.constant dense<0.000000e+00> : vector<8x4xf32>
    %707 = tpu.matmul %706, %23, %cst_320 {dimension_numbers = #tpu.dot_dimension_numbers<[1], [1], [0], [0], [0, 0, 1, 0], [], []>} : vector<8x32xf32>, vector<4x32xf32>, vector<8x4xf32> -> vector<8x4xf32>
    %708 = arith.mulf %705, %705 : vector<8x32xf32>
    %cst_321 = arith.constant dense<0.000000e+00> : vector<8x4xf32>
    %709 = tpu.matmul %708, %23, %cst_321 {dimension_numbers = #tpu.dot_dimension_numbers<[1], [1], [0], [0], [0, 0, 1, 0], [], []>} : vector<8x32xf32>, vector<4x32xf32>, vector<8x4xf32> -> vector<8x4xf32>
    %710 = arith.mulf %449, %449 : vector<8x32xf32>
    %cst_322 = arith.constant dense<0.000000e+00> : vector<8x4xf32>
    %711 = tpu.matmul %710, %23, %cst_322 {dimension_numbers = #tpu.dot_dimension_numbers<[1], [1], [0], [0], [0, 0, 1, 0], [], []>} : vector<8x32xf32>, vector<4x32xf32>, vector<8x4xf32> -> vector<8x4xf32>
    %cst_323 = arith.constant 1.000000e-16 : f32
    %712 = vector.broadcast %cst_323 : f32 to vector<8x4xf32>
    %713 = arith.maximumf %709, %712 : vector<8x4xf32>
    %714 = math.rsqrt %713 : vector<8x4xf32>
    %715 = arith.mulf %707, %714 : vector<8x4xf32>
    %cst_324 = arith.constant 1.000000e-16 : f32
    %716 = vector.broadcast %cst_324 : f32 to vector<8x4xf32>
    %717 = arith.maximumf %711, %716 : vector<8x4xf32>
    %718 = math.rsqrt %717 : vector<8x4xf32>
    %719 = arith.mulf %715, %718 : vector<8x4xf32>
    %cst_325 = arith.constant dense<0.000000e+00> : vector<8x8xf32>
    %720 = tpu.matmul %451, %447, %cst_325 {dimension_numbers = #tpu.dot_dimension_numbers<[1], [1], [0], [0], [0, 0, 1, 0], [], []>} : vector<8x32xf32>, vector<8x32xf32>, vector<8x8xf32> -> vector<8x8xf32>
    %721 = arith.mulf %451, %451 : vector<8x32xf32>
    %cst_326 = arith.constant dense<0.000000e+00> : vector<8xf32>
    %722 = vector.multi_reduction <add>, %721, %cst_326 [1] : vector<8x32xf32> to vector<8xf32>
    %723 = vector.shape_cast %722 : vector<8xf32> to vector<8x1xf32>
    %724 = arith.mulf %447, %447 : vector<8x32xf32>
    %cst_327 = arith.constant dense<0.000000e+00> : vector<8xf32>
    %725 = vector.multi_reduction <add>, %724, %cst_327 [1] : vector<8x32xf32> to vector<8xf32>
    %726 = vector.shape_cast %725 : vector<8xf32> to vector<8x1xf32>
    %727 = tpu.transpose %726, [1, 0] : vector<8x1xf32> -> vector<1x8xf32>
    %728 = vector.broadcast %723 : vector<8x1xf32> to vector<8x8xf32>
    %729 = vector.broadcast %727 : vector<1x8xf32> to vector<8x8xf32>
    %730 = arith.mulf %728, %729 : vector<8x8xf32>
    %cst_328 = arith.constant 1.000000e-16 : f32
    %731 = vector.broadcast %cst_328 : f32 to vector<8x8xf32>
    %732 = arith.maximumf %730, %731 : vector<8x8xf32>
    %733 = math.rsqrt %732 : vector<8x8xf32>
    %734 = arith.mulf %720, %733 : vector<8x8xf32>
    %cst_329 = arith.constant dense<0.000000e+00> : vector<8x32xf32>
    %735 = tpu.matmul %734, %447, %cst_329 {dimension_numbers = #tpu.dot_dimension_numbers<[1], [0], [0], [1], [0, 0, 1, 1], [], []>} : vector<8x8xf32>, vector<8x32xf32>, vector<8x32xf32> -> vector<8x32xf32>
    %cst_330 = arith.constant dense<0.000000e+00> : vector<8xf32>
    %736 = vector.multi_reduction <add>, %734, %cst_330 [1] : vector<8x8xf32> to vector<8xf32>
    %737 = vector.shape_cast %736 : vector<8xf32> to vector<8x1xf32>
    %738 = vector.broadcast %737 : vector<8x1xf32> to vector<8x32xf32>
    %739 = arith.divf %735, %738 : vector<8x32xf32>
    %740 = arith.mulf %739, %451 : vector<8x32xf32>
    %cst_331 = arith.constant dense<0.000000e+00> : vector<8x4xf32>
    %741 = tpu.matmul %740, %14, %cst_331 {dimension_numbers = #tpu.dot_dimension_numbers<[1], [1], [0], [0], [0, 0, 1, 0], [], []>} : vector<8x32xf32>, vector<4x32xf32>, vector<8x4xf32> -> vector<8x4xf32>
    %742 = arith.mulf %739, %739 : vector<8x32xf32>
    %cst_332 = arith.constant dense<0.000000e+00> : vector<8x4xf32>
    %743 = tpu.matmul %742, %14, %cst_332 {dimension_numbers = #tpu.dot_dimension_numbers<[1], [1], [0], [0], [0, 0, 1, 0], [], []>} : vector<8x32xf32>, vector<4x32xf32>, vector<8x4xf32> -> vector<8x4xf32>
    %744 = arith.mulf %451, %451 : vector<8x32xf32>
    %cst_333 = arith.constant dense<0.000000e+00> : vector<8x4xf32>
    %745 = tpu.matmul %744, %14, %cst_333 {dimension_numbers = #tpu.dot_dimension_numbers<[1], [1], [0], [0], [0, 0, 1, 0], [], []>} : vector<8x32xf32>, vector<4x32xf32>, vector<8x4xf32> -> vector<8x4xf32>
    %cst_334 = arith.constant 1.000000e-16 : f32
    %746 = vector.broadcast %cst_334 : f32 to vector<8x4xf32>
    %747 = arith.maximumf %743, %746 : vector<8x4xf32>
    %748 = math.rsqrt %747 : vector<8x4xf32>
    %749 = arith.mulf %741, %748 : vector<8x4xf32>
    %cst_335 = arith.constant 1.000000e-16 : f32
    %750 = vector.broadcast %cst_335 : f32 to vector<8x4xf32>
    %751 = arith.maximumf %745, %750 : vector<8x4xf32>
    %752 = math.rsqrt %751 : vector<8x4xf32>
    %753 = arith.mulf %749, %752 : vector<8x4xf32>
    %cst_336 = arith.constant dense<0xFF800000> : vector<8xf32>
    %754 = vector.multi_reduction <maximumf>, %734, %cst_336 [1] : vector<8x8xf32> to vector<8xf32>
    %755 = vector.shape_cast %754 : vector<8xf32> to vector<8x1xf32>
    %756 = tpu.iota {dimensions = array<i32: 1>} : vector<8x8xi32>
    %757 = vector.broadcast %755 : vector<8x1xf32> to vector<8x8xf32>
    %758 = arith.cmpf oeq, %734, %757 : vector<8x8xf32>
    %c8_i32_337 = arith.constant 8 : i32
    %759 = vector.broadcast %c8_i32_337 : i32 to vector<8x8xi32>
    %760 = arith.select %758, %756, %759 : vector<8x8xi1>, vector<8x8xi32>
    %cst_338 = arith.constant dense<2147483647> : vector<8xi32>
    %761 = vector.multi_reduction <minsi>, %760, %cst_338 [1] : vector<8x8xi32> to vector<8xi32>
    %762 = vector.shape_cast %761 : vector<8xi32> to vector<8x1xi32>
    %763 = vector.broadcast %762 : vector<8x1xi32> to vector<8x8xi32>
    %764 = arith.cmpi eq, %756, %763 : vector<8x8xi32>
    %765 = arith.extui %764 : vector<8x8xi1> to vector<8x8xi32>
    %766 = arith.sitofp %765 : vector<8x8xi32> to vector<8x8xf32>
    %cst_339 = arith.constant dense<0.000000e+00> : vector<8x32xf32>
    %767 = tpu.matmul %766, %447, %cst_339 {dimension_numbers = #tpu.dot_dimension_numbers<[1], [0], [0], [1], [0, 0, 1, 1], [], []>} : vector<8x8xf32>, vector<8x32xf32>, vector<8x32xf32> -> vector<8x32xf32>
    %768 = arith.mulf %767, %451 : vector<8x32xf32>
    %cst_340 = arith.constant dense<0.000000e+00> : vector<8x4xf32>
    %769 = tpu.matmul %768, %20, %cst_340 {dimension_numbers = #tpu.dot_dimension_numbers<[1], [1], [0], [0], [0, 0, 1, 0], [], []>} : vector<8x32xf32>, vector<4x32xf32>, vector<8x4xf32> -> vector<8x4xf32>
    %770 = arith.mulf %767, %767 : vector<8x32xf32>
    %cst_341 = arith.constant dense<0.000000e+00> : vector<8x4xf32>
    %771 = tpu.matmul %770, %20, %cst_341 {dimension_numbers = #tpu.dot_dimension_numbers<[1], [1], [0], [0], [0, 0, 1, 0], [], []>} : vector<8x32xf32>, vector<4x32xf32>, vector<8x4xf32> -> vector<8x4xf32>
    %772 = arith.mulf %451, %451 : vector<8x32xf32>
    %cst_342 = arith.constant dense<0.000000e+00> : vector<8x4xf32>
    %773 = tpu.matmul %772, %20, %cst_342 {dimension_numbers = #tpu.dot_dimension_numbers<[1], [1], [0], [0], [0, 0, 1, 0], [], []>} : vector<8x32xf32>, vector<4x32xf32>, vector<8x4xf32> -> vector<8x4xf32>
    %cst_343 = arith.constant 1.000000e-16 : f32
    %774 = vector.broadcast %cst_343 : f32 to vector<8x4xf32>
    %775 = arith.maximumf %771, %774 : vector<8x4xf32>
    %776 = math.rsqrt %775 : vector<8x4xf32>
    %777 = arith.mulf %769, %776 : vector<8x4xf32>
    %cst_344 = arith.constant 1.000000e-16 : f32
    %778 = vector.broadcast %cst_344 : f32 to vector<8x4xf32>
    %779 = arith.maximumf %773, %778 : vector<8x4xf32>
    %780 = math.rsqrt %779 : vector<8x4xf32>
    %781 = arith.mulf %777, %780 : vector<8x4xf32>
    %cst_345 = arith.constant dense<0.000000e+00> : vector<8x8xf32>
    %782 = tpu.matmul %453, %449, %cst_345 {dimension_numbers = #tpu.dot_dimension_numbers<[1], [1], [0], [0], [0, 0, 1, 0], [], []>} : vector<8x32xf32>, vector<8x32xf32>, vector<8x8xf32> -> vector<8x8xf32>
    %783 = arith.mulf %453, %453 : vector<8x32xf32>
    %cst_346 = arith.constant dense<0.000000e+00> : vector<8xf32>
    %784 = vector.multi_reduction <add>, %783, %cst_346 [1] : vector<8x32xf32> to vector<8xf32>
    %785 = vector.shape_cast %784 : vector<8xf32> to vector<8x1xf32>
    %786 = arith.mulf %449, %449 : vector<8x32xf32>
    %cst_347 = arith.constant dense<0.000000e+00> : vector<8xf32>
    %787 = vector.multi_reduction <add>, %786, %cst_347 [1] : vector<8x32xf32> to vector<8xf32>
    %788 = vector.shape_cast %787 : vector<8xf32> to vector<8x1xf32>
    %789 = tpu.transpose %788, [1, 0] : vector<8x1xf32> -> vector<1x8xf32>
    %790 = vector.broadcast %785 : vector<8x1xf32> to vector<8x8xf32>
    %791 = vector.broadcast %789 : vector<1x8xf32> to vector<8x8xf32>
    %792 = arith.mulf %790, %791 : vector<8x8xf32>
    %cst_348 = arith.constant 1.000000e-16 : f32
    %793 = vector.broadcast %cst_348 : f32 to vector<8x8xf32>
    %794 = arith.maximumf %792, %793 : vector<8x8xf32>
    %795 = math.rsqrt %794 : vector<8x8xf32>
    %796 = arith.mulf %782, %795 : vector<8x8xf32>
    %cst_349 = arith.constant dense<0.000000e+00> : vector<8x32xf32>
    %797 = tpu.matmul %796, %449, %cst_349 {dimension_numbers = #tpu.dot_dimension_numbers<[1], [0], [0], [1], [0, 0, 1, 1], [], []>} : vector<8x8xf32>, vector<8x32xf32>, vector<8x32xf32> -> vector<8x32xf32>
    %cst_350 = arith.constant dense<0.000000e+00> : vector<8xf32>
    %798 = vector.multi_reduction <add>, %796, %cst_350 [1] : vector<8x8xf32> to vector<8xf32>
    %799 = vector.shape_cast %798 : vector<8xf32> to vector<8x1xf32>
    %800 = vector.broadcast %799 : vector<8x1xf32> to vector<8x32xf32>
    %801 = arith.divf %797, %800 : vector<8x32xf32>
    %802 = arith.mulf %801, %453 : vector<8x32xf32>
    %cst_351 = arith.constant dense<0.000000e+00> : vector<8x4xf32>
    %803 = tpu.matmul %802, %17, %cst_351 {dimension_numbers = #tpu.dot_dimension_numbers<[1], [1], [0], [0], [0, 0, 1, 0], [], []>} : vector<8x32xf32>, vector<4x32xf32>, vector<8x4xf32> -> vector<8x4xf32>
    %804 = arith.mulf %801, %801 : vector<8x32xf32>
    %cst_352 = arith.constant dense<0.000000e+00> : vector<8x4xf32>
    %805 = tpu.matmul %804, %17, %cst_352 {dimension_numbers = #tpu.dot_dimension_numbers<[1], [1], [0], [0], [0, 0, 1, 0], [], []>} : vector<8x32xf32>, vector<4x32xf32>, vector<8x4xf32> -> vector<8x4xf32>
    %806 = arith.mulf %453, %453 : vector<8x32xf32>
    %cst_353 = arith.constant dense<0.000000e+00> : vector<8x4xf32>
    %807 = tpu.matmul %806, %17, %cst_353 {dimension_numbers = #tpu.dot_dimension_numbers<[1], [1], [0], [0], [0, 0, 1, 0], [], []>} : vector<8x32xf32>, vector<4x32xf32>, vector<8x4xf32> -> vector<8x4xf32>
    %cst_354 = arith.constant 1.000000e-16 : f32
    %808 = vector.broadcast %cst_354 : f32 to vector<8x4xf32>
    %809 = arith.maximumf %805, %808 : vector<8x4xf32>
    %810 = math.rsqrt %809 : vector<8x4xf32>
    %811 = arith.mulf %803, %810 : vector<8x4xf32>
    %cst_355 = arith.constant 1.000000e-16 : f32
    %812 = vector.broadcast %cst_355 : f32 to vector<8x4xf32>
    %813 = arith.maximumf %807, %812 : vector<8x4xf32>
    %814 = math.rsqrt %813 : vector<8x4xf32>
    %815 = arith.mulf %811, %814 : vector<8x4xf32>
    %cst_356 = arith.constant dense<0xFF800000> : vector<8xf32>
    %816 = vector.multi_reduction <maximumf>, %796, %cst_356 [1] : vector<8x8xf32> to vector<8xf32>
    %817 = vector.shape_cast %816 : vector<8xf32> to vector<8x1xf32>
    %818 = tpu.iota {dimensions = array<i32: 1>} : vector<8x8xi32>
    %819 = vector.broadcast %817 : vector<8x1xf32> to vector<8x8xf32>
    %820 = arith.cmpf oeq, %796, %819 : vector<8x8xf32>
    %c8_i32_357 = arith.constant 8 : i32
    %821 = vector.broadcast %c8_i32_357 : i32 to vector<8x8xi32>
    %822 = arith.select %820, %818, %821 : vector<8x8xi1>, vector<8x8xi32>
    %cst_358 = arith.constant dense<2147483647> : vector<8xi32>
    %823 = vector.multi_reduction <minsi>, %822, %cst_358 [1] : vector<8x8xi32> to vector<8xi32>
    %824 = vector.shape_cast %823 : vector<8xi32> to vector<8x1xi32>
    %825 = vector.broadcast %824 : vector<8x1xi32> to vector<8x8xi32>
    %826 = arith.cmpi eq, %818, %825 : vector<8x8xi32>
    %827 = arith.extui %826 : vector<8x8xi1> to vector<8x8xi32>
    %828 = arith.sitofp %827 : vector<8x8xi32> to vector<8x8xf32>
    %cst_359 = arith.constant dense<0.000000e+00> : vector<8x32xf32>
    %829 = tpu.matmul %828, %449, %cst_359 {dimension_numbers = #tpu.dot_dimension_numbers<[1], [0], [0], [1], [0, 0, 1, 1], [], []>} : vector<8x8xf32>, vector<8x32xf32>, vector<8x32xf32> -> vector<8x32xf32>
    %830 = arith.mulf %829, %453 : vector<8x32xf32>
    %cst_360 = arith.constant dense<0.000000e+00> : vector<8x4xf32>
    %831 = tpu.matmul %830, %23, %cst_360 {dimension_numbers = #tpu.dot_dimension_numbers<[1], [1], [0], [0], [0, 0, 1, 0], [], []>} : vector<8x32xf32>, vector<4x32xf32>, vector<8x4xf32> -> vector<8x4xf32>
    %832 = arith.mulf %829, %829 : vector<8x32xf32>
    %cst_361 = arith.constant dense<0.000000e+00> : vector<8x4xf32>
    %833 = tpu.matmul %832, %23, %cst_361 {dimension_numbers = #tpu.dot_dimension_numbers<[1], [1], [0], [0], [0, 0, 1, 0], [], []>} : vector<8x32xf32>, vector<4x32xf32>, vector<8x4xf32> -> vector<8x4xf32>
    %834 = arith.mulf %453, %453 : vector<8x32xf32>
    %cst_362 = arith.constant dense<0.000000e+00> : vector<8x4xf32>
    %835 = tpu.matmul %834, %23, %cst_362 {dimension_numbers = #tpu.dot_dimension_numbers<[1], [1], [0], [0], [0, 0, 1, 0], [], []>} : vector<8x32xf32>, vector<4x32xf32>, vector<8x4xf32> -> vector<8x4xf32>
    %cst_363 = arith.constant 1.000000e-16 : f32
    %836 = vector.broadcast %cst_363 : f32 to vector<8x4xf32>
    %837 = arith.maximumf %833, %836 : vector<8x4xf32>
    %838 = math.rsqrt %837 : vector<8x4xf32>
    %839 = arith.mulf %831, %838 : vector<8x4xf32>
    %cst_364 = arith.constant 1.000000e-16 : f32
    %840 = vector.broadcast %cst_364 : f32 to vector<8x4xf32>
    %841 = arith.maximumf %835, %840 : vector<8x4xf32>
    %842 = math.rsqrt %841 : vector<8x4xf32>
    %843 = arith.mulf %839, %842 : vector<8x4xf32>
    %c0_365 = arith.constant 0 : index
    %c1_366 = arith.constant 1 : index
    %c0_367 = arith.constant 0 : index
    %c16_368 = arith.constant 16 : index
    %844 = vector.load %arg13[%c0_365, %c1_366, %c0_367, %c16_368] : memref<2x2x8x32xf32, #tpu.memory_space<vmem>>, vector<1x1x8x4xf32>
    %845 = vector.shape_cast %844 : vector<1x1x8x4xf32> to vector<8x4xf32>
    %846 = vector.shape_cast %629 : vector<8x4xf32> to vector<1x1x8x4xf32>
    tpu.vector_store %arg13[%c0_365, %c1_366, %c0_367, %c16_368], %846 {strides = array<i32>} : memref<2x2x8x32xf32, #tpu.memory_space<vmem>>, vector<1x1x8x4xf32>,
    %c0_369 = arith.constant 0 : index
    %c1_370 = arith.constant 1 : index
    %c0_371 = arith.constant 0 : index
    %c20_372 = arith.constant 20 : index
    %847 = vector.load %arg13[%c0_369, %c1_370, %c0_371, %c20_372] : memref<2x2x8x32xf32, #tpu.memory_space<vmem>>, vector<1x1x8x4xf32>
    %848 = vector.shape_cast %847 : vector<1x1x8x4xf32> to vector<8x4xf32>
    %849 = vector.shape_cast %691 : vector<8x4xf32> to vector<1x1x8x4xf32>
    tpu.vector_store %arg13[%c0_369, %c1_370, %c0_371, %c20_372], %849 {strides = array<i32>} : memref<2x2x8x32xf32, #tpu.memory_space<vmem>>, vector<1x1x8x4xf32>,
    %c0_373 = arith.constant 0 : index
    %c1_374 = arith.constant 1 : index
    %c0_375 = arith.constant 0 : index
    %c24_376 = arith.constant 24 : index
    %850 = vector.load %arg13[%c0_373, %c1_374, %c0_375, %c24_376] : memref<2x2x8x32xf32, #tpu.memory_space<vmem>>, vector<1x1x8x4xf32>
    %851 = vector.shape_cast %850 : vector<1x1x8x4xf32> to vector<8x4xf32>
    %852 = vector.shape_cast %657 : vector<8x4xf32> to vector<1x1x8x4xf32>
    tpu.vector_store %arg13[%c0_373, %c1_374, %c0_375, %c24_376], %852 {strides = array<i32>} : memref<2x2x8x32xf32, #tpu.memory_space<vmem>>, vector<1x1x8x4xf32>,
    %c0_377 = arith.constant 0 : index
    %c1_378 = arith.constant 1 : index
    %c0_379 = arith.constant 0 : index
    %c28_380 = arith.constant 28 : index
    %853 = vector.load %arg13[%c0_377, %c1_378, %c0_379, %c28_380] : memref<2x2x8x32xf32, #tpu.memory_space<vmem>>, vector<1x1x8x4xf32>
    %854 = vector.shape_cast %853 : vector<1x1x8x4xf32> to vector<8x4xf32>
    %855 = vector.shape_cast %719 : vector<8x4xf32> to vector<1x1x8x4xf32>
    tpu.vector_store %arg13[%c0_377, %c1_378, %c0_379, %c28_380], %855 {strides = array<i32>} : memref<2x2x8x32xf32, #tpu.memory_space<vmem>>, vector<1x1x8x4xf32>,
    %c1_381 = arith.constant 1 : index
    %c1_382 = arith.constant 1 : index
    %c0_383 = arith.constant 0 : index
    %c16_384 = arith.constant 16 : index
    %856 = vector.load %arg13[%c1_381, %c1_382, %c0_383, %c16_384] : memref<2x2x8x32xf32, #tpu.memory_space<vmem>>, vector<1x1x8x4xf32>
    %857 = vector.shape_cast %856 : vector<1x1x8x4xf32> to vector<8x4xf32>
    %858 = vector.shape_cast %753 : vector<8x4xf32> to vector<1x1x8x4xf32>
    tpu.vector_store %arg13[%c1_381, %c1_382, %c0_383, %c16_384], %858 {strides = array<i32>} : memref<2x2x8x32xf32, #tpu.memory_space<vmem>>, vector<1x1x8x4xf32>,
    %c1_385 = arith.constant 1 : index
    %c1_386 = arith.constant 1 : index
    %c0_387 = arith.constant 0 : index
    %c20_388 = arith.constant 20 : index
    %859 = vector.load %arg13[%c1_385, %c1_386, %c0_387, %c20_388] : memref<2x2x8x32xf32, #tpu.memory_space<vmem>>, vector<1x1x8x4xf32>
    %860 = vector.shape_cast %859 : vector<1x1x8x4xf32> to vector<8x4xf32>
    %861 = vector.shape_cast %815 : vector<8x4xf32> to vector<1x1x8x4xf32>
    tpu.vector_store %arg13[%c1_385, %c1_386, %c0_387, %c20_388], %861 {strides = array<i32>} : memref<2x2x8x32xf32, #tpu.memory_space<vmem>>, vector<1x1x8x4xf32>,
    %c1_389 = arith.constant 1 : index
    %c1_390 = arith.constant 1 : index
    %c0_391 = arith.constant 0 : index
    %c24_392 = arith.constant 24 : index
    %862 = vector.load %arg13[%c1_389, %c1_390, %c0_391, %c24_392] : memref<2x2x8x32xf32, #tpu.memory_space<vmem>>, vector<1x1x8x4xf32>
    %863 = vector.shape_cast %862 : vector<1x1x8x4xf32> to vector<8x4xf32>
    %864 = vector.shape_cast %781 : vector<8x4xf32> to vector<1x1x8x4xf32>
    tpu.vector_store %arg13[%c1_389, %c1_390, %c0_391, %c24_392], %864 {strides = array<i32>} : memref<2x2x8x32xf32, #tpu.memory_space<vmem>>, vector<1x1x8x4xf32>,
    %c1_393 = arith.constant 1 : index
    %c1_394 = arith.constant 1 : index
    %c0_395 = arith.constant 0 : index
    %c28_396 = arith.constant 28 : index
    %865 = vector.load %arg13[%c1_393, %c1_394, %c0_395, %c28_396] : memref<2x2x8x32xf32, #tpu.memory_space<vmem>>, vector<1x1x8x4xf32>
    %866 = vector.shape_cast %865 : vector<1x1x8x4xf32> to vector<8x4xf32>
    %867 = vector.shape_cast %843 : vector<8x4xf32> to vector<1x1x8x4xf32>
    tpu.vector_store %arg13[%c1_393, %c1_394, %c0_395, %c28_396], %867 {strides = array<i32>} : memref<2x2x8x32xf32, #tpu.memory_space<vmem>>, vector<1x1x8x4xf32>,
    return
  }
  func.func @transform_0(%arg0: i32) -> (i32, i32, i32) {
    %c0_i32 = arith.constant 0 : i32
    %c0_i32_0 = arith.constant 0 : i32
    %c0_i32_1 = arith.constant 0 : i32
    return %arg0, %c0_i32, %c0_i32_0 : i32, i32, i32
  }
  func.func @transform_1(%arg0: i32) -> (i32, i32, i32) {
    %c0_i32 = arith.constant 0 : i32
    %c0_i32_0 = arith.constant 0 : i32
    %c0_i32_1 = arith.constant 0 : i32
    return %arg0, %c0_i32, %c0_i32_0 : i32, i32, i32
  }
  func.func @transform_2(%arg0: i32) -> (i32, i32, i32) {
    %c1_i32 = arith.constant 1 : i32
    %0 = arith.addi %arg0, %c1_i32 : i32
    %c0_i32 = arith.constant 0 : i32
    %c0_i32_0 = arith.constant 0 : i32
    %c0_i32_1 = arith.constant 0 : i32
    return %0, %c0_i32, %c0_i32_0 : i32, i32, i32
  }
  func.func @transform_3(%arg0: i32) -> (i32, i32, i32) {
    %c1_i32 = arith.constant 1 : i32
    %0 = arith.addi %arg0, %c1_i32 : i32
    %c0_i32 = arith.constant 0 : i32
    %c0_i32_0 = arith.constant 0 : i32
    %c0_i32_1 = arith.constant 0 : i32
    return %0, %c0_i32, %c0_i32_0 : i32, i32, i32
  }
  func.func @transform_4(%arg0: i32) -> (i32, i32) {
    %c0_i32 = arith.constant 0 : i32
    %c0_i32_0 = arith.constant 0 : i32
    %c0_i32_1 = arith.constant 0 : i32
    return %c0_i32, %c0_i32_0 : i32, i32
  }
  func.func @transform_5(%arg0: i32) -> (i32, i32) {
    %c0_i32 = arith.constant 0 : i32
    %c0_i32_0 = arith.constant 0 : i32
    %c0_i32_1 = arith.constant 0 : i32
    return %c0_i32, %c0_i32_0 : i32, i32
  }
  func.func @transform_6(%arg0: i32) -> (i32, i32) {
    %c0_i32 = arith.constant 0 : i32
    %c0_i32_0 = arith.constant 0 : i32
    %c0_i32_1 = arith.constant 0 : i32
    return %c0_i32, %c0_i32_0 : i32, i32
  }
  func.func @transform_7(%arg0: i32) -> (i32, i32) {
    %c0_i32 = arith.constant 0 : i32
    %c0_i32_0 = arith.constant 0 : i32
    %c0_i32_1 = arith.constant 0 : i32
    return %c0_i32, %c0_i32_0 : i32, i32
  }
  func.func @transform_8(%arg0: i32) -> (i32, i32) {
    %c0_i32 = arith.constant 0 : i32
    %c0_i32_0 = arith.constant 0 : i32
    %c0_i32_1 = arith.constant 0 : i32
    return %c0_i32, %c0_i32_0 : i32, i32
  }
  func.func @transform_9(%arg0: i32) -> (i32, i32) {
    %c0_i32 = arith.constant 0 : i32
    %c0_i32_0 = arith.constant 0 : i32
    %c0_i32_1 = arith.constant 0 : i32
    return %c0_i32, %c0_i32_0 : i32, i32
  }
  func.func @transform_10(%arg0: i32) -> (i32, i32) {
    %c0_i32 = arith.constant 0 : i32
    %c0_i32_0 = arith.constant 0 : i32
    %c0_i32_1 = arith.constant 0 : i32
    return %c0_i32, %c0_i32_0 : i32, i32
  }
  func.func @transform_11(%arg0: i32) -> (i32, i32) {
    %c0_i32 = arith.constant 0 : i32
    %c0_i32_0 = arith.constant 0 : i32
    %c0_i32_1 = arith.constant 0 : i32
    return %c0_i32, %c0_i32_0 : i32, i32
  }
  func.func @transform_12(%arg0: i32) -> (i32, i32, i32, i32) {
    %c0_i32 = arith.constant 0 : i32
    %c0_i32_0 = arith.constant 0 : i32
    %c0_i32_1 = arith.constant 0 : i32
    %c0_i32_2 = arith.constant 0 : i32
    return %c0_i32, %arg0, %c0_i32_0, %c0_i32_1 : i32, i32, i32, i32
  }
}

</mosaic_0001>

<bundles_post_ra>
// kernel: bimpm_forward.3
= control target key start
LH: loop header
LB: loop body
LE: loop exit
PB: predicated region body
PF: predicated region fallthrough
CT: control target
= control target key end

     0   :  { %v1606_v1 = vmov 0   ;;  %vm62_vm0 = vcmask 261120   ;;  %v32_v19 = vlaneseq  ;;  %vm170_vm1 = vcmask 1041409   ;;  %s1609_s30 = smov 96   ;;  %s2418_s1 = inlined_call_operand.vmem [shape: bf16[32,256], index: 1, kind: input, shape index: {}]   ;;  %s2419_s2 = inlined_call_operand.vmem [shape: bf16[64,256], index: 2, kind: input, shape index: {}]   ;;  %s2420_s0 = inlined_call_operand.vmem [shape: f32[32,32], index: 0, kind: input, shape index: {}]   ;;  %s2421_s3 = inlined_call_operand.vmem [shape: f32[1,256], index: 3, kind: input, shape index: {}]   ;;  %s2422_s4 = inlined_call_operand.vmem [shape: f32[4,8,32], index: 4, kind: output, shape index: {0}]   ;;  %s2423_s5 = inlined_call_operand.vmem [shape: f32[4,8,32], index: 5, kind: output, shape index: {1}]  }
   0x1   :  { %v1492_v0 = vld [vmem:[%s2418_s1 + $0x4] ss:$8 sps:$4 sm:$0xff]   ;;  %101 = vmatprep.mubr.bf16.mxu0 %v1606_v1  ;;  %280 = vmatprep.mubr.bf16.mxu1 %v1606_v1  ;;  %v1494_v2 = vld [vmem:[%s2418_s1] ss:$8 sps:$4 sm:$0xff]   ;;  %v1495_v3 = vld [vmem:[%s2418_s1 + $0x14] ss:$8 sps:$4 sm:$0xff]  }
   0x2   :  { %69 = vmatprep.subr.bf16.mxu0 %v1492_v0  ;;  %v1497_v4 = vld [vmem:[%s2418_s1 + $0x10] ss:$8 sps:$4 sm:$0xff]   ;;  %v1657_v5 = vld [vmem:[%s2419_s2 + $0x4] ss:$8 sps:$4 sm:$0xff]   ;;  %v1662_v6 = vld [vmem:[%s2419_s2] ss:$8 sps:$4 sm:$0xff]  }
   0x3   :  { %70 = vmatpush1.bf16.msra.mxu0 %v1494_v2  ;;  %v20_v7 = vld [vmem:[%s2420_s0] sm:$0xff]  ;;  %v21_v8 = vld [vmem:[%s2420_s0 + $0x8] sm:$0xff]  ;;  %248 = vmatprep.subr.bf16.mxu1 %v1657_v5  ;;  %v1674_v9 = vld [vmem:[%s2419_s2 + $0x14] ss:$8 sps:$4 sm:$0xff]   ;;  %v1738_v20 = vshrl.u32 %v32_v19, 7  ;;  %v131_v24 = vand.u32 127, %v32_v19 }
   0x4   :  { %71 = vmatprep.subr.bf16.mxu0 %v1495_v3  ;;  %249 = vmatpush1.bf16.msra.mxu1 %v1662_v6  ;;  %v24_v10 = vpack.c.bf16 %v21_v8, %v20_v7  ;;  %v1680_v11 = vld [vmem:[%s2419_s2 + $0x10] ss:$8 sps:$4 sm:$0xff]   ;;  %v1686_v12 = vld [vmem:[%s2419_s2 + $0x24] ss:$8 sps:$4 sm:$0xff]   ;;  %v1694_v13 = vld [vmem:[%s2419_s2 + $0x20] ss:$8 sps:$4 sm:$0xff]  }
   0x5   :  { %250 = vmatprep.subr.bf16.mxu1 %v1674_v9  ;;  %v22_v14 = vld [vmem:[%s2420_s0 + $0x10] sm:$0xff]  ;;  %v23_v15 = vld [vmem:[%s2420_s0 + $0x18] sm:$0xff]  ;;  %v1741_v21 = vsub.s32 0, %v1738_v20  ;;  %v30_v22 = vld [vmem:[%s2421_s3] sm:$0x3]  ;;  %v38_v23 = vsub.s32 1, %v1738_v20 }
   0x6   :  { %v1707_v16 = vld [vmem:[%s2419_s2 + $0x34] ss:$8 sps:$4 sm:$0xff]   ;;  %v25_v17 = vpack.c.bf16 %v23_v15, %v22_v14  ;;  %v1715_v18 = vld [vmem:[%s2419_s2 + $0x30] ss:$8 sps:$4 sm:$0xff]   ;;  %v1748_v27 = vadd.s32 128, %v131_v24  ;;  %v137_v33 = vand.u32 63, %v131_v24 }
   0x7   :  { %72 = vmatpush1.bf16.msra.mxu0 %v1497_v4  ;;  %v35_v25 = vrot.slane %v30_v22, %v1741_v21  ;;  %v39_v26 = vrot.slane %v30_v22, %v38_v23  ;;  %vm173_vm2 = vcmask 1042434   ;;  %vm176_vm4 = vcmask 1043459   ;;  %s1607_s3 = smov 64  }
   0x8   :  { %360 = vmatprep.subr.bf16.mxu0 %v1657_v5  ;;  %251 = vmatpush1.bf16.msra.mxu1 %v1680_v11  ;;  %v144_v34 = vand.u32 63, %v1748_v27  ;;  %vm1789_vm3 = vcmp.lt.s32.totalorder %v137_v33, 32  ;;  %vm160_vm6 = vcmp.lt.s32.totalorder %v1748_v27, 192  ;;  %vm244_vm7 = vcmask 523264  }
   0x9   :  { %252 = vmatprep.subr.bf16.mxu1 %v1686_v12  ;;  %vm1332_vm8 = vcmask 1040384   ;;  %vm1337_vm9 = vcmask 1041408   ;;  %vm1342_vm10 = vcmask 1042432   ;;  %vm1347_vm11 = vcmask 1043456  }
   0xa   :  { %1455 = vmatmul.mubr.msk.bf16.vlgmr.msra.gmra.mrb[0].mxu0 %vm62_vm0, %v24_v10  ;;  %vm1793_vm5 = vcmp.lt.s32.totalorder %v144_v34, 32  ;;  %vm1352_vm12 = vcmask 1044480   ;;  %vm1357_vm13 = vcmask 1045504   ;;  %vm1362_vm14 = vcmask 1046528  }
   0xb   :  { %111 = vmatprep.mubr.bf16.mxu0 %v1606_v1  ;;  %361 = vmatpush1.bf16.msra.mxu0 %v1662_v6 }
   0xc   :  { %362 = vmatprep.subr.bf16.mxu0 %v1674_v9  ;;  %253 = vmatpush1.bf16.msra.mxu1 %v1694_v13 }
   0xd   :  { %254 = vmatprep.subr.bf16.mxu1 %v1707_v16 }
   0xf   :  { %363 = vmatpush1.bf16.msra.mxu0 %v1680_v11 }
  0x10   :  { %364 = vmatprep.subr.bf16.mxu0 %v1686_v12  ;;  %255 = vmatpush1.bf16.msra.mxu1 %v1715_v18 }
  0x11   :  { %472 = vmatprep.subr.bf16.mxu1 %v1657_v5 }
  0x12   :  { %1456 = vmatmul.mubr.msk.bf16.gmra.mrb[4].mxu0 %vm62_vm0, %v25_v17 }
  0x13   :  { %392 = vmatprep.mubr.bf16.mxu0 %v1606_v1  ;;  %365 = vmatpush1.bf16.msra.mxu0 %v1694_v13 }
  0x14   :  { %281 = vmatmul.mubr.bf16.vlgmr.msra.gmra.mrb[0].mxu1 %v1606_v1  ;;  %366 = vmatprep.subr.bf16.mxu0 %v1707_v16 }
  0x15   :  { %473 = vmatpush1.bf16.msra.mxu1 %v1662_v6  ;;  %504 = vmatprep.mubr.bf16.mxu1 %v1606_v1 }
  0x16   :  { %474 = vmatprep.subr.bf16.mxu1 %v1674_v9 }
  0x17   :  { %367 = vmatpush1.bf16.msra.mxu0 %v1715_v18 }
  0x18   :  { %584 = vmatprep.subr.bf16.mxu0 %v1657_v5 }
  0x19   :  { %475 = vmatpush1.bf16.msra.mxu1 %v1680_v11 }
  0x1a   :  { %476 = vmatprep.subr.bf16.mxu1 %v1686_v12 }
  0x1d   :  { %477 = vmatpush1.bf16.msra.mxu1 %v1694_v13 }
  0x1e   :  { %478 = vmatprep.subr.bf16.mxu1 %v1707_v16 }
  0x21   :  { %479 = vmatpush1.bf16.msra.mxu1 %v1715_v18 }
  0x22   :  { %666 = vmatprep.subr.bf16.mxu1 %v1657_v5 }
  0xdd   :  { %v103_v28 = vpop.f32.mrb[0].mxu0 }
  0xde   :  { %v1750_v29 = vadd.f32 %v103_v28, %v35_v25  ;;  %v105_v30 = vpop.f32.mrb[1].mxu0 }
  0xdf   :  { %v1752_v31 = vadd.f32 %v105_v30, %v39_v26  ;;  %v107_v32 = vpop.f32.mrb[2].mxu0 }
  0xe0   :  { %v1755_v35 = vadd.f32 %v107_v32, %v35_v25  ;;  %v109_v36 = vpop.f32.mrb[3].mxu0  ;;  %v186_v37 = vrot.slane %v1750_v29, 7  ;;  %v324_v38 = vrot.slane %v1750_v29, 1  ;;  %v338_v39 = vrot.slane %v1750_v29, 6 }
  0xe1   :  { %v1760_v40 = vadd.f32 %v109_v36, %v39_v26  ;;  %v193_v41 = vrot.slane %v1752_v31, 7  ;;  %v330_v42 = vrot.slane %v1752_v31, 1  ;;  %v345_v43 = vrot.slane %v1752_v31, 6 }
  0xe2   :  { %v169_v44 = vrot.slane %v1755_v35, 7  ;;  %v187_v45 = vrot.slane %v1755_v35, 6  ;;  %v325_v46 = vsel %vm170_vm1, %v1755_v35, %v324_v38  ;;  %v339_v47 = vrot.slane %v1755_v35, 5 }
  0xe3   :  { %v178_v48 = vrot.slane %v1760_v40, 7  ;;  %v194_v49 = vrot.slane %v1760_v40, 6  ;;  %v1774_v50 = vsel %vm170_vm1, %v1760_v40, %v330_v42  ;;  %v346_v51 = vrot.slane %v1760_v40, 5 }
  0xe4   :  { %v171_v52 = vsel %vm170_vm1, %v169_v44, %v1750_v29  ;;  %v188_v53 = vsel %vm170_vm1, %v187_v45, %v186_v37  ;;  %v340_v54 = vsel %vm170_vm1, %v339_v47, %v338_v39  ;;  %v436_v55 = vrot.slane %v1750_v29, 2 }
  0xe5   :  { %v113_v56 = vpop.f32.mrb[4].mxu0  ;;  %v179_v57 = vsel %vm170_vm1, %v178_v48, %v1752_v31  ;;  %v195_v58 = vsel %vm170_vm1, %v194_v49, %v193_v41  ;;  %v347_v59 = vsel %vm170_vm1, %v346_v51, %v345_v43  ;;  %v437_v60 = vrot.slane %v1755_v35, 1 }
  0xe6   :  { %v1787_v61 = vadd.f32 %v113_v56, %v35_v25  ;;  %v115_v62 = vpop.f32.mrb[5].mxu0  ;;  %v450_v7 = vrot.slane %v1750_v29, 5  ;;  %v451_v8 = vrot.slane %v1755_v35, 4 }
  0xe7   :  { %v1797_v2 = vadd.f32 %v115_v62, %v39_v26  ;;  %v117_v3 = vpop.f32.mrb[6].mxu0  ;;  %v438_v4 = vsel %vm170_vm1, %v437_v60, %v436_v55  ;;  %v282_v19 = vpop.f32.mrb[0].mxu1 }
  0xe8   :  { %v1802_v10 = vadd.f32 %v117_v3, %v35_v25  ;;  %v119_v14 = vpop.f32.mrb[7].mxu0  ;;  %v172_v15 = vrot.slane %v1787_v61, 6  ;;  %v189_v17 = vrot.slane %v1787_v61, 5  ;;  %v326_v22 = vrot.slane %v1787_v61, 7  ;;  %v284_v30 = vpop.f32.mrb[1].mxu1 }
  0xe9   :  { %v1807_v23 = vadd.f32 %v119_v14, %v39_v26  ;;  %v180_v24 = vrot.slane %v1797_v2, 6  ;;  %v196_v28 = vrot.slane %v1797_v2, 5  ;;  %v341_v32 = vrot.slane %v1787_v61, 4  ;;  %v286_v37 = vpop.f32.mrb[2].mxu1 }
  0xea   :  { %v174_v25 = vsel %vm173_vm2, %v172_v15, %v171_v52  ;;  %v175_v33 = vrot.slane %v1802_v10, 5  ;;  %v190_v34 = vsel %vm173_vm2, %v189_v17, %v188_v53  ;;  %v191_v36 = vrot.slane %v1802_v10, 4  ;;  %v287_v42 = vpop.f32.mrb[3].mxu1 }
  0xeb   :  { %v181_v38 = vsel %vm173_vm2, %v180_v24, %v179_v57  ;;  %v182_v26 = vrot.slane %v1807_v23, 5  ;;  %v197_v39 = vsel %vm173_vm2, %v196_v28, %v195_v58  ;;  %v198_v41 = vrot.slane %v1807_v23, 4 }
  0xec   :  { %v1821_v43 = vsel %vm176_vm4, %v175_v33, %v174_v25  ;;  %v1824_v44 = vsel %vm176_vm4, %v191_v36, %v190_v34  ;;  %v327_v45 = vsel %vm173_vm2, %v326_v22, %v325_v46  ;;  %v328_v47 = vrot.slane %v1802_v10, 6 }
  0xed   :  { %v202_v48 = vsel %vm1789_vm3, %v1821_v43, %v1824_v44  ;;  %v1833_v49 = vsel %vm176_vm4, %v182_v26, %v181_v38  ;;  %v1836_v51 = vsel %vm176_vm4, %v198_v41, %v197_v39  ;;  %v342_v52 = vsel %vm173_vm2, %v341_v32, %v340_v54 }
  0xee   :  { %v1839_v53 = vadd.f32 %v282_v19, %v202_v48  ;;  %v203_v46 = vsel %vm1793_vm5, %v1833_v49, %v1836_v51  ;;  %v1846_v55 = vsel %vm176_vm4, %v328_v47, %v327_v45  ;;  %v343_v56 = vrot.slane %v1802_v10, 3 }
  0xef   :  { %v1849_v57 = vadd.f32 %v284_v30, %v203_v46  ;;  %v332_v58 = vrot.slane %v1797_v2, 7  ;;  %v334_v60 = vrot.slane %v1807_v23, 6  ;;  %v348_v54 = vrot.slane %v1797_v2, 4 }
  0xf0   :  { %v1855_v62 = vsel %vm176_vm4, %v343_v56, %v342_v52  ;;  %v350_v3 = vrot.slane %v1807_v23, 3  ;;  %v439_v14 = vsel %vm173_vm2, %v1787_v61, %v438_v4  ;;  %v443_v15 = vrot.slane %v1760_v40, 1 }
  0xf1   :  { %v1466_v17 = vmul.f32 -1.442695, %v1849_v57  ;;  %v354_v19 = vsel %vm1789_vm3, %v1846_v55, %v1855_v62  ;;  %v333_v22 = vsel %vm173_vm2, %v332_v58, %v1774_v50  ;;  %v442_v24 = vrot.slane %v1752_v31, 2 }
  0xf2   :  { %v1870_v28 = vsel %vm176_vm4, %v334_v60, %v333_v22  ;;  %v349_v30 = vsel %vm173_vm2, %v348_v54, %v347_v59  ;;  %v440_v4 = vrot.slane %v1802_v10, 7  ;;  %v457_v32 = vrot.slane %v1752_v31, 5 }
  0xf3   :  { %1510 = vpow2.f32 %v1466_v17  ;;  %v1876_v25 = vsel %vm176_vm4, %v350_v3, %v349_v30  ;;  %v452_v33 = vsel %vm170_vm1, %v451_v8, %v450_v7  ;;  %v453_v34 = vrot.slane %v1787_v61, 3 }
  0xf4   :  { %v355_v50 = vsel %vm1793_vm5, %v1870_v28, %v1876_v25  ;;  %v1885_v36 = vsel %vm176_vm4, %v440_v4, %v439_v14  ;;  %v455_v59 = vrot.slane %v1802_v10, 2  ;;  %v444_v37 = vsel %vm170_vm1, %v443_v15, %v442_v24 }
  0xf5   :  { %v454_v38 = vsel %vm173_vm2, %v453_v34, %v452_v33  ;;  %v445_v26 = vsel %vm173_vm2, %v1797_v2, %v444_v37  ;;  %v446_v7 = vrot.slane %v1807_v23, 7  ;;  %v458_v8 = vrot.slane %v1760_v40, 4 }
  0xf6   :  { %v1895_v39 = vsel %vm176_vm4, %v455_v59, %v454_v38  ;;  %v460_v41 = vrot.slane %v1797_v2, 3  ;;  %v462_v42 = vrot.slane %v1807_v23, 2  ;;  %v548_v45 = vrot.slane %v1750_v29, 3 }
  0xf7   :  { %v466_v47 = vsel %vm1789_vm3, %v1885_v36, %v1895_v39  ;;  %v1905_v48 = vsel %vm176_vm4, %v446_v7, %v445_v26  ;;  %v459_v52 = vsel %vm170_vm1, %v458_v8, %v457_v32  ;;  %v549_v46 = vrot.slane %v1755_v35, 2 }
  0xf8   :  { %v461_v56 = vsel %vm173_vm2, %v460_v41, %v459_v52  ;;  %v551_v58 = vrot.slane %v1787_v61, 1  ;;  %v562_v60 = vrot.slane %v1750_v29, 4  ;;  %v563_v54 = vrot.slane %v1755_v35, 3 }
  0xf9   :  { %v1914_v3 = vsel %vm176_vm4, %v462_v42, %v461_v56  ;;  %v550_v14 = vsel %vm170_vm1, %v549_v46, %v548_v45  ;;  %v565_v15 = vrot.slane %v1787_v61, 2  ;;  %v567_v17 = vrot.slane %v1802_v10, 1 }
  0xfa   :  { %v467_v22 = vsel %vm1793_vm5, %v1905_v48, %v1914_v3  ;;  %v552_v24 = vsel %vm173_vm2, %v551_v58, %v550_v14  ;;  %v564_v29 = vsel %vm170_vm1, %v563_v54, %v562_v60  ;;  %v554_v35 = vrot.slane %v1752_v31, 3 }
  0xfb   :  { %v1928_v30 = vsel %vm176_vm4, %v1802_v10, %v552_v24  ;;  %v566_v4 = vsel %vm173_vm2, %v565_v15, %v564_v29  ;;  %v555_v61 = vrot.slane %v1760_v40, 2  ;;  %v557_v32 = vrot.slane %v1797_v2, 1 }
  0xfc   :  { %v1934_v33 = vsel %vm176_vm4, %v567_v17, %v566_v4  ;;  %v569_v34 = vrot.slane %v1752_v31, 4  ;;  %v570_v59 = vrot.slane %v1760_v40, 3  ;;  %v572_v37 = vrot.slane %v1797_v2, 2 }
  0xfd   :  { %v1511_v38 = vpop.eup %1510  ;;  %v578_v10 = vsel %vm1789_vm3, %v1928_v30, %v1934_v33  ;;  %v556_v26 = vsel %vm170_vm1, %v555_v61, %v554_v35  ;;  %v574_v7 = vrot.slane %v1807_v23, 1  ;;  %v660_v31 = vsel %vm1789_vm3, %v1934_v33, %v1928_v30 }
  0xfe   :  { %v298_v8 = vadd.f32 1.0, %v1511_v38  ;;  %v558_v41 = vsel %vm173_vm2, %v557_v32, %v556_v26  ;;  %v571_v42 = vsel %vm170_vm1, %v570_v59, %v569_v34  ;;  %1512 = vtanh.f32 %v1849_v57 }
  0xff   :  { %v1954_v40 = vsel %vm176_vm4, %v1807_v23, %v558_v41  ;;  %v573_v2 = vsel %vm173_vm2, %v572_v37, %v571_v42  ;;  %v742_v45 = vsel %vm1789_vm3, %v1895_v39, %v1885_v36  ;;  %v1465_v24 = vmul.f32 -1.442695, %v1839_v53 }
 0x100   :  { %1514 = vrcp.f32 %v298_v8  ;;  %v1962_v52 = vsel %vm176_vm4, %v574_v7, %v573_v2 }
 0x101   :  { %v579_v46 = vsel %vm1793_vm5, %v1954_v40, %v1962_v52  ;;  %v661_v56 = vsel %vm1793_vm5, %v1962_v52, %v1954_v40  ;;  %1516 = vpow2.f32 %v1465_v24 }
 0x108   :  { %v1513_v14 = vpop.eup %1512 }
 0x10a   :  { %v1515_v15 = vpop.eup %1514 }
 0x10b   :  { %v306_v17 = vsel %vm160_vm6, %v1515_v15, %v1513_v14  ;;  %v1517_v29 = vpop.eup %1516 }
 0x10c   :  { %309 = vrot.lane.b32.xlu0 %v306_v17, %s1607_s3  ;;  %v297_v35 = vadd.f32 1.0, %v1517_v29 }
 0x10e   :  { %1518 = vrcp.f32 %v297_v35 }
 0x118   :  { %v1519_v4 = vpop.eup %1518 }
 0x119   :  { %v307_v34 = vmul.f32 0.0, %v1519_v4 }
 0x17e   :  { %v310_v61 = vpop.permute.xlu0 %309 }
 0x17f   :  { %v312_v32 = vmul.f32 %v1519_v4, %v310_v61 }
 0x181   :  { %314 = vrot.lane.b32.xlu0 %v312_v32, %s1607_s3 }
 0x1f3   :  { %v315_v59 = vpop.permute.xlu0 %314 }
 0x1f4   :  { %v317_v37 = vadd.f32 %v315_v59, %v307_v34 }
 0x1f6   :  { %1520 = vtanh.f32 %v317_v37 }
 0x200   :  { %v1521_v38 = vpop.eup %1520 }
 0x201   :  { %320 = vrot.lane.b32.xlu1 %v1521_v38, %s1607_s3 }
 0x273   :  { %v321_v26 = vpop.permute.xlu1 %320 }
 0x274   :  { %v323_v7 = vmul.f32 %v321_v26, %v306_v17 }
 0x276   :  { %v356_v53 = vpack.c.bf16 %v323_v7, %v323_v7 }
 0x278   :  { %1467 = vmatmul.mubr.msk.bf16.vlgmr.msra.gmra.mrb[8].mxu0 %vm244_vm7, %v356_v53 }
 0x279   :  { %585 = vmatpush1.bf16.msra.mxu0 %v1662_v6  ;;  %616 = vmatprep.mubr.bf16.mxu0 %v1606_v1 }
 0x27a   :  { %586 = vmatprep.subr.bf16.mxu0 %v1674_v9 }
 0x27d   :  { %587 = vmatpush1.bf16.msra.mxu0 %v1680_v11 }
 0x27e   :  { %588 = vmatprep.subr.bf16.mxu0 %v1686_v12 }
 0x281   :  { %589 = vmatpush1.bf16.msra.mxu0 %v1694_v13 }
 0x282   :  { %590 = vmatprep.subr.bf16.mxu0 %v1707_v16 }
 0x285   :  { %591 = vmatpush1.bf16.msra.mxu0 %v1715_v18 }
 0x286   :  { %748 = vmatprep.subr.bf16.mxu0 %v1657_v5 }
 0x34b   :  { %v394_v8 = vpop.f32.mrb[8].mxu0 }
 0x34c   :  { %v401_v41 = vadd.f32 %v394_v8, %v354_v19  ;;  %v396_v42 = vpop.f32.mrb[9].mxu0 }
 0x34d   :  { %v402_v2 = vadd.f32 %v396_v42, %v355_v50  ;;  %v398_v14 = vpop.f32.mrb[10].mxu0 }
 0x34e   :  { %v399_v15 = vpop.f32.mrb[11].mxu0  ;;  %v1468_v61 = vmul.f32 -1.442695, %v401_v41 }
 0x34f   :  { %v1469_v17 = vmul.f32 -1.442695, %v402_v2 }
 0x351   :  { %1522 = vpow2.f32 %v1469_v17 }
 0x352   :  { %1524 = vtanh.f32 %v402_v2  ;;  %v1608_v2 = vmov 1966171168  }
 0x353   :  { %v990_v41 = vunpack.c.l.s4 %v1608_v2 }
 0x355   :  { %v991_v14 = vunpack.c.0.s8 %v990_v41 }
 0x357   :  { %v2028_v15 = vsub.s32 %v991_v14, %v1738_v20 }
 0x359   :  { %v995_v17 = vrot.slane %v323_v7, %v2028_v15 }
 0x35b   :  { %v1523_v24 = vpop.eup %1522 }
 0x35c   :  { %v410_v29 = vadd.f32 1.0, %v1523_v24  ;;  %v1525_v35 = vpop.eup %1524 }
 0x35e   :  { %1526 = vrcp.f32 %v410_v29 }
 0x35f   :  { %1528 = vpow2.f32 %v1468_v61  ;;  %v2033_v61 = vrot.slane %v995_v17, %v2028_v15 }
 0x368   :  { %v1527_v4 = vpop.eup %1526 }
 0x369   :  { %v418_v19 = vsel %vm160_vm6, %v1527_v4, %v1525_v35  ;;  %v1529_v32 = vpop.eup %1528  ;;  %v996_v35 = vcombine.high %v995_v17, %v995_v17 }
 0x36a   :  { %421 = vrot.lane.b32.xlu1 %v418_v19, %s1607_s3  ;;  %v409_v34 = vadd.f32 1.0, %v1529_v32 }
 0x36b   :  { %v2040_v20 = vrot.slane %v996_v35, %v2028_v15 }
 0x36c   :  { %1530 = vrcp.f32 %v409_v34 }
 0x36d   :  { %v2072_v14 = vcombine.high %v2040_v20, %v2040_v20 }
 0x376   :  { %v1531_v50 = vpop.eup %1530 }
 0x377   :  { %v419_v26 = vmul.f32 %v1531_v50, %v317_v37 }
 0x3dc   :  { %v422_v59 = vpop.permute.xlu1 %421 }
 0x3dd   :  { %v424_v38 = vmul.f32 %v1531_v50, %v422_v59  ;;  %v2049_v59 = vcombine.high %v2033_v61, %v2033_v61 }
 0x3df   :  { %426 = vrot.lane.b32.xlu0 %v424_v38, %s1607_s3 }
 0x451   :  { %v427_v53 = vpop.permute.xlu0 %426 }
 0x452   :  { %v2023_v8 = vadd.f32 %v427_v53, %v419_v26 }
 0x454   :  { %1532 = vtanh.f32 %v2023_v8 }
 0x45e   :  { %v1533_v42 = vpop.eup %1532 }
 0x45f   :  { %432 = vrot.lane.b32.xlu1 %v1533_v42, %s1607_s3 }
 0x4d1   :  { %v433_v24 = vpop.permute.xlu1 %432 }
 0x4d2   :  { %v435_v29 = vmul.f32 %v433_v24, %v418_v19 }
 0x4d4   :  { %v468_v37 = vpack.c.bf16 %v435_v29, %v435_v29  ;;  %v1024_v4 = vrot.slane %v435_v29, %v2028_v15 }
 0x4d6   :  { %v1025_v32 = vcombine.high %v1024_v4, %v1024_v4  ;;  %v1032_v34 = vrot.slane %v1024_v4, %v2028_v15  ;;  %1470 = vmatmul.mubr.msk.bf16.vlgmr.msra.gmra.mrb[4].mxu1 %vm244_vm7, %v468_v37 }
 0x4d7   :  { %667 = vmatpush1.bf16.msra.mxu1 %v1662_v6  ;;  %698 = vmatprep.mubr.bf16.mxu1 %v1606_v1 }
 0x4d8   :  { %v1039_v7 = vrot.slane %v1025_v32, %v2028_v15  ;;  %v1040_v19 = vcombine.high %v1032_v34, %v1032_v34  ;;  %v2044_v50 = vrot.slane %v1032_v34, %v1741_v21  ;;  %668 = vmatprep.subr.bf16.mxu1 %v1674_v9 }
 0x4da   :  { %v1041_v38 = vcombine.high %v1039_v7, %v1039_v7  ;;  %v2054_v26 = vsel %vm1332_vm8, %v2033_v61, %v2044_v50  ;;  %v2057_v53 = vrot.slane %v1039_v7, %v1741_v21  ;;  %v2060_v42 = vrot.slane %v1040_v19, %v1741_v21 }
 0x4db   :  { %669 = vmatpush1.bf16.msra.mxu1 %v1680_v11 }
 0x4dc   :  { %670 = vmatprep.subr.bf16.mxu1 %v1686_v12  ;;  %v1334_v2 = vsel %vm1332_vm8, %v2040_v20, %v2057_v53  ;;  %v1335_v41 = vsel %vm1332_vm8, %v2049_v59, %v2060_v42  ;;  %v2075_v17 = vrot.slane %v1041_v38, %v1741_v21 }
 0x4de   :  { %v1336_v24 = vsel %vm1332_vm8, %v2072_v14, %v2075_v17 }
 0x4df   :  { %671 = vmatpush1.bf16.msra.mxu1 %v1694_v13 }
 0x4e0   :  { %672 = vmatprep.subr.bf16.mxu1 %v1707_v16 }
 0x4e3   :  { %673 = vmatpush1.bf16.msra.mxu1 %v1715_v18 }
 0x4e4   :  { %830 = vmatprep.subr.bf16.mxu1 %v1657_v5 }
 0x5a9   :  { %v506_v29 = vpop.f32.mrb[4].mxu1 }
 0x5aa   :  { %v513_v35 = vadd.f32 %v506_v29, %v466_v47  ;;  %v508_v37 = vpop.f32.mrb[5].mxu1 }
 0x5ab   :  { %v514_v4 = vadd.f32 %v508_v37, %v467_v22  ;;  %v510_v32 = vpop.f32.mrb[6].mxu1 }
 0x5ac   :  { %v511_v34 = vpop.f32.mrb[7].mxu1  ;;  %v1471_v29 = vmul.f32 -1.442695, %v513_v35 }
 0x5ad   :  { %v1472_v7 = vmul.f32 -1.442695, %v514_v4 }
 0x5af   :  { %1534 = vpow2.f32 %v1472_v7 }
 0x5b0   :  { %1536 = vtanh.f32 %v514_v4 }
 0x5b9   :  { %v1535_v19 = vpop.eup %1534 }
 0x5ba   :  { %v522_v38 = vadd.f32 1.0, %v1535_v19  ;;  %v1537_v54 = vpop.eup %1536 }
 0x5bc   :  { %1538 = vrcp.f32 %v522_v38 }
 0x5bd   :  { %1540 = vpow2.f32 %v1471_v29 }
 0x5c6   :  { %v1539_v60 = vpop.eup %1538 }
 0x5c7   :  { %v530_v47 = vsel %vm160_vm6, %v1539_v60, %v1537_v54  ;;  %v1541_v58 = vpop.eup %1540 }
 0x5c8   :  { %533 = vrot.lane.b32.xlu0 %v530_v47, %s1607_s3  ;;  %v521_v23 = vadd.f32 1.0, %v1541_v58 }
 0x5ca   :  { %1542 = vrcp.f32 %v521_v23 }
 0x5d4   :  { %v1543_v22 = vpop.eup %1542 }
 0x5d5   :  { %v531_v4 = vmul.f32 %v1543_v22, %v2023_v8 }
 0x63a   :  { %v534_v37 = vpop.permute.xlu0 %533 }
 0x63b   :  { %v536_v32 = vmul.f32 %v1543_v22, %v534_v37 }
 0x63d   :  { %538 = vrot.lane.b32.xlu1 %v536_v32, %s1607_s3 }
 0x6af   :  { %v539_v34 = vpop.permute.xlu1 %538 }
 0x6b0   :  { %v541_v7 = vadd.f32 %v539_v34, %v531_v4 }
 0x6b2   :  { %1544 = vtanh.f32 %v541_v7 }
 0x6bc   :  { %v1545_v19 = vpop.eup %1544 }
 0x6bd   :  { %544 = vrot.lane.b32.xlu0 %v1545_v19, %s1607_s3 }
 0x72f   :  { %v545_v60 = vpop.permute.xlu0 %544 }
 0x730   :  { %v547_v54 = vmul.f32 %v545_v60, %v530_v47 }
 0x732   :  { %v580_v35 = vpack.c.bf16 %v547_v54, %v547_v54  ;;  %v1049_v38 = vrot.slane %v547_v54, %v2028_v15 }
 0x734   :  { %v1050_v58 = vcombine.high %v1049_v38, %v1049_v38  ;;  %v1057_v23 = vrot.slane %v1049_v38, %v2028_v15  ;;  %1473 = vmatmul.mubr.msk.bf16.vlgmr.msra.gmra.mrb[12].mxu0 %vm244_vm7, %v580_v35 }
 0x735   :  { %749 = vmatpush1.bf16.msra.mxu0 %v1662_v6  ;;  %780 = vmatprep.mubr.bf16.mxu0 %v1606_v1 }
 0x736   :  { %v1064_v8 = vrot.slane %v1050_v58, %v2028_v15  ;;  %v1065_v29 = vcombine.high %v1057_v23, %v1057_v23  ;;  %v2107_v22 = vrot.slane %v1057_v23, %v1741_v21  ;;  %750 = vmatprep.subr.bf16.mxu0 %v1674_v9 }
 0x738   :  { %v1066_v47 = vcombine.high %v1064_v8, %v1064_v8  ;;  %v2111_v37 = vrot.slane %v1064_v8, %v1741_v21  ;;  %v2114_v32 = vrot.slane %v1065_v29, %v1741_v21  ;;  %v1338_v4 = vsel %vm1337_vm9, %v2054_v26, %v2107_v22 }
 0x739   :  { %751 = vmatpush1.bf16.msra.mxu0 %v1680_v11 }
 0x73a   :  { %v2121_v34 = vrot.slane %v1066_v47, %v1741_v21  ;;  %752 = vmatprep.subr.bf16.mxu0 %v1686_v12  ;;  %v1339_v19 = vsel %vm1337_vm9, %v1334_v2, %v2111_v37  ;;  %v1340_v60 = vsel %vm1337_vm9, %v1335_v41, %v2114_v32 }
 0x73c   :  { %v1341_v54 = vsel %vm1337_vm9, %v1336_v24, %v2121_v34 }
 0x73d   :  { %753 = vmatpush1.bf16.msra.mxu0 %v1694_v13 }
 0x73e   :  { %754 = vmatprep.subr.bf16.mxu0 %v1707_v16 }
 0x741   :  { %755 = vmatpush1.bf16.msra.mxu0 %v1715_v18 }
 0x742   :  { %912 = vmatprep.subr.bf16.mxu0 %v1657_v5 }
 0x807   :  { %v618_v26 = vpop.f32.mrb[12].mxu0 }
 0x808   :  { %v625_v2 = vadd.f32 %v618_v26, %v578_v10  ;;  %v620_v35 = vpop.f32.mrb[13].mxu0 }
 0x809   :  { %v626_v41 = vadd.f32 %v620_v35, %v579_v46  ;;  %v622_v24 = vpop.f32.mrb[14].mxu0 }
 0x80a   :  { %v623_v38 = vpop.f32.mrb[15].mxu0  ;;  %v1474_v47 = vmul.f32 -1.442695, %v625_v2 }
 0x80b   :  { %v1475_v58 = vmul.f32 -1.442695, %v626_v41 }
 0x80d   :  { %1546 = vpow2.f32 %v1475_v58 }
 0x80e   :  { %1548 = vtanh.f32 %v626_v41 }
 0x817   :  { %v1547_v23 = vpop.eup %1546 }
 0x818   :  { %v634_v5 = vadd.f32 1.0, %v1547_v23  ;;  %v1549_v8 = vpop.eup %1548 }
 0x81a   :  { %1550 = vrcp.f32 %v634_v5 }
 0x81b   :  { %1552 = vpow2.f32 %v1474_v47 }
 0x824   :  { %v1551_v29 = vpop.eup %1550 }
 0x825   :  { %v642_v10 = vsel %vm160_vm6, %v1551_v29, %v1549_v8  ;;  %v1553_v26 = vpop.eup %1552 }
 0x826   :  { %645 = vrot.lane.b32.xlu1 %v642_v10, %s1607_s3  ;;  %v633_v57 = vadd.f32 1.0, %v1553_v26 }
 0x828   :  { %1554 = vrcp.f32 %v633_v57 }
 0x832   :  { %v1555_v46 = vpop.eup %1554 }
 0x833   :  { %v643_v38 = vmul.f32 %v1555_v46, %v541_v7 }
 0x898   :  { %v646_v35 = vpop.permute.xlu1 %645 }
 0x899   :  { %v648_v24 = vmul.f32 %v1555_v46, %v646_v35 }
 0x89b   :  { %650 = vrot.lane.b32.xlu0 %v648_v24, %s1607_s3 }
 0x90d   :  { %v651_v41 = vpop.permute.xlu0 %650 }
 0x90e   :  { %v653_v58 = vadd.f32 %v651_v41, %v643_v38 }
 0x910   :  { %1556 = vtanh.f32 %v653_v58 }
 0x91a   :  { %v1557_v23 = vpop.eup %1556 }
 0x91b   :  { %656 = vrot.lane.b32.xlu1 %v1557_v23, %s1607_s3 }
 0x98d   :  { %v657_v5 = vpop.permute.xlu1 %656 }
 0x98e   :  { %v659_v8 = vmul.f32 %v657_v5, %v642_v10 }
 0x990   :  { %v662_v29 = vpack.c.bf16 %v659_v8, %v659_v8  ;;  %v1074_v2 = vrot.slane %v659_v8, %v2028_v15 }
 0x992   :  { %v1075_v47 = vcombine.high %v1074_v2, %v1074_v2  ;;  %v1082_v57 = vrot.slane %v1074_v2, %v2028_v15  ;;  %1476 = vmatmul.mubr.msk.bf16.vlgmr.msra.gmra.mrb[8].mxu1 %vm244_vm7, %v662_v29 }
 0x993   :  { %831 = vmatpush1.bf16.msra.mxu1 %v1662_v6  ;;  %862 = vmatprep.mubr.bf16.mxu1 %v1606_v1 }
 0x994   :  { %v1089_v7 = vrot.slane %v1075_v47, %v2028_v15  ;;  %v1090_v26 = vcombine.high %v1082_v57, %v1082_v57  ;;  %v2156_v46 = vrot.slane %v1082_v57, %v1741_v21  ;;  %832 = vmatprep.subr.bf16.mxu1 %v1674_v9 }
 0x996   :  { %v1091_v10 = vcombine.high %v1089_v7, %v1089_v7  ;;  %v2160_v35 = vrot.slane %v1089_v7, %v1741_v21  ;;  %v2163_v24 = vrot.slane %v1090_v26, %v1741_v21  ;;  %v1343_v38 = vsel %vm1342_vm10, %v1338_v4, %v2156_v46 }
 0x997   :  { %833 = vmatpush1.bf16.msra.mxu1 %v1680_v11 }
 0x998   :  { %v2169_v41 = vrot.slane %v1091_v10, %v1741_v21  ;;  %834 = vmatprep.subr.bf16.mxu1 %v1686_v12  ;;  %v1344_v23 = vsel %vm1342_vm10, %v1339_v19, %v2160_v35  ;;  %v1345_v5 = vsel %vm1342_vm10, %v1340_v60, %v2163_v24 }
 0x99a   :  { %v1346_v8 = vsel %vm1342_vm10, %v1341_v54, %v2169_v41 }
 0x99b   :  { %835 = vmatpush1.bf16.msra.mxu1 %v1694_v13 }
 0x99c   :  { %836 = vmatprep.subr.bf16.mxu1 %v1707_v16 }
 0x99f   :  { %837 = vmatpush1.bf16.msra.mxu1 %v1715_v18 }
 0xa65   :  { %v700_v4 = vpop.f32.mrb[8].mxu1 }
 0xa66   :  { %v707_v29 = vadd.f32 %v700_v4, %v660_v31  ;;  %v702_v19 = vpop.f32.mrb[9].mxu1 }
 0xa67   :  { %v708_v60 = vadd.f32 %v702_v19, %v661_v56  ;;  %v704_v54 = vpop.f32.mrb[10].mxu1 }
 0xa68   :  { %v705_v2 = vpop.f32.mrb[11].mxu1  ;;  %v1477_v33 = vmul.f32 -1.442695, %v707_v29 }
 0xa69   :  { %v1478_v47 = vmul.f32 -1.442695, %v708_v60 }
 0xa6b   :  { %1558 = vpow2.f32 %v1478_v47 }
 0xa6c   :  { %1560 = vtanh.f32 %v708_v60 }
 0xa75   :  { %v1559_v57 = vpop.eup %1558 }
 0xa76   :  { %v716_v7 = vadd.f32 1.0, %v1559_v57  ;;  %v1561_v26 = vpop.eup %1560 }
 0xa78   :  { %1562 = vrcp.f32 %v716_v7 }
 0xa79   :  { %1564 = vpow2.f32 %v1477_v33 }
 0xa82   :  { %v1563_v10 = vpop.eup %1562 }
 0xa83   :  { %v724_v30 = vsel %vm160_vm6, %v1563_v10, %v1561_v26  ;;  %v1565_v31 = vpop.eup %1564 }
 0xa84   :  { %727 = vrot.lane.b32.xlu0 %v724_v30, %s1607_s3  ;;  %v715_v40 = vadd.f32 1.0, %v1565_v31 }
 0xa86   :  { %1566 = vrcp.f32 %v715_v40 }
 0xa90   :  { %v1567_v52 = vpop.eup %1566 }
 0xa91   :  { %v725_v19 = vmul.f32 %v1567_v52, %v653_v58 }
 0xaf6   :  { %v728_v56 = vpop.permute.xlu0 %727 }
 0xaf7   :  { %v730_v4 = vmul.f32 %v1567_v52, %v728_v56 }
 0xaf9   :  { %732 = vrot.lane.b32.xlu1 %v730_v4, %s1607_s3 }
 0xb6b   :  { %v733_v60 = vpop.permute.xlu1 %732 }
 0xb6c   :  { %v735_v54 = vadd.f32 %v733_v60, %v725_v19 }
 0xb6e   :  { %1568 = vtanh.f32 %v735_v54 }
 0xb78   :  { %v1569_v2 = vpop.eup %1568 }
 0xb79   :  { %738 = vrot.lane.b32.xlu0 %v1569_v2, %s1607_s3 }
 0xbeb   :  { %v739_v47 = vpop.permute.xlu0 %738 }
 0xbec   :  { %v741_v57 = vmul.f32 %v739_v47, %v724_v30 }
 0xbee   :  { %v744_v7 = vpack.c.bf16 %v741_v57, %v741_v57  ;;  %v1099_v29 = vrot.slane %v741_v57, %v2028_v15 }
 0xbf0   :  { %v1100_v26 = vcombine.high %v1099_v29, %v1099_v29  ;;  %v1107_v10 = vrot.slane %v1099_v29, %v2028_v15  ;;  %1479 = vmatmul.mubr.msk.bf16.vlgmr.msra.gmra.mrb[16].mxu0 %vm244_vm7, %v744_v7 }
 0xbf1   :  { %913 = vmatpush1.bf16.msra.mxu0 %v1662_v6  ;;  %944 = vmatprep.mubr.bf16.mxu0 %v1606_v1 }
 0xbf2   :  { %v1114_v58 = vrot.slane %v1100_v26, %v2028_v15  ;;  %v1115_v33 = vcombine.high %v1107_v10, %v1107_v10  ;;  %v2203_v31 = vrot.slane %v1107_v10, %v1741_v21  ;;  %914 = vmatprep.subr.bf16.mxu0 %v1674_v9 }
 0xbf4   :  { %v1116_v30 = vcombine.high %v1114_v58, %v1114_v58  ;;  %v2207_v40 = vrot.slane %v1114_v58, %v1741_v21  ;;  %v2210_v52 = vrot.slane %v1115_v33, %v1741_v21  ;;  %v1348_v6 = vsel %vm1347_vm11, %v1343_v38, %v2203_v31 }
 0xbf5   :  { %915 = vmatpush1.bf16.msra.mxu0 %v1680_v11 }
 0xbf6   :  { %v2216_v1 = vrot.slane %v1116_v30, %v1741_v21  ;;  %916 = vmatprep.subr.bf16.mxu0 %v1686_v12  ;;  %v1349_v9 = vsel %vm1347_vm11, %v1344_v23, %v2207_v40  ;;  %v1350_v56 = vsel %vm1347_vm11, %v1345_v5, %v2210_v52  ;;  %v2428_v23 = vsel %vm1793_vm5, %v1914_v3, %v1905_v48 }
 0xbf8   :  { %v1351_v4 = vsel %vm1347_vm11, %v1346_v8, %v2216_v1 }
 0xbf9   :  { %917 = vmatpush1.bf16.msra.mxu0 %v1694_v13 }
 0xbfa   :  { %918 = vmatprep.subr.bf16.mxu0 %v1707_v16 }
 0xbfd   :  { %919 = vmatpush1.bf16.msra.mxu0 %v1715_v18 }
 0xcc3   :  { %v782_v11 = vpop.f32.mrb[16].mxu0 }
 0xcc4   :  { %v789_v12 = vadd.f32 %v782_v11, %v742_v45  ;;  %v784_v38 = vpop.f32.mrb[17].mxu0 }
 0xcc5   :  { %v790_v5 = vadd.f32 %v784_v38, %v2428_v23  ;;  %v786_v8 = vpop.f32.mrb[18].mxu0 }
 0xcc6   :  { %v787_v13 = vpop.f32.mrb[19].mxu0  ;;  %v1480_v39 = vmul.f32 -1.442695, %v789_v12 }
 0xcc7   :  { %v1481_v19 = vmul.f32 -1.442695, %v790_v5 }
 0xcc9   :  { %1570 = vpow2.f32 %v1481_v19 }
 0xcca   :  { %1572 = vtanh.f32 %v790_v5 }
 0xcd3   :  { %v1571_v16 = vpop.eup %1570 }
 0xcd4   :  { %v798_v18 = vadd.f32 1.0, %v1571_v16  ;;  %v1573_v60 = vpop.eup %1572 }
 0xcd6   :  { %1574 = vrcp.f32 %v798_v18 }
 0xcd7   :  { %1576 = vpow2.f32 %v1480_v39 }
 0xce0   :  { %v1575_v2 = vpop.eup %1574 }
 0xce1   :  { %v806_v36 = vsel %vm160_vm6, %v1575_v2, %v1573_v60  ;;  %v1577_v45 = vpop.eup %1576 }
 0xce2   :  { %809 = vrot.lane.b32.xlu1 %v806_v36, %s1607_s3  ;;  %v797_v48 = vadd.f32 1.0, %v1577_v45  ;;  %v2429_v45 = vsel %vm1789_vm3, %v1855_v62, %v1846_v55 }
 0xce4   :  { %1578 = vrcp.f32 %v797_v48 }
 0xcee   :  { %v1579_v3 = vpop.eup %1578 }
 0xcef   :  { %v807_v7 = vmul.f32 %v1579_v3, %v735_v54 }
 0xd54   :  { %v810_v47 = vpop.permute.xlu1 %809 }
 0xd55   :  { %v812_v57 = vmul.f32 %v1579_v3, %v810_v47  ;;  %v2430_v3 = vsel %vm1793_vm5, %v1876_v25, %v1870_v28 }
 0xd57   :  { %814 = vrot.lane.b32.xlu0 %v812_v57, %s1607_s3 }
 0xdc9   :  { %v815_v29 = vpop.permute.xlu0 %814 }
 0xdca   :  { %v817_v26 = vadd.f32 %v815_v29, %v807_v7 }
 0xdcc   :  { %1580 = vtanh.f32 %v817_v26 }
 0xdd6   :  { %v1581_v10 = vpop.eup %1580 }
 0xdd7   :  { %820 = vrot.lane.b32.xlu1 %v1581_v10, %s1607_s3 }
 0xe49   :  { %v821_v58 = vpop.permute.xlu1 %820 }
 0xe4a   :  { %v823_v33 = vmul.f32 %v821_v58, %v806_v36 }
 0xe4c   :  { %v826_v30 = vpack.c.bf16 %v823_v33, %v823_v33  ;;  %v1124_v11 = vrot.slane %v823_v33, %v2028_v15 }
 0xe4e   :  { %v1125_v12 = vcombine.high %v1124_v11, %v1124_v11  ;;  %v1132_v38 = vrot.slane %v1124_v11, %v2028_v15  ;;  %1482 = vmatmul.mubr.msk.bf16.vlgmr.msra.gmra.mrb[12].mxu1 %vm244_vm7, %v826_v30 }
 0xe50   :  { %v1139_v23 = vrot.slane %v1125_v12, %v2028_v15  ;;  %v1140_v54 = vcombine.high %v1132_v38, %v1132_v38  ;;  %v2248_v5 = vrot.slane %v1132_v38, %v1741_v21 }
 0xe52   :  { %v1141_v8 = vcombine.high %v1139_v23, %v1139_v23  ;;  %v2251_v13 = vrot.slane %v1139_v23, %v1741_v21  ;;  %v2254_v19 = vrot.slane %v1140_v54, %v1741_v21  ;;  %v1353_v16 = vsel %vm1352_vm12, %v1348_v6, %v2248_v5 }
 0xe54   :  { %v2259_v18 = vrot.slane %v1141_v8, %v1741_v21  ;;  %v1354_v60 = vsel %vm1352_vm12, %v1349_v9, %v2251_v13  ;;  %v1355_v2 = vsel %vm1352_vm12, %v1350_v56, %v2254_v19 }
 0xe56   :  { %v1356_v36 = vsel %vm1352_vm12, %v1351_v4, %v2259_v18 }
 0xf21   :  { %v864_v39 = vpop.f32.mrb[12].mxu1 }
 0xf22   :  { %v871_v48 = vadd.f32 %v864_v39, %v2429_v45  ;;  %v866_v6 = vpop.f32.mrb[13].mxu1 }
 0xf23   :  { %v872_v9 = vadd.f32 %v866_v6, %v2430_v3  ;;  %v868_v47 = vpop.f32.mrb[14].mxu1 }
 0xf24   :  { %v869_v57 = vpop.f32.mrb[15].mxu1  ;;  %v1483_v62 = vmul.f32 -1.442695, %v871_v48 }
 0xf25   :  { %v1484_v56 = vmul.f32 -1.442695, %v872_v9 }
 0xf27   :  { %1582 = vpow2.f32 %v1484_v56 }
 0xf28   :  { %1584 = vtanh.f32 %v872_v9 }
 0xf31   :  { %v1583_v7 = vpop.eup %1582 }
 0xf32   :  { %v880_v4 = vadd.f32 1.0, %v1583_v7  ;;  %v1585_v29 = vpop.eup %1584 }
 0xf34   :  { %1586 = vrcp.f32 %v880_v4 }
 0xf35   :  { %1588 = vpow2.f32 %v1483_v62 }
 0xf3e   :  { %v1587_v10 = vpop.eup %1586 }
 0xf3f   :  { %v888_v55 = vsel %vm160_vm6, %v1587_v10, %v1585_v29  ;;  %v1589_v58 = vpop.eup %1588 }
 0xf40   :  { %891 = vrot.lane.b32.xlu0 %v888_v55, %s1607_s3  ;;  %v879_v28 = vadd.f32 1.0, %v1589_v58  ;;  %v2431_v58 = vsel %vm1789_vm3, %v1824_v44, %v1821_v43 }
 0xf42   :  { %1590 = vrcp.f32 %v879_v28 }
 0xf4c   :  { %v1591_v25 = vpop.eup %1590 }
 0xf4d   :  { %v889_v11 = vmul.f32 %v1591_v25, %v817_v26 }
 0xfb2   :  { %v892_v33 = vpop.permute.xlu0 %891 }
 0xfb3   :  { %v894_v30 = vmul.f32 %v1591_v25, %v892_v33 }
 0xfb5   :  { %896 = vrot.lane.b32.xlu1 %v894_v30, %s1607_s3 }
0x1027   :  { %v897_v12 = vpop.permute.xlu1 %896 }
0x1028   :  { %v899_v38 = vadd.f32 %v897_v12, %v889_v11 }
0x102a   :  { %1592 = vtanh.f32 %v899_v38 }
0x1034   :  { %v1593_v23 = vpop.eup %1592 }
0x1035   :  { %902 = vrot.lane.b32.xlu0 %v1593_v23, %s1607_s3 }
0x10a7   :  { %v903_v54 = vpop.permute.xlu0 %902 }
0x10a8   :  { %v905_v8 = vmul.f32 %v903_v54, %v888_v55 }
0x10aa   :  { %v908_v39 = vpack.c.bf16 %v905_v8, %v905_v8  ;;  %v1149_v45 = vrot.slane %v905_v8, %v2028_v15 }
0x10ac   :  { %v1150_v48 = vcombine.high %v1149_v45, %v1149_v45  ;;  %v1157_v6 = vrot.slane %v1149_v45, %v2028_v15  ;;  %1485 = vmatmul.mubr.msk.bf16.vlgmr.msra.gmra.mrb[20].mxu0 %vm244_vm7, %v908_v39 }
0x10ae   :  { %v1164_v3 = vrot.slane %v1150_v48, %v2028_v15  ;;  %v1165_v26 = vcombine.high %v1157_v6, %v1157_v6  ;;  %v1295_v9 = vrot.slane %v1157_v6, %v1741_v21 }
0x10b0   :  { %v1166_v47 = vcombine.high %v1164_v3, %v1164_v3  ;;  %v1299_v57 = vrot.slane %v1164_v3, %v1741_v21  ;;  %v1303_v56 = vrot.slane %v1165_v26, %v1741_v21  ;;  %v1358_v7 = vsel %vm1357_vm13, %v1353_v16, %v1295_v9 }
0x10b2   :  { %v2291_v4 = vrot.slane %v1166_v47, %v1741_v21  ;;  %v1359_v29 = vsel %vm1357_vm13, %v1354_v60, %v1299_v57  ;;  %v2295_v10 = vsel %vm1357_vm13, %v1355_v2, %v1303_v56  ;;  %v2432_v60 = vsel %vm1793_vm5, %v1836_v51, %v1833_v49 }
0x10b4   :  { %v2299_v55 = vsel %vm1357_vm13, %v1356_v36, %v2291_v4 }
0x117f   :  { %v946_v62 = vpop.f32.mrb[20].mxu0 }
0x1180   :  { %v953_v28 = vadd.f32 %v946_v62, %v2431_v58  ;;  %v948_v16 = vpop.f32.mrb[21].mxu0 }
0x1181   :  { %v954_v25 = vadd.f32 %v948_v16, %v2432_v60  ;;  %v950_v2 = vpop.f32.mrb[22].mxu0  ;;  %v1378_v60 = vrot.slane %v2033_v61, %v1741_v21 }
0x1182   :  { %v951_v33 = vpop.f32.mrb[23].mxu0  ;;  %v1486_v0 = vmul.f32 -1.442695, %v953_v28 }
0x1183   :  { %v1487_v30 = vmul.f32 -1.442695, %v954_v25 }
0x1185   :  { %1594 = vpow2.f32 %v1487_v30 }
0x1186   :  { %1596 = vtanh.f32 %v954_v25  ;;  %v1382_v25 = vrot.slane %v2040_v20, %v1741_v21  ;;  %v1386_v20 = vrot.slane %v2049_v59, %v1741_v21 }
0x118f   :  { %v1595_v36 = vpop.eup %1594 }
0x1190   :  { %v962_v11 = vadd.f32 1.0, %v1595_v36  ;;  %v1597_v63 = vpop.eup %1596 }
0x1192   :  { %1598 = vrcp.f32 %v962_v11 }
0x1193   :  { %1600 = vpow2.f32 %v1486_v0 }
0x119c   :  { %v1599_v12 = vpop.eup %1598 }
0x119d   :  { %v970_v43 = vsel %vm160_vm6, %v1599_v12, %v1597_v63  ;;  %v1601_v44 = vpop.eup %1600 }
0x119e   :  { %973 = vrot.lane.b32.xlu1 %v970_v43, %s1607_s3  ;;  %v961_v49 = vadd.f32 1.0, %v1601_v44 }
0x11a0   :  { %1602 = vrcp.f32 %v961_v49 }
0x11aa   :  { %v1603_v51 = vpop.eup %1602 }
0x11ab   :  { %v971_v8 = vmul.f32 %v1603_v51, %v899_v38 }
0x1210   :  { %v974_v23 = vpop.permute.xlu1 %973 }
0x1211   :  { %v976_v54 = vmul.f32 %v1603_v51, %v974_v23 }
0x1213   :  { %978 = vrot.lane.b32.xlu0 %v976_v54, %s1607_s3 }
0x1285   :  { %v979_v39 = vpop.permute.xlu0 %978 }
0x1286   :  { %v981_v45 = vadd.f32 %v979_v39, %v971_v8 }
0x1288   :  { %1604 = vtanh.f32 %v981_v45 }
0x1292   :  { %v1605_v48 = vpop.eup %1604 }
0x1293   :  { %984 = vrot.lane.b32.xlu1 %v1605_v48, %s1607_s3 }
0x1305   :  { %v985_v27 = vpop.permute.xlu1 %984 }
0x1306   :  { %v987_v6 = vmul.f32 %v985_v27, %v970_v43 }
0x1308   :  { %v1174_v3 = vrot.slane %v987_v6, %v2028_v15 }
0x130a   :  { %v1175_v26 = vcombine.high %v1174_v3, %v1174_v3  ;;  %v1182_v47 = vrot.slane %v1174_v3, %v2028_v15 }
0x130c   :  { %v1189_v62 = vrot.slane %v1175_v26, %v2028_v15  ;;  %v1190_v58 = vcombine.high %v1182_v47, %v1182_v47  ;;  %v1315_v28 = vrot.slane %v1182_v47, %v1741_v21  ;;  %v1395_v38 = vsel %vm1332_vm8, %v1182_v47, %v1295_v9 }
0x130d   :  { %v1399_v16 = vsel %vm1337_vm9, %v1395_v38, %v2248_v5 }
0x130e   :  { %v1191_v2 = vcombine.high %v1189_v62, %v1189_v62  ;;  %v1319_v33 = vrot.slane %v1189_v62, %v1741_v21  ;;  %v1323_v30 = vrot.slane %v1190_v58, %v1741_v21  ;;  %v1363_v15 = vsel %vm1362_vm14, %v1358_v7, %v1315_v28 }
0x130f   :  { %1367 = vst.msk [vmem:[%s2422_s4] sm:$0xff] %vm62_vm0, %v1363_v15  ;;  %v1396_v5 = vsel %vm1332_vm8, %v1189_v62, %v1299_v57  ;;  %v1397_v9 = vsel %vm1332_vm8, %v1190_v58, %v1303_v56  ;;  %v1403_v61 = vsel %vm1342_vm10, %v1399_v16, %v2203_v31 }
0x1310   :  { %v1327_v36 = vrot.slane %v1191_v2, %v1741_v21  ;;  %v1407_v7 = vsel %vm1347_vm11, %v1403_v61, %v2156_v46  ;;  %v1400_v11 = vsel %vm1337_vm9, %v1396_v5, %v2251_v13  ;;  %v1364_v63 = vsel %vm1362_vm14, %v1359_v29, %v1319_v33 }
0x1311   :  { %v1411_v57 = vsel %vm1352_vm12, %v1407_v7, %v2107_v22  ;;  %v1404_v56 = vsel %vm1342_vm10, %v1400_v11, %v2207_v40  ;;  %1368 = vst.msk [vmem:[%s2422_s4 + $0x8] sm:$0xff] %vm62_vm0, %v1364_v63  ;;  %v1401_v59 = vsel %vm1337_vm9, %v1397_v9, %v2254_v19  ;;  %v1365_v46 = vsel %vm1362_vm14, %v2295_v10, %v1323_v30 }
0x1312   :  { %v1415_v31 = vsel %vm1357_vm13, %v1411_v57, %v2044_v50  ;;  %v1408_v22 = vsel %vm1347_vm11, %v1404_v56, %v2160_v35  ;;  %v1405_v40 = vsel %vm1342_vm10, %v1401_v59, %v2210_v52  ;;  %1369 = vst.msk [vmem:[%s2422_s4 + $0x10] sm:$0xff] %vm62_vm0, %v1365_v46  ;;  %v1398_v13 = vsel %vm1332_vm8, %v1191_v2, %v2291_v4 }
0x1313   :  { %v1419_v19 = vsel %vm1362_vm14, %v1415_v31, %v1378_v60  ;;  %v1412_v29 = vsel %vm1352_vm12, %v1408_v22, %v2111_v37  ;;  %v1409_v50 = vsel %vm1347_vm11, %v1405_v40, %v2163_v24  ;;  %v1402_v35 = vsel %vm1337_vm9, %v1398_v13, %v2259_v18 }
0x1314   :  { %1427 = vrot.lane.b32.xlu0 %v1419_v19, %s1609_s30  ;;  %v1416_v52 = vsel %vm1357_vm13, %v1412_v29, %v2057_v53  ;;  %v1413_v10 = vsel %vm1352_vm12, %v1409_v50, %v2114_v32  ;;  %v1406_v4 = vsel %vm1342_vm10, %v1402_v35, %v2216_v1  ;;  %v1366_v37 = vsel %vm1362_vm14, %v2299_v55, %v1327_v36 }
0x1315   :  { %v1420_v12 = vsel %vm1362_vm14, %v1416_v52, %v1382_v25  ;;  %v1417_v24 = vsel %vm1357_vm13, %v1413_v10, %v2060_v42  ;;  %v1410_v18 = vsel %vm1347_vm11, %v1406_v4, %v2169_v41  ;;  %1370 = vst.msk [vmem:[%s2422_s4 + $0x18] sm:$0xff] %vm62_vm0, %v1366_v37  ;;  %v1390_v32 = vrot.slane %v2072_v14, %v1741_v21 }
0x1316   :  { %1429 = vrot.lane.b32.xlu1 %v1420_v12, %s1609_s30  ;;  %v1421_v53 = vsel %vm1362_vm14, %v1417_v24, %v1386_v20  ;;  %v1414_v1 = vsel %vm1352_vm12, %v1410_v18, %v2121_v34 }
0x1317   :  { %v1418_v42 = vsel %vm1357_vm13, %v1414_v1, %v2075_v17 }
0x1318   :  { %1431 = vrot.lane.b32.xlu0 %v1421_v53, %s1609_s30  ;;  %v1422_v41 = vsel %vm1362_vm14, %v1418_v42, %v1390_v32 }
0x131a   :  { %1433 = vrot.lane.b32.xlu1 %v1422_v41, %s1609_s30 }
0x1386   :  { %v1428_v55 = vpop.permute.xlu0 %1427 }
0x1387   :  { %1439 = vst.msk [vmem:[%s2423_s5] sm:$0xff] %vm62_vm0, %v1428_v55 }
0x1388   :  { %v1430_v43 = vpop.permute.xlu1 %1429 }
0x1389   :  { %1440 = vst.msk [vmem:[%s2423_s5 + $0x8] sm:$0xff] %vm62_vm0, %v1430_v43 }
0x138a   :  { %v1432_v21 = vpop.permute.xlu0 %1431 }
0x138b   :  { %1441 = vst.msk [vmem:[%s2423_s5 + $0x10] sm:$0xff] %vm62_vm0, %v1432_v21 }
0x138c   :  { %v1434_v14 = vpop.permute.xlu1 %1433 }
0x138d   :  { %1442 = vst.msk [vmem:[%s2423_s5 + $0x18] sm:$0xff] %vm62_vm0, %v1434_v14 }

// kernel: bimpm_forward.5
= control target key start
LH: loop header
LB: loop body
LE: loop exit
PB: predicated region body
PF: predicated region fallthrough
CT: control target
= control target key end

     0   :  { %v1525_v2 = vmov 0   ;;  %vm76_vm0 = vcmask 261120   ;;  %s2144_s0 = inlined_call_operand.vmem [shape: f32[32,32], index: 0, kind: input, shape index: {}]   ;;  %s2145_s1 = inlined_call_operand.vmem [shape: bf16[32,256], index: 1, kind: input, shape index: {}]   ;;  %s2146_s2 = inlined_call_operand.vmem [shape: bf16[64,256], index: 2, kind: input, shape index: {}]   ;;  %s2147_s3 = inlined_call_operand.vmem [shape: f32[1,256], index: 3, kind: input, shape index: {}]   ;;  %s2148_s4 = inlined_call_operand.vmem [shape: bf16[64,64], index: 4, kind: input, shape index: {}]   ;;  %s2149_s5 = inlined_call_operand.vmem [shape: bf16[64,64], index: 5, kind: input, shape index: {}]   ;;  %s2150_s6 = inlined_call_operand.vmem [shape: f32[1,64], index: 6, kind: input, shape index: {}]   ;;  %s2151_s7 = inlined_call_operand.vmem [shape: bf16[64,2], index: 7, kind: input, shape index: {}]   ;;  %s2152_s8 = inlined_call_operand.vmem [shape: f32[1,2], index: 8, kind: input, shape index: {}]   ;;  %s2153_s9 = inlined_call_operand.hbm [shape: f32[2,2], index: 9, kind: output, shape index: {}]  }
   0x1   :  { %v1373_v0 = vld [vmem:[%s2145_s1 + $0x4] ss:$8 sps:$4 sm:$0xff]   ;;  %v1375_v1 = vld [vmem:[%s2145_s1] ss:$8 sps:$4 sm:$0xff]   ;;  %115 = vmatprep.mubr.bf16.mxu0 %v1525_v2  ;;  %294 = vmatprep.mubr.bf16.mxu1 %v1525_v2  ;;  %v1376_v3 = vld [vmem:[%s2145_s1 + $0x14] ss:$8 sps:$4 sm:$0xff]  }
   0x2   :  { %83 = vmatprep.subr.bf16.mxu0 %v1373_v0  ;;  %v1378_v4 = vld [vmem:[%s2145_s1 + $0x10] ss:$8 sps:$4 sm:$0xff]   ;;  %v1597_v5 = vld [vmem:[%s2146_s2 + $0x4] ss:$8 sps:$4 sm:$0xff]   ;;  %v1602_v6 = vld [vmem:[%s2146_s2] ss:$8 sps:$4 sm:$0xff]  }
   0x3   :  { %84 = vmatpush1.bf16.msra.mxu0 %v1375_v1  ;;  %v34_v7 = vld [vmem:[%s2144_s0] sm:$0xff]  ;;  %v35_v8 = vld [vmem:[%s2144_s0 + $0x8] sm:$0xff]  ;;  %262 = vmatprep.subr.bf16.mxu1 %v1597_v5  ;;  %v1614_v9 = vld [vmem:[%s2146_s2 + $0x14] ss:$8 sps:$4 sm:$0xff]  }
   0x4   :  { %85 = vmatprep.subr.bf16.mxu0 %v1376_v3  ;;  %263 = vmatpush1.bf16.msra.mxu1 %v1602_v6  ;;  %v38_v10 = vpack.c.bf16 %v35_v8, %v34_v7  ;;  %v1620_v11 = vld [vmem:[%s2146_s2 + $0x10] ss:$8 sps:$4 sm:$0xff]   ;;  %v1626_v12 = vld [vmem:[%s2146_s2 + $0x24] ss:$8 sps:$4 sm:$0xff]   ;;  %v1631_v13 = vld [vmem:[%s2146_s2 + $0x20] ss:$8 sps:$4 sm:$0xff]  }
   0x5   :  { %264 = vmatprep.subr.bf16.mxu1 %v1614_v9  ;;  %v36_v14 = vld [vmem:[%s2144_s0 + $0x10] sm:$0xff]  ;;  %v37_v15 = vld [vmem:[%s2144_s0 + $0x18] sm:$0xff] }
   0x6   :  { %v1643_v16 = vld [vmem:[%s2146_s2 + $0x34] ss:$8 sps:$4 sm:$0xff]   ;;  %v1652_v17 = vld [vmem:[%s2146_s2 + $0x30] ss:$8 sps:$4 sm:$0xff]   ;;  %v39_v18 = vpack.c.bf16 %v37_v15, %v36_v14 }
   0x7   :  { %86 = vmatpush1.bf16.msra.mxu0 %v1378_v4 }
   0x8   :  { %374 = vmatprep.subr.bf16.mxu0 %v1597_v5  ;;  %265 = vmatpush1.bf16.msra.mxu1 %v1620_v11 }
   0x9   :  { %266 = vmatprep.subr.bf16.mxu1 %v1626_v12 }
   0xa   :  { %1267 = vmatmul.mubr.msk.bf16.vlgmr.msra.gmra.mrb[0].mxu0 %vm76_vm0, %v38_v10 }
   0xb   :  { %125 = vmatprep.mubr.bf16.mxu0 %v1525_v2  ;;  %375 = vmatpush1.bf16.msra.mxu0 %v1602_v6 }
   0xc   :  { %376 = vmatprep.subr.bf16.mxu0 %v1614_v9  ;;  %267 = vmatpush1.bf16.msra.mxu1 %v1631_v13 }
   0xd   :  { %268 = vmatprep.subr.bf16.mxu1 %v1643_v16 }
   0xf   :  { %377 = vmatpush1.bf16.msra.mxu0 %v1620_v11 }
  0x10   :  { %378 = vmatprep.subr.bf16.mxu0 %v1626_v12 }
  0x11   :  { %14 = vsyncpa [#allocation3], 0  ;;  %269 = vmatpush1.bf16.msra.mxu1 %v1652_v17  ;;  %v46_v19 = vlaneseq  ;;  %v44_v22 = vld [vmem:[%s2147_s3] sm:$0x3]  ;;  %vm184_vm1 = vcmask 1041409   ;;  %vm187_vm2 = vcmask 1042434  }
  0x12   :  { %1268 = vmatmul.mubr.msk.bf16.gmra.mrb[4].mxu0 %vm76_vm0, %v39_v18  ;;  %486 = vmatprep.subr.bf16.mxu1 %v1597_v5  ;;  %vm190_vm4 = vcmask 1043459   ;;  %s1526_s3 = smov 64   ;;  %vm258_vm7 = vcmask 523264   ;;  %vm1528_vm8 = vmmov 0   ;;  %s1529_s19 = smov [#allocation2]   ;;  %vm1247_vm9 = vcmask 9216  }
  0x13   :  { %406 = vmatprep.mubr.bf16.mxu0 %v1525_v2  ;;  %379 = vmatpush1.bf16.msra.mxu0 %v1631_v13  ;;  %v47_v20 = vshrl.u32 %v46_v19, 7  ;;  %v145_v23 = vand.u32 127, %v46_v19  ;;  %s1255_s20 = sshll.u32 %s1529_s19, 4  ;;  %s1256_s20 = int_to_ptr.vmem [resolvable:$true] %s1255_s20 }
  0x14   :  { %295 = vmatmul.mubr.bf16.vlgmr.msra.gmra.mrb[0].mxu1 %v1525_v2  ;;  %380 = vmatprep.subr.bf16.mxu0 %v1643_v16  ;;  %p1506_p1 = scmp.lt.s32.totalorder %s1256_s20, %s1256_s20 }
  0x15   :  { %487 = vmatpush1.bf16.msra.mxu1 %v1602_v6  ;;  %518 = vmatprep.mubr.bf16.mxu1 %v1525_v2  ;;  %v48_v21 = vsub.s32 0, %v47_v20  ;;  %v52_v24 = vsub.s32 1, %v47_v20  ;;  %v1681_v26 = vadd.s32 128, %v145_v23  ;;  %v151_v33 = vand.u32 63, %v145_v23 }
  0x16   :  { %488 = vmatprep.subr.bf16.mxu1 %v1614_v9 }
  0x17   :  { %381 = vmatpush1.bf16.msra.mxu0 %v1652_v17  ;;  %v49_v25 = vrot.slane %v44_v22, %v48_v21  ;;  %v53_v27 = vrot.slane %v44_v22, %v52_v24  ;;  %v158_v34 = vand.u32 63, %v1681_v26  ;;  %vm1722_vm3 = vcmp.lt.s32.totalorder %v151_v33, 32 }
  0x18   :  { %598 = vmatprep.subr.bf16.mxu0 %v1597_v5  ;;  %vm174_vm6 = vcmp.lt.s32.totalorder %v1681_v26, 192  ;;  %v1392_v26 = vld [vmem:[%s2149_s5] sm:$0xff]  }
  0x19   :  { %489 = vmatpush1.bf16.msra.mxu1 %v1620_v11  ;;  %vm1726_vm5 = vcmp.lt.s32.totalorder %v158_v34, 32 }
  0x1a   :  { %490 = vmatprep.subr.bf16.mxu1 %v1626_v12 }
  0x1d   :  { %491 = vmatpush1.bf16.msra.mxu1 %v1631_v13 }
  0x1e   :  { %492 = vmatprep.subr.bf16.mxu1 %v1643_v16 }
  0x21   :  { %493 = vmatpush1.bf16.msra.mxu1 %v1652_v17 }
  0x22   :  { %680 = vmatprep.subr.bf16.mxu1 %v1597_v5 }
  0xdd   :  { %v117_v28 = vpop.f32.mrb[0].mxu0 }
  0xde   :  { %v1683_v29 = vadd.f32 %v117_v28, %v49_v25  ;;  %v119_v30 = vpop.f32.mrb[1].mxu0 }
  0xdf   :  { %v1685_v31 = vadd.f32 %v119_v30, %v53_v27  ;;  %v121_v32 = vpop.f32.mrb[2].mxu0 }
  0xe0   :  { %v1688_v35 = vadd.f32 %v121_v32, %v49_v25  ;;  %v123_v36 = vpop.f32.mrb[3].mxu0  ;;  %v200_v37 = vrot.slane %v1683_v29, 7  ;;  %v338_v38 = vrot.slane %v1683_v29, 1  ;;  %v352_v39 = vrot.slane %v1683_v29, 6 }
  0xe1   :  { %v1693_v40 = vadd.f32 %v123_v36, %v53_v27  ;;  %v207_v41 = vrot.slane %v1685_v31, 7  ;;  %v344_v42 = vrot.slane %v1685_v31, 1  ;;  %v359_v43 = vrot.slane %v1685_v31, 6 }
  0xe2   :  { %v183_v44 = vrot.slane %v1688_v35, 7  ;;  %v201_v45 = vrot.slane %v1688_v35, 6  ;;  %v339_v46 = vsel %vm184_vm1, %v1688_v35, %v338_v38  ;;  %v353_v47 = vrot.slane %v1688_v35, 5 }
  0xe3   :  { %v192_v48 = vrot.slane %v1693_v40, 7  ;;  %v208_v49 = vrot.slane %v1693_v40, 6  ;;  %v1707_v50 = vsel %vm184_vm1, %v1693_v40, %v344_v42  ;;  %v360_v51 = vrot.slane %v1693_v40, 5 }
  0xe4   :  { %v185_v52 = vsel %vm184_vm1, %v183_v44, %v1683_v29  ;;  %v202_v53 = vsel %vm184_vm1, %v201_v45, %v200_v37  ;;  %v354_v54 = vsel %vm184_vm1, %v353_v47, %v352_v39  ;;  %v450_v55 = vrot.slane %v1683_v29, 2 }
  0xe5   :  { %v127_v56 = vpop.f32.mrb[4].mxu0  ;;  %v193_v57 = vsel %vm184_vm1, %v192_v48, %v1685_v31  ;;  %v209_v58 = vsel %vm184_vm1, %v208_v49, %v207_v41  ;;  %v361_v59 = vsel %vm184_vm1, %v360_v51, %v359_v43  ;;  %v451_v60 = vrot.slane %v1688_v35, 1 }
  0xe6   :  { %v1720_v61 = vadd.f32 %v127_v56, %v49_v25  ;;  %v129_v62 = vpop.f32.mrb[5].mxu0  ;;  %v464_v7 = vrot.slane %v1683_v29, 5  ;;  %v465_v8 = vrot.slane %v1688_v35, 4 }
  0xe7   :  { %v1730_v1 = vadd.f32 %v129_v62, %v53_v27  ;;  %v131_v3 = vpop.f32.mrb[6].mxu0  ;;  %v452_v4 = vsel %vm184_vm1, %v451_v60, %v450_v55  ;;  %v296_v19 = vpop.f32.mrb[0].mxu1 }
  0xe8   :  { %v1735_v10 = vadd.f32 %v131_v3, %v49_v25  ;;  %v133_v14 = vpop.f32.mrb[7].mxu0  ;;  %v186_v15 = vrot.slane %v1720_v61, 6  ;;  %v203_v18 = vrot.slane %v1720_v61, 5  ;;  %v340_v20 = vrot.slane %v1720_v61, 7  ;;  %v298_v24 = vpop.f32.mrb[1].mxu1 }
  0xe9   :  { %v1740_v21 = vadd.f32 %v133_v14, %v53_v27  ;;  %v194_v22 = vrot.slane %v1730_v1, 6  ;;  %v210_v23 = vrot.slane %v1730_v1, 5  ;;  %v355_v28 = vrot.slane %v1720_v61, 4  ;;  %v300_v34 = vpop.f32.mrb[2].mxu1 }
  0xea   :  { %v188_v25 = vsel %vm187_vm2, %v186_v15, %v185_v52  ;;  %v189_v30 = vrot.slane %v1735_v10, 5  ;;  %v204_v32 = vsel %vm187_vm2, %v203_v18, %v202_v53  ;;  %v205_v33 = vrot.slane %v1735_v10, 4  ;;  %v301_v39 = vpop.f32.mrb[3].mxu1 }
  0xeb   :  { %v195_v36 = vsel %vm187_vm2, %v194_v22, %v193_v57  ;;  %v196_v27 = vrot.slane %v1740_v21, 5  ;;  %v211_v37 = vsel %vm187_vm2, %v210_v23, %v209_v58  ;;  %v212_v38 = vrot.slane %v1740_v21, 4 }
  0xec   :  { %v1754_v41 = vsel %vm190_vm4, %v189_v30, %v188_v25  ;;  %v1757_v42 = vsel %vm190_vm4, %v205_v33, %v204_v32  ;;  %v341_v43 = vsel %vm187_vm2, %v340_v20, %v339_v46  ;;  %v342_v44 = vrot.slane %v1735_v10, 6 }
  0xed   :  { %v216_v45 = vsel %vm1722_vm3, %v1754_v41, %v1757_v42  ;;  %v1766_v47 = vsel %vm190_vm4, %v196_v27, %v195_v36  ;;  %v1769_v48 = vsel %vm190_vm4, %v212_v38, %v211_v37  ;;  %v356_v49 = vsel %vm187_vm2, %v355_v28, %v354_v54 }
  0xee   :  { %v1772_v51 = vadd.f32 %v296_v19, %v216_v45  ;;  %v217_v46 = vsel %vm1726_vm5, %v1766_v47, %v1769_v48  ;;  %v1779_v52 = vsel %vm190_vm4, %v342_v44, %v341_v43  ;;  %v357_v53 = vrot.slane %v1735_v10, 3 }
  0xef   :  { %v1782_v55 = vadd.f32 %v298_v24, %v217_v46  ;;  %v346_v56 = vrot.slane %v1730_v1, 7  ;;  %v348_v57 = vrot.slane %v1740_v21, 6  ;;  %v362_v54 = vrot.slane %v1730_v1, 4 }
  0xf0   :  { %v1788_v58 = vsel %vm190_vm4, %v357_v53, %v356_v49  ;;  %v364_v60 = vrot.slane %v1740_v21, 3  ;;  %v453_v62 = vsel %vm187_vm2, %v1720_v61, %v452_v4  ;;  %v457_v3 = vrot.slane %v1693_v40, 1 }
  0xf1   :  { %v1278_v14 = vmul.f32 -1.442695, %v1782_v55  ;;  %v368_v15 = vsel %vm1722_vm3, %v1779_v52, %v1788_v58  ;;  %v347_v18 = vsel %vm187_vm2, %v346_v56, %v1707_v50  ;;  %v456_v19 = vrot.slane %v1685_v31, 2 }
  0xf2   :  { %v1803_v20 = vsel %vm190_vm4, %v348_v57, %v347_v18  ;;  %v363_v22 = vsel %vm187_vm2, %v362_v54, %v361_v59  ;;  %v454_v4 = vrot.slane %v1735_v10, 7  ;;  %v471_v23 = vrot.slane %v1685_v31, 5 }
  0xf3   :  { %1403 = vpow2.f32 %v1278_v14  ;;  %v1809_v24 = vsel %vm190_vm4, %v364_v60, %v363_v22  ;;  %v466_v28 = vsel %vm184_vm1, %v465_v8, %v464_v7  ;;  %v467_v25 = vrot.slane %v1720_v61, 3 }
  0xf4   :  { %v369_v50 = vsel %vm1726_vm5, %v1803_v20, %v1809_v24  ;;  %v1818_v30 = vsel %vm190_vm4, %v454_v4, %v453_v62  ;;  %v469_v59 = vrot.slane %v1735_v10, 2  ;;  %v458_v32 = vsel %vm184_vm1, %v457_v3, %v456_v19 }
  0xf5   :  { %v468_v33 = vsel %vm187_vm2, %v467_v25, %v466_v28  ;;  %v459_v34 = vsel %vm187_vm2, %v1730_v1, %v458_v32  ;;  %v460_v7 = vrot.slane %v1740_v21, 7  ;;  %v472_v8 = vrot.slane %v1693_v40, 4 }
  0xf6   :  { %v1828_v36 = vsel %vm190_vm4, %v469_v59, %v468_v33  ;;  %v474_v27 = vrot.slane %v1730_v1, 3  ;;  %v476_v37 = vrot.slane %v1740_v21, 2  ;;  %v562_v38 = vrot.slane %v1683_v29, 3 }
  0xf7   :  { %v480_v39 = vsel %vm1722_vm3, %v1818_v30, %v1828_v36  ;;  %v1838_v43 = vsel %vm190_vm4, %v460_v7, %v459_v34  ;;  %v473_v44 = vsel %vm184_vm1, %v472_v8, %v471_v23  ;;  %v563_v45 = vrot.slane %v1688_v35, 2 }
  0xf8   :  { %v475_v49 = vsel %vm187_vm2, %v474_v27, %v473_v44  ;;  %v565_v46 = vrot.slane %v1720_v61, 1  ;;  %v576_v53 = vrot.slane %v1683_v29, 4  ;;  %v577_v56 = vrot.slane %v1688_v35, 3 }
  0xf9   :  { %v1847_v57 = vsel %vm190_vm4, %v476_v37, %v475_v49  ;;  %v564_v54 = vsel %vm184_vm1, %v563_v45, %v562_v38  ;;  %v579_v60 = vrot.slane %v1720_v61, 2  ;;  %v581_v62 = vrot.slane %v1735_v10, 1 }
  0xfa   :  { %v481_v3 = vsel %vm1726_vm5, %v1838_v43, %v1847_v57  ;;  %v566_v14 = vsel %vm187_vm2, %v565_v46, %v564_v54  ;;  %v578_v29 = vsel %vm184_vm1, %v577_v56, %v576_v53  ;;  %v568_v35 = vrot.slane %v1685_v31, 3 }
  0xfb   :  { %v1861_v18 = vsel %vm190_vm4, %v1735_v10, %v566_v14  ;;  %v580_v19 = vsel %vm187_vm2, %v579_v60, %v578_v29  ;;  %v569_v61 = vrot.slane %v1693_v40, 2  ;;  %v571_v22 = vrot.slane %v1730_v1, 1 }
  0xfc   :  { %v1867_v4 = vsel %vm190_vm4, %v581_v62, %v580_v19  ;;  %v583_v23 = vrot.slane %v1685_v31, 4  ;;  %v584_v28 = vrot.slane %v1693_v40, 3  ;;  %v586_v25 = vrot.slane %v1730_v1, 2 }
  0xfd   :  { %v1404_v59 = vpop.eup %1403  ;;  %v592_v10 = vsel %vm1722_vm3, %v1861_v18, %v1867_v4  ;;  %v570_v32 = vsel %vm184_vm1, %v569_v61, %v568_v35  ;;  %v588_v33 = vrot.slane %v1740_v21, 1  ;;  %v674_v31 = vsel %vm1722_vm3, %v1867_v4, %v1861_v18 }
  0xfe   :  { %v312_v34 = vadd.f32 1.0, %v1404_v59  ;;  %v572_v7 = vsel %vm187_vm2, %v571_v22, %v570_v32  ;;  %v585_v8 = vsel %vm184_vm1, %v584_v28, %v583_v23  ;;  %1405 = vtanh.f32 %v1782_v55 }
  0xff   :  { %v1887_v40 = vsel %vm190_vm4, %v1740_v21, %v572_v7  ;;  %v587_v1 = vsel %vm187_vm2, %v586_v25, %v585_v8  ;;  %v756_v27 = vsel %vm1722_vm3, %v1828_v36, %v1818_v30  ;;  %v757_v55 = vsel %vm1726_vm5, %v1847_v57, %v1838_v43 }
 0x100   :  { %1407 = vrcp.f32 %v312_v34  ;;  %v1895_v37 = vsel %vm190_vm4, %v588_v33, %v587_v1  ;;  %v838_v21 = vsel %vm1722_vm3, %v1788_v58, %v1779_v52  ;;  %v839_v45 = vsel %vm1726_vm5, %v1809_v24, %v1803_v20 }
 0x101   :  { %v593_v38 = vsel %vm1726_vm5, %v1887_v40, %v1895_v37  ;;  %v675_v44 = vsel %vm1726_vm5, %v1895_v37, %v1887_v40  ;;  %v920_v49 = vsel %vm1722_vm3, %v1757_v42, %v1754_v41  ;;  %v921_v46 = vsel %vm1726_vm5, %v1769_v48, %v1766_v47 }
 0x102   :  { %v1277_v60 = vmul.f32 -1.442695, %v1772_v51 }
 0x104   :  { %1409 = vpow2.f32 %v1277_v60 }
 0x108   :  { %v1406_v53 = vpop.eup %1405 }
 0x10a   :  { %v1408_v56 = vpop.eup %1407 }
 0x10b   :  { %v320_v54 = vsel %vm174_vm6, %v1408_v56, %v1406_v53 }
 0x10c   :  { %323 = vrot.lane.b32.xlu0 %v320_v54, %s1526_s3 }
 0x10e   :  { %v1410_v62 = vpop.eup %1409 }
 0x10f   :  { %v311_v14 = vadd.f32 1.0, %v1410_v62 }
 0x111   :  { %1411 = vrcp.f32 %v311_v14 }
 0x11b   :  { %v1412_v29 = vpop.eup %1411 }
 0x11c   :  { %v321_v61 = vmul.f32 0.0, %v1412_v29 }
 0x17e   :  { %v324_v35 = vpop.permute.xlu0 %323 }
 0x17f   :  { %v326_v19 = vmul.f32 %v1412_v29, %v324_v35 }
 0x181   :  { %328 = vrot.lane.b32.xlu0 %v326_v19, %s1526_s3 }
 0x1f3   :  { %v329_v22 = vpop.permute.xlu0 %328 }
 0x1f4   :  { %v331_v23 = vadd.f32 %v329_v22, %v321_v61 }
 0x1f6   :  { %1413 = vtanh.f32 %v331_v23 }
 0x200   :  { %v1414_v28 = vpop.eup %1413 }
 0x201   :  { %334 = vrot.lane.b32.xlu1 %v1414_v28, %s1526_s3 }
 0x273   :  { %v335_v25 = vpop.permute.xlu1 %334 }
 0x274   :  { %v337_v59 = vmul.f32 %v335_v25, %v320_v54 }
 0x276   :  { %v370_v51 = vpack.c.bf16 %v337_v59, %v337_v59 }
 0x278   :  { %1279 = vmatmul.mubr.msk.bf16.vlgmr.msra.gmra.mrb[8].mxu0 %vm258_vm7, %v370_v51 }
 0x279   :  { %599 = vmatpush1.bf16.msra.mxu0 %v1602_v6  ;;  %630 = vmatprep.mubr.bf16.mxu0 %v1525_v2 }
 0x27a   :  { %600 = vmatprep.subr.bf16.mxu0 %v1614_v9 }
 0x27d   :  { %601 = vmatpush1.bf16.msra.mxu0 %v1620_v11 }
 0x27e   :  { %602 = vmatprep.subr.bf16.mxu0 %v1626_v12 }
 0x281   :  { %603 = vmatpush1.bf16.msra.mxu0 %v1631_v13 }
 0x282   :  { %604 = vmatprep.subr.bf16.mxu0 %v1643_v16 }
 0x285   :  { %605 = vmatpush1.bf16.msra.mxu0 %v1652_v17 }
 0x286   :  { %762 = vmatprep.subr.bf16.mxu0 %v1597_v5 }
 0x34b   :  { %v408_v32 = vpop.f32.mrb[8].mxu0 }
 0x34c   :  { %v415_v33 = vadd.f32 %v408_v32, %v368_v15  ;;  %v410_v34 = vpop.f32.mrb[9].mxu0 }
 0x34d   :  { %v416_v7 = vadd.f32 %v410_v34, %v369_v50  ;;  %v412_v8 = vpop.f32.mrb[10].mxu0 }
 0x34e   :  { %v413_v1 = vpop.f32.mrb[11].mxu0  ;;  %v1280_v14 = vmul.f32 -1.442695, %v415_v33 }
 0x34f   :  { %v1281_v53 = vmul.f32 -1.442695, %v416_v7 }
 0x351   :  { %1415 = vpow2.f32 %v1281_v53 }
 0x352   :  { %1417 = vtanh.f32 %v416_v7 }
 0x35b   :  { %v1416_v56 = vpop.eup %1415 }
 0x35c   :  { %v424_v54 = vadd.f32 1.0, %v1416_v56  ;;  %v1418_v60 = vpop.eup %1417 }
 0x35e   :  { %1419 = vrcp.f32 %v424_v54 }
 0x35f   :  { %1421 = vpow2.f32 %v1280_v14 }
 0x368   :  { %v1420_v62 = vpop.eup %1419 }
 0x369   :  { %v432_v15 = vsel %vm174_vm6, %v1420_v62, %v1418_v60  ;;  %v1422_v29 = vpop.eup %1421 }
 0x36a   :  { %435 = vrot.lane.b32.xlu1 %v432_v15, %s1526_s3  ;;  %v423_v35 = vadd.f32 1.0, %v1422_v29 }
 0x36c   :  { %1423 = vrcp.f32 %v423_v35 }
 0x376   :  { %v1424_v50 = vpop.eup %1423 }
 0x377   :  { %v433_v22 = vmul.f32 %v1424_v50, %v331_v23 }
 0x3dc   :  { %v436_v19 = vpop.permute.xlu1 %435 }
 0x3dd   :  { %v438_v61 = vmul.f32 %v1424_v50, %v436_v19 }
 0x3df   :  { %440 = vrot.lane.b32.xlu0 %v438_v61, %s1526_s3 }
 0x451   :  { %v441_v28 = vpop.permute.xlu0 %440 }
 0x452   :  { %v443_v25 = vadd.f32 %v441_v28, %v433_v22 }
 0x454   :  { %1425 = vtanh.f32 %v443_v25 }
 0x45e   :  { %v1426_v59 = vpop.eup %1425 }
 0x45f   :  { %446 = vrot.lane.b32.xlu1 %v1426_v59, %s1526_s3 }
 0x4d1   :  { %v447_v51 = vpop.permute.xlu1 %446 }
 0x4d2   :  { %v449_v32 = vmul.f32 %v447_v51, %v432_v15 }
 0x4d4   :  { %v482_v34 = vpack.c.bf16 %v449_v32, %v449_v32 }
 0x4d6   :  { %1282 = vmatmul.mubr.msk.bf16.vlgmr.msra.gmra.mrb[4].mxu1 %vm258_vm7, %v482_v34 }
 0x4d7   :  { %681 = vmatpush1.bf16.msra.mxu1 %v1602_v6  ;;  %712 = vmatprep.mubr.bf16.mxu1 %v1525_v2 }
 0x4d8   :  { %682 = vmatprep.subr.bf16.mxu1 %v1614_v9 }
 0x4db   :  { %683 = vmatpush1.bf16.msra.mxu1 %v1620_v11 }
 0x4dc   :  { %684 = vmatprep.subr.bf16.mxu1 %v1626_v12 }
 0x4df   :  { %685 = vmatpush1.bf16.msra.mxu1 %v1631_v13 }
 0x4e0   :  { %686 = vmatprep.subr.bf16.mxu1 %v1643_v16 }
 0x4e3   :  { %687 = vmatpush1.bf16.msra.mxu1 %v1652_v17 }
 0x4e4   :  { %844 = vmatprep.subr.bf16.mxu1 %v1597_v5 }
 0x5a9   :  { %v520_v23 = vpop.f32.mrb[4].mxu1 }
 0x5aa   :  { %v527_v33 = vadd.f32 %v520_v23, %v480_v39  ;;  %v522_v7 = vpop.f32.mrb[5].mxu1 }
 0x5ab   :  { %v528_v8 = vadd.f32 %v522_v7, %v481_v3  ;;  %v524_v1 = vpop.f32.mrb[6].mxu1 }
 0x5ac   :  { %v525_v53 = vpop.f32.mrb[7].mxu1  ;;  %v1283_v14 = vmul.f32 -1.442695, %v527_v33 }
 0x5ad   :  { %v1284_v56 = vmul.f32 -1.442695, %v528_v8 }
 0x5af   :  { %1427 = vpow2.f32 %v1284_v56 }
 0x5b0   :  { %1429 = vtanh.f32 %v528_v8 }
 0x5b9   :  { %v1428_v54 = vpop.eup %1427 }
 0x5ba   :  { %v536_v60 = vadd.f32 1.0, %v1428_v54  ;;  %v1430_v62 = vpop.eup %1429 }
 0x5bc   :  { %1431 = vrcp.f32 %v536_v60 }
 0x5bd   :  { %1433 = vpow2.f32 %v1283_v14 }
 0x5c6   :  { %v1432_v15 = vpop.eup %1431 }
 0x5c7   :  { %v544_v39 = vsel %vm174_vm6, %v1432_v15, %v1430_v62  ;;  %v1434_v29 = vpop.eup %1433 }
 0x5c8   :  { %547 = vrot.lane.b32.xlu0 %v544_v39, %s1526_s3  ;;  %v535_v35 = vadd.f32 1.0, %v1434_v29 }
 0x5ca   :  { %1435 = vrcp.f32 %v535_v35 }
 0x5d4   :  { %v1436_v3 = vpop.eup %1435 }
 0x5d5   :  { %v545_v61 = vmul.f32 %v1436_v3, %v443_v25 }
 0x63a   :  { %v548_v50 = vpop.permute.xlu0 %547 }
 0x63b   :  { %v550_v19 = vmul.f32 %v1436_v3, %v548_v50 }
 0x63d   :  { %552 = vrot.lane.b32.xlu1 %v550_v19, %s1526_s3 }
 0x6af   :  { %v553_v22 = vpop.permute.xlu1 %552 }
 0x6b0   :  { %v555_v28 = vadd.f32 %v553_v22, %v545_v61 }
 0x6b2   :  { %1437 = vtanh.f32 %v555_v28 }
 0x6bc   :  { %v1438_v59 = vpop.eup %1437 }
 0x6bd   :  { %558 = vrot.lane.b32.xlu0 %v1438_v59, %s1526_s3 }
 0x72f   :  { %v559_v51 = vpop.permute.xlu0 %558 }
 0x730   :  { %v561_v32 = vmul.f32 %v559_v51, %v544_v39 }
 0x732   :  { %v594_v34 = vpack.c.bf16 %v561_v32, %v561_v32 }
 0x734   :  { %1285 = vmatmul.mubr.msk.bf16.vlgmr.msra.gmra.mrb[12].mxu0 %vm258_vm7, %v594_v34 }
 0x735   :  { %763 = vmatpush1.bf16.msra.mxu0 %v1602_v6  ;;  %794 = vmatprep.mubr.bf16.mxu0 %v1525_v2 }
 0x736   :  { %764 = vmatprep.subr.bf16.mxu0 %v1614_v9 }
 0x739   :  { %765 = vmatpush1.bf16.msra.mxu0 %v1620_v11 }
 0x73a   :  { %766 = vmatprep.subr.bf16.mxu0 %v1626_v12 }
 0x73d   :  { %767 = vmatpush1.bf16.msra.mxu0 %v1631_v13 }
 0x73e   :  { %768 = vmatprep.subr.bf16.mxu0 %v1643_v16 }
 0x741   :  { %769 = vmatpush1.bf16.msra.mxu0 %v1652_v17 }
 0x742   :  { %926 = vmatprep.subr.bf16.mxu0 %v1597_v5 }
 0x807   :  { %v632_v25 = vpop.f32.mrb[12].mxu0 }
 0x808   :  { %v639_v23 = vadd.f32 %v632_v25, %v592_v10  ;;  %v634_v33 = vpop.f32.mrb[13].mxu0 }
 0x809   :  { %v640_v7 = vadd.f32 %v634_v33, %v593_v38  ;;  %v636_v8 = vpop.f32.mrb[14].mxu0 }
 0x80a   :  { %v637_v1 = vpop.f32.mrb[15].mxu0  ;;  %v1286_v62 = vmul.f32 -1.442695, %v639_v23 }
 0x80b   :  { %v1287_v53 = vmul.f32 -1.442695, %v640_v7 }
 0x80d   :  { %1439 = vpow2.f32 %v1287_v53 }
 0x80e   :  { %1441 = vtanh.f32 %v640_v7 }
 0x817   :  { %v1440_v56 = vpop.eup %1439 }
 0x818   :  { %v648_v5 = vadd.f32 1.0, %v1440_v56  ;;  %v1442_v54 = vpop.eup %1441 }
 0x81a   :  { %1443 = vrcp.f32 %v648_v5 }
 0x81b   :  { %1445 = vpow2.f32 %v1286_v62 }
 0x824   :  { %v1444_v60 = vpop.eup %1443 }
 0x825   :  { %v656_v10 = vsel %vm174_vm6, %v1444_v60, %v1442_v54  ;;  %v1446_v15 = vpop.eup %1445 }
 0x826   :  { %659 = vrot.lane.b32.xlu1 %v656_v10, %s1526_s3  ;;  %v647_v39 = vadd.f32 1.0, %v1446_v15 }
 0x828   :  { %1447 = vrcp.f32 %v647_v39 }
 0x832   :  { %v1448_v38 = vpop.eup %1447 }
 0x833   :  { %v657_v35 = vmul.f32 %v1448_v38, %v555_v28 }
 0x898   :  { %v660_v14 = vpop.permute.xlu1 %659 }
 0x899   :  { %v662_v29 = vmul.f32 %v1448_v38, %v660_v14 }
 0x89b   :  { %664 = vrot.lane.b32.xlu0 %v662_v29, %s1526_s3 }
 0x90d   :  { %v665_v3 = vpop.permute.xlu0 %664 }
 0x90e   :  { %v667_v50 = vadd.f32 %v665_v3, %v657_v35 }
 0x910   :  { %1449 = vtanh.f32 %v667_v50 }
 0x91a   :  { %v1450_v19 = vpop.eup %1449 }
 0x91b   :  { %670 = vrot.lane.b32.xlu1 %v1450_v19, %s1526_s3 }
 0x98d   :  { %v671_v61 = vpop.permute.xlu1 %670 }
 0x98e   :  { %v673_v22 = vmul.f32 %v671_v61, %v656_v10 }
 0x990   :  { %v676_v59 = vpack.c.bf16 %v673_v22, %v673_v22 }
 0x992   :  { %1288 = vmatmul.mubr.msk.bf16.vlgmr.msra.gmra.mrb[8].mxu1 %vm258_vm7, %v676_v59 }
 0x993   :  { %845 = vmatpush1.bf16.msra.mxu1 %v1602_v6  ;;  %876 = vmatprep.mubr.bf16.mxu1 %v1525_v2 }
 0x994   :  { %846 = vmatprep.subr.bf16.mxu1 %v1614_v9 }
 0x997   :  { %847 = vmatpush1.bf16.msra.mxu1 %v1620_v11 }
 0x998   :  { %848 = vmatprep.subr.bf16.mxu1 %v1626_v12 }
 0x99b   :  { %849 = vmatpush1.bf16.msra.mxu1 %v1631_v13 }
 0x99c   :  { %850 = vmatprep.subr.bf16.mxu1 %v1643_v16 }
 0x99f   :  { %851 = vmatpush1.bf16.msra.mxu1 %v1652_v17 }
 0xa65   :  { %v714_v28 = vpop.f32.mrb[8].mxu1 }
 0xa66   :  { %v721_v51 = vadd.f32 %v714_v28, %v674_v31  ;;  %v716_v32 = vpop.f32.mrb[9].mxu1 }
 0xa67   :  { %v722_v34 = vadd.f32 %v716_v32, %v675_v44  ;;  %v718_v25 = vpop.f32.mrb[10].mxu1 }
 0xa68   :  { %v719_v23 = vpop.f32.mrb[11].mxu1  ;;  %v1289_v4 = vmul.f32 -1.442695, %v721_v51 }
 0xa69   :  { %v1290_v33 = vmul.f32 -1.442695, %v722_v34 }
 0xa6b   :  { %1451 = vpow2.f32 %v1290_v33 }
 0xa6c   :  { %1453 = vtanh.f32 %v722_v34 }
 0xa75   :  { %v1452_v7 = vpop.eup %1451 }
 0xa76   :  { %v730_v8 = vadd.f32 1.0, %v1452_v7  ;;  %v1454_v1 = vpop.eup %1453 }
 0xa78   :  { %1455 = vrcp.f32 %v730_v8 }
 0xa79   :  { %1457 = vpow2.f32 %v1289_v4 }
 0xa82   :  { %v1456_v53 = vpop.eup %1455 }
 0xa83   :  { %v738_v18 = vsel %vm174_vm6, %v1456_v53, %v1454_v1  ;;  %v1458_v31 = vpop.eup %1457 }
 0xa84   :  { %741 = vrot.lane.b32.xlu0 %v738_v18, %s1526_s3  ;;  %v729_v40 = vadd.f32 1.0, %v1458_v31 }
 0xa86   :  { %1459 = vrcp.f32 %v729_v40 }
 0xa90   :  { %v1460_v37 = vpop.eup %1459 }
 0xa91   :  { %v739_v5 = vmul.f32 %v1460_v37, %v667_v50 }
 0xaf6   :  { %v742_v44 = vpop.permute.xlu0 %741 }
 0xaf7   :  { %v744_v56 = vmul.f32 %v1460_v37, %v742_v44 }
 0xaf9   :  { %746 = vrot.lane.b32.xlu1 %v744_v56, %s1526_s3 }
 0xb6b   :  { %v747_v54 = vpop.permute.xlu1 %746 }
 0xb6c   :  { %v749_v60 = vadd.f32 %v747_v54, %v739_v5 }
 0xb6e   :  { %1461 = vtanh.f32 %v749_v60 }
 0xb78   :  { %v1462_v10 = vpop.eup %1461 }
 0xb79   :  { %752 = vrot.lane.b32.xlu0 %v1462_v10, %s1526_s3 }
 0xbeb   :  { %v753_v62 = vpop.permute.xlu0 %752 }
 0xbec   :  { %v755_v15 = vmul.f32 %v753_v62, %v738_v18 }
 0xbee   :  { %v758_v39 = vpack.c.bf16 %v755_v15, %v755_v15 }
 0xbf0   :  { %1291 = vmatmul.mubr.msk.bf16.vlgmr.msra.gmra.mrb[16].mxu0 %vm258_vm7, %v758_v39 }
 0xbf1   :  { %927 = vmatpush1.bf16.msra.mxu0 %v1602_v6  ;;  %958 = vmatprep.mubr.bf16.mxu0 %v1525_v2 }
 0xbf2   :  { %928 = vmatprep.subr.bf16.mxu0 %v1614_v9 }
 0xbf5   :  { %929 = vmatpush1.bf16.msra.mxu0 %v1620_v11 }
 0xbf6   :  { %930 = vmatprep.subr.bf16.mxu0 %v1626_v12 }
 0xbf9   :  { %931 = vmatpush1.bf16.msra.mxu0 %v1631_v13 }
 0xbfa   :  { %932 = vmatprep.subr.bf16.mxu0 %v1643_v16 }
 0xbfd   :  { %933 = vmatpush1.bf16.msra.mxu0 %v1652_v17 }
 0xcc3   :  { %v796_v38 = vpop.f32.mrb[16].mxu0 }
 0xcc4   :  { %v803_v6 = vadd.f32 %v796_v38, %v756_v27  ;;  %v798_v2 = vpop.f32.mrb[17].mxu0 }
 0xcc5   :  { %v804_v9 = vadd.f32 %v798_v2, %v757_v55  ;;  %v800_v11 = vpop.f32.mrb[18].mxu0 }
 0xcc6   :  { %v801_v12 = vpop.f32.mrb[19].mxu0  ;;  %v1292_v36 = vmul.f32 -1.442695, %v803_v6 }
 0xcc7   :  { %v1293_v13 = vmul.f32 -1.442695, %v804_v9  ;;  %v1391_v12 = vld [vmem:[%s2148_s4] sm:$0xff]  }
 0xcc9   :  { %1463 = vpow2.f32 %v1293_v13  ;;  %v1527_v13 = vmov 0.0  }
 0xcca   :  { %1465 = vtanh.f32 %v804_v9  ;;  %1344 = vmatprep.subr.bf16.mxu0 %v1527_v13  ;;  %1332 = vmatprep.subr.bf16.mxu1 %v1527_v13 }
 0xcd3   :  { %v1464_v16 = vpop.eup %1463 }
 0xcd4   :  { %v812_v17 = vadd.f32 1.0, %v1464_v16  ;;  %v1466_v14 = vpop.eup %1465  ;;  %v1393_v16 = vld [vmem:[%s2148_s4 + $0x8] sm:$0xff]  }
 0xcd6   :  { %1467 = vrcp.f32 %v812_v17  ;;  %v1394_v17 = vld [vmem:[%s2149_s5 + $0x8] sm:$0xff]  }
 0xcd7   :  { %1469 = vpow2.f32 %v1292_v36 }
 0xce0   :  { %v1468_v29 = vpop.eup %1467 }
 0xce1   :  { %v820_v30 = vsel %vm174_vm6, %v1468_v29, %v1466_v14  ;;  %v1470_v27 = vpop.eup %1469  ;;  %v1395_v14 = vld [vmem:[%s2148_s4 + $0x10] sm:$0xff]  }
 0xce2   :  { %823 = vrot.lane.b32.xlu1 %v820_v30, %s1526_s3  ;;  %v811_v43 = vadd.f32 1.0, %v1470_v27  ;;  %v1396_v29 = vld [vmem:[%s2149_s5 + $0x10] sm:$0xff]  }
 0xce4   :  { %1471 = vrcp.f32 %v811_v43  ;;  %v1397_v43 = vld [vmem:[%s2148_s4 + $0x18] sm:$0xff]  }
 0xcee   :  { %v1472_v57 = vpop.eup %1471 }
 0xcef   :  { %v821_v3 = vmul.f32 %v1472_v57, %v749_v60 }
 0xd54   :  { %v824_v55 = vpop.permute.xlu1 %823 }
 0xd55   :  { %v826_v35 = vmul.f32 %v1472_v57, %v824_v55  ;;  %v1398_v57 = vld [vmem:[%s2149_s5 + $0x18] sm:$0xff]  }
 0xd57   :  { %828 = vrot.lane.b32.xlu0 %v826_v35, %s1526_s3 }
 0xdc9   :  { %v829_v50 = vpop.permute.xlu0 %828 }
 0xdca   :  { %v831_v19 = vadd.f32 %v829_v50, %v821_v3 }
 0xdcc   :  { %1473 = vtanh.f32 %v831_v19 }
 0xdd6   :  { %v1474_v61 = vpop.eup %1473 }
 0xdd7   :  { %834 = vrot.lane.b32.xlu1 %v1474_v61, %s1526_s3  ;;  %v1399_v61 = vld [vmem:[%s2151_s7] sm:$0xff]  }
 0xe49   :  { %v835_v22 = vpop.permute.xlu1 %834 }
 0xe4a   :  { %v837_v59 = vmul.f32 %v835_v22, %v820_v30  ;;  %v1400_v22 = vld [vmem:[%s2151_s7 + $0x8] sm:$0xff]  }
 0xe4c   :  { %v840_v28 = vpack.c.bf16 %v837_v59, %v837_v59  ;;  %v1401_v59 = vld [vmem:[%s2151_s7 + $0x10] sm:$0xff]  }
 0xe4e   :  { %1294 = vmatmul.mubr.msk.bf16.vlgmr.msra.gmra.mrb[12].mxu1 %vm258_vm7, %v840_v28  ;;  %v1402_v28 = vld [vmem:[%s2151_s7 + $0x18] sm:$0xff]  }
 0xe4f   :  { %1333 = vmatpush3.bf16.msra.mxu1 %v1392_v26  ;;  %1340 = vmatprep.mubr.msk.bf16.mxu1 %vm1528_vm8, %v1527_v13 }
 0xe50   :  { %1334 = vmatprep.subr.bf16.mxu1 %v1527_v13 }
 0xe53   :  { %1335 = vmatpush3.bf16.msra.mxu1 %v1394_v17 }
 0xe54   :  { %1336 = vmatprep.subr.bf16.mxu1 %v1527_v13 }
 0xe57   :  { %1337 = vmatpush3.bf16.msra.mxu1 %v1396_v29 }
 0xe58   :  { %1338 = vmatprep.subr.bf16.mxu1 %v1527_v13 }
 0xe5b   :  { %1339 = vmatpush3.bf16.msra.mxu1 %v1398_v57 }
 0xe5c   :  { %1356 = vmatprep.subr.bf16.mxu1 %v1527_v13 }
 0xf21   :  { %v878_v51 = vpop.f32.mrb[12].mxu1 }
 0xf22   :  { %v885_v32 = vadd.f32 %v878_v51, %v838_v21  ;;  %v880_v34 = vpop.f32.mrb[13].mxu1 }
 0xf23   :  { %v886_v25 = vadd.f32 %v880_v34, %v839_v45  ;;  %v882_v23 = vpop.f32.mrb[14].mxu1 }
 0xf24   :  { %v883_v33 = vpop.f32.mrb[15].mxu1  ;;  %v1295_v58 = vmul.f32 -1.442695, %v885_v32 }
 0xf25   :  { %v1296_v7 = vmul.f32 -1.442695, %v886_v25 }
 0xf27   :  { %1475 = vpow2.f32 %v1296_v7 }
 0xf28   :  { %1477 = vtanh.f32 %v886_v25  ;;  %v1310_v25 = vld [vmem:[%s2150_s6] ss:$0 sm:$0xff]  ;;  %s1501_s6 = scalar_lea.vmem %s1256_s20, 32 }
 0xf29   :  { %p1502_p0 = scmp.ne.s32.totalorder %s1256_s20, %s1501_s6  ;;  %p1507_p2 = scmp.lt.s32.totalorder %s1501_s6, %s1501_s6 }
 0xf2b   :  { %p1508_p3 = por %p1507_p2, %p1506_p1 }
 0xf2d   :  { %p1509_p4 = pnand %p1508_p3, %p1502_p0 }
 0xf31   :  { %v1476_v8 = vpop.eup %1475 }
 0xf32   :  { %v894_v1 = vadd.f32 1.0, %v1476_v8  ;;  %v1478_v53 = vpop.eup %1477 }
 0xf34   :  { %1479 = vrcp.f32 %v894_v1 }
 0xf35   :  { %1481 = vpow2.f32 %v1295_v58 }
 0xf3e   :  { %v1480_v18 = vpop.eup %1479 }
 0xf3f   :  { %v902_v52 = vsel %vm174_vm6, %v1480_v18, %v1478_v53  ;;  %v1482_v21 = vpop.eup %1481 }
 0xf40   :  { %905 = vrot.lane.b32.xlu0 %v902_v52, %s1526_s3  ;;  %v893_v20 = vadd.f32 1.0, %v1482_v21  ;;  %v1311_v21 = vld [vmem:[%s2152_s8] ss:$0 sm:$0xff] }
 0xf42   :  { %1483 = vrcp.f32 %v893_v20 }
 0xf4c   :  { %v1484_v24 = vpop.eup %1483 }
 0xf4d   :  { %v903_v31 = vmul.f32 %v1484_v24, %v831_v19 }
 0xfb2   :  { %v906_v45 = vpop.permute.xlu0 %905 }
 0xfb3   :  { %v908_v4 = vmul.f32 %v1484_v24, %v906_v45 }
 0xfb5   :  { %910 = vrot.lane.b32.xlu1 %v908_v4, %s1526_s3 }
0x1027   :  { %v911_v40 = vpop.permute.xlu1 %910 }
0x1028   :  { %v913_v37 = vadd.f32 %v911_v40, %v903_v31 }
0x102a   :  { %1485 = vtanh.f32 %v913_v37 }
0x1034   :  { %v1486_v44 = vpop.eup %1485 }
0x1035   :  { %916 = vrot.lane.b32.xlu0 %v1486_v44, %s1526_s3 }
0x10a7   :  { %v917_v56 = vpop.permute.xlu0 %916 }
0x10a8   :  { %v919_v5 = vmul.f32 %v917_v56, %v902_v52 }
0x10aa   :  { %v922_v54 = vpack.c.bf16 %v919_v5, %v919_v5 }
0x10ac   :  { %1297 = vmatmul.mubr.msk.bf16.vlgmr.msra.gmra.mrb[20].mxu0 %vm258_vm7, %v922_v54 }
0x10ad   :  { %1345 = vmatpush3.bf16.msra.mxu0 %v1391_v12  ;;  %1352 = vmatprep.mubr.msk.bf16.mxu0 %vm1528_vm8, %v1527_v13 }
0x10ae   :  { %1346 = vmatprep.subr.bf16.mxu0 %v1527_v13 }
0x10b1   :  { %1347 = vmatpush3.bf16.msra.mxu0 %v1393_v16 }
0x10b2   :  { %1348 = vmatprep.subr.bf16.mxu0 %v1527_v13 }
0x10b5   :  { %1349 = vmatpush3.bf16.msra.mxu0 %v1395_v14 }
0x10b6   :  { %1350 = vmatprep.subr.bf16.mxu0 %v1527_v13 }
0x10b9   :  { %1351 = vmatpush3.bf16.msra.mxu0 %v1397_v43 }
0x117f   :  { %v960_v60 = vpop.f32.mrb[20].mxu0 }
0x1180   :  { %v967_v10 = vadd.f32 %v960_v60, %v920_v49  ;;  %v962_v62 = vpop.f32.mrb[21].mxu0 }
0x1181   :  { %v968_v15 = vadd.f32 %v962_v62, %v921_v46  ;;  %v964_v39 = vpop.f32.mrb[22].mxu0 }
0x1182   :  { %v965_v38 = vpop.f32.mrb[23].mxu0  ;;  %v1298_v0 = vmul.f32 -1.442695, %v967_v10 }
0x1183   :  { %v1299_v6 = vmul.f32 -1.442695, %v968_v15 }
0x1185   :  { %1487 = vpow2.f32 %v1299_v6 }
0x1186   :  { %1489 = vtanh.f32 %v968_v15 }
0x118f   :  { %v1488_v2 = vpop.eup %1487 }
0x1190   :  { %v976_v9 = vadd.f32 1.0, %v1488_v2  ;;  %v1490_v63 = vpop.eup %1489 }
0x1192   :  { %1491 = vrcp.f32 %v976_v9 }
0x1193   :  { %1493 = vpow2.f32 %v1298_v0 }
0x119c   :  { %v1492_v11 = vpop.eup %1491 }
0x119d   :  { %v984_v41 = vsel %vm174_vm6, %v1492_v11, %v1490_v63  ;;  %v1494_v42 = vpop.eup %1493 }
0x119e   :  { %987 = vrot.lane.b32.xlu1 %v984_v41, %s1526_s3  ;;  %v975_v47 = vadd.f32 1.0, %v1494_v42 }
0x11a0   :  { %1495 = vrcp.f32 %v975_v47 }
0x11aa   :  { %v1496_v48 = vpop.eup %1495 }
0x11ab   :  { %v985_v30 = vmul.f32 %v1496_v48, %v913_v37 }
0x1210   :  { %v988_v49 = vpop.permute.xlu1 %987 }
0x1211   :  { %v990_v46 = vmul.f32 %v1496_v48, %v988_v49 }
0x1213   :  { %992 = vrot.lane.b32.xlu0 %v990_v46, %s1526_s3 }
0x1285   :  { %v993_v36 = vpop.permute.xlu0 %992 }
0x1286   :  { %v995_v27 = vadd.f32 %v993_v36, %v985_v30 }
0x1288   :  { %1497 = vtanh.f32 %v995_v27 }
0x1292   :  { %v1498_v55 = vpop.eup %1497 }
0x1293   :  { %998 = vrot.lane.b32.xlu1 %v1498_v55, %s1526_s3 }
0x1305   :  { %v999_v35 = vpop.permute.xlu1 %998 }
0x1306   :  { %v1001_v3 = vmul.f32 %v999_v35, %v984_v41 }
0x1308   :  { %v1002_v50 = vpack.c.bf16 %v1001_v3, %v1001_v3 }
0x130a   :  { %v1020_v19 = vrot.slane %v1002_v50, 1  ;;  %1353 = vmatmul.mubr.msk.bf16.vlgmr.msra.gmra.mrb[24].mxu0 %vm258_vm7, %v1002_v50 }
0x130c   :  { %1341 = vmatmul.mubr.msk.bf16.vlgmr.msra.gmra.mrb[16].mxu1 %vm258_vm7, %v1020_v19 }
0x130d   :  { %1364 = vmatprep.mubr.msk.bf16.mxu1 %vm1528_vm8, %v1527_v13  ;;  %1357 = vmatpush3.bf16.msra.mxu1 %v1399_v61 }
0x130e   :  { %1358 = vmatprep.subr.bf16.mxu1 %v1527_v13 }
0x1311   :  { %1359 = vmatpush3.bf16.msra.mxu1 %v1400_v22 }
0x1312   :  { %1360 = vmatprep.subr.bf16.mxu1 %v1527_v13 }
0x1315   :  { %1361 = vmatpush3.bf16.msra.mxu1 %v1401_v59 }
0x1316   :  { %1362 = vmatprep.subr.bf16.mxu1 %v1527_v13 }
0x1319   :  { %1363 = vmatpush3.bf16.msra.mxu1 %v1402_v28 }
0x13dd   :  { %v1149_v51 = vpop.f32.mrb[24].mxu0 }
0x13de   :  { %v1354_v32 = vpop.f32.mrb[25].mxu0 }
0x13df   :  { %v1082_v34 = vpop.f32.mrb[16].mxu1  ;;  %v1152_v23 = vpop.f32.mrb[26].mxu0 }
0x13e0   :  { %v1150_v33 = vadd.f32 %v1149_v51, %v1082_v34  ;;  %v1342_v7 = vpop.f32.mrb[17].mxu1  ;;  %v1355_v8 = vpop.f32.mrb[27].mxu0 }
0x13e1   :  { %v1085_v1 = vpop.f32.mrb[18].mxu1 }
0x13e2   :  { %v1162_v53 = vadd.f32 %v1310_v25, %v1150_v33  ;;  %v1343_v18 = vpop.f32.mrb[19].mxu1 }
0x13e4   :  { %1499 = vtanh.f32 %v1162_v53 }
0x13ee   :  { %v1500_v52 = vpop.eup %1499 }
0x13ef   :  { %v1164_v58 = vpack.c.bf16 %v1500_v52, %v1500_v52 }
0x13f1   :  { %1365 = vmatmul.mubr.msk.bf16.vlgmr.msra.gmra.mrb[20].mxu1 %vm258_vm7, %v1164_v58 }
0x14c4   :  { %v1241_v20 = vpop.f32.mrb[20].mxu1 }
0x14c5   :  { %v1242_v24 = vadd.f32 %v1311_v21, %v1241_v20  ;;  %v1366_v45 = vpop.f32.mrb[21].mxu1 }
0x14c6   :  { %v1244_v4 = vpop.f32.mrb[22].mxu1 }
0x14c7   :  { %v1367_v31 = vpop.f32.mrb[23].mxu1  ;;  %1248 = vst.msk [vmem:[#allocation2] sm:$0x3] %vm1247_vm9, %v1242_v24 }
0x14c8   :  { %1512 = shalt.err (!%p1509_p4)
}
0x14c9   :  { %s1513_s8 = scalar_lea.hbm %s2153_s9, 32 }
0x14ca   :  { %p1514_p5 = scmp.ne.s32.totalorder %s2153_s9, %s1513_s8  ;;  %p1517_p6 = scmp.lt.u32.totalorder %s1513_s8, %s2153_s9 }
0x14cc   :  { %p1519_p7 = pnand %p1517_p6, %p1514_p5 }
0x14ce   :  { %1522 = shalt.err (!%p1519_p7)
}
0x14cf   :  { %1258 = dma.vmem_to_hbm [thread:$0]  %s1256_s20, 32, %s2153_s9, [#allocation3]  }
0x14d0   :  { %1523 = dma.done.wait [#allocation3], 32  }
0x14d1   :  { %1524 = vsyncadd [#allocation3], 4294967264 }
0x14d2   :  { %1262 = vsyncpa [#allocation3], 1 }

// kernel: bimpm_forward.4
= control target key start
LH: loop header
LB: loop body
LE: loop exit
PB: predicated region body
PF: predicated region fallthrough
CT: control target
= control target key end

     0   :  { %v105_v0 = vlaneseq  ;;  %vm110_vm0 = vcmask 261120   ;;  %v12842_v2 = vmov 0.0   ;;  %vm11244_vm1 = vmmov 0   ;;  %s11246_s18 = smov 4   ;;  %s11247_s23 = smov 8   ;;  %s12829_s2 = inlined_call_operand.vmem [shape: f32[4,8,32], index: 2, kind: input, shape index: {}, may-alias: {0,2}]   ;;  %s12830_s4 = inlined_call_operand.vmem [shape: f32[4,32], index: 4, kind: input, shape index: {}]   ;;  %s12831_s0 = inlined_call_operand.vmem [shape: f32[4,8,32], index: 0, kind: input, shape index: {}, may-alias: {0,2}]   ;;  %s12832_s3 = inlined_call_operand.vmem [shape: f32[4,8,32], index: 3, kind: input, shape index: {}, may-alias: {1,3}]   ;;  %s12833_s5 = inlined_call_operand.vmem [shape: f32[4,32], index: 5, kind: input, shape index: {}]   ;;  %s12834_s6 = inlined_call_operand.vmem [shape: f32[4,32], index: 6, kind: input, shape index: {}]   ;;  %s12835_s1 = inlined_call_operand.vmem [shape: f32[4,8,32], index: 1, kind: input, shape index: {}, may-alias: {1,3}]   ;;  %s12836_s7 = inlined_call_operand.vmem [shape: f32[4,32], index: 7, kind: input, shape index: {}]   ;;  %s12837_s12 = inlined_call_operand.vmem [shape: f32[2,2,8,32], index: 12, kind: output, shape index: {}]   ;;  %s12838_s8 = inlined_call_operand.vmem [shape: f32[4,32], index: 8, kind: input, shape index: {}]   ;;  %s12839_s10 = inlined_call_operand.vmem [shape: f32[4,32], index: 10, kind: input, shape index: {}]   ;;  %s12840_s9 = inlined_call_operand.vmem [shape: f32[4,32], index: 9, kind: input, shape index: {}]   ;;  %s12841_s11 = inlined_call_operand.vmem [shape: f32[4,32], index: 11, kind: input, shape index: {}]  }
   0x1   :  { %v11321_v1 = vld [vmem:[%s12829_s2 + $0x10] sm:$0xff]  ;;  %10515 = vmatprep.subr.mxu0 %v12842_v2  ;;  %v85_v3 = vld [vmem:[%s12830_s4] sm:$0xf]  ;;  %10520 = vmatprep.subr.mxu1 %v12842_v2  ;;  %v11245_v14 = vmov 1966171168   ;;  %vm349_vm2 = vcmask 31744  }
   0x2   :  { %v11330_v4 = vmul.f32 %v11321_v1, %v11321_v1  ;;  %v11332_v5 = vmul.f32 %v85_v3, %v85_v3  ;;  %v11335_v6 = vshrl.u32 %v105_v0, 7  ;;  %10517 = vmatprep.mubr.msk.f32.mxu0 %vm11244_vm1, %v12842_v2  ;;  %v11342_v7 = vld [vmem:[%s12831_s0] sm:$0xff]  ;;  %10522 = vmatprep.mubr.msk.f32.mxu1 %vm11244_vm1, %v12842_v2  ;;  %v11356_v10 = vld [vmem:[%s12832_s3 + $0x10] sm:$0xff]  ;;  %v1081_v15 = vunpack.c.l.s4 %v11245_v14  ;;  %s11249_s24 = smov 24   ;;  %s11250_s25 = smov 12  }
   0x3   :  { %v87_v8 = vld [vmem:[%s12833_s5] sm:$0xf]  ;;  %v11351_v9 = vmul.f32 %v11342_v7, %v11342_v7  ;;  %v11389_v23 = vmul.f32 %v11356_v10, %v11356_v10  ;;  %vm1456_vm3 = vcmask 64512   ;;  %s11251_s27 = smov 20   ;;  %s11252_s28 = smov 28  }
   0x4   :  { %v2198_v11 = vsel %vm110_vm0, %v11330_v4, 0.0  ;;  %v11361_v12 = vsub.s32 7, %v11335_v6  ;;  %10521 = vmatpush3.xpose.msk.msra.mxu1 %vm110_vm0, %v11332_v5  ;;  %v11365_v13 = vmul.f32 %v87_v8, %v87_v8  ;;  %v1082_v20 = vunpack.c.0.s8 %v1081_v15  ;;  %v89_v22 = vld [vmem:[%s12834_s6] sm:$0xf] }
   0x5   :  { %2199 = vadd.xlane.f32.xlu0 %v2198_v11  ;;  %10530 = vmatprep.subr.mxu1 %v12842_v2  ;;  %v2195_v21 = vsel %vm110_vm0, %v11351_v9, 0.0  ;;  %v11394_v24 = vld [vmem:[%s12835_s1] sm:$0xff]  ;;  %v266_v26 = vrot.slane %v11330_v4, 7  ;;  %v11404_v27 = vmul.f32 %v89_v22, %v89_v22  ;;  %v511_v29 = vrot.slane %v11389_v23, 7 }
   0x6   :  { %v108_v16 = vrot.slane %v11321_v1, %v11361_v12  ;;  %v354_v17 = vrot.slane %v11356_v10, %v11361_v12  ;;  %v11397_v25 = vsub.s32 %v1082_v20, %v11335_v6  ;;  %v603_v28 = vrot.slane %v11342_v7, %v11361_v12  ;;  %v91_v34 = vld [vmem:[%s12836_s7] sm:$0xf] }
   0x7   :  { %10523 = vmatmul.mubr.msk.f32.vlgmr.msra.gmra.mrb[0].mxu1 %vm110_vm0, %v11351_v9  ;;  %v841_v30 = vrot.slane %v11394_v24, %v11361_v12  ;;  %v11424_v31 = vmul.f32 %v11394_v24, %v11394_v24  ;;  %v11446_v37 = vmul.f32 %v91_v34, %v91_v34  ;;  %v11449_v38 = vsub.s32 0, %v11335_v6 }
   0x8   :  { %v109_v18 = vmul.f32 %v108_v16, %v11332_v5  ;;  %v355_v19 = vmul.f32 %v354_v17, %v11365_v13  ;;  %10532 = vmatprep.mubr.msk.f32.mxu1 %vm11244_vm1, %v12842_v2  ;;  %v1086_v32 = vrot.slane %v11404_v27, %v11397_v25  ;;  %v604_v33 = vmul.f32 %v603_v28, %v11332_v5 }
   0x9   :  { %2196 = vadd.xlane.f32.xlu0 %v2195_v21  ;;  %v842_v35 = vmul.f32 %v841_v30, %v11365_v13  ;;  %v753_v40 = vrot.slane %v11351_v9, 7  ;;  %v1601_v42 = vrot.slane %v11446_v37, %v11397_v25  ;;  %v991_v45 = vrot.slane %v11424_v31, 7 }
   0xa   :  { %10516 = vmatpush3.xpose.msk.msra.mxu0 %vm110_vm0, %v109_v18  ;;  %10531 = vmatpush3.xpose.msk.msra.mxu1 %vm110_vm0, %v355_v19  ;;  %v1087_v36 = vcombine.high %v1086_v32, %v1086_v32  ;;  %v1094_v39 = vrot.slane %v1086_v32, %v11397_v25 }
   0xb   :  { %10525 = vmatprep.subr.mxu0 %v12842_v2  ;;  %10540 = vmatprep.subr.mxu1 %v12842_v2  ;;  %v1602_v48 = vcombine.high %v1601_v42, %v1601_v42  ;;  %v1609_v51 = vrot.slane %v1601_v42, %v11397_v25 }
   0xc   :  { %v1101_v41 = vrot.slane %v1087_v36, %v11397_v25  ;;  %v11473_v43 = vrot.slane %v1094_v39, %v11449_v38  ;;  %v1102_v44 = vcombine.high %v1094_v39, %v1094_v39 }
   0xd   :  { %10518 = vmatmul.mubr.msk.f32.vlgmr.msra.gmra.mrb[0].mxu0 %vm110_vm0, %v11342_v7  ;;  %10533 = vmatmul.mubr.msk.f32.vlgmr.msra.gmra.mrb[2].mxu1 %vm110_vm0, %v11394_v24  ;;  %v1616_v54 = vrot.slane %v1602_v48, %v11397_v25  ;;  %v11520_v56 = vrot.slane %v1609_v51, %v11449_v38  ;;  %v1617_v57 = vcombine.high %v1609_v51, %v1609_v51 }
   0xe   :  { %10526 = vmatpush3.xpose.msk.msra.mxu0 %vm110_vm0, %v11332_v5  ;;  %10527 = vmatprep.mubr.msk.f32.mxu0 %vm11244_vm1, %v12842_v2  ;;  %v11485_v46 = vrot.slane %v1101_v41, %v11449_v38  ;;  %v1103_v47 = vcombine.high %v1101_v41, %v1101_v41  ;;  %v1124_v49 = vmul.f32 %v11473_v43, %v11342_v7 }
   0xf   :  { %10535 = vmatprep.subr.mxu0 %v12842_v2  ;;  %10541 = vmatpush3.xpose.msk.msra.mxu1 %vm110_vm0, %v11365_v13  ;;  %v11495_v50 = vrot.slane %v1102_v44, %v11449_v38  ;;  %v11534_v59 = vrot.slane %v1616_v54, %v11449_v38  ;;  %v1618_v60 = vcombine.high %v1616_v54, %v1616_v54 }
  0x10   :  { %10542 = vmatprep.mubr.msk.f32.mxu1 %vm11244_vm1, %v12842_v2  ;;  %10550 = vmatprep.subr.mxu1 %v12842_v2  ;;  %v1125_v52 = vmul.f32 %v11485_v46, %v11342_v7  ;;  %v11510_v53 = vrot.slane %v1103_v47, %v11449_v38  ;;  %v1639_v61 = vmul.f32 %v11520_v56, %v11394_v24 }
  0x11   :  { %10528 = vmatmul.mubr.msk.f32.vlgmr.msra.gmra.mrb[2].mxu0 %vm110_vm0, %v266_v26  ;;  %v1126_v55 = vmul.f32 %v11495_v50, %v11342_v7  ;;  %v11543_v62 = vrot.slane %v1617_v57, %v11449_v38  ;;  %v1640_v63 = vmul.f32 %v11534_v59, %v11394_v24  ;;  %v11556_v3 = vrot.slane %v1618_v60, %v11449_v38 }
  0x12   :  { %10536 = vmatpush3.xpose.msk.msra.mxu0 %vm110_vm0, %v11365_v13  ;;  %10537 = vmatprep.mubr.msk.f32.mxu0 %vm11244_vm1, %v12842_v2  ;;  %v1127_v58 = vmul.f32 %v11510_v53, %v11342_v7 }
  0x13   :  { %10545 = vmatprep.subr.mxu0 %v12842_v2  ;;  %10543 = vmatmul.mubr.msk.f32.vlgmr.msra.gmra.mrb[4].mxu1 %vm110_vm0, %v511_v29  ;;  %v1641_v8 = vmul.f32 %v11543_v62, %v11394_v24  ;;  %v1642_v11 = vmul.f32 %v11556_v3, %v11394_v24 }
  0x14   :  { %10551 = vmatpush3.xpose.msk.msra.mxu1 %vm110_vm0, %v11332_v5  ;;  %10552 = vmatprep.mubr.msk.f32.mxu1 %vm11244_vm1, %v12842_v2 }
  0x15   :  { %10538 = vmatmul.mubr.msk.f32.vlgmr.msra.gmra.mrb[4].mxu0 %vm110_vm0, %v11424_v31  ;;  %10560 = vmatprep.subr.mxu1 %v12842_v2 }
  0x16   :  { %10546 = vmatpush3.xpose.msk.msra.mxu0 %vm110_vm0, %v604_v33  ;;  %10547 = vmatprep.mubr.msk.f32.mxu0 %vm11244_vm1, %v12842_v2 }
  0x17   :  { %10555 = vmatprep.subr.mxu0 %v12842_v2  ;;  %10553 = vmatmul.mubr.msk.f32.vlgmr.msra.gmra.mrb[6].mxu1 %vm110_vm0, %v11330_v4 }
  0x18   :  { %10561 = vmatpush3.xpose.msk.msra.mxu1 %vm110_vm0, %v842_v35  ;;  %10562 = vmatprep.mubr.msk.f32.mxu1 %vm11244_vm1, %v12842_v2 }
  0x19   :  { %10548 = vmatmul.mubr.msk.f32.vlgmr.msra.gmra.mrb[6].mxu0 %vm110_vm0, %v11321_v1  ;;  %10570 = vmatprep.subr.mxu1 %v12842_v2 }
  0x1a   :  { %10556 = vmatpush3.xpose.msk.msra.mxu0 %vm110_vm0, %v11332_v5  ;;  %10557 = vmatprep.mubr.msk.f32.mxu0 %vm11244_vm1, %v12842_v2 }
  0x1b   :  { %10565 = vmatprep.subr.mxu0 %v12842_v2  ;;  %10563 = vmatmul.mubr.msk.f32.vlgmr.msra.gmra.mrb[8].mxu1 %vm110_vm0, %v11356_v10 }
  0x1c   :  { %10571 = vmatpush3.xpose.msk.msra.mxu1 %vm110_vm0, %v11365_v13  ;;  %10572 = vmatprep.mubr.msk.f32.mxu1 %vm11244_vm1, %v12842_v2 }
  0x1d   :  { %10558 = vmatmul.mubr.msk.f32.vlgmr.msra.gmra.mrb[8].mxu0 %vm110_vm0, %v753_v40  ;;  %10583 = vmatprep.subr.mxu1 %v12842_v2 }
  0x1e   :  { %10566 = vmatpush3.xpose.msk.msra.mxu0 %vm110_vm0, %v11365_v13  ;;  %10567 = vmatprep.mubr.msk.f32.mxu0 %vm11244_vm1, %v12842_v2 }
  0x1f   :  { %10575 = vmatprep.subr.msk.mxu0 %vm110_vm0, %v11321_v1  ;;  %10573 = vmatmul.mubr.msk.f32.vlgmr.msra.gmra.mrb[10].mxu1 %vm110_vm0, %v991_v45 }
  0x20   :  { %10584 = vmatpush3.xpose.msk.msra.mxu1 %vm110_vm0, %v11351_v9  ;;  %10585 = vmatprep.mubr.msk.f32.mxu1 %vm11244_vm1, %v12842_v2 }
  0x21   :  { %10568 = vmatmul.mubr.msk.f32.vlgmr.msra.gmra.mrb[10].mxu0 %vm110_vm0, %v11389_v23  ;;  %10588 = vmatprep.subr.mxu1 %v12842_v2 }
  0x22   :  { %10576 = vmatpush3.xpose.msk.msra.mxu0 %vm110_vm0, %v11321_v1  ;;  %10577 = vmatprep.mubr.msk.f32.mxu0 %vm110_vm0, %v1124_v49 }
  0x23   :  { %10593 = vmatprep.subr.msk.mxu0 %vm110_vm0, %v11356_v10  ;;  %10586 = vmatmul.mubr.msk.f32.vlgmr.msra.gmra.mrb[12].mxu1 %vm110_vm0, %v11404_v27 }
  0x24   :  { %10589 = vmatpush3.xpose.msk.msra.mxu1 %vm110_vm0, %v11330_v4  ;;  %10590 = vmatprep.mubr.msk.f32.mxu1 %vm11244_vm1, %v12842_v2 }
  0x25   :  { %10578 = vmatmul.mubr.msk.f32.vlgmr.msra.gmra.mrb[12].mxu0 %vm110_vm0, %v1125_v52  ;;  %10601 = vmatprep.subr.mxu1 %v12842_v2 }
  0x26   :  { %10594 = vmatpush3.xpose.msk.msra.mxu0 %vm110_vm0, %v11356_v10  ;;  %10580 = vmatprep.mubr.msk.f32.mxu0 %vm110_vm0, %v1126_v55 }
  0x27   :  { %10611 = vmatprep.subr.mxu0 %v12842_v2  ;;  %10591 = vmatmul.mubr.msk.f32.vlgmr.msra.gmra.mrb[14].mxu1 %vm110_vm0, %v11404_v27 }
  0x28   :  { %10602 = vmatpush3.xpose.msk.msra.mxu1 %vm110_vm0, %v11424_v31  ;;  %10603 = vmatprep.mubr.msk.f32.mxu1 %vm11244_vm1, %v12842_v2 }
  0x29   :  { %10581 = vmatmul.mubr.msk.f32.gmra.mrb[14].mxu0 %vm110_vm0, %v1127_v58  ;;  %10606 = vmatprep.subr.mxu1 %v12842_v2 }
  0x2a   :  { %10595 = vmatprep.mubr.msk.f32.mxu0 %vm110_vm0, %v1639_v61 }
  0x2b   :  { %10604 = vmatmul.mubr.msk.f32.vlgmr.msra.gmra.mrb[16].mxu1 %vm110_vm0, %v11446_v37 }
  0x2c   :  { %10607 = vmatpush3.xpose.msk.msra.mxu1 %vm110_vm0, %v11389_v23  ;;  %10608 = vmatprep.mubr.msk.f32.mxu1 %vm11244_vm1, %v12842_v2 }
  0x2d   :  { %10596 = vmatmul.mubr.msk.f32.vlgmr.msra.gmra.mrb[16].mxu0 %vm110_vm0, %v1640_v63  ;;  %10616 = vmatprep.subr.mxu1 %v12842_v2 }
  0x2e   :  { %10612 = vmatpush3.xpose.msk.msra.mxu0 %vm110_vm0, %v11321_v1  ;;  %10598 = vmatprep.mubr.msk.f32.mxu0 %vm110_vm0, %v1641_v8 }
  0x2f   :  { %10609 = vmatmul.mubr.msk.f32.vlgmr.msra.gmra.mrb[18].mxu1 %vm110_vm0, %v11446_v37  ;;  %10621 = vmatprep.subr.mxu0 %v12842_v2 }
  0x30   :  { %10617 = vmatpush3.msra.mxu1 %v11321_v1  ;;  %10618 = vmatprep.mubr.msk.f32.mxu1 %vm11244_vm1, %v12842_v2 }
  0x31   :  { %10599 = vmatmul.mubr.msk.f32.gmra.mrb[18].mxu0 %vm110_vm0, %v1642_v11  ;;  %10626 = vmatprep.subr.mxu1 %v12842_v2 }
  0x32   :  { %10613 = vmatprep.mubr.msk.f32.mxu0 %vm11244_vm1, %v12842_v2 }
  0x35   :  { %10614 = vmatmul.mubr.msk.f32.vlgmr.msra.gmra.mrb[20].mxu0 %vm110_vm0, %v11342_v7 }
  0x36   :  { %10623 = vmatprep.mubr.msk.f32.mxu0 %vm11244_vm1, %v12842_v2 }
  0x92   :  { %v11589_v14 = vpop.xlane.xlu0 %2199 }
  0x93   :  { %2201 = vxpose.xlu1.b32.start.end [1/1] (short) (narrow) %v11589_v14, 8 }
  0xda   :  { %v260_v15 = vpop.f32.mrb[0].mxu1 }
  0xdb   :  { %v339_v16 = vmax.f32 %v260_v15, 1e-16  ;;  %v10524_v17 = vpop.f32.mrb[1].mxu1 }
  0xdd   :  { %11077 = vrsqrt.f32 %v339_v16 }
  0xe0   :  { %v183_v18 = vpop.f32.mrb[0].mxu0  ;;  %v428_v19 = vpop.f32.mrb[2].mxu1 }
  0xe1   :  { %v10519_v20 = vpop.f32.mrb[1].mxu0  ;;  %v10534_v21 = vpop.f32.mrb[3].mxu1 }
  0xe4   :  { %v335_v22 = vpop.f32.mrb[2].mxu0 }
  0xe5   :  { %v342_v26 = vmax.f32 %v335_v22, 1e-16  ;;  %v10529_v28 = vpop.f32.mrb[3].mxu0 }
  0xe6   :  { %v580_v29 = vpop.f32.mrb[4].mxu1 }
  0xe7   :  { %v11078_v30 = vpop.eup %11077  ;;  %11079 = vrsqrt.f32 %v342_v26  ;;  %v587_v32 = vmax.f32 %v580_v29, 1e-16  ;;  %v10544_v33 = vpop.f32.mrb[5].mxu1 }
  0xe8   :  { %v341_v34 = vmul.f32 %v11078_v30, %v183_v18  ;;  %v505_v35 = vpop.f32.mrb[4].mxu0 }
  0xe9   :  { %v584_v36 = vmax.f32 %v505_v35, 1e-16  ;;  %v10539_v39 = vpop.f32.mrb[5].mxu0  ;;  %11081 = vrsqrt.f32 %v587_v32 }
  0xea   :  { %v749_v40 = vpop.f32.mrb[6].mxu1 }
  0xeb   :  { %11083 = vrsqrt.f32 %v584_v36  ;;  %v826_v41 = vmax.f32 %v749_v40, 1e-16  ;;  %v10554_v42 = vpop.f32.mrb[7].mxu1 }
  0xec   :  { %v677_v44 = vpop.f32.mrb[6].mxu0 }
  0xed   :  { %v10549_v45 = vpop.f32.mrb[7].mxu0  ;;  %11085 = vrsqrt.f32 %v826_v41 }
  0xee   :  { %v915_v47 = vpop.f32.mrb[8].mxu1 }
  0xef   :  { %v10564_v48 = vpop.f32.mrb[9].mxu1 }
  0xf0   :  { %v822_v49 = vpop.f32.mrb[8].mxu0 }
  0xf1   :  { %v11080_v51 = vpop.eup %11079  ;;  %v829_v52 = vmax.f32 %v822_v49, 1e-16  ;;  %v10559_v54 = vpop.f32.mrb[9].mxu0 }
  0xf2   :  { %v347_v55 = vrot.slane %v11080_v51, %v11449_v38  ;;  %v1060_v57 = vpop.f32.mrb[10].mxu1 }
  0xf3   :  { %v11082_v58 = vpop.eup %11081  ;;  %11087 = vrsqrt.f32 %v829_v52  ;;  %v1067_v60 = vmax.f32 %v1060_v57, 1e-16  ;;  %v10574_v61 = vpop.f32.mrb[11].mxu1 }
  0xf4   :  { %v987_v63 = vpop.f32.mrb[10].mxu0  ;;  %v592_v8 = vrot.slane %v11082_v58, %v11449_v38  ;;  %v348_v11 = vmul.f32 %v347_v55, %v341_v34  ;;  %v11624_v52 = vpop.xlane.xlu0 %2196 }
  0xf5   :  { %v11084_v15 = vpop.eup %11083  ;;  %v1064_v16 = vmax.f32 %v987_v63, 1e-16  ;;  %v10569_v17 = vpop.f32.mrb[11].mxu0  ;;  %11089 = vrsqrt.f32 %v1067_v60 }
  0xf6   :  { %v586_v18 = vmul.f32 %v11084_v15, %v428_v19  ;;  %350 = vst.msk [vmem:[%s12837_s12] sm:$0xff] %vm349_vm2, %v348_v11  ;;  %v11632_v61 = vpop.f32.mrb[12].mxu1 }
  0xf7   :  { %v11086_v20 = vpop.eup %11085  ;;  %11091 = vrsqrt.f32 %v1064_v16  ;;  %v10587_v63 = vpop.f32.mrb[13].mxu1 }
  0xf8   :  { %v828_v21 = vmul.f32 %v11086_v20, %v677_v44  ;;  %v11598_v22 = vpop.f32.mrb[12].mxu0  ;;  %v11600_v26 = vmul.f32 %v592_v8, %v586_v18  ;;  %v11641_v20 = vand.u32 127, %v105_v0 }
  0xf9   :  { %v11602_v28 = vpop.f32.mrb[13].mxu0 }
  0xfa   :  { %v11634_v8 = vpop.f32.mrb[14].mxu1 }
  0xfb   :  { %v10592_v11 = vpop.f32.mrb[15].mxu1 }
  0xfc   :  { %v11604_v29 = vpop.f32.mrb[14].mxu0  ;;  %v2942_v11 = vsel %vm110_vm0, %v11389_v23, 0.0 }
  0xfd   :  { %v11088_v30 = vpop.eup %11087  ;;  %v11606_v32 = vpop.f32.mrb[15].mxu0 }
  0xfe   :  { %v834_v19 = vrot.slane %v11088_v30, %v11449_v38  ;;  %v11636_v15 = vpop.f32.mrb[16].mxu1 }
  0xff   :  { %v11090_v33 = vpop.eup %11089  ;;  %v10605_v16 = vpop.f32.mrb[17].mxu1 }
 0x100   :  { %v11609_v34 = vpop.f32.mrb[16].mxu0  ;;  %v1072_v35 = vrot.slane %v11090_v33, %v11449_v38  ;;  %v835_v36 = vmul.f32 %v834_v19, %v828_v21  ;;  %v97_v16 = vld [vmem:[%s12839_s10] sm:$0xf] }
 0x101   :  { %v11092_v39 = vpop.eup %11091  ;;  %v11612_v40 = vpop.f32.mrb[17].mxu0 }
 0x102   :  { %v1066_v41 = vmul.f32 %v11092_v39, %v915_v47  ;;  %10055 = vst.msk [vmem:[%s12837_s12 + $0x10] sm:$0xff] %vm349_vm2, %v835_v36  ;;  %v11638_v17 = vpop.f32.mrb[18].mxu1  ;;  %v93_v39 = vld [vmem:[%s12838_s8] sm:$0xf] }
 0x103   :  { %v10610_v18 = vpop.f32.mrb[19].mxu1 }
 0x104   :  { %v11618_v42 = vpop.f32.mrb[18].mxu0  ;;  %v11620_v44 = vmul.f32 %v1072_v35, %v1066_v41  ;;  %v11649_v41 = vmul.f32 %v93_v39, %v93_v39  ;;  %v2939_v18 = vsel %vm110_vm0, %v11424_v31, 0.0 }
 0x105   :  { %v11622_v45 = vpop.f32.mrb[19].mxu0 }
 0x106   :  { %10622 = vmatpush3.xpose.msk.msra.mxu0 %vm110_vm0, %v11649_v41 }
 0x107   :  { %10631 = vmatprep.subr.mxu0 %v12842_v2 }
 0x108   :  { %v2191_v48 = vpop.f32.mrb[20].mxu0 }
 0x109   :  { %v10615_v49 = vpop.f32.mrb[21].mxu0 }
 0x113   :  { %v2217_v51 = vpop.trf.xlu1 }
 0x114   :  { %v2236_v54 = vrot.slane %v2217_v51, %v11449_v38 }
 0x116   :  { %v2237_v47 = vmul.f32 %v2236_v54, %v11624_v52 }
 0x118   :  { %v2238_v55 = vmax.f32 %v2237_v47, 1e-16 }
 0x11a   :  { %11093 = vrsqrt.f32 %v2238_v55 }
 0x124   :  { %v11094_v57 = vpop.eup %11093 }
 0x125   :  { %v2240_v58 = vmul.f32 %v11094_v57, %v2191_v48 }
 0x127   :  { %10619 = vmatmul.mubr.msk.f32.vlgmr.msra.gmra.mrb[20].mxu1 %vm1456_vm3, %v2240_v58  ;;  %v2546_v60 = vsel %vm1456_vm3, %v2240_v58, -inf  ;;  %v2314_v36 = vsel %vm1456_vm3, %v2240_v58, 0.0 }
 0x128   :  { %2547 = vmax.xlane.f32.xlu1 %v2546_v60  ;;  %10628 = vmatprep.mubr.msk.f32.mxu1 %vm11244_vm1, %v12842_v2 }
 0x129   :  { %10627 = vmatpush3.xpose.msk.msra.mxu1 %vm110_vm0, %v11649_v41 }
 0x12a   :  { %10636 = vmatprep.subr.mxu1 %v12842_v2 }
 0x1b5   :  { %v2548_v21 = vpop.xlane.xlu1 %2547 }
 0x1b6   :  { %vm2549_vm4 = vcmp.eq.f32.partialorder %v2240_v58, %v2548_v21  ;;  %v11680_v21 = vmul.f32 %v97_v16, %v97_v16 }
 0x1b7   :  { %v2550_v30 = vsel %vm2549_vm4, %v11641_v20, 8 }
 0x1b8   :  { %v2551_v19 = vsel %vm1456_vm3, %v2550_v30, 2147483647 }
 0x1b9   :  { %v2553_v33 = vshra.s32 %v2551_v19, 16  ;;  %v2552_v49 = vand.u32 65535, %v2551_v19 }
 0x1bb   :  { %v2555_v35 = vcvt.s32.f32 %v2553_v33  ;;  %v2554_v54 = vcvt.s32.f32 %v2552_v49 }
 0x1bd   :  { %2556 = vmin.xlane.f32.xlu0 %v2555_v35 }
 0x1c1   :  { %2315 = vadd.xlane.f32.xlu0 %v2314_v36 }
 0x1fa   :  { %v2310_v0 = vpop.f32.mrb[20].mxu1 }
 0x1fb   :  { %v10620_v48 = vpop.f32.mrb[21].mxu1 }
 0x24a   :  { %v2557_v51 = vpop.xlane.xlu0 %2556 }
 0x24b   :  { %vm2558_vm5 = vcmp.eq.f32.partialorder %v2555_v35, %v2557_v51  ;;  %v2563_v30 = vcvt.f32.s32 %v2557_v51 }
 0x24c   :  { %v2559_v47 = vsel %vm2558_vm5, %v2554_v54, inf }
 0x24d   :  { %2560 = vmin.xlane.f32.xlu0 %v2559_v47  ;;  %v2564_v33 = vshll.u32 %v2563_v30, 16 }
 0x24e   :  { %v2316_v55 = vpop.xlane.xlu0 %2315 }
 0x24f   :  { %11095 = vrcp.f32 %v2316_v55 }
 0x251   :  { %2943 = vadd.xlane.f32.xlu0 %v2942_v11 }
 0x255   :  { %2940 = vadd.xlane.f32.xlu0 %v2939_v18 }
 0x259   :  { %v11096_v57 = vpop.eup %11095 }
 0x25a   :  { %v2318_v58 = vmul.f32 %v11096_v57, %v2310_v0 }
 0x25c   :  { %v2319_v60 = vmul.f32 %v2318_v58, %v11342_v7  ;;  %v2396_v63 = vmul.f32 %v2318_v58, %v2318_v58 }
 0x25e   :  { %10624 = vmatmul.mubr.msk.f32.vlgmr.msra.gmra.mrb[22].mxu0 %vm110_vm0, %v2319_v60  ;;  %10629 = vmatmul.mubr.msk.f32.vlgmr.msra.gmra.mrb[22].mxu1 %vm110_vm0, %v2396_v63 }
 0x25f   :  { %10632 = vmatpush3.xpose.msk.msra.mxu0 %vm110_vm0, %v11649_v41  ;;  %10633 = vmatprep.mubr.msk.f32.mxu0 %vm11244_vm1, %v12842_v2 }
 0x260   :  { %10637 = vmatpush3.msra.mxu1 %v11321_v1  ;;  %10638 = vmatprep.mubr.msk.f32.mxu1 %vm11244_vm1, %v12842_v2 }
 0x261   :  { %10646 = vmatprep.subr.mxu1 %v12842_v2  ;;  %10641 = vmatprep.subr.mxu0 %v12842_v2 }
 0x262   :  { %10634 = vmatmul.mubr.msk.f32.vlgmr.msra.gmra.mrb[24].mxu0 %vm110_vm0, %v11351_v9 }
 0x263   :  { %10643 = vmatprep.mubr.msk.f32.mxu0 %vm11244_vm1, %v12842_v2  ;;  %10642 = vmatpush3.xpose.msk.msra.mxu0 %vm110_vm0, %v11680_v21 }
 0x264   :  { %10651 = vmatprep.subr.mxu0 %v12842_v2 }
 0x2da   :  { %v2561_v19 = vpop.xlane.xlu0 %2560 }
 0x2db   :  { %v2562_v35 = vcvt.f32.s32 %v2561_v19 }
 0x2dd   :  { %v2565_v36 = vadd.s32 %v2564_v33, %v2562_v35 }
 0x2de   :  { %v11695_v16 = vpop.xlane.xlu0 %2943 }
 0x2df   :  { %vm2566_vm6 = vcmp.eq.s32.totalorder %v11641_v20, %v2565_v36  ;;  %2945 = vxpose.xlu0.b32.start.end [1/1] (short) (narrow) %v11695_v16, 8 }
 0x2e0   :  { %v10092_v39 = vsel %vm2566_vm6, 1.0, %v12842_v2 }
 0x2e1   :  { %10639 = vmatmul.mubr.msk.f32.vlgmr.msra.gmra.mrb[24].mxu1 %vm1456_vm3, %v10092_v39 }
 0x2e2   :  { %10647 = vmatpush3.xpose.msk.msra.mxu1 %vm110_vm0, %v11680_v21  ;;  %10648 = vmatprep.mubr.msk.f32.mxu1 %vm11244_vm1, %v12842_v2  ;;  %v11721_v35 = vpop.xlane.xlu0 %2940 }
 0x2e3   :  { %10656 = vmatprep.subr.mxu1 %v12842_v2 }
 0x331   :  { %v2392_v0 = vpop.f32.mrb[22].mxu0  ;;  %v2466_v48 = vpop.f32.mrb[22].mxu1 }
 0x332   :  { %v2540_v49 = vmax.f32 %v2466_v48, 1e-16  ;;  %v10625_v51 = vpop.f32.mrb[23].mxu0  ;;  %v10630_v54 = vpop.f32.mrb[23].mxu1 }
 0x334   :  { %11097 = vrsqrt.f32 %v2540_v49 }
 0x335   :  { %v2536_v47 = vpop.f32.mrb[24].mxu0 }
 0x336   :  { %v2543_v55 = vmax.f32 %v2536_v47, 1e-16  ;;  %v10635_v57 = vpop.f32.mrb[25].mxu0 }
 0x338   :  { %11099 = vrsqrt.f32 %v2543_v55 }
 0x33e   :  { %v11098_v58 = vpop.eup %11097 }
 0x33f   :  { %v2542_v60 = vmul.f32 %v11098_v58, %v2392_v0 }
 0x342   :  { %v11100_v63 = vpop.eup %11099 }
 0x343   :  { %v11693_v11 = vmul.f32 %v11100_v63, %v2542_v60 }
 0x35f   :  { %v2961_v36 = vpop.trf.xlu0 }
 0x360   :  { %v2980_v39 = vrot.slane %v2961_v36, %v11449_v38 }
 0x3b4   :  { %v2638_v18 = vpop.f32.mrb[24].mxu1 }
 0x3b5   :  { %v2642_v30 = vmul.f32 %v2638_v18, %v11342_v7  ;;  %v2719_v19 = vmul.f32 %v2638_v18, %v2638_v18  ;;  %v10640_v33 = vpop.f32.mrb[25].mxu1 }
 0x3b7   :  { %10644 = vmatmul.mubr.msk.f32.vlgmr.msra.gmra.mrb[26].mxu0 %vm110_vm0, %v2642_v30  ;;  %10649 = vmatmul.mubr.msk.f32.vlgmr.msra.gmra.mrb[26].mxu1 %vm110_vm0, %v2719_v19 }
 0x3b8   :  { %10657 = vmatpush3.xpose.msk.msra.mxu1 %vm110_vm0, %v11356_v10  ;;  %10652 = vmatpush3.xpose.msk.msra.mxu0 %vm110_vm0, %v11680_v21 }
 0x3b9   :  { %10653 = vmatprep.mubr.msk.f32.mxu0 %vm11244_vm1, %v12842_v2  ;;  %10658 = vmatprep.mubr.msk.f32.mxu1 %vm11244_vm1, %v12842_v2 }
 0x3ba   :  { %10661 = vmatprep.subr.mxu0 %v12842_v2  ;;  %10666 = vmatprep.subr.mxu1 %v12842_v2 }
 0x3bb   :  { %10654 = vmatmul.mubr.msk.f32.vlgmr.msra.gmra.mrb[28].mxu0 %vm110_vm0, %v11351_v9  ;;  %10659 = vmatmul.mubr.msk.f32.vlgmr.msra.gmra.mrb[28].mxu1 %vm110_vm0, %v11394_v24  ;;  %v2981_v9 = vmul.f32 %v2980_v39, %v11721_v35 }
 0x3bc   :  { %10662 = vmatpush3.msra.mxu0 %v11356_v10  ;;  %10663 = vmatprep.mubr.msk.f32.mxu0 %vm11244_vm1, %v12842_v2 }
 0x3bd   :  { %10671 = vmatprep.subr.mxu0 %v12842_v2  ;;  %10668 = vmatprep.mubr.msk.f32.mxu1 %vm11244_vm1, %v12842_v2  ;;  %v2982_v0 = vmax.f32 %v2981_v9, 1e-16 }
 0x3bf   :  { %11101 = vrsqrt.f32 %v2982_v0 }
 0x3c9   :  { %v11102_v55 = vpop.eup %11101 }
 0x48a   :  { %v2715_v48 = vpop.f32.mrb[26].mxu0  ;;  %v2789_v49 = vpop.f32.mrb[26].mxu1 }
 0x48b   :  { %v2863_v51 = vmax.f32 %v2789_v49, 1e-16  ;;  %v10645_v54 = vpop.f32.mrb[27].mxu0  ;;  %v10650_v47 = vpop.f32.mrb[27].mxu1 }
 0x48d   :  { %11103 = vrsqrt.f32 %v2863_v51 }
 0x48e   :  { %v2859_v57 = vpop.f32.mrb[28].mxu0  ;;  %v2935_v58 = vpop.f32.mrb[28].mxu1 }
 0x48f   :  { %v2866_v60 = vmax.f32 %v2859_v57, 1e-16  ;;  %v2984_v63 = vmul.f32 %v11102_v55, %v2935_v58  ;;  %v10660_v18 = vpop.f32.mrb[29].mxu1  ;;  %v10655_v30 = vpop.f32.mrb[29].mxu0  ;;  %v95_v57 = vld [vmem:[%s12840_s9] sm:$0xf] }
 0x491   :  { %11105 = vrsqrt.f32 %v2866_v60  ;;  %10664 = vmatmul.mubr.msk.f32.vlgmr.msra.gmra.mrb[30].mxu0 %vm1456_vm3, %v2984_v63  ;;  %v3290_v19 = vsel %vm1456_vm3, %v2984_v63, -inf  ;;  %v3058_v55 = vsel %vm1456_vm3, %v2984_v63, 0.0 }
 0x492   :  { %3291 = vmax.xlane.f32.xlu1 %v3290_v19  ;;  %10673 = vmatprep.mubr.msk.f32.mxu0 %vm11244_vm1, %v12842_v2 }
 0x497   :  { %v11104_v33 = vpop.eup %11103 }
 0x498   :  { %v2865_v36 = vmul.f32 %v11104_v33, %v2715_v48  ;;  %v11737_v48 = vmul.f32 %v95_v57, %v95_v57 }
 0x49a   :  { %10667 = vmatpush3.xpose.msk.msra.mxu1 %vm110_vm0, %v11737_v48  ;;  %10672 = vmatpush3.xpose.msk.msra.mxu0 %vm110_vm0, %v11737_v48 }
 0x49b   :  { %v11106_v39 = vpop.eup %11105  ;;  %10676 = vmatprep.subr.mxu1 %v12842_v2  ;;  %10681 = vmatprep.subr.mxu0 %v12842_v2 }
 0x49c   :  { %v11729_v9 = vmul.f32 %v11106_v39, %v2865_v36 }
 0x51f   :  { %v3292_v0 = vpop.xlane.xlu1 %3291 }
 0x520   :  { %vm3293_vm7 = vcmp.eq.f32.partialorder %v2984_v63, %v3292_v0 }
 0x521   :  { %v3294_v49 = vsel %vm3293_vm7, %v11641_v20, 8 }
 0x522   :  { %v3295_v51 = vsel %vm1456_vm3, %v3294_v49, 2147483647 }
 0x523   :  { %v3297_v54 = vshra.s32 %v3295_v51, 16  ;;  %v3296_v63 = vand.u32 65535, %v3295_v51  ;;  %v99_v51 = vld [vmem:[%s12841_s11] sm:$0xf]  ;;  %s11248_s11 = smov 16  }
 0x525   :  { %v3299_v47 = vcvt.s32.f32 %v3297_v54  ;;  %v3298_v30 = vcvt.s32.f32 %v3296_v63 }
 0x527   :  { %3300 = vmin.xlane.f32.xlu1 %v3299_v47 }
 0x52b   :  { %3059 = vadd.xlane.f32.xlu1 %v3058_v55 }
 0x564   :  { %v3054_v58 = vpop.f32.mrb[30].mxu0 }
 0x565   :  { %v10665_v60 = vpop.f32.mrb[31].mxu0 }
 0x5b4   :  { %v3301_v18 = vpop.xlane.xlu1 %3300 }
 0x5b5   :  { %vm3302_vm8 = vcmp.eq.f32.partialorder %v3299_v47, %v3301_v18  ;;  %v3307_v54 = vcvt.f32.s32 %v3301_v18 }
 0x5b6   :  { %v3303_v19 = vsel %vm3302_vm8, %v3298_v30, inf }
 0x5b7   :  { %3304 = vmin.xlane.f32.xlu1 %v3303_v19  ;;  %v3308_v55 = vshll.u32 %v3307_v54, 16 }
 0x5b8   :  { %v3060_v33 = vpop.xlane.xlu1 %3059 }
 0x5b9   :  { %11107 = vrcp.f32 %v3060_v33 }
 0x5c3   :  { %v11108_v36 = vpop.eup %11107 }
 0x5c4   :  { %v3062_v39 = vmul.f32 %v11108_v36, %v3054_v58 }
 0x5c6   :  { %v3063_v0 = vmul.f32 %v3062_v39, %v11394_v24  ;;  %v3140_v49 = vmul.f32 %v3062_v39, %v3062_v39 }
 0x5c8   :  { %10669 = vmatmul.mubr.msk.f32.vlgmr.msra.gmra.mrb[30].mxu1 %vm110_vm0, %v3063_v0  ;;  %10674 = vmatmul.mubr.msk.f32.vlgmr.msra.gmra.mrb[32].mxu0 %vm110_vm0, %v3140_v49 }
 0x5c9   :  { %10677 = vmatpush3.xpose.msk.msra.mxu1 %vm110_vm0, %v11737_v48  ;;  %10678 = vmatprep.mubr.msk.f32.mxu1 %vm11244_vm1, %v12842_v2 }
 0x5ca   :  { %10682 = vmatpush3.msra.mxu0 %v11356_v10  ;;  %10683 = vmatprep.mubr.msk.f32.mxu0 %vm11244_vm1, %v12842_v2  ;;  %v11765_v10 = vmul.f32 %v99_v51, %v99_v51 }
 0x5cb   :  { %10691 = vmatprep.subr.mxu0 %v12842_v2  ;;  %10686 = vmatprep.subr.mxu1 %v12842_v2 }
 0x5cc   :  { %10679 = vmatmul.mubr.msk.f32.vlgmr.msra.gmra.mrb[32].mxu1 %vm110_vm0, %v11424_v31 }
 0x5cd   :  { %10688 = vmatprep.mubr.msk.f32.mxu1 %vm11244_vm1, %v12842_v2  ;;  %10687 = vmatpush3.xpose.msk.msra.mxu1 %vm110_vm0, %v11765_v10 }
 0x5ce   :  { %10696 = vmatprep.subr.mxu1 %v12842_v2 }
 0x5ea   :  { %3683 = vxpose.xlu1.b32.start.end [1/1] (short) (narrow) %v11624_v52, 8 }
 0x644   :  { %v3305_v47 = vpop.xlane.xlu1 %3304 }
 0x645   :  { %v3306_v57 = vcvt.f32.s32 %v3305_v47 }
 0x647   :  { %v3309_v58 = vadd.s32 %v3308_v55, %v3306_v57 }
 0x649   :  { %vm3310_vm9 = vcmp.eq.s32.totalorder %v11641_v20, %v3309_v58 }
 0x64a   :  { %v10109_v52 = vsel %vm3310_vm9, 1.0, %v12842_v2 }
 0x64b   :  { %10684 = vmatmul.mubr.msk.f32.vlgmr.msra.gmra.mrb[34].mxu0 %vm1456_vm3, %v10109_v52 }
 0x64c   :  { %10692 = vmatpush3.xpose.msk.msra.mxu0 %vm110_vm0, %v11765_v10  ;;  %10693 = vmatprep.mubr.msk.f32.mxu0 %vm11244_vm1, %v12842_v2 }
 0x64d   :  { %10701 = vmatprep.subr.mxu0 %v12842_v2 }
 0x69b   :  { %v3136_v60 = vpop.f32.mrb[30].mxu1  ;;  %v3210_v63 = vpop.f32.mrb[32].mxu0 }
 0x69c   :  { %v3284_v18 = vmax.f32 %v3210_v63, 1e-16  ;;  %v10670_v30 = vpop.f32.mrb[31].mxu1  ;;  %v10675_v19 = vpop.f32.mrb[33].mxu0 }
 0x69e   :  { %11109 = vrsqrt.f32 %v3284_v18 }
 0x69f   :  { %v3280_v33 = vpop.f32.mrb[32].mxu1 }
 0x6a0   :  { %v3287_v36 = vmax.f32 %v3280_v33, 1e-16  ;;  %v10680_v39 = vpop.f32.mrb[33].mxu1 }
 0x6a2   :  { %11111 = vrsqrt.f32 %v3287_v36 }
 0x6a8   :  { %v11110_v0 = vpop.eup %11109 }
 0x6a9   :  { %v3286_v49 = vmul.f32 %v11110_v0, %v3136_v60 }
 0x6ac   :  { %v11112_v51 = vpop.eup %11111 }
 0x6ad   :  { %v11778_v54 = vmul.f32 %v11112_v51, %v3286_v49 }
 0x71e   :  { %v3382_v47 = vpop.f32.mrb[34].mxu0 }
 0x71f   :  { %v3386_v55 = vmul.f32 %v3382_v47, %v11394_v24  ;;  %v3463_v57 = vmul.f32 %v3382_v47, %v3382_v47  ;;  %v10685_v58 = vpop.f32.mrb[35].mxu0  ;;  %v3699_v24 = vpop.trf.xlu1 }
 0x721   :  { %10689 = vmatmul.mubr.msk.f32.vlgmr.msra.gmra.mrb[34].mxu1 %vm110_vm0, %v3386_v55  ;;  %10694 = vmatmul.mubr.msk.f32.vlgmr.msra.gmra.mrb[36].mxu0 %vm110_vm0, %v3463_v57 }
 0x722   :  { %10702 = vmatpush3.xpose.msk.msra.mxu0 %vm110_vm0, %v11342_v7  ;;  %10697 = vmatpush3.xpose.msk.msra.mxu1 %vm110_vm0, %v11765_v10 }
 0x723   :  { %10698 = vmatprep.mubr.msk.f32.mxu1 %vm11244_vm1, %v12842_v2  ;;  %10703 = vmatprep.mubr.msk.f32.mxu0 %vm11244_vm1, %v12842_v2 }
 0x724   :  { %10706 = vmatprep.subr.mxu1 %v12842_v2  ;;  %10711 = vmatprep.subr.mxu0 %v12842_v2 }
 0x725   :  { %10699 = vmatmul.mubr.msk.f32.vlgmr.msra.gmra.mrb[36].mxu1 %vm110_vm0, %v11424_v31  ;;  %10704 = vmatmul.mubr.msk.f32.vlgmr.msra.gmra.mrb[38].mxu0 %vm110_vm0, %v11321_v1  ;;  %v3718_v31 = vrot.slane %v3699_v24, %v11449_v38 }
 0x726   :  { %10707 = vmatpush3.msra.mxu1 %v11342_v7  ;;  %10708 = vmatprep.mubr.msk.f32.mxu1 %vm11244_vm1, %v12842_v2 }
 0x727   :  { %10716 = vmatprep.subr.mxu1 %v12842_v2  ;;  %10712 = vmatpush3.xpose.msk.msra.mxu0 %vm110_vm0, %v11649_v41  ;;  %v3719_v1 = vmul.f32 %v3718_v31, %v11589_v14 }
 0x728   :  { %10713 = vmatprep.mubr.msk.f32.mxu0 %vm11244_vm1, %v12842_v2  ;;  %10721 = vmatprep.subr.mxu0 %v12842_v2 }
 0x729   :  { %v3720_v52 = vmax.f32 %v3719_v1, 1e-16 }
 0x72b   :  { %11113 = vrsqrt.f32 %v3720_v52 }
 0x735   :  { %v11114_v33 = vpop.eup %11113 }
 0x7f4   :  { %v3459_v60 = vpop.f32.mrb[34].mxu1  ;;  %v3533_v63 = vpop.f32.mrb[36].mxu0 }
 0x7f5   :  { %v3607_v18 = vmax.f32 %v3533_v63, 1e-16  ;;  %v10690_v30 = vpop.f32.mrb[35].mxu1  ;;  %v10695_v19 = vpop.f32.mrb[37].mxu0 }
 0x7f7   :  { %11115 = vrsqrt.f32 %v3607_v18 }
 0x7f8   :  { %v3603_v36 = vpop.f32.mrb[36].mxu1  ;;  %v3679_v39 = vpop.f32.mrb[38].mxu0 }
 0x7f9   :  { %v3610_v0 = vmax.f32 %v3603_v36, 1e-16  ;;  %v3722_v49 = vmul.f32 %v11114_v33, %v3679_v39  ;;  %v10705_v51 = vpop.f32.mrb[39].mxu0  ;;  %v10700_v47 = vpop.f32.mrb[37].mxu1 }
 0x7fb   :  { %11117 = vrsqrt.f32 %v3610_v0  ;;  %10709 = vmatmul.mubr.msk.f32.vlgmr.msra.gmra.mrb[38].mxu1 %vm1456_vm3, %v3722_v49  ;;  %v4025_v14 = vsel %vm1456_vm3, %v3722_v49, -inf  ;;  %v3796_v55 = vsel %vm1456_vm3, %v3722_v49, 0.0 }
 0x7fc   :  { %4026 = vmax.xlane.f32.xlu0 %v4025_v14  ;;  %10717 = vmatpush3.xpose.msk.msra.mxu1 %vm110_vm0, %v11649_v41 }
 0x7fd   :  { %10718 = vmatprep.mubr.msk.f32.mxu1 %vm11244_vm1, %v12842_v2  ;;  %10726 = vmatprep.subr.mxu1 %v12842_v2 }
 0x800   :  { %3797 = vadd.xlane.f32.xlu0 %v3796_v55 }
 0x801   :  { %v11116_v57 = vpop.eup %11115 }
 0x802   :  { %v3609_v58 = vmul.f32 %v11116_v57, %v3459_v60  ;;  %v11237_v60 = vld [vmem:[%s12829_s2 + $0x10] sm:$0xff] }
 0x805   :  { %v11118_v24 = vpop.eup %11117 }
 0x806   :  { %v11816_v31 = vmul.f32 %v11118_v24, %v3609_v58 }
 0x889   :  { %v4027_v1 = vpop.xlane.xlu0 %4026 }
 0x88a   :  { %vm4028_vm10 = vcmp.eq.f32.partialorder %v3722_v49, %v4027_v1 }
 0x88b   :  { %v4029_v52 = vsel %vm4028_vm10, %v11641_v20, 8 }
 0x88c   :  { %v4030_v63 = vsel %vm1456_vm3, %v4029_v52, 2147483647 }
 0x88d   :  { %v4032_v18 = vshra.s32 %v4030_v63, 16  ;;  %v3798_v19 = vpop.xlane.xlu0 %3797  ;;  %v4031_v49 = vand.u32 65535, %v4030_v63 }
 0x88e   :  { %11119 = vrcp.f32 %v3798_v19 }
 0x88f   :  { %v4034_v30 = vcvt.s32.f32 %v4032_v18  ;;  %v4033_v14 = vcvt.s32.f32 %v4031_v49 }
 0x891   :  { %4035 = vmin.xlane.f32.xlu1 %v4034_v30 }
 0x898   :  { %v11120_v33 = vpop.eup %11119 }
 0x8ce   :  { %v3792_v36 = vpop.f32.mrb[38].mxu1 }
 0x8cf   :  { %v3800_v39 = vmul.f32 %v11120_v33, %v3792_v36  ;;  %v10710_v0 = vpop.f32.mrb[39].mxu1 }
 0x8d1   :  { %v3801_v51 = vmul.f32 %v11237_v60, %v3800_v39  ;;  %v3875_v47 = vmul.f32 %v3800_v39, %v3800_v39 }
 0x8d3   :  { %10714 = vmatmul.mubr.msk.f32.vlgmr.msra.gmra.mrb[40].mxu0 %vm110_vm0, %v3801_v51  ;;  %10719 = vmatmul.mubr.msk.f32.vlgmr.msra.gmra.mrb[40].mxu1 %vm110_vm0, %v3875_v47 }
 0x8d4   :  { %10722 = vmatpush3.xpose.msk.msra.mxu0 %vm110_vm0, %v11649_v41  ;;  %10723 = vmatprep.mubr.msk.f32.mxu0 %vm11244_vm1, %v12842_v2 }
 0x8d5   :  { %10727 = vmatpush3.msra.mxu1 %v11342_v7  ;;  %10728 = vmatprep.mubr.msk.f32.mxu1 %vm11244_vm1, %v12842_v2 }
 0x8d6   :  { %10736 = vmatprep.subr.mxu1 %v12842_v2  ;;  %10731 = vmatprep.subr.mxu0 %v12842_v2 }
 0x8d7   :  { %10724 = vmatmul.mubr.msk.f32.vlgmr.msra.gmra.mrb[42].mxu0 %vm110_vm0, %v11330_v4 }
 0x8d8   :  { %10732 = vmatpush3.xpose.msk.msra.mxu0 %vm110_vm0, %v11680_v21  ;;  %10733 = vmatprep.mubr.msk.f32.mxu0 %vm11244_vm1, %v12842_v2 }
 0x8d9   :  { %10741 = vmatprep.subr.mxu0 %v12842_v2 }
 0x91e   :  { %v4036_v7 = vpop.xlane.xlu1 %4035 }
 0x91f   :  { %vm4037_vm11 = vcmp.eq.f32.partialorder %v4034_v30, %v4036_v7  ;;  %v4042_v19 = vcvt.f32.s32 %v4036_v7 }
 0x920   :  { %v4038_v55 = vsel %vm4037_vm11, %v4033_v14, inf }
 0x921   :  { %4039 = vmin.xlane.f32.xlu0 %v4038_v55  ;;  %v4043_v63 = vshll.u32 %v4042_v19, 16 }
 0x94e   :  { %4415 = vxpose.xlu0.b32.start.end [1/1] (short) (narrow) %v11721_v35, 8 }
 0x9a6   :  { %v3871_v57 = vpop.f32.mrb[40].mxu0  ;;  %v3945_v58 = vpop.f32.mrb[40].mxu1 }
 0x9a7   :  { %v4019_v24 = vmax.f32 %v3945_v58, 1e-16  ;;  %v10715_v1 = vpop.f32.mrb[41].mxu0  ;;  %v10720_v52 = vpop.f32.mrb[41].mxu1 }
 0x9a9   :  { %11121 = vrsqrt.f32 %v4019_v24 }
 0x9aa   :  { %v4015_v18 = vpop.f32.mrb[42].mxu0 }
 0x9ab   :  { %v4022_v33 = vmax.f32 %v4015_v18, 1e-16  ;;  %v10725_v36 = vpop.f32.mrb[43].mxu0 }
 0x9ad   :  { %11123 = vrsqrt.f32 %v4022_v33 }
 0x9ae   :  { %v4040_v39 = vpop.xlane.xlu0 %4039 }
 0x9af   :  { %v4041_v0 = vcvt.f32.s32 %v4040_v39 }
 0x9b1   :  { %v4044_v51 = vadd.s32 %v4043_v63, %v4041_v0 }
 0x9b3   :  { %v11122_v30 = vpop.eup %11121  ;;  %vm4045_vm12 = vcmp.eq.s32.totalorder %v11641_v20, %v4044_v51 }
 0x9b4   :  { %v10126_v35 = vsel %vm4045_vm12, 1.0, %v12842_v2  ;;  %v4021_v47 = vmul.f32 %v11122_v30, %v3871_v57  ;;  %v11857_v57 = vld [vmem:[%s12835_s1] sm:$0xff]  ;;  %vm598_vm12 = vcmask 64544  }
 0x9b5   :  { %10729 = vmatmul.mubr.msk.f32.vlgmr.msra.gmra.mrb[42].mxu1 %vm1456_vm3, %v10126_v35 }
 0x9b6   :  { %10737 = vmatpush3.xpose.msk.msra.mxu1 %vm110_vm0, %v11680_v21  ;;  %10738 = vmatprep.mubr.msk.f32.mxu1 %vm11244_vm1, %v12842_v2 }
 0x9b7   :  { %v11124_v49 = vpop.eup %11123  ;;  %10746 = vmatprep.subr.mxu1 %v12842_v2 }
 0x9b8   :  { %v11850_v7 = vmul.f32 %v11124_v49, %v4021_v47 }
 0xa88   :  { %v4117_v14 = vpop.f32.mrb[42].mxu1 }
 0xa89   :  { %v4121_v55 = vmul.f32 %v11237_v60, %v4117_v14  ;;  %v4195_v58 = vmul.f32 %v4117_v14, %v4117_v14  ;;  %v10730_v24 = vpop.f32.mrb[43].mxu1  ;;  %v11874_v60 = vld [vmem:[%s12832_s3 + $0x10] sm:$0xff] }
 0xa8b   :  { %10734 = vmatmul.mubr.msk.f32.vlgmr.msra.gmra.mrb[44].mxu0 %vm110_vm0, %v4121_v55  ;;  %10739 = vmatmul.mubr.msk.f32.vlgmr.msra.gmra.mrb[44].mxu1 %vm110_vm0, %v4195_v58 }
 0xa8c   :  { %10747 = vmatpush3.xpose.msk.msra.mxu1 %vm110_vm0, %v11857_v57  ;;  %10742 = vmatpush3.xpose.msk.msra.mxu0 %vm110_vm0, %v11680_v21 }
 0xa8d   :  { %10743 = vmatprep.mubr.msk.f32.mxu0 %vm11244_vm1, %v12842_v2  ;;  %10748 = vmatprep.mubr.msk.f32.mxu1 %vm11244_vm1, %v12842_v2 }
 0xa8e   :  { %10751 = vmatprep.subr.mxu0 %v12842_v2  ;;  %10756 = vmatprep.subr.mxu1 %v12842_v2 }
 0xa8f   :  { %10744 = vmatmul.mubr.msk.f32.vlgmr.msra.gmra.mrb[46].mxu0 %vm110_vm0, %v11330_v4  ;;  %10749 = vmatmul.mubr.msk.f32.vlgmr.msra.gmra.mrb[46].mxu1 %vm110_vm0, %v11874_v60  ;;  %v4431_v4 = vpop.trf.xlu0 }
 0xa90   :  { %10752 = vmatpush3.msra.mxu0 %v11857_v57  ;;  %10753 = vmatprep.mubr.msk.f32.mxu0 %vm11244_vm1, %v12842_v2  ;;  %v4450_v1 = vrot.slane %v4431_v4, %v11449_v38 }
 0xa91   :  { %10761 = vmatprep.subr.mxu0 %v12842_v2  ;;  %10757 = vmatpush3.xpose.msk.msra.mxu1 %vm110_vm0, %v11737_v48 }
 0xa92   :  { %10758 = vmatprep.mubr.msk.f32.mxu1 %vm11244_vm1, %v12842_v2  ;;  %10766 = vmatprep.subr.mxu1 %v12842_v2  ;;  %v4451_v52 = vmul.f32 %v4450_v1, %v11695_v16 }
 0xa94   :  { %v4452_v18 = vmax.f32 %v4451_v52, 1e-16 }
 0xa96   :  { %11125 = vrsqrt.f32 %v4452_v18 }
 0xaa0   :  { %v11126_v0 = vpop.eup %11125 }
 0xb5e   :  { %v4191_v19 = vpop.f32.mrb[44].mxu0  ;;  %v4265_v33 = vpop.f32.mrb[44].mxu1 }
 0xb5f   :  { %v4339_v36 = vmax.f32 %v4265_v33, 1e-16  ;;  %v10735_v39 = vpop.f32.mrb[45].mxu0  ;;  %v10740_v63 = vpop.f32.mrb[45].mxu1 }
 0xb61   :  { %11127 = vrsqrt.f32 %v4339_v36 }
 0xb62   :  { %v4335_v51 = vpop.f32.mrb[46].mxu0  ;;  %v4411_v30 = vpop.f32.mrb[46].mxu1 }
 0xb63   :  { %v4342_v35 = vmax.f32 %v4335_v51, 1e-16  ;;  %v4454_v47 = vmul.f32 %v11126_v0, %v4411_v30  ;;  %v10750_v49 = vpop.f32.mrb[47].mxu1  ;;  %v10745_v14 = vpop.f32.mrb[47].mxu0 }
 0xb65   :  { %11129 = vrsqrt.f32 %v4342_v35  ;;  %10754 = vmatmul.mubr.msk.f32.vlgmr.msra.gmra.mrb[48].mxu0 %vm1456_vm3, %v4454_v47  ;;  %v4757_v16 = vsel %vm1456_vm3, %v4454_v47, -inf  ;;  %v4528_v39 = vsel %vm1456_vm3, %v4454_v47, 0.0 }
 0xb66   :  { %4758 = vmax.xlane.f32.xlu1 %v4757_v16  ;;  %10762 = vmatpush3.xpose.msk.msra.mxu0 %vm110_vm0, %v11737_v48 }
 0xb67   :  { %10763 = vmatprep.mubr.msk.f32.mxu0 %vm11244_vm1, %v12842_v2  ;;  %10771 = vmatprep.subr.mxu0 %v12842_v2 }
 0xb6b   :  { %v11128_v55 = vpop.eup %11127 }
 0xb6c   :  { %v4341_v58 = vmul.f32 %v11128_v55, %v4191_v19 }
 0xb6f   :  { %v11130_v24 = vpop.eup %11129 }
 0xb70   :  { %v11896_v4 = vmul.f32 %v11130_v24, %v4341_v58 }
 0xbf3   :  { %v4759_v1 = vpop.xlane.xlu1 %4758 }
 0xbf4   :  { %vm4760_vm13 = vcmp.eq.f32.partialorder %v4454_v47, %v4759_v1 }
 0xbf5   :  { %v4761_v52 = vsel %vm4760_vm13, %v11641_v20, 8 }
 0xbf6   :  { %v4762_v18 = vsel %vm1456_vm3, %v4761_v52, 2147483647 }
 0xbf7   :  { %v4764_v33 = vshra.s32 %v4762_v18, 16  ;;  %v4763_v51 = vand.u32 65535, %v4762_v18 }
 0xbf9   :  { %v4766_v36 = vcvt.s32.f32 %v4764_v33  ;;  %v4765_v19 = vcvt.s32.f32 %v4763_v51 }
 0xbfb   :  { %4767 = vmin.xlane.f32.xlu1 %v4766_v36 }
 0xbff   :  { %4529 = vadd.xlane.f32.xlu1 %v4528_v39 }
 0xc38   :  { %v4524_v63 = vpop.f32.mrb[48].mxu0 }
 0xc39   :  { %v10755_v0 = vpop.f32.mrb[49].mxu0 }
 0xc88   :  { %v4768_v30 = vpop.xlane.xlu1 %4767 }
 0xc89   :  { %vm4769_vm14 = vcmp.eq.f32.partialorder %v4766_v36, %v4768_v30  ;;  %v4774_v1 = vcvt.f32.s32 %v4768_v30 }
 0xc8a   :  { %v4770_v35 = vsel %vm4769_vm14, %v4765_v19, inf }
 0xc8b   :  { %4771 = vmin.xlane.f32.xlu1 %v4770_v35  ;;  %v4775_v18 = vshll.u32 %v4774_v1, 16  ;;  %v11944_v1 = vld [vmem:[%s12831_s0 + $0x8] sm:$0xff] }
 0xc8c   :  { %v4530_v49 = vpop.xlane.xlu1 %4529 }
 0xc8d   :  { %11131 = vrcp.f32 %v4530_v49 }
 0xc97   :  { %v11132_v14 = vpop.eup %11131 }
 0xc98   :  { %v4532_v16 = vmul.f32 %v11132_v14, %v4524_v63 }
 0xc9a   :  { %v4533_v55 = vmul.f32 %v11874_v60, %v4532_v16  ;;  %v4607_v58 = vmul.f32 %v4532_v16, %v4532_v16 }
 0xc9c   :  { %10759 = vmatmul.mubr.msk.f32.vlgmr.msra.gmra.mrb[48].mxu1 %vm110_vm0, %v4533_v55  ;;  %10764 = vmatmul.mubr.msk.f32.vlgmr.msra.gmra.mrb[50].mxu0 %vm110_vm0, %v4607_v58 }
 0xc9d   :  { %10767 = vmatpush3.xpose.msk.msra.mxu1 %vm110_vm0, %v11737_v48  ;;  %10768 = vmatprep.mubr.msk.f32.mxu1 %vm11244_vm1, %v12842_v2 }
 0xc9e   :  { %10772 = vmatpush3.msra.mxu0 %v11857_v57  ;;  %10773 = vmatprep.mubr.msk.f32.mxu0 %vm11244_vm1, %v12842_v2  ;;  %v11923_v57 = vld [vmem:[%s12829_s2 + $0x18] sm:$0xff] }
 0xc9f   :  { %10781 = vmatprep.subr.mxu0 %v12842_v2  ;;  %10776 = vmatprep.subr.mxu1 %v12842_v2  ;;  %v11927_v47 = vmul.f32 %v11923_v57, %v11923_v57 }
 0xca0   :  { %10769 = vmatmul.mubr.msk.f32.vlgmr.msra.gmra.mrb[50].mxu1 %vm110_vm0, %v11389_v23 }
 0xca1   :  { %10777 = vmatpush3.xpose.msk.msra.mxu1 %vm110_vm0, %v11765_v10  ;;  %10778 = vmatprep.mubr.msk.f32.mxu1 %vm11244_vm1, %v12842_v2  ;;  %v7112_v24 = vsel %vm110_vm0, %v11927_v47, 0.0 }
 0xca2   :  { %10786 = vmatprep.subr.mxu1 %v12842_v2  ;;  %7113 = vadd.xlane.f32.xlu1 %v7112_v24 }
 0xd18   :  { %v4772_v52 = vpop.xlane.xlu1 %4771 }
 0xd19   :  { %v4773_v33 = vcvt.f32.s32 %v4772_v52  ;;  %v11948_v52 = vmul.f32 %v11944_v1, %v11944_v1 }
 0xd1b   :  { %v4776_v36 = vadd.s32 %v4775_v18, %v4773_v33  ;;  %v7109_v18 = vsel %vm110_vm0, %v11948_v52, 0.0 }
 0xd1c   :  { %7110 = vadd.xlane.f32.xlu1 %v7109_v18 }
 0xd1d   :  { %vm4777_vm15 = vcmp.eq.s32.totalorder %v11641_v20, %v4776_v36  ;;  %v5132_v36 = vrot.slane %v11923_v57, %v11361_v12 }
 0xd1e   :  { %v10143_v39 = vsel %vm4777_vm15, 1.0, %v12842_v2 }
 0xd1f   :  { %10774 = vmatmul.mubr.msk.f32.vlgmr.msra.gmra.mrb[52].mxu0 %vm1456_vm3, %v10143_v39 }
 0xd20   :  { %10782 = vmatpush3.xpose.msk.msra.mxu0 %vm110_vm0, %v11765_v10  ;;  %10783 = vmatprep.mubr.msk.f32.mxu0 %vm11244_vm1, %v12842_v2 }
 0xd21   :  { %10791 = vmatprep.subr.mxu0 %v12842_v2 }
 0xd2f   :  { %v11952_v33 = vpop.xlane.xlu1 %7113 }
 0xd30   :  { %7115 = vxpose.xlu0.b32.start.end [1/1] (short) (narrow) %v11952_v33, 8 }
 0xd6f   :  { %v4603_v63 = vpop.f32.mrb[48].mxu1  ;;  %v4677_v0 = vpop.f32.mrb[50].mxu0 }
 0xd70   :  { %v4751_v51 = vmax.f32 %v4677_v0, 1e-16  ;;  %v10760_v30 = vpop.f32.mrb[49].mxu1  ;;  %v10765_v19 = vpop.f32.mrb[51].mxu0 }
 0xd71   :  { %v11962_v19 = vld [vmem:[%s12832_s3 + $0x18] sm:$0xff] }
 0xd72   :  { %11133 = vrsqrt.f32 %v4751_v51 }
 0xd73   :  { %v4747_v35 = vpop.f32.mrb[50].mxu1 }
 0xd74   :  { %v4754_v49 = vmax.f32 %v4747_v35, 1e-16  ;;  %v10770_v14 = vpop.f32.mrb[51].mxu1  ;;  %v5374_v35 = vrot.slane %v11962_v19, %v11361_v12 }
 0xd75   :  { %v11990_v14 = vld [vmem:[%s12835_s1 + $0x8] sm:$0xff] }
 0xd76   :  { %11135 = vrsqrt.f32 %v4754_v49  ;;  %v5375_v49 = vmul.f32 %v5374_v35, %v11365_v13 }
 0xd7c   :  { %v11134_v16 = vpop.eup %11133 }
 0xd7d   :  { %v4753_v55 = vmul.f32 %v11134_v16, %v4603_v63  ;;  %v5133_v63 = vmul.f32 %v5132_v36, %v11332_v5  ;;  %v12005_v16 = vmul.f32 %v11990_v14, %v11990_v14  ;;  %v5857_v36 = vrot.slane %v11990_v14, %v11361_v12 }
 0xd80   :  { %v11136_v58 = vpop.eup %11135 }
 0xd81   :  { %v11939_v24 = vmul.f32 %v11136_v58, %v4753_v55  ;;  %v12009_v55 = vmul.f32 %v11962_v19, %v11962_v19 }
 0xd83   :  { %v5528_v18 = vrot.slane %v12009_v55, 7 }
 0xdf2   :  { %v4849_v39 = vpop.f32.mrb[52].mxu0 }
 0xdf3   :  { %v4853_v0 = vmul.f32 %v11874_v60, %v4849_v39  ;;  %v4927_v51 = vmul.f32 %v4849_v39, %v4849_v39  ;;  %v10775_v30 = vpop.f32.mrb[53].mxu0  ;;  %v5286_v60 = vrot.slane %v11927_v47, 7  ;;  %v5769_v39 = vrot.slane %v11948_v52, 7 }
 0xdf5   :  { %10779 = vmatmul.mubr.msk.f32.vlgmr.msra.gmra.mrb[52].mxu1 %vm110_vm0, %v4853_v0  ;;  %10784 = vmatmul.mubr.msk.f32.vlgmr.msra.gmra.mrb[54].mxu0 %vm110_vm0, %v4927_v51  ;;  %v6096_v0 = vmul.f32 %v11944_v1, %v11485_v46  ;;  %v6557_v46 = vmul.f32 %v11990_v14, %v11520_v56  ;;  %v6560_v56 = vmul.f32 %v11990_v14, %v11556_v3 }
 0xdf6   :  { %10792 = vmatpush3.xpose.msk.msra.mxu0 %vm110_vm0, %v5133_v63  ;;  %10787 = vmatpush3.xpose.msk.msra.mxu1 %vm110_vm0, %v11765_v10  ;;  %v6007_v63 = vrot.slane %v12005_v16, 7 }
 0xdf7   :  { %10788 = vmatprep.mubr.msk.f32.mxu1 %vm11244_vm1, %v12842_v2  ;;  %10793 = vmatprep.mubr.msk.f32.mxu0 %vm11244_vm1, %v12842_v2 }
 0xdf8   :  { %10801 = vmatprep.subr.mxu0 %v12842_v2  ;;  %10796 = vmatprep.subr.mxu1 %v12842_v2 }
 0xdf9   :  { %10789 = vmatmul.mubr.msk.f32.vlgmr.msra.gmra.mrb[54].mxu1 %vm110_vm0, %v11389_v23  ;;  %10794 = vmatmul.mubr.msk.f32.vlgmr.msra.gmra.mrb[56].mxu0 %vm110_vm0, %v11944_v1  ;;  %v5619_v23 = vrot.slane %v11944_v1, %v11361_v12  ;;  %v5858_v12 = vmul.f32 %v5857_v36, %v11365_v13 }
 0xdfa   :  { %10802 = vmatpush3.xpose.msk.msra.mxu0 %vm110_vm0, %v11332_v5  ;;  %10797 = vmatpush3.xpose.msk.msra.mxu1 %vm110_vm0, %v11332_v5 }
 0xdfb   :  { %10798 = vmatprep.mubr.msk.f32.mxu1 %vm11244_vm1, %v12842_v2  ;;  %10803 = vmatprep.mubr.msk.f32.mxu0 %vm11244_vm1, %v12842_v2  ;;  %v5620_v58 = vmul.f32 %v5619_v23, %v11332_v5 }
 0xdfc   :  { %10811 = vmatprep.subr.mxu0 %v12842_v2  ;;  %10806 = vmatprep.subr.mxu1 %v12842_v2 }
 0xdfd   :  { %10799 = vmatmul.mubr.msk.f32.vlgmr.msra.gmra.mrb[56].mxu1 %vm110_vm0, %v11948_v52  ;;  %10804 = vmatmul.mubr.msk.f32.vlgmr.msra.gmra.mrb[58].mxu0 %vm110_vm0, %v5286_v60 }
 0xdfe   :  { %10812 = vmatpush3.xpose.msk.msra.mxu0 %vm110_vm0, %v11365_v13  ;;  %10807 = vmatpush3.xpose.msk.msra.mxu1 %vm110_vm0, %v5375_v49 }
 0xdff   :  { %10808 = vmatprep.mubr.msk.f32.mxu1 %vm11244_vm1, %v12842_v2  ;;  %10813 = vmatprep.mubr.msk.f32.mxu0 %vm11244_vm1, %v12842_v2 }
 0xe00   :  { %10821 = vmatprep.subr.mxu0 %v12842_v2  ;;  %10816 = vmatprep.subr.mxu1 %v12842_v2 }
 0xe01   :  { %10809 = vmatmul.mubr.msk.f32.vlgmr.msra.gmra.mrb[58].mxu1 %vm110_vm0, %v11990_v14  ;;  %10814 = vmatmul.mubr.msk.f32.vlgmr.msra.gmra.mrb[60].mxu0 %vm110_vm0, %v12005_v16 }
 0xe02   :  { %10822 = vmatpush3.xpose.msk.msra.mxu0 %vm110_vm0, %v5620_v58  ;;  %10817 = vmatpush3.xpose.msk.msra.mxu1 %vm110_vm0, %v11365_v13 }
 0xe03   :  { %10818 = vmatprep.mubr.msk.f32.mxu1 %vm11244_vm1, %v12842_v2  ;;  %10823 = vmatprep.mubr.msk.f32.mxu0 %vm11244_vm1, %v12842_v2 }
 0xe04   :  { %10831 = vmatprep.subr.mxu0 %v12842_v2  ;;  %10826 = vmatprep.subr.mxu1 %v12842_v2 }
 0xe05   :  { %10819 = vmatmul.mubr.msk.f32.vlgmr.msra.gmra.mrb[60].mxu1 %vm110_vm0, %v5528_v18  ;;  %10824 = vmatmul.mubr.msk.f32.vlgmr.msra.gmra.mrb[62].mxu0 %vm110_vm0, %v11923_v57 }
 0xe06   :  { %10832 = vmatpush3.xpose.msk.msra.mxu0 %vm110_vm0, %v11332_v5  ;;  %10827 = vmatpush3.xpose.msk.msra.mxu1 %vm110_vm0, %v11332_v5  ;;  %v6095_v5 = vmul.f32 %v11944_v1, %v11473_v43  ;;  %v6097_v43 = vmul.f32 %v11944_v1, %v11495_v50  ;;  %v6558_v50 = vmul.f32 %v11990_v14, %v11534_v59 }
 0xe07   :  { %10828 = vmatprep.mubr.msk.f32.mxu1 %vm11244_vm1, %v12842_v2  ;;  %10833 = vmatprep.mubr.msk.f32.mxu0 %vm11244_vm1, %v12842_v2 }
 0xe08   :  { %10841 = vmatprep.subr.mxu0 %v12842_v2  ;;  %10836 = vmatprep.subr.mxu1 %v12842_v2 }
 0xe09   :  { %10829 = vmatmul.mubr.msk.f32.vlgmr.msra.gmra.mrb[62].mxu1 %vm110_vm0, %v11927_v47  ;;  %10834 = vmatmul.mubr.msk.f32.vlgmr.msra.gmra.mrb[64].mxu0 %vm110_vm0, %v5769_v39 }
 0xe0a   :  { %10842 = vmatpush3.xpose.msk.msra.mxu0 %vm110_vm0, %v11365_v13  ;;  %10837 = vmatpush3.xpose.msk.msra.mxu1 %vm110_vm0, %v5858_v12 }
 0xe0b   :  { %10838 = vmatprep.mubr.msk.f32.mxu1 %vm11244_vm1, %v12842_v2  ;;  %10843 = vmatprep.mubr.msk.f32.mxu0 %vm11244_vm1, %v12842_v2 }
 0xe0c   :  { %10851 = vmatprep.subr.msk.mxu0 %vm110_vm0, %v11923_v57  ;;  %10846 = vmatprep.subr.mxu1 %v12842_v2 }
 0xe0d   :  { %10839 = vmatmul.mubr.msk.f32.vlgmr.msra.gmra.mrb[64].mxu1 %vm110_vm0, %v11962_v19  ;;  %10844 = vmatmul.mubr.msk.f32.vlgmr.msra.gmra.mrb[66].mxu0 %vm110_vm0, %v12009_v55 }
 0xe0e   :  { %10852 = vmatpush3.xpose.msk.msra.mxu0 %vm110_vm0, %v11923_v57  ;;  %10847 = vmatpush3.xpose.msk.msra.mxu1 %vm110_vm0, %v11365_v13  ;;  %v6098_v13 = vmul.f32 %v11944_v1, %v11510_v53  ;;  %v6559_v53 = vmul.f32 %v11990_v14, %v11543_v62 }
 0xe0f   :  { %10848 = vmatprep.mubr.msk.f32.mxu1 %vm11244_vm1, %v12842_v2  ;;  %10853 = vmatprep.mubr.msk.f32.mxu0 %vm110_vm0, %v6095_v5 }
 0xe10   :  { %10869 = vmatprep.subr.msk.mxu0 %vm110_vm0, %v11962_v19  ;;  %10859 = vmatprep.subr.mxu1 %v12842_v2 }
 0xe11   :  { %10849 = vmatmul.mubr.msk.f32.vlgmr.msra.gmra.mrb[66].mxu1 %vm110_vm0, %v6007_v63  ;;  %10854 = vmatmul.mubr.msk.f32.vlgmr.msra.gmra.mrb[68].mxu0 %vm110_vm0, %v6096_v0 }
 0xe12   :  { %10870 = vmatpush3.xpose.msk.msra.mxu0 %vm110_vm0, %v11962_v19  ;;  %10856 = vmatprep.mubr.msk.f32.mxu0 %vm110_vm0, %v6097_v43 }
 0xe13   :  { %10887 = vmatprep.subr.mxu0 %v12842_v2  ;;  %10860 = vmatpush3.xpose.msk.msra.mxu1 %vm110_vm0, %v11948_v52 }
 0xe14   :  { %10861 = vmatprep.mubr.msk.f32.mxu1 %vm11244_vm1, %v12842_v2  ;;  %10864 = vmatprep.subr.mxu1 %v12842_v2 }
 0xe15   :  { %10857 = vmatmul.mubr.msk.f32.gmra.mrb[70].mxu0 %vm110_vm0, %v6098_v13 }
 0xe16   :  { %10871 = vmatprep.mubr.msk.f32.mxu0 %vm110_vm0, %v6557_v46  ;;  %10862 = vmatmul.mubr.msk.f32.vlgmr.msra.gmra.mrb[68].mxu1 %vm110_vm0, %v11404_v27 }
 0xe17   :  { %10865 = vmatpush3.xpose.msk.msra.mxu1 %vm110_vm0, %v11927_v47  ;;  %10866 = vmatprep.mubr.msk.f32.mxu1 %vm11244_vm1, %v12842_v2 }
 0xe18   :  { %10877 = vmatprep.subr.mxu1 %v12842_v2 }
 0xe19   :  { %10872 = vmatmul.mubr.msk.f32.vlgmr.msra.gmra.mrb[72].mxu0 %vm110_vm0, %v6558_v50 }
 0xe1a   :  { %10888 = vmatpush3.xpose.msk.msra.mxu0 %vm110_vm0, %v11923_v57  ;;  %10874 = vmatprep.mubr.msk.f32.mxu0 %vm110_vm0, %v6559_v53  ;;  %v7131_v53 = vpop.trf.xlu0 }
 0xe1b   :  { %10867 = vmatmul.mubr.msk.f32.vlgmr.msra.gmra.mrb[70].mxu1 %vm110_vm0, %v11404_v27  ;;  %10897 = vmatprep.subr.mxu0 %v12842_v2 }
 0xe1c   :  { %10878 = vmatpush3.xpose.msk.msra.mxu1 %vm110_vm0, %v12005_v16  ;;  %10879 = vmatprep.mubr.msk.f32.mxu1 %vm11244_vm1, %v12842_v2 }
 0xe1d   :  { %10875 = vmatmul.mubr.msk.f32.gmra.mrb[74].mxu0 %vm110_vm0, %v6560_v56  ;;  %10882 = vmatprep.subr.mxu1 %v12842_v2 }
 0xe1e   :  { %10889 = vmatprep.mubr.msk.f32.mxu0 %vm11244_vm1, %v12842_v2 }
 0xe1f   :  { %10880 = vmatmul.mubr.msk.f32.vlgmr.msra.gmra.mrb[72].mxu1 %vm110_vm0, %v11446_v37 }
 0xe20   :  { %10883 = vmatpush3.xpose.msk.msra.mxu1 %vm110_vm0, %v12009_v55  ;;  %10884 = vmatprep.mubr.msk.f32.mxu1 %vm11244_vm1, %v12842_v2 }
 0xe21   :  { %10890 = vmatmul.mubr.msk.f32.vlgmr.msra.gmra.mrb[76].mxu0 %vm110_vm0, %v11944_v1  ;;  %10892 = vmatprep.subr.mxu1 %v12842_v2 }
 0xe22   :  { %10898 = vmatpush3.xpose.msk.msra.mxu0 %vm110_vm0, %v11649_v41  ;;  %10899 = vmatprep.mubr.msk.f32.mxu0 %vm11244_vm1, %v12842_v2 }
 0xe23   :  { %10885 = vmatmul.mubr.msk.f32.vlgmr.msra.gmra.mrb[74].mxu1 %vm110_vm0, %v11446_v37  ;;  %10907 = vmatprep.subr.mxu0 %v12842_v2 }
 0xe24   :  { %10893 = vmatpush3.msra.mxu1 %v11923_v57  ;;  %10894 = vmatprep.mubr.msk.f32.mxu1 %vm11244_vm1, %v12842_v2 }
 0xe25   :  { %10902 = vmatprep.subr.mxu1 %v12842_v2 }
 0xec8   :  { %v4923_v27 = vpop.f32.mrb[52].mxu1  ;;  %v4997_v59 = vpop.f32.mrb[54].mxu0 }
 0xec9   :  { %v5071_v62 = vmax.f32 %v4997_v59, 1e-16  ;;  %v10780_v3 = vpop.f32.mrb[53].mxu1  ;;  %v10785_v51 = vpop.f32.mrb[55].mxu0 }
 0xecb   :  { %11137 = vrsqrt.f32 %v5071_v62 }
 0xecc   :  { %v5067_v30 = vpop.f32.mrb[54].mxu1  ;;  %v5206_v35 = vpop.f32.mrb[56].mxu0 }
 0xecd   :  { %v5074_v60 = vmax.f32 %v5067_v30, 1e-16  ;;  %v10795_v49 = vpop.f32.mrb[57].mxu0  ;;  %v10790_v37 = vpop.f32.mrb[55].mxu1 }
 0xece   :  { %v12153_v49 = vpop.xlane.xlu1 %7110 }
 0xecf   :  { %11139 = vrsqrt.f32 %v5074_v60 }
 0xed0   :  { %v5280_v23 = vpop.f32.mrb[56].mxu1  ;;  %v5355_v58 = vpop.f32.mrb[58].mxu0 }
 0xed1   :  { %v5359_v18 = vmax.f32 %v5280_v23, 1e-16  ;;  %v5362_v36 = vmax.f32 %v5355_v58, 1e-16  ;;  %v10805_v39 = vpop.f32.mrb[59].mxu0  ;;  %v10800_v12 = vpop.f32.mrb[57].mxu1  ;;  %v7150_v58 = vrot.slane %v7131_v53, %v11449_v38 }
 0xed3   :  { %11141 = vrsqrt.f32 %v5359_v18 }
 0xed4   :  { %11143 = vrsqrt.f32 %v5362_v36  ;;  %v5522_v5 = vpop.f32.mrb[60].mxu0  ;;  %v5448_v63 = vpop.f32.mrb[58].mxu1 }
 0xed5   :  { %v11138_v0 = vpop.eup %11137  ;;  %v5601_v43 = vmax.f32 %v5522_v5, 1e-16  ;;  %v10815_v13 = vpop.f32.mrb[61].mxu0 }
 0xed6   :  { %v10810_v46 = vpop.f32.mrb[59].mxu1  ;;  %v5073_v50 = vmul.f32 %v11138_v0, %v4923_v27 }
 0xed7   :  { %11145 = vrsqrt.f32 %v5601_v43 }
 0xed8   :  { %v5597_v56 = vpop.f32.mrb[60].mxu1  ;;  %v5693_v59 = vpop.f32.mrb[62].mxu0 }
 0xed9   :  { %v11140_v62 = vpop.eup %11139  ;;  %v5604_v3 = vmax.f32 %v5597_v56, 1e-16  ;;  %v10825_v51 = vpop.f32.mrb[63].mxu0 }
 0xeda   :  { %v10820_v30 = vpop.f32.mrb[61].mxu1  ;;  %v12151_v60 = vmul.f32 %v11140_v62, %v5073_v50  ;;  %v7151_v50 = vmul.f32 %v7150_v58, %v12153_v49 }
 0xedb   :  { %11147 = vrsqrt.f32 %v5604_v3 }
 0xedc   :  { %v5765_v37 = vpop.f32.mrb[62].mxu1  ;;  %v5838_v23 = vpop.f32.mrb[64].mxu0 }
 0xedd   :  { %v11142_v18 = vpop.eup %11141  ;;  %v5842_v36 = vmax.f32 %v5765_v37, 1e-16  ;;  %v5845_v27 = vmax.f32 %v5838_v23, 1e-16  ;;  %v10835_v39 = vpop.f32.mrb[65].mxu0 }
 0xede   :  { %v10830_v12 = vpop.f32.mrb[63].mxu1  ;;  %v11144_v5 = vpop.eup %11143  ;;  %v5361_v0 = vmul.f32 %v11142_v18, %v5206_v35  ;;  %v7152_v23 = vmax.f32 %v7151_v50, 1e-16 }
 0xedf   :  { %v5367_v43 = vrot.slane %v11144_v5, %v11449_v38  ;;  %11149 = vrsqrt.f32 %v5842_v36 }
 0xee0   :  { %11151 = vrsqrt.f32 %v5845_v27  ;;  %v6003_v13 = vpop.f32.mrb[66].mxu0  ;;  %v5931_v46 = vpop.f32.mrb[64].mxu1 }
 0xee1   :  { %v11146_v56 = vpop.eup %11145  ;;  %v6080_v62 = vmax.f32 %v6003_v13, 1e-16  ;;  %v10845_v3 = vpop.f32.mrb[67].mxu0  ;;  %v5368_v53 = vmul.f32 %v5367_v43, %v5361_v0 }
 0xee2   :  { %v10840_v51 = vpop.f32.mrb[65].mxu1  ;;  %v5603_v30 = vmul.f32 %v11146_v56, %v5448_v63 }
 0xee3   :  { %11153 = vrsqrt.f32 %v6080_v62  ;;  %10167 = vst.msk [vmem:[%s12837_s12 + $0x8] sm:$0xff] %vm349_vm2, %v5368_v53 }
 0xee4   :  { %v6076_v35 = vpop.f32.mrb[66].mxu1  ;;  %v12162_v37 = vpop.f32.mrb[68].mxu0 }
 0xee5   :  { %12844 = vst [vmem:[#allocation2_spill] sm:$0xff] %v12162_v37  ;;  %v11148_v18 = vpop.eup %11147  ;;  %v6083_v36 = vmax.f32 %v6076_v35, 1e-16  ;;  %v12164_v27 = vpop.f32.mrb[69].mxu0 }
 0xee6   :  { %12845 = vst [vmem:[#allocation3_spill] sm:$0xff] %v12164_v27  ;;  %v10850_v58 = vpop.f32.mrb[67].mxu1  ;;  %v5609_v39 = vrot.slane %v11148_v18, %v11449_v38 }
 0xee7   :  { %11155 = vrsqrt.f32 %v6083_v36 }
 0xee8   :  { %11157 = vrsqrt.f32 %v7152_v23  ;;  %v12167_v63 = vpop.f32.mrb[70].mxu0  ;;  %v12169_v12 = vmul.f32 %v5609_v39, %v5603_v30 }
 0xee9   :  { %12846 = vst [vmem:[#allocation4_spill] sm:$0xff] %v12167_v63  ;;  %v11150_v5 = vpop.eup %11149  ;;  %v12171_v0 = vpop.f32.mrb[71].mxu0 }
 0xeea   :  { %12847 = vst [vmem:[#allocation5_spill] sm:$0xff] %v12171_v0  ;;  %v11152_v43 = vpop.eup %11151  ;;  %v5844_v13 = vmul.f32 %v11150_v5, %v5693_v59 }
 0xeeb   :  { %v5850_v50 = vrot.slane %v11152_v43, %v11449_v38 }
 0xeec   :  { %v12174_v56 = vpop.f32.mrb[72].mxu0 }
 0xeed   :  { %12848 = vst [vmem:[#allocation6_spill] sm:$0xff] %v12174_v56  ;;  %v11154_v62 = vpop.eup %11153  ;;  %v12176_v3 = vpop.f32.mrb[73].mxu0  ;;  %v5851_v51 = vmul.f32 %v5850_v50, %v5844_v13 }
 0xeee   :  { %v6082_v53 = vmul.f32 %v11154_v62, %v5931_v46  ;;  %v12197_v13 = vpop.f32.mrb[68].mxu1 }
 0xeef   :  { %10181 = vst.msk [vmem:[%s12837_s12 + $0x18] sm:$0xff] %vm349_vm2, %v5851_v51  ;;  %v10863_v50 = vpop.f32.mrb[69].mxu1 }
 0xef0   :  { %v12182_v30 = vpop.f32.mrb[74].mxu0  ;;  %v12199_v62 = vpop.f32.mrb[70].mxu1 }
 0xef1   :  { %12849 = vst [vmem:[#allocation7_spill] sm:$0xff] %v12182_v30  ;;  %v11156_v35 = vpop.eup %11155  ;;  %v12184_v23 = vpop.f32.mrb[75].mxu0 }
 0xef2   :  { %12850 = vst [vmem:[#allocation8_spill] sm:$0xff] %v12184_v23  ;;  %v11158_v59 = vpop.eup %11157  ;;  %v6088_v18 = vrot.slane %v11156_v35, %v11449_v38  ;;  %v10868_v51 = vpop.f32.mrb[71].mxu1 }
 0xef4   :  { %v7105_v36 = vpop.f32.mrb[76].mxu0  ;;  %v12187_v58 = vmul.f32 %v6088_v18, %v6082_v53  ;;  %v12201_v53 = vpop.f32.mrb[72].mxu1 }
 0xef5   :  { %v7154_v39 = vmul.f32 %v11158_v59, %v7105_v36  ;;  %v10891_v5 = vpop.f32.mrb[77].mxu0  ;;  %v10881_v35 = vpop.f32.mrb[73].mxu1 }
 0xef6   :  { %12851 = vst [vmem:[#allocation9_spill] sm:$0xff] %v12187_v58  ;;  %v12203_v59 = vpop.f32.mrb[74].mxu1 }
 0xef7   :  { %10895 = vmatmul.mubr.msk.f32.vlgmr.msra.gmra.mrb[76].mxu1 %vm1456_vm3, %v7154_v39  ;;  %v7457_v46 = vsel %vm1456_vm3, %v7154_v39, -inf  ;;  %v7228_v43 = vsel %vm1456_vm3, %v7154_v39, 0.0  ;;  %v10886_v18 = vpop.f32.mrb[75].mxu1 }
 0xef8   :  { %7458 = vmax.xlane.f32.xlu1 %v7457_v46  ;;  %10903 = vmatpush3.xpose.msk.msra.mxu1 %vm110_vm0, %v11649_v41  ;;  %v7847_v18 = vsel %vm110_vm0, %v12005_v16, 0.0 }
 0xef9   :  { %10904 = vmatprep.mubr.msk.f32.mxu1 %vm11244_vm1, %v12842_v2  ;;  %10912 = vmatprep.subr.mxu1 %v12842_v2 }
 0xefc   :  { %7229 = vadd.xlane.f32.xlu1 %v7228_v43 }
 0xf85   :  { %v7459_v36 = vpop.xlane.xlu1 %7458 }
 0xf86   :  { %vm7460_vm2 = vcmp.eq.f32.partialorder %v7154_v39, %v7459_v36  ;;  %v12852_v39 = vmov 0.0  }
 0xf87   :  { %v7461_v5 = vsel %vm7460_vm2, %v11641_v20, 8  ;;  %vm1491_vm2 = vcmask 1041409  }
 0xf88   :  { %v7462_v46 = vsel %vm1456_vm3, %v7461_v5, 2147483647 }
 0xf89   :  { %v7464_v2 = vshra.s32 %v7462_v46, 16  ;;  %v7230_v23 = vpop.xlane.xlu1 %7229 }
 0xf8a   :  { %11159 = vrcp.f32 %v7230_v23  ;;  %v7850_v23 = vsel %vm110_vm0, %v12009_v55, 0.0 }
 0xf8b   :  { %v7466_v43 = vcvt.s32.f32 %v7464_v2  ;;  %v7463_v2 = vand.u32 65535, %v7462_v46 }
 0xf8d   :  { %7467 = vmin.xlane.f32.xlu0 %v7466_v43 }
 0xf94   :  { %v11160_v50 = vpop.eup %11159 }
 0xfca   :  { %v7224_v56 = vpop.f32.mrb[76].mxu1 }
 0xfcb   :  { %v7232_v51 = vmul.f32 %v11160_v50, %v7224_v56  ;;  %v10896_v0 = vpop.f32.mrb[77].mxu1 }
 0xfcc   :  { %v7465_v0 = vcvt.s32.f32 %v7463_v2 }
 0xfcd   :  { %v7233_v35 = vmul.f32 %v11944_v1, %v7232_v51  ;;  %v7307_v37 = vmul.f32 %v7232_v51, %v7232_v51 }
 0xfcf   :  { %10900 = vmatmul.mubr.msk.f32.vlgmr.msra.gmra.mrb[78].mxu0 %vm110_vm0, %v7233_v35  ;;  %10905 = vmatmul.mubr.msk.f32.vlgmr.msra.gmra.mrb[78].mxu1 %vm110_vm0, %v7307_v37 }
 0xfd0   :  { %10908 = vmatpush3.xpose.msk.msra.mxu0 %vm110_vm0, %v11649_v41  ;;  %10909 = vmatprep.mubr.msk.f32.mxu0 %vm11244_vm1, %v12852_v39 }
 0xfd1   :  { %10913 = vmatpush3.msra.mxu1 %v11923_v57  ;;  %10914 = vmatprep.mubr.msk.f32.mxu1 %vm11244_vm1, %v12852_v39 }
 0xfd2   :  { %10922 = vmatprep.subr.mxu1 %v12852_v39  ;;  %10917 = vmatprep.subr.mxu0 %v12852_v39 }
 0xfd3   :  { %10910 = vmatmul.mubr.msk.f32.vlgmr.msra.gmra.mrb[80].mxu0 %vm110_vm0, %v11948_v52 }
 0xfd4   :  { %10918 = vmatpush3.xpose.msk.msra.mxu0 %vm110_vm0, %v11680_v21  ;;  %10919 = vmatprep.mubr.msk.f32.mxu0 %vm11244_vm1, %v12852_v39 }
 0xfd5   :  { %10927 = vmatprep.subr.mxu0 %v12852_v39 }
0x101a   :  { %v7468_v37 = vpop.xlane.xlu0 %7467 }
0x101b   :  { %vm7469_vm4 = vcmp.eq.f32.partialorder %v7466_v43, %v7468_v37  ;;  %v7474_v30 = vcvt.f32.s32 %v7468_v37 }
0x101c   :  { %v7470_v56 = vsel %vm7469_vm4, %v7465_v0, inf  ;;  %vm1493_vm4 = vcmask 1042434  }
0x101d   :  { %7471 = vmin.xlane.f32.xlu1 %v7470_v56  ;;  %v7475_v56 = vshll.u32 %v7474_v30, 16 }
0x1021   :  { %7851 = vadd.xlane.f32.xlu1 %v7850_v23 }
0x1025   :  { %7848 = vadd.xlane.f32.xlu1 %v7847_v18 }
0x10a2   :  { %v7303_v36 = vpop.f32.mrb[78].mxu0  ;;  %v7377_v5 = vpop.f32.mrb[78].mxu1 }
0x10a3   :  { %v7451_v50 = vmax.f32 %v7377_v5, 1e-16  ;;  %v10901_v51 = vpop.f32.mrb[79].mxu0  ;;  %v10906_v35 = vpop.f32.mrb[79].mxu1 }
0x10a5   :  { %11161 = vrsqrt.f32 %v7451_v50 }
0x10a6   :  { %v7447_v46 = vpop.f32.mrb[80].mxu0 }
0x10a7   :  { %v7454_v2 = vmax.f32 %v7447_v46, 1e-16  ;;  %v10911_v43 = vpop.f32.mrb[81].mxu0 }
0x10a9   :  { %11163 = vrsqrt.f32 %v7454_v2 }
0x10aa   :  { %v7472_v0 = vpop.xlane.xlu1 %7471 }
0x10ab   :  { %v7473_v27 = vcvt.f32.s32 %v7472_v0 }
0x10ad   :  { %v7476_v63 = vadd.s32 %v7475_v56, %v7473_v27 }
0x10ae   :  { %v12240_v27 = vpop.xlane.xlu1 %7851 }
0x10af   :  { %v11162_v23 = vpop.eup %11161  ;;  %vm7477_vm5 = vcmp.eq.s32.totalorder %v11641_v20, %v7476_v63  ;;  %7853 = vxpose.xlu1.b32.start.end [1/1] (short) (narrow) %v12240_v27, 8 }
0x10b0   :  { %v10220_v18 = vsel %vm7477_vm5, 1.0, %v12852_v39  ;;  %v7453_v58 = vmul.f32 %v11162_v23, %v7303_v36  ;;  %vm1495_vm5 = vcmask 1043459  }
0x10b1   :  { %10915 = vmatmul.mubr.msk.f32.vlgmr.msra.gmra.mrb[80].mxu1 %vm1456_vm3, %v10220_v18 }
0x10b2   :  { %10923 = vmatpush3.xpose.msk.msra.mxu1 %vm110_vm0, %v11680_v21  ;;  %10924 = vmatprep.mubr.msk.f32.mxu1 %vm11244_vm1, %v12852_v39 }
0x10b3   :  { %v11164_v37 = vpop.eup %11163  ;;  %10932 = vmatprep.subr.mxu1 %v12852_v39 }
0x10b4   :  { %v12238_v30 = vmul.f32 %v11164_v37, %v7453_v58  ;;  %v12269_v58 = vpop.xlane.xlu1 %7848 }
0x10b6   :  { %12853 = vst [vmem:[#allocation10_spill] sm:$0xff] %v12238_v30 }
0x1184   :  { %v7549_v63 = vpop.f32.mrb[80].mxu1 }
0x1185   :  { %v7553_v36 = vmul.f32 %v11944_v1, %v7549_v63  ;;  %v7627_v5 = vmul.f32 %v7549_v63, %v7549_v63  ;;  %v10916_v50 = vpop.f32.mrb[81].mxu1 }
0x1187   :  { %10920 = vmatmul.mubr.msk.f32.vlgmr.msra.gmra.mrb[82].mxu0 %vm110_vm0, %v7553_v36  ;;  %10925 = vmatmul.mubr.msk.f32.vlgmr.msra.gmra.mrb[82].mxu1 %vm110_vm0, %v7627_v5 }
0x1188   :  { %10933 = vmatpush3.xpose.msk.msra.mxu1 %vm110_vm0, %v11962_v19  ;;  %10928 = vmatpush3.xpose.msk.msra.mxu0 %vm110_vm0, %v11680_v21 }
0x1189   :  { %10929 = vmatprep.mubr.msk.f32.mxu0 %vm11244_vm1, %v12852_v39  ;;  %10934 = vmatprep.mubr.msk.f32.mxu1 %vm11244_vm1, %v12852_v39 }
0x118a   :  { %10937 = vmatprep.subr.mxu0 %v12852_v39  ;;  %10942 = vmatprep.subr.mxu1 %v12852_v39 }
0x118b   :  { %10930 = vmatmul.mubr.msk.f32.vlgmr.msra.gmra.mrb[84].mxu0 %vm110_vm0, %v11948_v52  ;;  %10935 = vmatmul.mubr.msk.f32.vlgmr.msra.gmra.mrb[84].mxu1 %vm110_vm0, %v11990_v14  ;;  %v7869_v52 = vpop.trf.xlu1 }
0x118c   :  { %10938 = vmatpush3.msra.mxu0 %v11962_v19  ;;  %10939 = vmatprep.mubr.msk.f32.mxu0 %vm11244_vm1, %v12852_v39  ;;  %v7888_v51 = vrot.slane %v7869_v52, %v11449_v38 }
0x118d   :  { %10947 = vmatprep.subr.mxu0 %v12852_v39  ;;  %10943 = vmatpush3.xpose.msk.msra.mxu1 %vm110_vm0, %v11737_v48 }
0x118e   :  { %10944 = vmatprep.mubr.msk.f32.mxu1 %vm11244_vm1, %v12852_v39  ;;  %10952 = vmatprep.subr.mxu1 %v12852_v39  ;;  %v7889_v35 = vmul.f32 %v7888_v51, %v12269_v58 }
0x1190   :  { %v7890_v46 = vmax.f32 %v7889_v35, 1e-16 }
0x1192   :  { %11165 = vrsqrt.f32 %v7890_v46 }
0x119c   :  { %v11166_v18 = vpop.eup %11165 }
0x125a   :  { %v7623_v2 = vpop.f32.mrb[82].mxu0  ;;  %v7697_v43 = vpop.f32.mrb[82].mxu1 }
0x125b   :  { %v7771_v0 = vmax.f32 %v7697_v43, 1e-16  ;;  %v10921_v56 = vpop.f32.mrb[83].mxu0  ;;  %v10926_v23 = vpop.f32.mrb[83].mxu1 }
0x125d   :  { %11167 = vrsqrt.f32 %v7771_v0 }
0x125e   :  { %v7767_v37 = vpop.f32.mrb[84].mxu0  ;;  %v7843_v63 = vpop.f32.mrb[84].mxu1 }
0x125f   :  { %v7774_v36 = vmax.f32 %v7767_v37, 1e-16  ;;  %v7892_v5 = vmul.f32 %v11166_v18, %v7843_v63  ;;  %v10936_v50 = vpop.f32.mrb[85].mxu1  ;;  %v10931_v30 = vpop.f32.mrb[85].mxu0 }
0x1261   :  { %11169 = vrsqrt.f32 %v7774_v36  ;;  %10940 = vmatmul.mubr.msk.f32.vlgmr.msra.gmra.mrb[86].mxu0 %vm1456_vm3, %v7892_v5  ;;  %v8195_v52 = vsel %vm1456_vm3, %v7892_v5, -inf  ;;  %v7966_v37 = vsel %vm1456_vm3, %v7892_v5, 0.0 }
0x1262   :  { %8196 = vmax.xlane.f32.xlu0 %v8195_v52  ;;  %10948 = vmatpush3.xpose.msk.msra.mxu0 %vm110_vm0, %v11737_v48 }
0x1263   :  { %10949 = vmatprep.mubr.msk.f32.mxu0 %vm11244_vm1, %v12852_v39  ;;  %10957 = vmatprep.subr.mxu0 %v12852_v39 }
0x1267   :  { %v11168_v51 = vpop.eup %11167 }
0x1268   :  { %v7773_v35 = vmul.f32 %v11168_v51, %v7623_v2 }
0x126b   :  { %v11170_v46 = vpop.eup %11169 }
0x126c   :  { %v12280_v43 = vmul.f32 %v11170_v46, %v7773_v35 }
0x126e   :  { %12854 = vst [vmem:[#allocation11_spill] sm:$0xff] %v12280_v43 }
0x12ef   :  { %v8197_v30 = vpop.xlane.xlu0 %8196 }
0x12f0   :  { %vm8198_vm6 = vcmp.eq.f32.partialorder %v7892_v5, %v8197_v30 }
0x12f1   :  { %v8199_v0 = vsel %vm8198_vm6, %v11641_v20, 8  ;;  %vm5087_vm6 = vcmask 195744  }
0x12f2   :  { %v8200_v56 = vsel %vm1456_vm3, %v8199_v0, 2147483647 }
0x12f3   :  { %v8202_v23 = vshra.s32 %v8200_v56, 16  ;;  %v8201_v50 = vand.u32 65535, %v8200_v56 }
0x12f5   :  { %v8204_v18 = vcvt.s32.f32 %v8202_v23  ;;  %v8203_v2 = vcvt.s32.f32 %v8201_v50 }
0x12f7   :  { %8205 = vmin.xlane.f32.xlu0 %v8204_v18 }
0x12fb   :  { %7967 = vadd.xlane.f32.xlu0 %v7966_v37 }
0x1334   :  { %v7962_v63 = vpop.f32.mrb[86].mxu0 }
0x1335   :  { %v10941_v36 = vpop.f32.mrb[87].mxu0 }
0x1384   :  { %v8206_v52 = vpop.xlane.xlu0 %8205 }
0x1385   :  { %vm8207_vm7 = vcmp.eq.f32.partialorder %v8204_v18, %v8206_v52 }
0x1386   :  { %v8208_v51 = vsel %vm8207_vm7, %v8203_v2, inf  ;;  %vm5093_vm7 = vcmask 228544  }
0x1387   :  { %8209 = vmin.xlane.f32.xlu0 %v8208_v51 }
0x1388   :  { %v7968_v35 = vpop.xlane.xlu0 %7967 }
0x1389   :  { %11171 = vrcp.f32 %v7968_v35 }
0x1393   :  { %v11172_v46 = vpop.eup %11171 }
0x1394   :  { %v7970_v30 = vmul.f32 %v11172_v46, %v7962_v63 }
0x1396   :  { %v7971_v0 = vmul.f32 %v11990_v14, %v7970_v30  ;;  %v8045_v43 = vmul.f32 %v7970_v30, %v7970_v30 }
0x1398   :  { %10945 = vmatmul.mubr.msk.f32.vlgmr.msra.gmra.mrb[86].mxu1 %vm110_vm0, %v7971_v0  ;;  %10950 = vmatmul.mubr.msk.f32.vlgmr.msra.gmra.mrb[88].mxu0 %vm110_vm0, %v8045_v43 }
0x1399   :  { %10953 = vmatpush3.xpose.msk.msra.mxu1 %vm110_vm0, %v11737_v48  ;;  %10954 = vmatprep.mubr.msk.f32.mxu1 %vm11244_vm1, %v12852_v39 }
0x139a   :  { %10958 = vmatpush3.msra.mxu0 %v11962_v19  ;;  %10959 = vmatprep.mubr.msk.f32.mxu0 %vm11244_vm1, %v12852_v39  ;;  %v8212_v19 = vcvt.f32.s32 %v8206_v52 }
0x139b   :  { %10967 = vmatprep.subr.mxu0 %v12852_v39  ;;  %10962 = vmatprep.subr.mxu1 %v12852_v39 }
0x139c   :  { %10955 = vmatmul.mubr.msk.f32.vlgmr.msra.gmra.mrb[88].mxu1 %vm110_vm0, %v12005_v16  ;;  %v8213_v43 = vshll.u32 %v8212_v19, 16 }
0x139d   :  { %10963 = vmatpush3.xpose.msk.msra.mxu1 %vm110_vm0, %v11765_v10  ;;  %10964 = vmatprep.mubr.msk.f32.mxu1 %vm11244_vm1, %v12852_v39 }
0x139e   :  { %10972 = vmatprep.subr.mxu1 %v12852_v39 }
0x13b4   :  { %8585 = vxpose.xlu0.b32.start.end [1/1] (short) (narrow) %v12153_v49, 8 }
0x1414   :  { %v8210_v5 = vpop.xlane.xlu0 %8209 }
0x1415   :  { %v8211_v56 = vcvt.f32.s32 %v8210_v5 }
0x1417   :  { %v8214_v23 = vadd.s32 %v8213_v43, %v8211_v56 }
0x1419   :  { %vm8215_vm8 = vcmp.eq.s32.totalorder %v11641_v20, %v8214_v23 }
0x141a   :  { %v10237_v18 = vsel %vm8215_vm8, 1.0, %v12852_v39  ;;  %vm5099_vm8 = vcmask 261344  }
0x141b   :  { %10960 = vmatmul.mubr.msk.f32.vlgmr.msra.gmra.mrb[90].mxu0 %vm1456_vm3, %v10237_v18 }
0x141c   :  { %10968 = vmatpush3.xpose.msk.msra.mxu0 %vm110_vm0, %v11765_v10  ;;  %10969 = vmatprep.mubr.msk.f32.mxu0 %vm11244_vm1, %v12852_v39 }
0x141d   :  { %10977 = vmatprep.subr.mxu0 %v12852_v39 }
0x146b   :  { %v8041_v49 = vpop.f32.mrb[86].mxu1  ;;  %v8115_v37 = vpop.f32.mrb[88].mxu0 }
0x146c   :  { %v8189_v63 = vmax.f32 %v8115_v37, 1e-16  ;;  %v10946_v36 = vpop.f32.mrb[87].mxu1  ;;  %v10951_v50 = vpop.f32.mrb[89].mxu0 }
0x146e   :  { %11173 = vrsqrt.f32 %v8189_v63 }
0x146f   :  { %v8185_v52 = vpop.f32.mrb[88].mxu1 }
0x1470   :  { %v8192_v2 = vmax.f32 %v8185_v52, 1e-16  ;;  %v10956_v51 = vpop.f32.mrb[89].mxu1 }
0x1472   :  { %11175 = vrsqrt.f32 %v8192_v2 }
0x1478   :  { %v11174_v35 = vpop.eup %11173 }
0x1479   :  { %v8191_v46 = vmul.f32 %v11174_v35, %v8041_v49 }
0x147c   :  { %v11176_v30 = vpop.eup %11175 }
0x147d   :  { %v12313_v0 = vmul.f32 %v11176_v30, %v8191_v46 }
0x14ee   :  { %v8287_v19 = vpop.f32.mrb[90].mxu0 }
0x14ef   :  { %v8291_v5 = vmul.f32 %v11990_v14, %v8287_v19  ;;  %v8365_v43 = vmul.f32 %v8287_v19, %v8287_v19  ;;  %v10961_v56 = vpop.f32.mrb[91].mxu0  ;;  %v8601_v14 = vpop.trf.xlu0 }
0x14f1   :  { %10965 = vmatmul.mubr.msk.f32.vlgmr.msra.gmra.mrb[90].mxu1 %vm110_vm0, %v8291_v5  ;;  %10970 = vmatmul.mubr.msk.f32.vlgmr.msra.gmra.mrb[92].mxu0 %vm110_vm0, %v8365_v43 }
0x14f2   :  { %10978 = vmatpush3.xpose.msk.msra.mxu0 %vm110_vm0, %v11944_v1  ;;  %10973 = vmatpush3.xpose.msk.msra.mxu1 %vm110_vm0, %v11765_v10 }
0x14f3   :  { %10974 = vmatprep.mubr.msk.f32.mxu1 %vm11244_vm1, %v12852_v39  ;;  %10979 = vmatprep.mubr.msk.f32.mxu0 %vm11244_vm1, %v12852_v39 }
0x14f4   :  { %10982 = vmatprep.subr.mxu1 %v12852_v39  ;;  %10987 = vmatprep.subr.mxu0 %v12852_v39 }
0x14f5   :  { %10975 = vmatmul.mubr.msk.f32.vlgmr.msra.gmra.mrb[92].mxu1 %vm110_vm0, %v12005_v16  ;;  %10980 = vmatmul.mubr.msk.f32.vlgmr.msra.gmra.mrb[94].mxu0 %vm110_vm0, %v11923_v57  ;;  %v8620_v16 = vrot.slane %v8601_v14, %v11449_v38 }
0x14f6   :  { %10983 = vmatpush3.msra.mxu1 %v11944_v1  ;;  %10984 = vmatprep.mubr.msk.f32.mxu1 %vm11244_vm1, %v12852_v39 }
0x14f7   :  { %10992 = vmatprep.subr.mxu1 %v12852_v39  ;;  %10988 = vmatpush3.xpose.msk.msra.mxu0 %vm110_vm0, %v11649_v41  ;;  %v8621_v23 = vmul.f32 %v8620_v16, %v11952_v33 }
0x14f8   :  { %10989 = vmatprep.mubr.msk.f32.mxu0 %vm11244_vm1, %v12852_v39  ;;  %10997 = vmatprep.subr.mxu0 %v12852_v39 }
0x14f9   :  { %v8622_v18 = vmax.f32 %v8621_v23, 1e-16 }
0x14fb   :  { %11177 = vrsqrt.f32 %v8622_v18 }
0x1505   :  { %v11178_v52 = vpop.eup %11177 }
0x15c4   :  { %v8361_v49 = vpop.f32.mrb[90].mxu1  ;;  %v8435_v37 = vpop.f32.mrb[92].mxu0 }
0x15c5   :  { %v8509_v63 = vmax.f32 %v8435_v37, 1e-16  ;;  %v10966_v36 = vpop.f32.mrb[91].mxu1  ;;  %v10971_v50 = vpop.f32.mrb[93].mxu0 }
0x15c7   :  { %11179 = vrsqrt.f32 %v8509_v63 }
0x15c8   :  { %v8505_v2 = vpop.f32.mrb[92].mxu1  ;;  %v8581_v51 = vpop.f32.mrb[94].mxu0 }
0x15c9   :  { %v8512_v35 = vmax.f32 %v8505_v2, 1e-16  ;;  %v8624_v46 = vmul.f32 %v11178_v52, %v8581_v51  ;;  %v10981_v30 = vpop.f32.mrb[95].mxu0  ;;  %v10976_v19 = vpop.f32.mrb[93].mxu1 }
0x15ca   :  { %v12376_v19 = vsub.s32 3, %v11335_v6 }
0x15cb   :  { %11181 = vrsqrt.f32 %v8512_v35  ;;  %10985 = vmatmul.mubr.msk.f32.vlgmr.msra.gmra.mrb[94].mxu1 %vm1456_vm3, %v8624_v46  ;;  %v8927_v33 = vsel %vm1456_vm3, %v8624_v46, -inf  ;;  %v8698_v5 = vsel %vm1456_vm3, %v8624_v46, 0.0 }
0x15cc   :  { %8928 = vmax.xlane.f32.xlu1 %v8927_v33  ;;  %10993 = vmatpush3.xpose.msk.msra.mxu1 %vm110_vm0, %v11649_v41  ;;  %v1391_v33 = vrot.slane %v11632_v61, %v12376_v19 }
0x15cd   :  { %10994 = vmatprep.mubr.msk.f32.mxu1 %vm11244_vm1, %v12852_v39  ;;  %11002 = vmatprep.subr.mxu1 %v12852_v39 }
0x15d0   :  { %8699 = vadd.xlane.f32.xlu1 %v8698_v5 }
0x15d1   :  { %v11180_v43 = vpop.eup %11179 }
0x15d2   :  { %v8511_v56 = vmul.f32 %v11180_v43, %v8361_v49 }
0x15d5   :  { %v11182_v14 = vpop.eup %11181 }
0x15d6   :  { %v12351_v16 = vmul.f32 %v11182_v14, %v8511_v56 }
0x1659   :  { %v8929_v23 = vpop.xlane.xlu1 %8928 }
0x165a   :  { %vm8930_vm9 = vcmp.eq.f32.partialorder %v8624_v46, %v8929_v23 }
0x165b   :  { %v8931_v18 = vsel %vm8930_vm9, %v11641_v20, 8 }
0x165c   :  { %v8932_v37 = vsel %vm1456_vm3, %v8931_v18, 2147483647 }
0x165d   :  { %v8934_v63 = vshra.s32 %v8932_v37, 16  ;;  %v8700_v50 = vpop.xlane.xlu1 %8699 }
0x165e   :  { %11183 = vrcp.f32 %v8700_v50 }
0x165f   :  { %v8936_v36 = vcvt.s32.f32 %v8934_v63 }
0x1661   :  { %8937 = vmin.xlane.f32.xlu0 %v8936_v36 }
0x1668   :  { %v11184_v52 = vpop.eup %11183 }
0x169e   :  { %v8694_v2 = vpop.f32.mrb[94].mxu1 }
0x169f   :  { %v8702_v51 = vmul.f32 %v11184_v52, %v8694_v2  ;;  %v10986_v35 = vpop.f32.mrb[95].mxu1 }
0x16a1   :  { %v8703_v49 = vmul.f32 %v11923_v57, %v8702_v51  ;;  %v8777_v30 = vmul.f32 %v8702_v51, %v8702_v51 }
0x16a3   :  { %10990 = vmatmul.mubr.msk.f32.vlgmr.msra.gmra.mrb[96].mxu0 %vm110_vm0, %v8703_v49  ;;  %10995 = vmatmul.mubr.msk.f32.vlgmr.msra.gmra.mrb[96].mxu1 %vm110_vm0, %v8777_v30 }
0x16a4   :  { %10998 = vmatpush3.xpose.msk.msra.mxu0 %vm110_vm0, %v11649_v41  ;;  %10999 = vmatprep.mubr.msk.f32.mxu0 %vm11244_vm1, %v12852_v39  ;;  %v8933_v41 = vand.u32 65535, %v8932_v37 }
0x16a5   :  { %11003 = vmatpush3.msra.mxu1 %v11944_v1  ;;  %11004 = vmatprep.mubr.msk.f32.mxu1 %vm11244_vm1, %v12852_v39 }
0x16a6   :  { %11012 = vmatprep.subr.mxu1 %v12852_v39  ;;  %11007 = vmatprep.subr.mxu0 %v12852_v39  ;;  %v8935_v1 = vcvt.s32.f32 %v8933_v41  ;;  %v12394_v41 = vrot.slane %v11634_v8, %v11397_v25 }
0x16a7   :  { %11000 = vmatmul.mubr.msk.f32.vlgmr.msra.gmra.mrb[98].mxu0 %vm110_vm0, %v11927_v47 }
0x16a8   :  { %11008 = vmatpush3.xpose.msk.msra.mxu0 %vm110_vm0, %v11680_v21  ;;  %11009 = vmatprep.mubr.msk.f32.mxu0 %vm11244_vm1, %v12852_v39 }
0x16a9   :  { %11017 = vmatprep.subr.mxu0 %v12852_v39 }
0x16ee   :  { %v8938_v57 = vpop.xlane.xlu0 %8937 }
0x16ef   :  { %vm8939_vm10 = vcmp.eq.f32.partialorder %v8936_v36, %v8938_v57  ;;  %v8944_v37 = vcvt.f32.s32 %v8938_v57  ;;  %v1403_v57 = vcombine.high %v12394_v41, %v12394_v41 }
0x16f0   :  { %v8940_v46 = vsel %vm8939_vm10, %v8935_v1, inf }
0x16f1   :  { %8941 = vmin.xlane.f32.xlu1 %v8940_v46  ;;  %v8945_v50 = vshll.u32 %v8944_v37, 16  ;;  %v12399_v1 = vrot.slane %v1403_v57, %v11397_v25 }
0x1724   :  { %9317 = vxpose.xlu1.b32.start.end [1/1] (short) (narrow) %v12269_v58, 8 }
0x1742   :  { %1075 = vrot.lane.b32.xlu1 %v11620_v44, %s11246_s18 }
0x1746   :  { %1393 = vbcast.lane.b32.xlu1 %v1391_v33, 256  ;;  %v1419_v33 = vcombine.high %v12399_v1, %v12399_v1 }
0x1748   :  { %v1435_v8 = vrot.slane %v1419_v33, %v11449_v38 }
0x1776   :  { %v8773_v5 = vpop.f32.mrb[96].mxu0  ;;  %v8847_v43 = vpop.f32.mrb[96].mxu1 }
0x1777   :  { %v8921_v56 = vmax.f32 %v8847_v43, 1e-16  ;;  %v10991_v14 = vpop.f32.mrb[97].mxu0  ;;  %v10996_v23 = vpop.f32.mrb[97].mxu1 }
0x1779   :  { %11185 = vrsqrt.f32 %v8921_v56 }
0x177a   :  { %v8917_v18 = vpop.f32.mrb[98].mxu0 }
0x177b   :  { %v8924_v58 = vmax.f32 %v8917_v18, 1e-16  ;;  %v11001_v63 = vpop.f32.mrb[99].mxu0 }
0x177d   :  { %11187 = vrsqrt.f32 %v8924_v58  ;;  %v11240_v58 = vld [vmem:[%s12829_s2 + $0x18] sm:$0xff] }
0x177e   :  { %v8942_v36 = vpop.xlane.xlu1 %8941 }
0x177f   :  { %v8943_v52 = vcvt.f32.s32 %v8942_v36 }
0x1781   :  { %v8946_v2 = vadd.s32 %v8945_v50, %v8943_v52  ;;  %v12419_v52 = vld [vmem:[%s12835_s1 + $0x8] sm:$0xff] }
0x1783   :  { %v11186_v44 = vpop.eup %11185  ;;  %vm8947_vm11 = vcmp.eq.s32.totalorder %v11641_v20, %v8946_v2 }
0x1784   :  { %v10254_v51 = vsel %vm8947_vm11, 1.0, %v12852_v39  ;;  %v8923_v35 = vmul.f32 %v11186_v44, %v8773_v5 }
0x1785   :  { %11005 = vmatmul.mubr.msk.f32.vlgmr.msra.gmra.mrb[98].mxu1 %vm1456_vm3, %v10254_v51 }
0x1786   :  { %11013 = vmatpush3.xpose.msk.msra.mxu1 %vm110_vm0, %v11680_v21  ;;  %11014 = vmatprep.mubr.msk.f32.mxu1 %vm11244_vm1, %v12852_v39 }
0x1787   :  { %v11188_v49 = vpop.eup %11187  ;;  %11022 = vmatprep.subr.mxu1 %v12852_v39 }
0x1788   :  { %v12390_v30 = vmul.f32 %v11188_v49, %v8923_v35 }
0x17a4   :  { %v9333_v46 = vpop.trf.xlu1 }
0x17b4   :  { %v1076_v5 = vpop.permute.xlu1 %1075 }
0x17b5   :  { %10062 = vst.msk [vmem:[%s12837_s12 + $0x10] sm:$0xff] %vm598_vm12, %v1076_v5 }
0x17b8   :  { %v1394_v43 = vpop.permute.xlu1 %1393 }
0x17b9   :  { %v1443_v56 = vmul.f32 %v1435_v8, %v1394_v43 }
0x17bb   :  { %v1447_v14 = vmax.f32 %v1443_v56, 1e-16 }
0x17bd   :  { %11189 = vrsqrt.f32 %v1447_v14 }
0x17c7   :  { %v11190_v23 = vpop.eup %11189 }
0x17c8   :  { %v12409_v18 = vmul.f32 %v11190_v23, %v11604_v29  ;;  %v12436_v29 = vld [vmem:[%s12832_s3 + $0x18] sm:$0xff] }
0x1858   :  { %v9019_v37 = vpop.f32.mrb[98].mxu1 }
0x1859   :  { %v9023_v63 = vmul.f32 %v11240_v58, %v9019_v37  ;;  %v9097_v36 = vmul.f32 %v9019_v37, %v9019_v37  ;;  %v11006_v50 = vpop.f32.mrb[99].mxu1 }
0x185b   :  { %11010 = vmatmul.mubr.msk.f32.vlgmr.msra.gmra.mrb[100].mxu0 %vm110_vm0, %v9023_v63  ;;  %11015 = vmatmul.mubr.msk.f32.vlgmr.msra.gmra.mrb[100].mxu1 %vm110_vm0, %v9097_v36 }
0x185c   :  { %11023 = vmatpush3.xpose.msk.msra.mxu1 %vm110_vm0, %v12419_v52  ;;  %11018 = vmatpush3.xpose.msk.msra.mxu0 %vm110_vm0, %v11680_v21  ;;  %v9352_v21 = vrot.slane %v9333_v46, %v11449_v38 }
0x185d   :  { %11019 = vmatprep.mubr.msk.f32.mxu0 %vm11244_vm1, %v12852_v39  ;;  %11024 = vmatprep.mubr.msk.f32.mxu1 %vm11244_vm1, %v12852_v39 }
0x185e   :  { %11027 = vmatprep.subr.mxu0 %v12852_v39  ;;  %11032 = vmatprep.subr.mxu1 %v12852_v39 }
0x185f   :  { %11020 = vmatmul.mubr.msk.f32.vlgmr.msra.gmra.mrb[102].mxu0 %vm110_vm0, %v11927_v47  ;;  %11025 = vmatmul.mubr.msk.f32.vlgmr.msra.gmra.mrb[102].mxu1 %vm110_vm0, %v12436_v29  ;;  %v9353_v47 = vmul.f32 %v9352_v21, %v12240_v27 }
0x1860   :  { %11028 = vmatpush3.msra.mxu0 %v12419_v52  ;;  %11029 = vmatprep.mubr.msk.f32.mxu0 %vm11244_vm1, %v12852_v39 }
0x1861   :  { %11037 = vmatprep.subr.mxu0 %v12852_v39  ;;  %11033 = vmatpush3.xpose.msk.msra.mxu1 %vm110_vm0, %v11737_v48  ;;  %v9354_v2 = vmax.f32 %v9353_v47, 1e-16 }
0x1862   :  { %11034 = vmatprep.mubr.msk.f32.mxu1 %vm11244_vm1, %v12852_v39  ;;  %11042 = vmatprep.subr.mxu1 %v12852_v39 }
0x1863   :  { %11191 = vrsqrt.f32 %v9354_v2 }
0x186d   :  { %v11192_v33 = vpop.eup %11191 }
0x192e   :  { %v9093_v44 = vpop.f32.mrb[100].mxu0  ;;  %v9167_v51 = vpop.f32.mrb[100].mxu1 }
0x192f   :  { %v9241_v35 = vmax.f32 %v9167_v51, 1e-16  ;;  %v11011_v49 = vpop.f32.mrb[101].mxu0  ;;  %v11016_v57 = vpop.f32.mrb[101].mxu1 }
0x1931   :  { %11193 = vrsqrt.f32 %v9241_v35 }
0x1932   :  { %v9237_v5 = vpop.f32.mrb[102].mxu0  ;;  %v9313_v8 = vpop.f32.mrb[102].mxu1 }
0x1933   :  { %v9244_v43 = vmax.f32 %v9237_v5, 1e-16  ;;  %v9356_v56 = vmul.f32 %v11192_v33, %v9313_v8  ;;  %v11026_v14 = vpop.f32.mrb[103].mxu1  ;;  %v11021_v23 = vpop.f32.mrb[103].mxu0 }
0x1935   :  { %11195 = vrsqrt.f32 %v9244_v43  ;;  %11030 = vmatmul.mubr.msk.f32.vlgmr.msra.gmra.mrb[104].mxu0 %vm1456_vm3, %v9356_v56  ;;  %v9659_v27 = vsel %vm1456_vm3, %v9356_v56, -inf  ;;  %v9430_v51 = vsel %vm1456_vm3, %v9356_v56, 0.0 }
0x1936   :  { %9660 = vmax.xlane.f32.xlu0 %v9659_v27  ;;  %11038 = vmatpush3.xpose.msk.msra.mxu0 %vm110_vm0, %v11737_v48 }
0x1937   :  { %11039 = vmatprep.mubr.msk.f32.mxu0 %vm11244_vm1, %v12852_v39  ;;  %11047 = vmatprep.subr.mxu0 %v12852_v39 }
0x193b   :  { %v11194_v46 = vpop.eup %11193 }
0x193c   :  { %v9243_v37 = vmul.f32 %v11194_v46, %v9093_v44 }
0x193f   :  { %v11196_v58 = vpop.eup %11195 }
0x1940   :  { %v12458_v63 = vmul.f32 %v11196_v58, %v9243_v37 }
0x19c3   :  { %v9661_v36 = vpop.xlane.xlu0 %9660 }
0x19c4   :  { %vm9662_vm13 = vcmp.eq.f32.partialorder %v9356_v56, %v9661_v36 }
0x19c5   :  { %v9663_v50 = vsel %vm9662_vm13, %v11641_v20, 8 }
0x19c6   :  { %v9664_v21 = vsel %vm1456_vm3, %v9663_v50, 2147483647 }
0x19c7   :  { %v9666_v47 = vshra.s32 %v9664_v21, 16  ;;  %v9665_v57 = vand.u32 65535, %v9664_v21  ;;  %v1410_v21 = vrot.slane %v12394_v41, %v11397_v25 }
0x19c9   :  { %v9668_v2 = vcvt.s32.f32 %v9666_v47  ;;  %v9667_v44 = vcvt.s32.f32 %v9665_v57  ;;  %v1427_v57 = vrot.slane %v12399_v1, %v11449_v38 }
0x19cb   :  { %9669 = vmin.xlane.f32.xlu0 %v9668_v2 }
0x19cf   :  { %9431 = vadd.xlane.f32.xlu0 %v9430_v51 }
0x1a08   :  { %v9426_v35 = vpop.f32.mrb[104].mxu0 }
0x1a09   :  { %v11031_v49 = vpop.f32.mrb[105].mxu0 }
0x1a58   :  { %v9670_v33 = vpop.xlane.xlu0 %9669 }
0x1a59   :  { %vm9671_vm14 = vcmp.eq.f32.partialorder %v9668_v2, %v9670_v33  ;;  %v9676_v37 = vcvt.f32.s32 %v9670_v33  ;;  %v1418_v33 = vcombine.high %v1410_v21, %v1410_v21 }
0x1a5a   :  { %v9672_v5 = vsel %vm9671_vm14, %v9667_v44, inf }
0x1a5b   :  { %9673 = vmin.xlane.f32.xlu0 %v9672_v5  ;;  %v9677_v36 = vshll.u32 %v9676_v37, 16 }
0x1a5c   :  { %v9432_v8 = vpop.xlane.xlu0 %9431 }
0x1a5d   :  { %11197 = vrcp.f32 %v9432_v8 }
0x1a67   :  { %v11198_v43 = vpop.eup %11197 }
0x1a68   :  { %v9434_v14 = vmul.f32 %v11198_v43, %v9426_v35  ;;  %v1431_v43 = vrot.slane %v1418_v33, %v11449_v38 }
0x1a6a   :  { %v9435_v23 = vmul.f32 %v12436_v29, %v9434_v14  ;;  %v9509_v27 = vmul.f32 %v9434_v14, %v9434_v14 }
0x1a6c   :  { %11035 = vmatmul.mubr.msk.f32.vlgmr.msra.gmra.mrb[104].mxu1 %vm110_vm0, %v9435_v23  ;;  %11040 = vmatmul.mubr.msk.f32.vlgmr.msra.gmra.mrb[106].mxu0 %vm110_vm0, %v9509_v27 }
0x1a6d   :  { %11043 = vmatpush3.xpose.msk.msra.mxu1 %vm110_vm0, %v11737_v48  ;;  %11044 = vmatprep.mubr.msk.f32.mxu1 %vm11244_vm1, %v12852_v39  ;;  %v1370_v48 = vrot.slane %v11632_v61, %v11449_v38 }
0x1a6e   :  { %11048 = vmatpush3.msra.mxu0 %v12419_v52  ;;  %11049 = vmatprep.mubr.msk.f32.mxu0 %vm11244_vm1, %v12852_v39  ;;  %v12487_v52 = vsub.s32 1, %v11335_v6 }
0x1a6f   :  { %11052 = vmatprep.subr.mxu1 %v12852_v39  ;;  %11057 = vmatprep.subr.mxu0 %v12852_v39 }
0x1a70   :  { %11045 = vmatmul.mubr.msk.f32.vlgmr.msra.gmra.mrb[106].mxu1 %vm110_vm0, %v12009_v55  ;;  %v1377_v56 = vrot.slane %v11632_v61, %v12487_v52 }
0x1a71   :  { %595 = vrot.lane.b32.xlu0 %v11600_v26, %s11246_s18  ;;  %11053 = vmatpush3.xpose.msk.msra.mxu1 %vm110_vm0, %v11765_v10  ;;  %v12492_v26 = vsub.s32 2, %v11335_v6 }
0x1a72   :  { %11054 = vmatprep.mubr.msk.f32.mxu1 %vm11244_vm1, %v12852_v39  ;;  %11062 = vmatprep.subr.mxu1 %v12852_v39 }
0x1a73   :  { %v1384_v46 = vrot.slane %v11632_v61, %v12492_v26  ;;  %v1423_v61 = vrot.slane %v1410_v21, %v11449_v38 }
0x1a75   :  { %1372 = vbcast.lane.b32.xlu0 %v1370_v48, 256 }
0x1a79   :  { %1379 = vbcast.lane.b32.xlu0 %v1377_v56, 256 }
0x1a7d   :  { %1386 = vbcast.lane.b32.xlu0 %v1384_v46, 256 }
0x1ae8   :  { %v9674_v58 = vpop.xlane.xlu0 %9673 }
0x1ae9   :  { %v9675_v50 = vcvt.f32.s32 %v9674_v58 }
0x1aeb   :  { %v9678_v47 = vadd.s32 %v9677_v36, %v9675_v50 }
0x1aec   :  { %v596_v2 = vpop.permute.xlu0 %595 }
0x1aed   :  { %vm9679_vm15 = vcmp.eq.s32.totalorder %v11641_v20, %v9678_v47  ;;  %599 = vst.msk [vmem:[%s12837_s12] sm:$0xff] %vm598_vm12, %v596_v2 }
0x1aee   :  { %v10271_v51 = vsel %vm9679_vm15, 1.0, %v12852_v39 }
0x1aef   :  { %11050 = vmatmul.mubr.msk.f32.vlgmr.msra.gmra.mrb[108].mxu0 %vm1456_vm3, %v10271_v51 }
0x1af0   :  { %v1373_v35 = vpop.permute.xlu0 %1372  ;;  %11058 = vmatpush3.xpose.msk.msra.mxu0 %vm110_vm0, %v11765_v10  ;;  %11059 = vmatprep.mubr.msk.f32.mxu0 %vm11244_vm1, %v12852_v39 }
0x1af1   :  { %v1440_v41 = vmul.f32 %v1423_v61, %v1373_v35 }
0x1af3   :  { %v1444_v49 = vmax.f32 %v1440_v41, 1e-16 }
0x1af4   :  { %v1380_v44 = vpop.permute.xlu0 %1379 }
0x1af5   :  { %11199 = vrsqrt.f32 %v1444_v49  ;;  %v1441_v5 = vmul.f32 %v1427_v57, %v1380_v44 }
0x1af7   :  { %v1445_v8 = vmax.f32 %v1441_v5, 1e-16 }
0x1af8   :  { %v1387_v14 = vpop.permute.xlu0 %1386 }
0x1af9   :  { %11201 = vrsqrt.f32 %v1445_v8  ;;  %v1442_v23 = vmul.f32 %v1431_v43, %v1387_v14 }
0x1afb   :  { %v1446_v27 = vmax.f32 %v1442_v23, 1e-16 }
0x1afd   :  { %11203 = vrsqrt.f32 %v1446_v27 }
0x1aff   :  { %v11200_v48 = vpop.eup %11199 }
0x1b00   :  { %v1452_v56 = vmul.f32 %v11200_v48, %v11602_v28 }
0x1b02   :  { %v1457_v46 = vsel %vm1456_vm3, %v1452_v56, -inf  ;;  %v1892_v56 = vrot.slane %v11636_v15, %v12487_v52 }
0x1b03   :  { %v11202_v37 = vpop.eup %11201  ;;  %1458 = vmax.xlane.f32.xlu0 %v1457_v46  ;;  %v1530_v1 = vrot.slane %v1457_v46, 4 }
0x1b04   :  { %v1453_v58 = vmul.f32 %v11202_v37, %v11598_v22  ;;  %v12521_v22 = vsel %vm1456_vm3, %v12409_v18, -inf  ;;  %v1899_v18 = vrot.slane %v11636_v15, %v12492_v26  ;;  %v1906_v37 = vrot.slane %v11636_v15, %v12376_v19 }
0x1b05   :  { %v1531_v36 = vmax.f32 %v1457_v46, %v1530_v1  ;;  %v1885_v1 = vrot.slane %v11636_v15, %v11449_v38 }
0x1b06   :  { %v1460_v50 = vsel %vm1456_vm3, %v1453_v58, -inf }
0x1b07   :  { %v11204_v21 = vpop.eup %11203  ;;  %v1532_v47 = vrot.slane %v1531_v36, 2  ;;  %1461 = vmax.xlane.f32.xlu1 %v1460_v50  ;;  %v1536_v2 = vrot.slane %v1460_v50, 4 }
0x1b08   :  { %v1454_v51 = vmul.f32 %v11204_v21, %v11606_v32 }
0x1b09   :  { %v1533_v61 = vmax.f32 %v1531_v36, %v1532_v47  ;;  %v1537_v35 = vmax.f32 %v1460_v50, %v1536_v2 }
0x1b0a   :  { %v1463_v28 = vsel %vm1456_vm3, %v1454_v51, -inf }
0x1b0b   :  { %v1538_v41 = vrot.slane %v1537_v35, 2  ;;  %1464 = vmax.xlane.f32.xlu0 %v1463_v28  ;;  %v1542_v49 = vrot.slane %v1463_v28, 4  ;;  %v1534_v57 = vrot.slane %v1533_v61, 1 }
0x1b0d   :  { %v1539_v33 = vmax.f32 %v1537_v35, %v1538_v41  ;;  %v1543_v44 = vmax.f32 %v1463_v28, %v1542_v49  ;;  %v1535_v32 = vmax.f32 %v1533_v61, %v1534_v57  ;;  %v1917_v57 = vrot.slane %v11638_v17, %v11397_v25 }
0x1b0f   :  { %v1540_v5 = vrot.slane %v1539_v33, 1  ;;  %v1544_v8 = vrot.slane %v1543_v44, 2  ;;  %1467 = vmax.xlane.f32.xlu0 %v12521_v22  ;;  %v1918_v15 = vcombine.high %v1917_v57, %v1917_v57 }
0x1b11   :  { %v1541_v43 = vmax.f32 %v1539_v33, %v1540_v5  ;;  %v1545_v14 = vmax.f32 %v1543_v44, %v1544_v8  ;;  %v12542_v33 = vsub.s32 %v11641_v20, %v11335_v6  ;;  %v1925_v5 = vrot.slane %v1917_v57, %v11397_v25 }
0x1b12   :  { %v1932_v8 = vrot.slane %v1918_v15, %v11397_v25 }
0x1b13   :  { %v1546_v23 = vrot.slane %v1545_v14, 1  ;;  %v1558_v27 = vsel %vm1491_vm2, %v1541_v43, %v1535_v32  ;;  %v1933_v17 = vcombine.high %v1925_v5, %v1925_v5 }
0x1b15   :  { %v1547_v48 = vmax.f32 %v1545_v14, %v1546_v23 }
0x1b17   :  { %v12528_v46 = vsel %vm1493_vm4, %v1547_v48, %v1558_v27  ;;  %v1942_v27 = vrot.slane %v1932_v8, %v11449_v38 }
0x1b18   :  { %1894 = vbcast.lane.b32.xlu1 %v1892_v56, 256 }
0x1b1c   :  { %1901 = vbcast.lane.b32.xlu1 %v1899_v18, 256 }
0x1b20   :  { %1908 = vbcast.lane.b32.xlu1 %v1906_v37, 256  ;;  %v1946_v37 = vrot.slane %v1933_v17, %v11449_v38 }
0x1b25   :  { %1887 = vbcast.lane.b32.xlu0 %v1885_v1, 256  ;;  %v1934_v1 = vcombine.high %v1932_v8, %v1932_v8 }
0x1b3f   :  { %v9505_v58 = vpop.f32.mrb[104].mxu1  ;;  %v9579_v36 = vpop.f32.mrb[106].mxu0 }
0x1b40   :  { %v9653_v50 = vmax.f32 %v9579_v36, 1e-16  ;;  %v11036_v21 = vpop.f32.mrb[105].mxu1  ;;  %v11041_v47 = vpop.f32.mrb[107].mxu0 }
0x1b42   :  { %11205 = vrsqrt.f32 %v9653_v50 }
0x1b43   :  { %v9649_v2 = vpop.f32.mrb[106].mxu1 }
0x1b44   :  { %v9656_v51 = vmax.f32 %v9649_v2, 1e-16  ;;  %v11046_v61 = vpop.f32.mrb[107].mxu1  ;;  %v1950_v2 = vrot.slane %v1934_v1, %v11449_v38 }
0x1b46   :  { %11207 = vrsqrt.f32 %v9656_v51  ;;  %v1938_v51 = vrot.slane %v1925_v5, %v11449_v38 }
0x1b4c   :  { %v11206_v35 = vpop.eup %11205 }
0x1b4d   :  { %v9655_v28 = vmul.f32 %v11206_v35, %v9505_v58 }
0x1b50   :  { %v11208_v41 = vpop.eup %11207 }
0x1b51   :  { %v12536_v49 = vmul.f32 %v11208_v41, %v9655_v28 }
0x1b90   :  { %v1459_v44 = vpop.xlane.xlu0 %1458 }
0x1b91   :  { %v1478_v43 = vrot.slane %v1459_v44, %v12542_v33 }
0x1b94   :  { %v1462_v32 = vpop.xlane.xlu1 %1461 }
0x1b95   :  { %v1482_v14 = vrot.slane %v1462_v32, %v12542_v33 }
0x1b97   :  { %v1492_v23 = vsel %vm1491_vm2, %v1482_v14, %v1478_v43 }
0x1b98   :  { %v1895_v48 = vpop.permute.xlu1 %1894  ;;  %v1465_v56 = vpop.xlane.xlu0 %1464 }
0x1b99   :  { %v1956_v18 = vmul.f32 %v1942_v27, %v1895_v48  ;;  %v1486_v6 = vrot.slane %v1465_v56, %v12542_v33 }
0x1b9b   :  { %v1960_v20 = vmax.f32 %v1956_v18, 1e-16  ;;  %v12553_v58 = vsel %vm1493_vm4, %v1486_v6, %v1492_v23 }
0x1b9c   :  { %v1902_v36 = vpop.permute.xlu1 %1901  ;;  %v12555_v50 = vpop.xlane.xlu0 %1467 }
0x1b9d   :  { %11209 = vrsqrt.f32 %v1960_v20  ;;  %v1957_v21 = vmul.f32 %v1946_v37, %v1902_v36 }
0x1b9f   :  { %v1961_v47 = vmax.f32 %v1957_v21, 1e-16 }
0x1ba0   :  { %v1909_v61 = vpop.permute.xlu1 %1908  ;;  %v1888_v35 = vpop.permute.xlu0 %1887 }
0x1ba1   :  { %11211 = vrsqrt.f32 %v1961_v47  ;;  %v1958_v28 = vmul.f32 %v1950_v2, %v1909_v61  ;;  %v1955_v41 = vmul.f32 %v1938_v51, %v1888_v35 }
0x1ba3   :  { %v1962_v57 = vmax.f32 %v1958_v28, 1e-16  ;;  %v1959_v15 = vmax.f32 %v1955_v41, 1e-16 }
0x1ba5   :  { %11213 = vrsqrt.f32 %v1962_v57 }
0x1ba6   :  { %11215 = vrsqrt.f32 %v1959_v15 }
0x1ba7   :  { %v11210_v44 = vpop.eup %11209 }
0x1ba8   :  { %v1968_v8 = vmul.f32 %v11210_v44, %v11609_v34 }
0x1baa   :  { %v1974_v32 = vsel %vm1456_vm3, %v1968_v8, -inf }
0x1bab   :  { %v11212_v43 = vpop.eup %11211  ;;  %1975 = vmax.xlane.f32.xlu1 %v1974_v32  ;;  %v2045_v14 = vrot.slane %v1974_v32, 4 }
0x1bac   :  { %v1969_v23 = vmul.f32 %v11212_v43, %v11622_v45 }
0x1bad   :  { %v2046_v5 = vmax.f32 %v1974_v32, %v2045_v14 }
0x1bae   :  { %v1977_v27 = vsel %vm1456_vm3, %v1969_v23, -inf }
0x1baf   :  { %v11214_v17 = vpop.eup %11213  ;;  %v2051_v48 = vrot.slane %v1977_v27, 4  ;;  %v2047_v37 = vrot.slane %v2046_v5, 2 }
0x1bb0   :  { %v11216_v56 = vpop.eup %11215  ;;  %v1970_v18 = vmul.f32 %v11214_v17, %v11618_v42 }
0x1bb1   :  { %v1967_v6 = vmul.f32 %v11216_v56, %v11612_v40  ;;  %v2052_v20 = vmax.f32 %v1977_v27, %v2051_v48  ;;  %v2048_v2 = vmax.f32 %v2046_v5, %v2047_v37 }
0x1bb2   :  { %v1980_v34 = vsel %vm1456_vm3, %v1970_v18, -inf }
0x1bb3   :  { %v1971_v1 = vsel %vm1456_vm3, %v1967_v6, -inf  ;;  %v2053_v36 = vrot.slane %v2052_v20, 2  ;;  %v2057_v21 = vrot.slane %v1980_v34, 4  ;;  %v2049_v41 = vrot.slane %v2048_v2, 1 }
0x1bb4   :  { %1972 = vmax.xlane.f32.xlu0 %v1971_v1  ;;  %v2039_v45 = vrot.slane %v1971_v1, 4  ;;  %v1548_v6 = vrot.slane %v12521_v22, 4 }
0x1bb5   :  { %v2058_v47 = vmax.f32 %v1980_v34, %v2057_v21  ;;  %v2054_v61 = vmax.f32 %v2052_v20, %v2053_v36  ;;  %v2050_v8 = vmax.f32 %v2048_v2, %v2049_v41  ;;  %v6339_v41 = vrot.slane %v12197_v13, %v11449_v38 }
0x1bb6   :  { %v2040_v51 = vmax.f32 %v1971_v1, %v2039_v45  ;;  %v1549_v20 = vmax.f32 %v12521_v22, %v1548_v6 }
0x1bb7   :  { %v2059_v35 = vrot.slane %v2058_v47, 2  ;;  %v2055_v57 = vrot.slane %v2054_v61, 1 }
0x1bb8   :  { %v2041_v28 = vrot.slane %v2040_v51, 2  ;;  %1978 = vmax.xlane.f32.xlu0 %v1977_v27  ;;  %v1550_v37 = vrot.slane %v1549_v20, 2 }
0x1bb9   :  { %v2060_v42 = vmax.f32 %v2058_v47, %v2059_v35  ;;  %v2056_v43 = vmax.f32 %v2054_v61, %v2055_v57 }
0x1bba   :  { %v2042_v40 = vmax.f32 %v2040_v51, %v2041_v28  ;;  %v1551_v1 = vmax.f32 %v1549_v20, %v1550_v37  ;;  %v6801_v28 = vrot.slane %v12201_v53, %v11449_v38 }
0x1bbb   :  { %v2061_v44 = vrot.slane %v2060_v42, 1 }
0x1bbc   :  { %v2043_v15 = vrot.slane %v2042_v40, 1  ;;  %1981 = vmax.xlane.f32.xlu0 %v1980_v34 }
0x1bbd   :  { %v2062_v14 = vmax.f32 %v2060_v42, %v2061_v44  ;;  %v6360_v42 = vrot.slane %v12197_v13, %v12376_v19  ;;  %v6353_v44 = vrot.slane %v12197_v13, %v12492_v26 }
0x1bbe   :  { %v2044_v32 = vmax.f32 %v2042_v40, %v2043_v15  ;;  %v6822_v40 = vrot.slane %v12201_v53, %v12376_v19  ;;  %v6346_v15 = vrot.slane %v12197_v13, %v12487_v52  ;;  %v6808_v19 = vrot.slane %v12201_v53, %v12487_v52 }
0x1bc0   :  { %v2067_v23 = vsel %vm1491_vm2, %v2050_v8, %v2044_v32  ;;  %v6815_v8 = vrot.slane %v12201_v53, %v12492_v26 }
0x1bc1   :  { %v2068_v5 = vsel %vm1493_vm4, %v2056_v43, %v2067_v23 }
0x1bc2   :  { %v9751_v17 = vpop.f32.mrb[108].mxu0  ;;  %v2069_v48 = vsel %vm1495_vm5, %v2062_v14, %v2068_v5 }
0x1bc3   :  { %v9755_v27 = vmul.f32 %v12436_v29, %v9751_v17  ;;  %v9829_v56 = vmul.f32 %v9751_v17, %v9751_v17  ;;  %v11051_v18 = vpop.f32.mrb[109].mxu0  ;;  %v1490_v29 = vrot.slane %v12555_v50, %v12542_v33 }
0x1bc5   :  { %11055 = vmatmul.mubr.msk.f32.vlgmr.msra.gmra.mrb[108].mxu1 %vm110_vm0, %v9755_v27  ;;  %11060 = vmatmul.mubr.msk.f32.vlgmr.msra.gmra.mrb[110].mxu0 %vm110_vm0, %v9829_v56  ;;  %v1496_v34 = vsel %vm1495_vm5, %v1490_v29, %v12553_v58 }
0x1bc6   :  { %11063 = vmatpush3.xpose.msk.msra.mxu1 %vm110_vm0, %v11765_v10  ;;  %11064 = vmatprep.mubr.msk.f32.mxu1 %vm11244_vm1, %v12852_v39  ;;  %v1552_v10 = vrot.slane %v1551_v1, 1  ;;  %vm2113_vm1 = vcmask 130144  }
0x1bc8   :  { %v1553_v36 = vmax.f32 %v1551_v1, %v1552_v10 }
0x1bc9   :  { %11065 = vmatmul.mubr.msk.f32.vlgmr.msra.gmra.mrb[110].mxu1 %vm110_vm0, %v12009_v55  ;;  %vm2107_vm0 = vcmask 97344  }
0x1bca   :  { %v1560_v39 = vsel %vm1495_vm5, %v1553_v36, %v12528_v46 }
0x1bde   :  { %1498 = vxpose.xlu1.b32.start.end [1/1] (short) (narrow) %v1496_v34, 8 }
0x1be9   :  { %1562 = vxpose.xlu0.b32.start.end [1/1] (short) (narrow) %v1560_v39, 8 }
0x1bed   :  { %2071 = vxpose.xlu0.b32.start.end [1/1] (short) (narrow) %v2069_v48, 8  ;;  %v6833_v48 = vrot.slane %v12203_v59, %v11397_v25 }
0x1bef   :  { %v6834_v18 = vcombine.high %v6833_v48, %v6833_v48  ;;  %v6841_v6 = vrot.slane %v6833_v48, %v11397_v25 }
0x1bf1   :  { %v6854_v59 = vrot.slane %v6841_v6, %v11449_v38 }
0x1c38   :  { %v1976_v21 = vpop.xlane.xlu1 %1975 }
0x1c39   :  { %v1994_v47 = vrot.slane %v1976_v21, %v12542_v33 }
0x1c41   :  { %v1973_v55 = vpop.xlane.xlu0 %1972 }
0x1c42   :  { %v1990_v22 = vrot.slane %v1973_v55, %v12542_v33 }
0x1c44   :  { %v2003_v51 = vsel %vm1491_vm2, %v1994_v47, %v1990_v22 }
0x1c45   :  { %v1979_v45 = vpop.xlane.xlu0 %1978 }
0x1c46   :  { %v1998_v50 = vrot.slane %v1979_v45, %v12542_v33 }
0x1c48   :  { %v2004_v61 = vsel %vm1493_vm4, %v1998_v50, %v2003_v51 }
0x1c49   :  { %v1982_v2 = vpop.xlane.xlu0 %1981 }
0x1c4a   :  { %v2002_v58 = vrot.slane %v1982_v2, %v12542_v33 }
0x1c4c   :  { %v2005_v46 = vsel %vm1495_vm5, %v2002_v58, %v2004_v61 }
0x1c4d   :  { %2007 = vxpose.xlu1.b32.start.end [1/1] (short) (narrow) %v2005_v46, 8 }
0x1c5e   :  { %v1514_v35 = vpop.trf.xlu1 }
0x1c5f   :  { %2104 = vrot.lane.b32.xlu0 %v1514_v35, %s11247_s23 }
0x1c63   :  { %6803 = vbcast.lane.b32.xlu0 %v6801_v28, 256 }
0x1c67   :  { %6362 = vbcast.lane.b32.xlu0 %v6360_v42, 256 }
0x1c69   :  { %v1578_v57 = vpop.trf.xlu0 }
0x1c6b   :  { %6341 = vbcast.lane.b32.xlu1 %v6339_v41, 256  ;;  %6824 = vbcast.lane.b32.xlu0 %v6822_v40, 256 }
0x1c6d   :  { %v2087_v17 = vpop.trf.xlu0 }
0x1c6f   :  { %6348 = vbcast.lane.b32.xlu1 %v6346_v15, 256  ;;  %2116 = vrot.lane.b32.xlu0 %v1578_v57, %s11247_s23 }
0x1c73   :  { %6355 = vbcast.lane.b32.xlu1 %v6353_v44, 256  ;;  %5078 = vrot.lane.b32.xlu0 %v11693_v11, %s11248_s11 }
0x1c77   :  { %6810 = vbcast.lane.b32.xlu1 %v6808_v19, 256  ;;  %5090 = vrot.lane.b32.xlu0 %v11729_v9, %s11249_s24  ;;  %v12855_v19 = vld [vmem:[#allocation9_spill] sm:$0xff] }
0x1c7b   :  { %6817 = vbcast.lane.b32.xlu1 %v6815_v8, 256  ;;  %5102 = vrot.lane.b32.xlu0 %v11850_v7, %s11248_s11 }
0x1c7f   :  { %5112 = vrot.lane.b32.xlu0 %v11896_v4, %s11249_s24  ;;  %v6371_v4 = vrot.slane %v12199_v62, %v11397_v25  ;;  %v6848_v62 = vrot.slane %v6834_v18, %v11397_v25 }
0x1c81   :  { %v6379_v1 = vrot.slane %v6371_v4, %v11397_v25  ;;  %v6850_v39 = vcombine.high %v6848_v62, %v6848_v62 }
0x1c83   :  { %5612 = vrot.lane.b32.xlu0 %v12169_v12, %s11246_s18  ;;  %v6372_v12 = vcombine.high %v6371_v4, %v6371_v4  ;;  %v6392_v22 = vrot.slane %v6379_v1, %v11449_v38  ;;  %v6866_v50 = vrot.slane %v6850_v39, %v11449_v38  ;;  %v6387_v46 = vcombine.high %v6379_v1, %v6379_v1  ;;  %v12859_v1 = vld [vmem:[#allocation2_spill] sm:$0xff] }
0x1c85   :  { %v6386_v56 = vrot.slane %v6372_v12, %v11397_v25  ;;  %v6400_v41 = vrot.slane %v6387_v46, %v11449_v38  ;;  %v12857_v12 = vld [vmem:[#allocation3_spill] sm:$0xff] }
0x1c87   :  { %v6388_v29 = vcombine.high %v6386_v56, %v6386_v56  ;;  %v6396_v61 = vrot.slane %v6386_v56, %v11449_v38 }
0x1c89   :  { %v6404_v36 = vrot.slane %v6388_v29, %v11449_v38 }
0x1c98   :  { %v9825_v11 = vpop.f32.mrb[108].mxu1  ;;  %v9899_v13 = vpop.f32.mrb[110].mxu0 }
0x1c99   :  { %v9973_v52 = vmax.f32 %v9899_v13, 1e-16  ;;  %v11056_v32 = vpop.f32.mrb[109].mxu1  ;;  %v11061_v43 = vpop.f32.mrb[111].mxu0  ;;  %v6849_v13 = vcombine.high %v6841_v6, %v6841_v6 }
0x1c9a   :  { %v12856_v43 = vld [vmem:[#allocation4_spill] sm:$0xff] }
0x1c9b   :  { %11217 = vrsqrt.f32 %v9973_v52 }
0x1c9c   :  { %v9969_v9 = vpop.f32.mrb[110].mxu1 }
0x1c9d   :  { %v9976_v14 = vmax.f32 %v9969_v9, 1e-16  ;;  %v11066_v23 = vpop.f32.mrb[111].mxu1 }
0x1c9f   :  { %11219 = vrsqrt.f32 %v9976_v14 }
0x1ca5   :  { %v11218_v53 = vpop.eup %11217 }
0x1ca6   :  { %v9975_v26 = vmul.f32 %v11218_v53, %v9825_v11  ;;  %v6858_v11 = vrot.slane %v6848_v62, %v11449_v38 }
0x1ca9   :  { %v11220_v5 = vpop.eup %11219 }
0x1caa   :  { %v12622_v7 = vmul.f32 %v11220_v5, %v9975_v26 }
0x1ccd   :  { %v2023_v27 = vpop.trf.xlu1 }
0x1cce   :  { %2110 = vrot.lane.b32.xlu1 %v2023_v27, %s11250_s25 }
0x1cd1   :  { %v2105_v20 = vpop.permute.xlu0 %2104 }
0x1cd2   :  { %2121 = vrot.lane.b32.xlu1 %v2087_v17, %s11250_s25  ;;  %2108 = vst.msk [vmem:[%s12837_s12] sm:$0xff] %vm2107_vm0, %v2105_v20  ;;  %v12858_v20 = vld [vmem:[#allocation7_spill] sm:$0xff] }
0x1cd5   :  { %v6804_v37 = vpop.permute.xlu0 %6803 }
0x1cd6   :  { %5084 = vrot.lane.b32.xlu1 %v11778_v54, %s11251_s27  ;;  %v6871_v34 = vmul.f32 %v6854_v59, %v6804_v37 }
0x1cd8   :  { %v6875_v10 = vmax.f32 %v6871_v34, 1e-16 }
0x1cd9   :  { %v6363_v55 = vpop.permute.xlu0 %6362 }
0x1cda   :  { %11221 = vrsqrt.f32 %v6875_v10  ;;  %5096 = vrot.lane.b32.xlu1 %v11816_v31, %s11252_s28  ;;  %v6412_v21 = vmul.f32 %v6404_v36, %v6363_v55 }
0x1cdc   :  { %v6416_v45 = vmax.f32 %v6412_v21, 1e-16 }
0x1cdd   :  { %v6342_v54 = vpop.permute.xlu1 %6341  ;;  %v6825_v47 = vpop.permute.xlu0 %6824 }
0x1cde   :  { %11223 = vrsqrt.f32 %v6416_v45  ;;  %v6409_v25 = vmul.f32 %v6392_v22, %v6342_v54  ;;  %5107 = vrot.lane.b32.xlu1 %v11939_v24, %s11251_s27  ;;  %v6874_v2 = vmul.f32 %v6866_v50, %v6825_v47  ;;  %v12860_v47 = vld [vmem:[#allocation5_spill] sm:$0xff] }
0x1ce0   :  { %v6413_v58 = vmax.f32 %v6409_v25, 1e-16  ;;  %v6878_v51 = vmax.f32 %v6874_v2, 1e-16 }
0x1ce1   :  { %v6349_v31 = vpop.permute.xlu1 %6348  ;;  %v2117_v35 = vpop.permute.xlu0 %2116 }
0x1ce2   :  { %11225 = vrsqrt.f32 %v6413_v58  ;;  %v6410_v28 = vmul.f32 %v6396_v61, %v6349_v31  ;;  %5117 = vrot.lane.b32.xlu1 %v12151_v60, %s11252_s28  ;;  %10081 = vst.msk [vmem:[%s12837_s12 + $0x10] sm:$0xff] %vm2107_vm0, %v2117_v35 }
0x1ce3   :  { %11227 = vrsqrt.f32 %v6878_v51 }
0x1ce4   :  { %v11222_v24 = vpop.eup %11221  ;;  %v6414_v42 = vmax.f32 %v6410_v28, 1e-16 }
0x1ce5   :  { %v6356_v40 = vpop.permute.xlu1 %6355  ;;  %v12656_v57 = vpop.permute.xlu0 %5078  ;;  %v6883_v15 = vmul.f32 %v11222_v24, %v12176_v3  ;;  %v6862_v3 = vrot.slane %v6849_v13, %v11449_v38 }
0x1ce6   :  { %11229 = vrsqrt.f32 %v6414_v42  ;;  %v6411_v44 = vmul.f32 %v6400_v41, %v6356_v40  ;;  %6091 = vrot.lane.b32.xlu1 %v12855_v19, %s11246_s18  ;;  %v12861_v41 = vld [vmem:[#allocation6_spill] sm:$0xff] }
0x1ce7   :  { %v6887_v56 = vsel %vm1456_vm3, %v6883_v15, -inf }
0x1ce8   :  { %v11224_v60 = vpop.eup %11223  ;;  %v6415_v8 = vmax.f32 %v6411_v44, 1e-16  ;;  %v6955_v34 = vrot.slane %v6887_v56, 4 }
0x1ce9   :  { %v6811_v52 = vpop.permute.xlu1 %6810  ;;  %v12662_v32 = vpop.permute.xlu0 %5090  ;;  %v6424_v9 = vmul.f32 %v11224_v60, %v12856_v43 }
0x1cea   :  { %11231 = vrsqrt.f32 %v6415_v8  ;;  %v6872_v14 = vmul.f32 %v6858_v11, %v6811_v52  ;;  %v6956_v2 = vmax.f32 %v6887_v56, %v6955_v34 }
0x1ceb   :  { %v6434_v26 = vsel %vm1456_vm3, %v6424_v9, -inf }
0x1cec   :  { %v11226_v23 = vpop.eup %11225  ;;  %v6876_v53 = vmax.f32 %v6872_v14, 1e-16  ;;  %v6511_v6 = vrot.slane %v6434_v26, 4  ;;  %v6957_v42 = vrot.slane %v6956_v2, 2 }
0x1ced   :  { %v11228_v5 = vpop.eup %11227  ;;  %v6818_v4 = vpop.permute.xlu1 %6817  ;;  %v6421_v48 = vmul.f32 %v11226_v23, %v12857_v12  ;;  %v12862_v23 = vld [vmem:[#allocation8_spill] sm:$0xff] }
0x1cee   :  { %v12667_v17 = vpop.permute.xlu0 %5102  ;;  %11233 = vrsqrt.f32 %v6876_v53  ;;  %v6873_v27 = vmul.f32 %v6862_v3, %v6818_v4  ;;  %v6886_v62 = vmul.f32 %v11228_v5, %v12858_v20  ;;  %v6512_v39 = vmax.f32 %v6434_v26, %v6511_v6 }
0x1cef   :  { %v6425_v18 = vsel %vm1456_vm3, %v6421_v48, -inf  ;;  %v6958_v14 = vmax.f32 %v6956_v2, %v6957_v42 }
0x1cf0   :  { %v11230_v59 = vpop.eup %11229  ;;  %v6877_v29 = vmax.f32 %v6873_v27, 1e-16  ;;  %v6493_v38 = vrot.slane %v6425_v18, 4  ;;  %6426 = vmax.xlane.f32.xlu0 %v6425_v18  ;;  %v6896_v22 = vsel %vm1456_vm3, %v6886_v62, -inf  ;;  %v6513_v46 = vrot.slane %v6512_v39, 2 }
0x1cf1   :  { %v6422_v10 = vmul.f32 %v11230_v59, %v12859_v1  ;;  %v6973_v31 = vrot.slane %v6896_v22, 4 }
0x1cf2   :  { %v12673_v37 = vpop.permute.xlu0 %5112  ;;  %11235 = vrsqrt.f32 %v6877_v29  ;;  %v6494_v36 = vmax.f32 %v6425_v18, %v6493_v38  ;;  %v6514_v60 = vmax.f32 %v6512_v39, %v6513_v46  ;;  %v6959_v29 = vrot.slane %v6958_v14, 1 }
0x1cf3   :  { %v12677_v55 = vsel %vm1456_vm3, %v6422_v10, -inf  ;;  %v6974_v8 = vmax.f32 %v6896_v22, %v6973_v31 }
0x1cf4   :  { %v11232_v21 = vpop.eup %11231  ;;  %v6495_v45 = vrot.slane %v6494_v36, 2  ;;  %v6499_v50 = vrot.slane %v12677_v55, 4  ;;  %v6515_v48 = vrot.slane %v6514_v60, 1 }
0x1cf5   :  { %v6423_v25 = vmul.f32 %v11232_v21, %v12860_v47  ;;  %v6975_v27 = vrot.slane %v6974_v8, 2 }
0x1cf6   :  { %v5613_v54 = vpop.permute.xlu0 %5612  ;;  %v6496_v58 = vmax.f32 %v6494_v36, %v6495_v45  ;;  %v6500_v51 = vmax.f32 %v12677_v55, %v6499_v50  ;;  %v6516_v10 = vmax.f32 %v6514_v60, %v6515_v48  ;;  %v6960_v50 = vmax.f32 %v6958_v14, %v6959_v29 }
0x1cf7   :  { %10174 = vst.msk [vmem:[%s12837_s12 + $0x8] sm:$0xff] %vm598_vm12, %v5613_v54  ;;  %v6431_v61 = vsel %vm1456_vm3, %v6423_v25, -inf  ;;  %v6976_v1 = vmax.f32 %v6974_v8, %v6975_v27  ;;  %v12863_v27 = vld [vmem:[#allocation10_spill] sm:$0xff] }
0x1cf8   :  { %v11234_v35 = vpop.eup %11233  ;;  %v6505_v28 = vrot.slane %v6431_v61, 4  ;;  %6432 = vmax.xlane.f32.xlu0 %v6431_v61  ;;  %v6501_v24 = vrot.slane %v6500_v51, 2  ;;  %v6497_v15 = vrot.slane %v6496_v58, 1 }
0x1cf9   :  { %v6884_v40 = vmul.f32 %v11234_v35, %v12861_v41  ;;  %v6977_v47 = vrot.slane %v6976_v1, 1 }
0x1cfa   :  { %v6506_v44 = vmax.f32 %v6431_v61, %v6505_v28  ;;  %v6502_v19 = vmax.f32 %v6500_v51, %v6501_v24  ;;  %v6498_v3 = vmax.f32 %v6496_v58, %v6497_v15 }
0x1cfb   :  { %v6890_v11 = vsel %vm1456_vm3, %v6884_v40, -inf  ;;  %v6978_v51 = vmax.f32 %v6976_v1, %v6977_v47 }
0x1cfc   :  { %v11236_v13 = vpop.eup %11235  ;;  %v6507_v52 = vrot.slane %v6506_v44, 2  ;;  %6888 = vmax.xlane.f32.xlu0 %v6887_v56  ;;  %v6503_v43 = vrot.slane %v6502_v19, 1  ;;  %v6961_v9 = vrot.slane %v6890_v11, 4 }
0x1cfd   :  { %v6885_v53 = vmul.f32 %v11236_v13, %v12862_v23 }
0x1cfe   :  { %v6508_v5 = vmax.f32 %v6506_v44, %v6507_v52  ;;  %v6504_v4 = vmax.f32 %v6502_v19, %v6503_v43  ;;  %v6962_v12 = vmax.f32 %v6890_v11, %v6961_v9 }
0x1cff   :  { %v6893_v18 = vsel %vm1456_vm3, %v6885_v53, -inf  ;;  %vm5081_vm3 = vcmask 162944  }
0x1d00   :  { %v6509_v6 = vrot.slane %v6508_v5, 1  ;;  %6435 = vmax.xlane.f32.xlu0 %v6434_v26  ;;  %v6963_v20 = vrot.slane %v6962_v12, 2  ;;  %v6967_v62 = vrot.slane %v6893_v18, 4  ;;  %v6521_v59 = vsel %vm1491_vm2, %v6504_v4, %v6498_v3 }
0x1d02   :  { %v6510_v56 = vmax.f32 %v6508_v5, %v6509_v6  ;;  %v6964_v38 = vmax.f32 %v6962_v12, %v6963_v20  ;;  %v6968_v34 = vmax.f32 %v6893_v18, %v6967_v62 }
0x1d04   :  { %6897 = vmax.xlane.f32.xlu0 %v6896_v22  ;;  %v6965_v36 = vrot.slane %v6964_v38, 1  ;;  %v6969_v39 = vrot.slane %v6968_v34, 2  ;;  %v6522_v21 = vsel %vm1493_vm4, %v6510_v56, %v6521_v59 }
0x1d05   :  { %v6523_v45 = vsel %vm1495_vm5, %v6516_v10, %v6522_v21 }
0x1d06   :  { %v6966_v54 = vmax.f32 %v6964_v38, %v6965_v36  ;;  %v6970_v26 = vmax.f32 %v6968_v34, %v6969_v39 }
0x1d08   :  { %v6971_v25 = vrot.slane %v6970_v26, 1  ;;  %v6983_v2 = vsel %vm1491_vm2, %v6966_v54, %v6960_v50 }
0x1d0a   :  { %6429 = vmax.xlane.f32.xlu1 %v12677_v55  ;;  %v6972_v58 = vmax.f32 %v6970_v26, %v6971_v25 }
0x1d0c   :  { %v6984_v61 = vsel %vm1493_vm4, %v6972_v58, %v6983_v2 }
0x1d0d   :  { %v6985_v22 = vsel %vm1495_vm5, %v6978_v51, %v6984_v61 }
0x1d0e   :  { %6891 = vmax.xlane.f32.xlu1 %v6890_v11 }
0x1d12   :  { %6894 = vmax.xlane.f32.xlu1 %v6893_v18 }
0x1d31   :  { %6525 = vxpose.xlu0.b32.start.end [1/1] (short) (narrow) %v6523_v45, 8 }
0x1d40   :  { %v2111_v46 = vpop.permute.xlu1 %2110 }
0x1d41   :  { %2114 = vst.msk [vmem:[%s12837_s12] sm:$0xff] %vm2113_vm1, %v2111_v46 }
0x1d42   :  { %5082 = vst.msk [vmem:[%s12837_s12] sm:$0xff] %vm5081_vm3, %v12656_v57 }
0x1d44   :  { %v2122_v55 = vpop.permute.xlu1 %2121 }
0x1d45   :  { %10082 = vst.msk [vmem:[%s12837_s12 + $0x10] sm:$0xff] %vm2113_vm1, %v2122_v55 }
0x1d46   :  { %10151 = vst.msk [vmem:[%s12837_s12 + $0x10] sm:$0xff] %vm5081_vm3, %v12667_v17 }
0x1d48   :  { %v5085_v31 = vpop.permute.xlu1 %5084 }
0x1d49   :  { %5088 = vst.msk [vmem:[%s12837_s12] sm:$0xff] %vm5087_vm6, %v5085_v31 }
0x1d4a   :  { %5094 = vst.msk [vmem:[%s12837_s12] sm:$0xff] %vm5093_vm7, %v12662_v32 }
0x1d4c   :  { %v5097_v57 = vpop.permute.xlu1 %5096 }
0x1d4d   :  { %5100 = vst.msk [vmem:[%s12837_s12] sm:$0xff] %vm5099_vm8, %v5097_v57 }
0x1d50   :  { %v5108_v17 = vpop.permute.xlu1 %5107 }
0x1d51   :  { %10152 = vst.msk [vmem:[%s12837_s12 + $0x10] sm:$0xff] %vm5087_vm6, %v5108_v17 }
0x1d52   :  { %10153 = vst.msk [vmem:[%s12837_s12 + $0x10] sm:$0xff] %vm5093_vm7, %v12673_v37 }
0x1d54   :  { %v5118_v35 = vpop.permute.xlu1 %5117 }
0x1d55   :  { %10154 = vst.msk [vmem:[%s12837_s12 + $0x10] sm:$0xff] %vm5099_vm8, %v5118_v35 }
0x1d58   :  { %v6092_v32 = vpop.permute.xlu1 %6091 }
0x1d59   :  { %10188 = vst.msk [vmem:[%s12837_s12 + $0x18] sm:$0xff] %vm598_vm12, %v6092_v32 }
0x1d7d   :  { %v6427_v28 = vpop.xlane.xlu0 %6426 }
0x1d7e   :  { %v6444_v15 = vrot.slane %v6427_v28, %v12542_v33 }
0x1d85   :  { %v6433_v24 = vpop.xlane.xlu0 %6432 }
0x1d86   :  { %v6452_v44 = vrot.slane %v6433_v24, %v12542_v33 }
0x1d89   :  { %v6889_v42 = vpop.xlane.xlu0 %6888 }
0x1d8a   :  { %v6906_v9 = vrot.slane %v6889_v42, %v12542_v33 }
0x1d8d   :  { %v6436_v41 = vpop.xlane.xlu0 %6435 }
0x1d8e   :  { %v6456_v19 = vrot.slane %v6436_v41, %v12542_v33 }
0x1d91   :  { %v6898_v43 = vpop.xlane.xlu0 %6897 }
0x1d92   :  { %v6918_v53 = vrot.slane %v6898_v43, %v12542_v33 }
0x1d97   :  { %v6430_v40 = vpop.xlane.xlu1 %6429 }
0x1d98   :  { %v6448_v37 = vrot.slane %v6430_v40, %v12542_v33 }
0x1d9a   :  { %v6457_v60 = vsel %vm1491_vm2, %v6448_v37, %v6444_v15 }
0x1d9b   :  { %v6892_v8 = vpop.xlane.xlu1 %6891  ;;  %v6458_v11 = vsel %vm1493_vm4, %v6452_v44, %v6457_v60 }
0x1d9c   :  { %v6459_v13 = vsel %vm1495_vm5, %v6456_v19, %v6458_v11  ;;  %v6910_v52 = vrot.slane %v6892_v8, %v12542_v33 }
0x1d9d   :  { %6461 = vxpose.xlu1.b32.start.end [1/1] (short) (narrow) %v6459_v13, 8 }
0x1d9e   :  { %v6919_v3 = vsel %vm1491_vm2, %v6910_v52, %v6906_v9 }
0x1d9f   :  { %v6895_v14 = vpop.xlane.xlu1 %6894 }
0x1da0   :  { %v6914_v23 = vrot.slane %v6895_v14, %v12542_v33  ;;  %v12864_v33 = vld [vmem:[#allocation11_spill] sm:$0xff] }
0x1da1   :  { %6987 = vxpose.xlu1.b32.start.end [1/1] (short) (narrow) %v6985_v22, 8 }
0x1da2   :  { %v6920_v5 = vsel %vm1493_vm4, %v6914_v23, %v6919_v3 }
0x1da3   :  { %v6921_v4 = vsel %vm1495_vm5, %v6918_v53, %v6920_v5 }
0x1da4   :  { %6923 = vxpose.xlu0.b32.start.end [1/1] (short) (narrow) %v6921_v4, 8 }
0x1db1   :  { %v6541_v48 = vpop.trf.xlu0 }
0x1e1d   :  { %v6477_v12 = vpop.trf.xlu1 }
0x1e1e   :  { %7020 = vrot.lane.b32.xlu0 %v6477_v12, %s11247_s23 }
0x1e21   :  { %v7003_v6 = vpop.trf.xlu1 }
0x1e22   :  { %9980 = vrot.lane.b32.xlu0 %v12863_v27, %s11248_s11 }
0x1e24   :  { %v6939_v18 = vpop.trf.xlu0 }
0x1e25   :  { %7025 = vrot.lane.b32.xlu1 %v6939_v18, %s11250_s25 }
0x1e26   :  { %9990 = vrot.lane.b32.xlu0 %v12864_v33, %s11249_s24 }
0x1e29   :  { %7030 = vrot.lane.b32.xlu1 %v6541_v48, %s11247_s23 }
0x1e2a   :  { %10000 = vrot.lane.b32.xlu0 %v12390_v30, %s11248_s11 }
0x1e2d   :  { %7035 = vrot.lane.b32.xlu1 %v7003_v6, %s11250_s25 }
0x1e2e   :  { %10010 = vrot.lane.b32.xlu0 %v12458_v63, %s11249_s24 }
0x1e31   :  { %9985 = vrot.lane.b32.xlu1 %v12313_v0, %s11251_s27 }
0x1e35   :  { %9995 = vrot.lane.b32.xlu1 %v12351_v16, %s11252_s28 }
0x1e39   :  { %10005 = vrot.lane.b32.xlu1 %v12536_v49, %s11251_s27 }
0x1e3d   :  { %10015 = vrot.lane.b32.xlu1 %v12622_v7, %s11252_s28 }
0x1e90   :  { %v7021_v20 = vpop.permute.xlu0 %7020 }
0x1e91   :  { %10207 = vst.msk [vmem:[%s12837_s12 + $0x8] sm:$0xff] %vm2107_vm0, %v7021_v20 }
0x1e94   :  { %v9981_v30 = vpop.permute.xlu0 %9980 }
0x1e97   :  { %v7026_v63 = vpop.permute.xlu1 %7025 }
0x1e98   :  { %10208 = vst.msk [vmem:[%s12837_s12 + $0x8] sm:$0xff] %vm2113_vm1, %v7026_v63  ;;  %v9991_v0 = vpop.permute.xlu0 %9990 }
0x1e99   :  { %10279 = vst.msk [vmem:[%s12837_s12 + $0x8] sm:$0xff] %vm5081_vm3, %v9981_v30 }
0x1e9b   :  { %v7031_v16 = vpop.permute.xlu1 %7030 }
0x1e9c   :  { %10209 = vst.msk [vmem:[%s12837_s12 + $0x18] sm:$0xff] %vm2107_vm0, %v7031_v16  ;;  %v10001_v7 = vpop.permute.xlu0 %10000 }
0x1e9f   :  { %v7036_v49 = vpop.permute.xlu1 %7035 }
0x1ea0   :  { %10210 = vst.msk [vmem:[%s12837_s12 + $0x18] sm:$0xff] %vm2113_vm1, %v7036_v49  ;;  %v10011_v29 = vpop.permute.xlu0 %10010 }
0x1ea1   :  { %10283 = vst.msk [vmem:[%s12837_s12 + $0x18] sm:$0xff] %vm5081_vm3, %v10001_v7 }
0x1ea3   :  { %v9986_v62 = vpop.permute.xlu1 %9985 }
0x1ea4   :  { %10280 = vst.msk [vmem:[%s12837_s12 + $0x8] sm:$0xff] %vm5087_vm6, %v9986_v62 }
0x1ea5   :  { %10281 = vst.msk [vmem:[%s12837_s12 + $0x8] sm:$0xff] %vm5093_vm7, %v9991_v0 }
0x1ea7   :  { %v9996_v59 = vpop.permute.xlu1 %9995 }
0x1ea8   :  { %10282 = vst.msk [vmem:[%s12837_s12 + $0x8] sm:$0xff] %vm5099_vm8, %v9996_v59 }
0x1eab   :  { %v10006_v56 = vpop.permute.xlu1 %10005 }
0x1eac   :  { %10284 = vst.msk [vmem:[%s12837_s12 + $0x18] sm:$0xff] %vm5087_vm6, %v10006_v56 }
0x1ead   :  { %10285 = vst.msk [vmem:[%s12837_s12 + $0x18] sm:$0xff] %vm5093_vm7, %v10011_v29 }
0x1eaf   :  { %v10016_v38 = vpop.permute.xlu1 %10015 }
0x1eb0   :  { %10286 = vst.msk [vmem:[%s12837_s12 + $0x18] sm:$0xff] %vm5099_vm8, %v10016_v38 }

</bundles_post_ra>
